<compile_context>
chip_gen: v6e
topology: v6e:2x2x1
jax: 0.10.0
libtpu: 0.0.40
codegen_flags: <defaults>
</compile_context>

<pallas_src>
import jax
import jax.numpy as jnp
from jax import lax
from jax.experimental import pallas as pl
from jax.experimental.pallas import tpu as pltpu

MEL = 8          # mel_dim      (PyTorch default 80, shrunk for the test)
HID = 16         # hidden_size == channels (PyTorch default 512, shrunk)
K0, S0, P0 = 1024, 488, 512            # wav2mel kernel / stride / padding (fixed)
T0, T1, T2, T3 = 302, 298, 294, 288    # time lengths fixed by the LayerNorm sizes
NF = T0 + 2                            # 304 stride-sized frames cover every window
BB = 4                                 # batch elements per grid step
EPS = 1e-5
SLOPE = 0.2


def _ln(x, g, b):
    """LayerNorm over the last axis, single-pass moments (biased var, eps=1e-5)."""
    mu = jnp.mean(x, axis=-1, keepdims=True)
    msq = jnp.mean(x * x, axis=-1, keepdims=True)
    var = jnp.maximum(msq - mu * mu, 0.0)
    return (x - mu) * lax.rsqrt(var + EPS) * g + b


def _ln_ref(x, g, b):
    """Two-pass LayerNorm used only by the independent reference."""
    mu = jnp.mean(x, axis=-1, keepdims=True)
    var = jnp.mean((x - mu) ** 2, axis=-1, keepdims=True)
    return (x - mu) * lax.rsqrt(var + EPS) * g + b


def _lrelu(x):
    return jnp.where(x >= 0, x, SLOPE * x)


def tdnn_kernel(frames_ref, wmelT_ref, w1_ref, ln_ref, ch_ref, o_ref):
    # ---- consolidated parameter slabs: loaded / sliced once per grid step -----
    g1, be1 = ln_ref[0:1, :T0], ln_ref[1:2, :T0]
    g2, be2 = ln_ref[2:3, :T1], ln_ref[3:4, :T1]
    g3, be3 = ln_ref[4:5, :T2], ln_ref[5:6, :T2]
    g4, be4 = ln_ref[6:7, :T3], ln_ref[7:8, :T3]
    ch = ch_ref[...]                                    # (BB*HID, 13), batch-tiled host-side
    b1 = ch[:, 0:1]
    w2, b2 = ch[:, 1:4], ch[:, 4:5]
    w3, b3 = ch[:, 5:8], ch[:, 8:9]
    w4, b4 = ch[:, 9:10], ch[:, 10:11]
    w5, b5 = ch[:, 11:12], ch[:, 12:13]

    # ---- wav2mel: ONE (BB*NF, S0) x (S0, 3*MEL) bf16 MXU matmul per grid step --
    a = jnp.dot(frames_ref[...], wmelT_ref[...],
                preferred_element_type=jnp.float32)                 # (BB*NF, 3*MEL) f32
    # tiny per-element (NF, 3*MEL) -> (3*MEL, NF) flip so time sits on lanes
    at = jnp.transpose(a.reshape(BB, NF, 3 * MEL), (0, 2, 1))       # (BB, 3*MEL, NF)
    # block-Toeplitz shift-add: lane shifts by 0/1/2 (cheap XLU rolls)
    x = (at[:, 0:MEL, 0:T0] + at[:, MEL:2 * MEL, 1:1 + T0]
         + at[:, 2 * MEL:3 * MEL, 2:2 + T0])                        # (BB, MEL, 302)
    # bn1 + LeakyReLU batched across BB on the sublane axis
    x = _lrelu(_ln(x.reshape(BB * MEL, T0), g1, be1))               # (BB*MEL, 302)

    # ---- td_layer1: batched bf16 matmul (BB,HID,5*MEL) x (BB,5*MEL,T1) ---------
    x3 = x.reshape(BB, MEL, T0)
    xs = jnp.concatenate([x3[:, :, k:k + T1] for k in range(5)],
                         axis=1).astype(jnp.bfloat16)               # (BB, 5*MEL, 298)
    y = lax.dot_general(w1_ref[...], xs, (((2,), (1,)), ((0,), (0,))),
                        preferred_element_type=jnp.float32)         # (BB, HID, 298)
    x = y.reshape(BB * HID, T1) + b1
    x = _lrelu(_ln(x, g2, be2))                                     # (BB*HID, 298)

    # ---- td_layer2: depthwise k=3, dilation=2 (batched across BB on sublanes) --
    x = (w2[:, 0:1] * x[:, 0:T2] + w2[:, 1:2] * x[:, 2:2 + T2]
         + w2[:, 2:3] * x[:, 4:4 + T2]) + b2                        # (BB*HID, 294)
    x = _lrelu(_ln(x, g3, be3))

    # ---- td_layer3: depthwise k=3, dilation=3 ----------------------------------
    x = (w3[:, 0:1] * x[:, 0:T3] + w3[:, 1:2] * x[:, 3:3 + T3]
         + w3[:, 2:3] * x[:, 6:6 + T3]) + b3                        # (BB*HID, 288)
    x = _lrelu(_ln(x, g4, be4))

    # ---- td_layer4: depthwise k=1.  bn4 (g4/be4) is applied AGAIN on purpose:
    #      the original module reuses self.bn4 after td_layer3 and td_layer4.
    x = _lrelu(_ln(w4 * x + b4, g4, be4))

    # ---- td_layer5: depthwise k=1 -----------------------------------------------
    # (TODO(synk): LN row-sums could be offloaded to the idle MXU with a
    #  precision=HIGHEST ones-dot once a bundle dump confirms XLU is binding.)
    o_ref[...] = (w5 * x + b5).reshape(BB, HID, T3)


def tdnn_forward(waveform, p):
    """waveform: (B, 1, W) float32 NCW with W = 488*301.  Returns (B, HID, 288)."""
    B, _, W = waveform.shape
    assert W == S0 * (T0 - 1), "LayerNorm sizes pin the waveform length to 146888"
    assert B % BB == 0, "batch must be a multiple of BB"

    # ---- frame the zero-padded waveform: pad + row-major reshape + bf16 cast.
    #      NO transpose -> no second HBM copy of the dominant stream.
    pad_r = NF * S0 - (W + P0)          # >= P0; extra zeros only meet zero weights
    xp = jnp.pad(waveform[:, 0, :], ((0, 0), (P0, pad_r)))
    frames = xp.reshape(B * NF, S0).astype(jnp.bfloat16)            # (B*NF, 488)

    # ---- block-Toeplitz wav2mel weight, transposed so frames stay untransposed:
    #      rows = [W[:, :488]; W[:, 488:976]; W[:, 976:] zero-padded to 488]^T
    w2pad = jnp.pad(p["w_mel"][:, 2 * S0:], ((0, 0), (0, 3 * S0 - K0)))
    wstack = jnp.concatenate(
        [p["w_mel"][:, 0:S0], p["w_mel"][:, S0:2 * S0], w2pad], axis=0)
    wmelT = jnp.transpose(wstack).astype(jnp.bfloat16)              # (S0, 3*MEL)

    # ---- td_layer1 weight: (HID, 5*MEL), tap-major, bf16, tiled over BB --------
    w1flat = jnp.transpose(p["w1"], (0, 2, 1)).reshape(HID, 5 * MEL)
    w1b = jnp.tile(w1flat[None].astype(jnp.bfloat16), (BB, 1, 1))   # (BB, HID, 40)

    # ---- consolidated tiny-parameter slabs --------------------------------------
    def row(a):
        return jnp.pad(a, ((0, 0), (0, T0 - a.shape[-1])))
    ln_slab = jnp.concatenate(
        [row(p["g1"]), row(p["be1"]), row(p["g2"]), row(p["be2"]),
         row(p["g3"]), row(p["be3"]), row(p["g4"]), row(p["be4"])], axis=0)  # (8, T0)
    ch_slab = jnp.concatenate(
        [p["b1"], p["w2"], p["b2"], p["w3"], p["b3"],
         p["w4"], p["b4"], p["w5"], p["b5"]], axis=1)                        # (HID, 13)
    ch_tiled = jnp.tile(ch_slab, (BB, 1))                                    # (BB*HID, 13)

    in_specs = [
        pl.BlockSpec((BB * NF, S0), lambda i: (i, 0)),          # frames (dominant stream)
        pl.BlockSpec((S0, 3 * MEL), lambda i: (0, 0)),          # wav2mel Toeplitz weight^T
        pl.BlockSpec((BB, HID, 5 * MEL), lambda i: (0, 0, 0)),  # td_layer1 weight (tiled)
        pl.BlockSpec((8, T0), lambda i: (0, 0)),                # LayerNorm slab
        pl.BlockSpec((BB * HID, 13), lambda i: (0, 0)),         # per-channel slab (tiled)
    ]
    out_spec = pl.BlockSpec((BB, HID, T3), lambda i: (i, 0, 0))

    # NOTE: at MEL=8/HID=16 the per-step footprint (~2.4 MiB double-buffered frames
    # + <1 MiB intermediates) is well under the default scoped VMEM limit on
    # v5e/v6e/v7x.  Re-derive and set vmem_limit_bytes explicitly before scaling
    # to MEL=80 / HID=512 (v7x has only 64 MiB physical VMEM).
    return pl.pallas_call(
        tdnn_kernel,
        out_shape=jax.ShapeDtypeStruct((B, HID, T3), jnp.float32),
        grid=(B // BB,),
        in_specs=in_specs,
        out_specs=out_spec,
        compiler_params=pltpu.CompilerParams(dimension_semantics=("parallel",)),
    )(frames, wmelT, w1b, ln_slab, ch_tiled)


def init_params(key):
    ks = jax.random.split(key, 20)

    def rnd(k, shape, scale):
        return (scale * jax.random.normal(k, shape)).astype(jnp.float32)

    p = {}
    p["w_mel"] = rnd(ks[0], (MEL, K0), 1.0 / (K0 ** 0.5))
    p["w1"] = rnd(ks[1], (HID, MEL, 5), 1.0 / ((MEL * 5) ** 0.5))
    p["b1"] = rnd(ks[2], (HID, 1), 0.1)
    p["w2"] = rnd(ks[3], (HID, 3), 1.0 / (3.0 ** 0.5))
    p["b2"] = rnd(ks[4], (HID, 1), 0.1)
    p["w3"] = rnd(ks[5], (HID, 3), 1.0 / (3.0 ** 0.5))
    p["b3"] = rnd(ks[6], (HID, 1), 0.1)
    p["w4"] = rnd(ks[7], (HID, 1), 1.0)
    p["b4"] = rnd(ks[8], (HID, 1), 0.1)
    p["w5"] = rnd(ks[9], (HID, 1), 1.0)
    p["b5"] = rnd(ks[10], (HID, 1), 0.1)
    # LayerNorm affine params (PyTorch inits to 1/0; jitter so the affine is exercised).
    p["g1"] = 1.0 + rnd(ks[11], (1, T0), 0.1)
    p["be1"] = rnd(ks[12], (1, T0), 0.1)
    p["g2"] = 1.0 + rnd(ks[13], (1, T1), 0.1)
    p["be2"] = rnd(ks[14], (1, T1), 0.1)
    p["g3"] = 1.0 + rnd(ks[15], (1, T2), 0.1)
    p["be3"] = rnd(ks[16], (1, T2), 0.1)
    p["g4"] = 1.0 + rnd(ks[17], (1, T3), 0.1)
    p["be4"] = rnd(ks[18], (1, T3), 0.1)
    return p


def reference(waveform, p):
    """Independent pure-JAX reference using lax.conv_general_dilated (HIGHEST precision)."""
    dn = ("NCH", "OIH", "NCH")
    prec = lax.Precision.HIGHEST
    x = lax.conv_general_dilated(waveform, p["w_mel"][:, None, :], (S0,),
                                 [(P0, P0)], dimension_numbers=dn, precision=prec)
    x = _lrelu(_ln_ref(x, p["g1"], p["be1"]))
    x = lax.conv_general_dilated(x, p["w1"], (1,), "VALID",
                                 dimension_numbers=dn, precision=prec) + p["b1"][None]
    x = _lrelu(_ln_ref(x, p["g2"], p["be2"]))
    x = lax.conv_general_dilated(x, p["w2"][:, None, :], (1,), "VALID",
                                 rhs_dilation=(2,), dimension_numbers=dn,
                                 feature_group_count=HID, precision=prec) + p["b2"][None]
    x = _lrelu(_ln_ref(x, p["g3"], p["be3"]))
    x = lax.conv_general_dilated(x, p["w3"][:, None, :], (1,), "VALID",
                                 rhs_dilation=(3,), dimension_numbers=dn,
                                 feature_group_count=HID, precision=prec) + p["b3"][None]
    x = _lrelu(_ln_ref(x, p["g4"], p["be4"]))
    x = p["w4"][None] * x + p["b4"][None]
    x = _lrelu(_ln_ref(x, p["g4"], p["be4"]))
    return p["w5"][None] * x + p["b5"][None]


if __name__ == "__main__":
    key = jax.random.PRNGKey(0)
    k_wave, k_par = jax.random.split(key)

    B = 4 * BB                    # grid of 4 -> >=2 pipelined steps per v7x core
    W = S0 * (T0 - 1)             # 146888 samples -> wav2mel output length 302
    waveform = jax.random.normal(k_wave, (B, 1, W), dtype=jnp.float32)
    params = init_params(k_par)

    out = jax.jit(tdnn_forward)(waveform, params)
    out = jax.block_until_ready(out)
    assert out.shape == (B, HID, T3), out.shape
    assert bool(jnp.all(jnp.isfinite(out)))

    # Kernel-math check: reference fed the same bf16-rounded waveform / wav2mel
    # weight that the kernel consumes (isolates kernel math from the deliberate
    # bf16 cast of the dominant input stream).
    params_q = dict(params)
    params_q["w_mel"] = params["w_mel"].astype(jnp.bfloat16).astype(jnp.float32)
    wave_q = waveform.astype(jnp.bfloat16).astype(jnp.float32)
    ref_q = reference(wave_q, params_q)
    err_q = float(jnp.max(jnp.abs(out - ref_q)))
    assert jnp.allclose(out, ref_q, atol=4e-2, rtol=4e-2), \
        f"max abs err vs bf16-input reference = {err_q}"

    # Gross-error guard vs the full-f32 reference (bounds the impact of the
    # bf16 input quantization itself).
    ref = reference(waveform, params)
    err = float(jnp.max(jnp.abs(out - ref)))
    assert jnp.allclose(out, ref, atol=2.5e-1, rtol=2.5e-1), \
        f"max abs err vs f32 reference = {err}"

    print("KERNEL_OK")
</pallas_src>

<mosaic_0001>
module attributes {stable_mosaic.version = 11 : i64} {
  func.func @tdnn_kernel(%arg0: i32, %arg1: memref<1216x488xbf16, #tpu.memory_space<vmem>>, %arg2: memref<488x24xbf16, #tpu.memory_space<vmem>>, %arg3: memref<4x16x40xbf16, #tpu.memory_space<vmem>>, %arg4: memref<8x302xf32, #tpu.memory_space<vmem>>, %arg5: memref<64x13xf32, #tpu.memory_space<vmem>>, %arg6: memref<4x16x288xf32, #tpu.memory_space<vmem>>) attributes {dimension_semantics = [#tpu.dimension_semantics<parallel>], iteration_bounds = array<i64: 4>, scalar_prefetch = 0 : i64, scratch_operands = 0 : i64, tpu.core_type = #tpu.core_type<tc>, window_params = [{transform_indices = @transform_0, window_bounds = array<i64: 1216, 488>}, {pipeline_mode = #tpu.pipeline_mode<synchronous>, transform_indices = @transform_1, window_bounds = array<i64: 488, 24>}, {pipeline_mode = #tpu.pipeline_mode<synchronous>, transform_indices = @transform_2, window_bounds = array<i64: 4, 16, 40>}, {pipeline_mode = #tpu.pipeline_mode<synchronous>, transform_indices = @transform_3, window_bounds = array<i64: 8, 302>}, {pipeline_mode = #tpu.pipeline_mode<synchronous>, transform_indices = @transform_4, window_bounds = array<i64: 64, 13>}, {transform_indices = @transform_5, window_bounds = array<i64: 4, 16, 288>}]} {
    %c0 = arith.constant 0 : index
    %c0_0 = arith.constant 0 : index
    %0 = vector.load %arg4[%c0, %c0_0] : memref<8x302xf32, #tpu.memory_space<vmem>>, vector<1x302xf32>
    %c1 = arith.constant 1 : index
    %c0_1 = arith.constant 0 : index
    %1 = vector.load %arg4[%c1, %c0_1] : memref<8x302xf32, #tpu.memory_space<vmem>>, vector<1x302xf32>
    %c2 = arith.constant 2 : index
    %c0_2 = arith.constant 0 : index
    %2 = vector.load %arg4[%c2, %c0_2] : memref<8x302xf32, #tpu.memory_space<vmem>>, vector<1x298xf32>
    %c3 = arith.constant 3 : index
    %c0_3 = arith.constant 0 : index
    %3 = vector.load %arg4[%c3, %c0_3] : memref<8x302xf32, #tpu.memory_space<vmem>>, vector<1x298xf32>
    %c4 = arith.constant 4 : index
    %c0_4 = arith.constant 0 : index
    %4 = vector.load %arg4[%c4, %c0_4] : memref<8x302xf32, #tpu.memory_space<vmem>>, vector<1x294xf32>
    %c5 = arith.constant 5 : index
    %c0_5 = arith.constant 0 : index
    %5 = vector.load %arg4[%c5, %c0_5] : memref<8x302xf32, #tpu.memory_space<vmem>>, vector<1x294xf32>
    %c6 = arith.constant 6 : index
    %c0_6 = arith.constant 0 : index
    %6 = vector.load %arg4[%c6, %c0_6] : memref<8x302xf32, #tpu.memory_space<vmem>>, vector<1x288xf32>
    %c7 = arith.constant 7 : index
    %c0_7 = arith.constant 0 : index
    %7 = vector.load %arg4[%c7, %c0_7] : memref<8x302xf32, #tpu.memory_space<vmem>>, vector<1x288xf32>
    %c0_8 = arith.constant 0 : index
    %c0_9 = arith.constant 0 : index
    %8 = vector.load %arg5[%c0_8, %c0_9] : memref<64x13xf32, #tpu.memory_space<vmem>>, vector<64x13xf32>
    %9 = vector.extract_strided_slice %8 {offsets = [0, 0], sizes = [64, 1], strides = [1, 1]} : vector<64x13xf32> to vector<64x1xf32>
    %10 = vector.extract_strided_slice %8 {offsets = [0, 1], sizes = [64, 3], strides = [1, 1]} : vector<64x13xf32> to vector<64x3xf32>
    %11 = vector.extract_strided_slice %8 {offsets = [0, 4], sizes = [64, 1], strides = [1, 1]} : vector<64x13xf32> to vector<64x1xf32>
    %12 = vector.extract_strided_slice %8 {offsets = [0, 5], sizes = [64, 3], strides = [1, 1]} : vector<64x13xf32> to vector<64x3xf32>
    %13 = vector.extract_strided_slice %8 {offsets = [0, 8], sizes = [64, 1], strides = [1, 1]} : vector<64x13xf32> to vector<64x1xf32>
    %14 = vector.extract_strided_slice %8 {offsets = [0, 9], sizes = [64, 1], strides = [1, 1]} : vector<64x13xf32> to vector<64x1xf32>
    %15 = vector.extract_strided_slice %8 {offsets = [0, 10], sizes = [64, 1], strides = [1, 1]} : vector<64x13xf32> to vector<64x1xf32>
    %16 = vector.extract_strided_slice %8 {offsets = [0, 11], sizes = [64, 1], strides = [1, 1]} : vector<64x13xf32> to vector<64x1xf32>
    %17 = vector.extract_strided_slice %8 {offsets = [0, 12], sizes = [64, 1], strides = [1, 1]} : vector<64x13xf32> to vector<64x1xf32>
    %c0_10 = arith.constant 0 : index
    %c0_11 = arith.constant 0 : index
    %18 = vector.load %arg1[%c0_10, %c0_11] : memref<1216x488xbf16, #tpu.memory_space<vmem>>, vector<1216x488xbf16>
    %c0_12 = arith.constant 0 : index
    %c0_13 = arith.constant 0 : index
    %19 = vector.load %arg2[%c0_12, %c0_13] : memref<488x24xbf16, #tpu.memory_space<vmem>>, vector<488x24xbf16>
    %cst = arith.constant dense<0.000000e+00> : vector<1216x24xf32>
    %20 = tpu.matmul %18, %19, %cst {dimension_numbers = #tpu.dot_dimension_numbers<[1], [0], [0], [1], [0, 0, 1, 1], [], []>} : vector<1216x488xbf16>, vector<488x24xbf16>, vector<1216x24xf32> -> vector<1216x24xf32>
    %21 = vector.shape_cast %20 : vector<1216x24xf32> to vector<4x304x24xf32>
    %22 = tpu.transpose %21, [0, 2, 1] : vector<4x304x24xf32> -> vector<4x24x304xf32>
    %23 = vector.extract_strided_slice %22 {offsets = [0, 0, 0], sizes = [4, 8, 302], strides = [1, 1, 1]} : vector<4x24x304xf32> to vector<4x8x302xf32>
    %24 = vector.extract_strided_slice %22 {offsets = [0, 8, 1], sizes = [4, 8, 302], strides = [1, 1, 1]} : vector<4x24x304xf32> to vector<4x8x302xf32>
    %25 = arith.addf %23, %24 : vector<4x8x302xf32>
    %26 = vector.extract_strided_slice %22 {offsets = [0, 16, 2], sizes = [4, 8, 302], strides = [1, 1, 1]} : vector<4x24x304xf32> to vector<4x8x302xf32>
    %27 = arith.addf %25, %26 : vector<4x8x302xf32>
    %28 = vector.shape_cast %27 : vector<4x8x302xf32> to vector<32x302xf32>
    %cst_14 = arith.constant dense<0.000000e+00> : vector<32xf32>
    %29 = vector.multi_reduction <add>, %28, %cst_14 [1] : vector<32x302xf32> to vector<32xf32>
    %30 = vector.shape_cast %29 : vector<32xf32> to vector<32x1xf32>
    %cst_15 = arith.constant 3.020000e+02 : f32
    %31 = vector.broadcast %cst_15 : f32 to vector<32x1xf32>
    %32 = arith.divf %30, %31 : vector<32x1xf32>
    %33 = arith.mulf %28, %28 : vector<32x302xf32>
    %cst_16 = arith.constant dense<0.000000e+00> : vector<32xf32>
    %34 = vector.multi_reduction <add>, %33, %cst_16 [1] : vector<32x302xf32> to vector<32xf32>
    %35 = vector.shape_cast %34 : vector<32xf32> to vector<32x1xf32>
    %cst_17 = arith.constant 3.020000e+02 : f32
    %36 = vector.broadcast %cst_17 : f32 to vector<32x1xf32>
    %37 = arith.divf %35, %36 : vector<32x1xf32>
    %38 = arith.mulf %32, %32 : vector<32x1xf32>
    %39 = arith.subf %37, %38 : vector<32x1xf32>
    %cst_18 = arith.constant 0.000000e+00 : f32
    %40 = vector.broadcast %cst_18 : f32 to vector<32x1xf32>
    %41 = arith.maximumf %39, %40 : vector<32x1xf32>
    %42 = vector.broadcast %32 : vector<32x1xf32> to vector<32x302xf32>
    %43 = arith.subf %28, %42 : vector<32x302xf32>
    %cst_19 = arith.constant 9.99999974E-6 : f32
    %44 = vector.broadcast %cst_19 : f32 to vector<32x1xf32>
    %45 = arith.addf %41, %44 : vector<32x1xf32>
    %46 = math.rsqrt %45 : vector<32x1xf32>
    %47 = vector.broadcast %46 : vector<32x1xf32> to vector<32x302xf32>
    %48 = arith.mulf %43, %47 : vector<32x302xf32>
    %49 = vector.broadcast %0 : vector<1x302xf32> to vector<32x302xf32>
    %50 = arith.mulf %48, %49 : vector<32x302xf32>
    %51 = vector.broadcast %1 : vector<1x302xf32> to vector<32x302xf32>
    %52 = arith.addf %50, %51 : vector<32x302xf32>
    %cst_20 = arith.constant 0.000000e+00 : f32
    %53 = vector.broadcast %cst_20 : f32 to vector<32x302xf32>
    %54 = arith.cmpf oge, %52, %53 : vector<32x302xf32>
    %cst_21 = arith.constant 2.000000e-01 : f32
    %55 = vector.broadcast %cst_21 : f32 to vector<32x302xf32>
    %56 = arith.mulf %55, %52 : vector<32x302xf32>
    %57 = arith.select %54, %52, %56 : vector<32x302xi1>, vector<32x302xf32>
    %58 = vector.shape_cast %57 : vector<32x302xf32> to vector<4x8x302xf32>
    %59 = vector.extract_strided_slice %58 {offsets = [0, 0, 0], sizes = [4, 8, 298], strides = [1, 1, 1]} : vector<4x8x302xf32> to vector<4x8x298xf32>
    %60 = vector.extract_strided_slice %58 {offsets = [0, 0, 1], sizes = [4, 8, 298], strides = [1, 1, 1]} : vector<4x8x302xf32> to vector<4x8x298xf32>
    %61 = vector.extract_strided_slice %58 {offsets = [0, 0, 2], sizes = [4, 8, 298], strides = [1, 1, 1]} : vector<4x8x302xf32> to vector<4x8x298xf32>
    %62 = vector.extract_strided_slice %58 {offsets = [0, 0, 3], sizes = [4, 8, 298], strides = [1, 1, 1]} : vector<4x8x302xf32> to vector<4x8x298xf32>
    %63 = vector.extract_strided_slice %58 {offsets = [0, 0, 4], sizes = [4, 8, 298], strides = [1, 1, 1]} : vector<4x8x302xf32> to vector<4x8x298xf32>
    %64 = tpu.concatenate %59, %60, %61, %62, %63 in 1 : vector<4x8x298xf32>, vector<4x8x298xf32>, vector<4x8x298xf32>, vector<4x8x298xf32>, vector<4x8x298xf32> -> vector<4x40x298xf32>
    %65 = arith.truncf %64 : vector<4x40x298xf32> to vector<4x40x298xbf16>
    %c0_22 = arith.constant 0 : index
    %c0_23 = arith.constant 0 : index
    %c0_24 = arith.constant 0 : index
    %66 = vector.load %arg3[%c0_22, %c0_23, %c0_24] : memref<4x16x40xbf16, #tpu.memory_space<vmem>>, vector<4x16x40xbf16>
    %cst_25 = arith.constant dense<0.000000e+00> : vector<4x16x298xf32>
    %67 = tpu.matmul %66, %65, %cst_25 {dimension_numbers = #tpu.dot_dimension_numbers<[2], [1], [1], [2], [0, 0, 0, 1, 1, 2], [0], [0]>} : vector<4x16x40xbf16>, vector<4x40x298xbf16>, vector<4x16x298xf32> -> vector<4x16x298xf32>
    %68 = vector.shape_cast %67 : vector<4x16x298xf32> to vector<64x298xf32>
    %69 = vector.broadcast %9 : vector<64x1xf32> to vector<64x298xf32>
    %70 = arith.addf %68, %69 : vector<64x298xf32>
    %cst_26 = arith.constant dense<0.000000e+00> : vector<64xf32>
    %71 = vector.multi_reduction <add>, %70, %cst_26 [1] : vector<64x298xf32> to vector<64xf32>
    %72 = vector.shape_cast %71 : vector<64xf32> to vector<64x1xf32>
    %cst_27 = arith.constant 2.980000e+02 : f32
    %73 = vector.broadcast %cst_27 : f32 to vector<64x1xf32>
    %74 = arith.divf %72, %73 : vector<64x1xf32>
    %75 = arith.mulf %70, %70 : vector<64x298xf32>
    %cst_28 = arith.constant dense<0.000000e+00> : vector<64xf32>
    %76 = vector.multi_reduction <add>, %75, %cst_28 [1] : vector<64x298xf32> to vector<64xf32>
    %77 = vector.shape_cast %76 : vector<64xf32> to vector<64x1xf32>
    %cst_29 = arith.constant 2.980000e+02 : f32
    %78 = vector.broadcast %cst_29 : f32 to vector<64x1xf32>
    %79 = arith.divf %77, %78 : vector<64x1xf32>
    %80 = arith.mulf %74, %74 : vector<64x1xf32>
    %81 = arith.subf %79, %80 : vector<64x1xf32>
    %cst_30 = arith.constant 0.000000e+00 : f32
    %82 = vector.broadcast %cst_30 : f32 to vector<64x1xf32>
    %83 = arith.maximumf %81, %82 : vector<64x1xf32>
    %84 = vector.broadcast %74 : vector<64x1xf32> to vector<64x298xf32>
    %85 = arith.subf %70, %84 : vector<64x298xf32>
    %cst_31 = arith.constant 9.99999974E-6 : f32
    %86 = vector.broadcast %cst_31 : f32 to vector<64x1xf32>
    %87 = arith.addf %83, %86 : vector<64x1xf32>
    %88 = math.rsqrt %87 : vector<64x1xf32>
    %89 = vector.broadcast %88 : vector<64x1xf32> to vector<64x298xf32>
    %90 = arith.mulf %85, %89 : vector<64x298xf32>
    %91 = vector.broadcast %2 : vector<1x298xf32> to vector<64x298xf32>
    %92 = arith.mulf %90, %91 : vector<64x298xf32>
    %93 = vector.broadcast %3 : vector<1x298xf32> to vector<64x298xf32>
    %94 = arith.addf %92, %93 : vector<64x298xf32>
    %cst_32 = arith.constant 0.000000e+00 : f32
    %95 = vector.broadcast %cst_32 : f32 to vector<64x298xf32>
    %96 = arith.cmpf oge, %94, %95 : vector<64x298xf32>
    %cst_33 = arith.constant 2.000000e-01 : f32
    %97 = vector.broadcast %cst_33 : f32 to vector<64x298xf32>
    %98 = arith.mulf %97, %94 : vector<64x298xf32>
    %99 = arith.select %96, %94, %98 : vector<64x298xi1>, vector<64x298xf32>
    %100 = vector.extract_strided_slice %10 {offsets = [0, 0], sizes = [64, 1], strides = [1, 1]} : vector<64x3xf32> to vector<64x1xf32>
    %101 = vector.extract_strided_slice %99 {offsets = [0, 0], sizes = [64, 294], strides = [1, 1]} : vector<64x298xf32> to vector<64x294xf32>
    %102 = vector.broadcast %100 : vector<64x1xf32> to vector<64x294xf32>
    %103 = arith.mulf %102, %101 : vector<64x294xf32>
    %104 = vector.extract_strided_slice %10 {offsets = [0, 1], sizes = [64, 1], strides = [1, 1]} : vector<64x3xf32> to vector<64x1xf32>
    %105 = vector.extract_strided_slice %99 {offsets = [0, 2], sizes = [64, 294], strides = [1, 1]} : vector<64x298xf32> to vector<64x294xf32>
    %106 = vector.broadcast %104 : vector<64x1xf32> to vector<64x294xf32>
    %107 = arith.mulf %106, %105 : vector<64x294xf32>
    %108 = arith.addf %103, %107 : vector<64x294xf32>
    %109 = vector.extract_strided_slice %10 {offsets = [0, 2], sizes = [64, 1], strides = [1, 1]} : vector<64x3xf32> to vector<64x1xf32>
    %110 = vector.extract_strided_slice %99 {offsets = [0, 4], sizes = [64, 294], strides = [1, 1]} : vector<64x298xf32> to vector<64x294xf32>
    %111 = vector.broadcast %109 : vector<64x1xf32> to vector<64x294xf32>
    %112 = arith.mulf %111, %110 : vector<64x294xf32>
    %113 = arith.addf %108, %112 : vector<64x294xf32>
    %114 = vector.broadcast %11 : vector<64x1xf32> to vector<64x294xf32>
    %115 = arith.addf %113, %114 : vector<64x294xf32>
    %cst_34 = arith.constant dense<0.000000e+00> : vector<64xf32>
    %116 = vector.multi_reduction <add>, %115, %cst_34 [1] : vector<64x294xf32> to vector<64xf32>
    %117 = vector.shape_cast %116 : vector<64xf32> to vector<64x1xf32>
    %cst_35 = arith.constant 2.940000e+02 : f32
    %118 = vector.broadcast %cst_35 : f32 to vector<64x1xf32>
    %119 = arith.divf %117, %118 : vector<64x1xf32>
    %120 = arith.mulf %115, %115 : vector<64x294xf32>
    %cst_36 = arith.constant dense<0.000000e+00> : vector<64xf32>
    %121 = vector.multi_reduction <add>, %120, %cst_36 [1] : vector<64x294xf32> to vector<64xf32>
    %122 = vector.shape_cast %121 : vector<64xf32> to vector<64x1xf32>
    %cst_37 = arith.constant 2.940000e+02 : f32
    %123 = vector.broadcast %cst_37 : f32 to vector<64x1xf32>
    %124 = arith.divf %122, %123 : vector<64x1xf32>
    %125 = arith.mulf %119, %119 : vector<64x1xf32>
    %126 = arith.subf %124, %125 : vector<64x1xf32>
    %cst_38 = arith.constant 0.000000e+00 : f32
    %127 = vector.broadcast %cst_38 : f32 to vector<64x1xf32>
    %128 = arith.maximumf %126, %127 : vector<64x1xf32>
    %129 = vector.broadcast %119 : vector<64x1xf32> to vector<64x294xf32>
    %130 = arith.subf %115, %129 : vector<64x294xf32>
    %cst_39 = arith.constant 9.99999974E-6 : f32
    %131 = vector.broadcast %cst_39 : f32 to vector<64x1xf32>
    %132 = arith.addf %128, %131 : vector<64x1xf32>
    %133 = math.rsqrt %132 : vector<64x1xf32>
    %134 = vector.broadcast %133 : vector<64x1xf32> to vector<64x294xf32>
    %135 = arith.mulf %130, %134 : vector<64x294xf32>
    %136 = vector.broadcast %4 : vector<1x294xf32> to vector<64x294xf32>
    %137 = arith.mulf %135, %136 : vector<64x294xf32>
    %138 = vector.broadcast %5 : vector<1x294xf32> to vector<64x294xf32>
    %139 = arith.addf %137, %138 : vector<64x294xf32>
    %cst_40 = arith.constant 0.000000e+00 : f32
    %140 = vector.broadcast %cst_40 : f32 to vector<64x294xf32>
    %141 = arith.cmpf oge, %139, %140 : vector<64x294xf32>
    %cst_41 = arith.constant 2.000000e-01 : f32
    %142 = vector.broadcast %cst_41 : f32 to vector<64x294xf32>
    %143 = arith.mulf %142, %139 : vector<64x294xf32>
    %144 = arith.select %141, %139, %143 : vector<64x294xi1>, vector<64x294xf32>
    %145 = vector.extract_strided_slice %12 {offsets = [0, 0], sizes = [64, 1], strides = [1, 1]} : vector<64x3xf32> to vector<64x1xf32>
    %146 = vector.extract_strided_slice %144 {offsets = [0, 0], sizes = [64, 288], strides = [1, 1]} : vector<64x294xf32> to vector<64x288xf32>
    %147 = vector.broadcast %145 : vector<64x1xf32> to vector<64x288xf32>
    %148 = arith.mulf %147, %146 : vector<64x288xf32>
    %149 = vector.extract_strided_slice %12 {offsets = [0, 1], sizes = [64, 1], strides = [1, 1]} : vector<64x3xf32> to vector<64x1xf32>
    %150 = vector.extract_strided_slice %144 {offsets = [0, 3], sizes = [64, 288], strides = [1, 1]} : vector<64x294xf32> to vector<64x288xf32>
    %151 = vector.broadcast %149 : vector<64x1xf32> to vector<64x288xf32>
    %152 = arith.mulf %151, %150 : vector<64x288xf32>
    %153 = arith.addf %148, %152 : vector<64x288xf32>
    %154 = vector.extract_strided_slice %12 {offsets = [0, 2], sizes = [64, 1], strides = [1, 1]} : vector<64x3xf32> to vector<64x1xf32>
    %155 = vector.extract_strided_slice %144 {offsets = [0, 6], sizes = [64, 288], strides = [1, 1]} : vector<64x294xf32> to vector<64x288xf32>
    %156 = vector.broadcast %154 : vector<64x1xf32> to vector<64x288xf32>
    %157 = arith.mulf %156, %155 : vector<64x288xf32>
    %158 = arith.addf %153, %157 : vector<64x288xf32>
    %159 = vector.broadcast %13 : vector<64x1xf32> to vector<64x288xf32>
    %160 = arith.addf %158, %159 : vector<64x288xf32>
    %cst_42 = arith.constant dense<0.000000e+00> : vector<64xf32>
    %161 = vector.multi_reduction <add>, %160, %cst_42 [1] : vector<64x288xf32> to vector<64xf32>
    %162 = vector.shape_cast %161 : vector<64xf32> to vector<64x1xf32>
    %cst_43 = arith.constant 2.880000e+02 : f32
    %163 = vector.broadcast %cst_43 : f32 to vector<64x1xf32>
    %164 = arith.divf %162, %163 : vector<64x1xf32>
    %165 = arith.mulf %160, %160 : vector<64x288xf32>
    %cst_44 = arith.constant dense<0.000000e+00> : vector<64xf32>
    %166 = vector.multi_reduction <add>, %165, %cst_44 [1] : vector<64x288xf32> to vector<64xf32>
    %167 = vector.shape_cast %166 : vector<64xf32> to vector<64x1xf32>
    %cst_45 = arith.constant 2.880000e+02 : f32
    %168 = vector.broadcast %cst_45 : f32 to vector<64x1xf32>
    %169 = arith.divf %167, %168 : vector<64x1xf32>
    %170 = arith.mulf %164, %164 : vector<64x1xf32>
    %171 = arith.subf %169, %170 : vector<64x1xf32>
    %cst_46 = arith.constant 0.000000e+00 : f32
    %172 = vector.broadcast %cst_46 : f32 to vector<64x1xf32>
    %173 = arith.maximumf %171, %172 : vector<64x1xf32>
    %174 = vector.broadcast %164 : vector<64x1xf32> to vector<64x288xf32>
    %175 = arith.subf %160, %174 : vector<64x288xf32>
    %cst_47 = arith.constant 9.99999974E-6 : f32
    %176 = vector.broadcast %cst_47 : f32 to vector<64x1xf32>
    %177 = arith.addf %173, %176 : vector<64x1xf32>
    %178 = math.rsqrt %177 : vector<64x1xf32>
    %179 = vector.broadcast %178 : vector<64x1xf32> to vector<64x288xf32>
    %180 = arith.mulf %175, %179 : vector<64x288xf32>
    %181 = vector.broadcast %6 : vector<1x288xf32> to vector<64x288xf32>
    %182 = arith.mulf %180, %181 : vector<64x288xf32>
    %183 = vector.broadcast %7 : vector<1x288xf32> to vector<64x288xf32>
    %184 = arith.addf %182, %183 : vector<64x288xf32>
    %cst_48 = arith.constant 0.000000e+00 : f32
    %185 = vector.broadcast %cst_48 : f32 to vector<64x288xf32>
    %186 = arith.cmpf oge, %184, %185 : vector<64x288xf32>
    %cst_49 = arith.constant 2.000000e-01 : f32
    %187 = vector.broadcast %cst_49 : f32 to vector<64x288xf32>
    %188 = arith.mulf %187, %184 : vector<64x288xf32>
    %189 = arith.select %186, %184, %188 : vector<64x288xi1>, vector<64x288xf32>
    %190 = vector.broadcast %14 : vector<64x1xf32> to vector<64x288xf32>
    %191 = arith.mulf %190, %189 : vector<64x288xf32>
    %192 = vector.broadcast %15 : vector<64x1xf32> to vector<64x288xf32>
    %193 = arith.addf %191, %192 : vector<64x288xf32>
    %cst_50 = arith.constant dense<0.000000e+00> : vector<64xf32>
    %194 = vector.multi_reduction <add>, %193, %cst_50 [1] : vector<64x288xf32> to vector<64xf32>
    %195 = vector.shape_cast %194 : vector<64xf32> to vector<64x1xf32>
    %cst_51 = arith.constant 2.880000e+02 : f32
    %196 = vector.broadcast %cst_51 : f32 to vector<64x1xf32>
    %197 = arith.divf %195, %196 : vector<64x1xf32>
    %198 = arith.mulf %193, %193 : vector<64x288xf32>
    %cst_52 = arith.constant dense<0.000000e+00> : vector<64xf32>
    %199 = vector.multi_reduction <add>, %198, %cst_52 [1] : vector<64x288xf32> to vector<64xf32>
    %200 = vector.shape_cast %199 : vector<64xf32> to vector<64x1xf32>
    %cst_53 = arith.constant 2.880000e+02 : f32
    %201 = vector.broadcast %cst_53 : f32 to vector<64x1xf32>
    %202 = arith.divf %200, %201 : vector<64x1xf32>
    %203 = arith.mulf %197, %197 : vector<64x1xf32>
    %204 = arith.subf %202, %203 : vector<64x1xf32>
    %cst_54 = arith.constant 0.000000e+00 : f32
    %205 = vector.broadcast %cst_54 : f32 to vector<64x1xf32>
    %206 = arith.maximumf %204, %205 : vector<64x1xf32>
    %207 = vector.broadcast %197 : vector<64x1xf32> to vector<64x288xf32>
    %208 = arith.subf %193, %207 : vector<64x288xf32>
    %cst_55 = arith.constant 9.99999974E-6 : f32
    %209 = vector.broadcast %cst_55 : f32 to vector<64x1xf32>
    %210 = arith.addf %206, %209 : vector<64x1xf32>
    %211 = math.rsqrt %210 : vector<64x1xf32>
    %212 = vector.broadcast %211 : vector<64x1xf32> to vector<64x288xf32>
    %213 = arith.mulf %208, %212 : vector<64x288xf32>
    %214 = vector.broadcast %6 : vector<1x288xf32> to vector<64x288xf32>
    %215 = arith.mulf %213, %214 : vector<64x288xf32>
    %216 = vector.broadcast %7 : vector<1x288xf32> to vector<64x288xf32>
    %217 = arith.addf %215, %216 : vector<64x288xf32>
    %cst_56 = arith.constant 0.000000e+00 : f32
    %218 = vector.broadcast %cst_56 : f32 to vector<64x288xf32>
    %219 = arith.cmpf oge, %217, %218 : vector<64x288xf32>
    %cst_57 = arith.constant 2.000000e-01 : f32
    %220 = vector.broadcast %cst_57 : f32 to vector<64x288xf32>
    %221 = arith.mulf %220, %217 : vector<64x288xf32>
    %222 = arith.select %219, %217, %221 : vector<64x288xi1>, vector<64x288xf32>
    %223 = vector.broadcast %16 : vector<64x1xf32> to vector<64x288xf32>
    %224 = arith.mulf %223, %222 : vector<64x288xf32>
    %225 = vector.broadcast %17 : vector<64x1xf32> to vector<64x288xf32>
    %226 = arith.addf %224, %225 : vector<64x288xf32>
    %227 = vector.shape_cast %226 : vector<64x288xf32> to vector<4x16x288xf32>
    %c0_58 = arith.constant 0 : index
    %c0_59 = arith.constant 0 : index
    %c0_60 = arith.constant 0 : index
    %228 = vector.load %arg6[%c0_58, %c0_59, %c0_60] : memref<4x16x288xf32, #tpu.memory_space<vmem>>, vector<4x16x288xf32>
    tpu.vector_store %arg6[%c0_58, %c0_59, %c0_60], %227 {strides = array<i32>} : memref<4x16x288xf32, #tpu.memory_space<vmem>>, vector<4x16x288xf32>,
    return
  }
  func.func @transform_0(%arg0: i32) -> (i32, i32) {
    %c0_i32 = arith.constant 0 : i32
    %c0_i32_0 = arith.constant 0 : i32
    return %arg0, %c0_i32 : i32, i32
  }
  func.func @transform_1(%arg0: i32) -> (i32, i32) {
    %c0_i32 = arith.constant 0 : i32
    %c0_i32_0 = arith.constant 0 : i32
    %c0_i32_1 = arith.constant 0 : i32
    return %c0_i32, %c0_i32_0 : i32, i32
  }
  func.func @transform_2(%arg0: i32) -> (i32, i32, i32) {
    %c0_i32 = arith.constant 0 : i32
    %c0_i32_0 = arith.constant 0 : i32
    %c0_i32_1 = arith.constant 0 : i32
    %c0_i32_2 = arith.constant 0 : i32
    return %c0_i32, %c0_i32_0, %c0_i32_1 : i32, i32, i32
  }
  func.func @transform_3(%arg0: i32) -> (i32, i32) {
    %c0_i32 = arith.constant 0 : i32
    %c0_i32_0 = arith.constant 0 : i32
    %c0_i32_1 = arith.constant 0 : i32
    return %c0_i32, %c0_i32_0 : i32, i32
  }
  func.func @transform_4(%arg0: i32) -> (i32, i32) {
    %c0_i32 = arith.constant 0 : i32
    %c0_i32_0 = arith.constant 0 : i32
    %c0_i32_1 = arith.constant 0 : i32
    return %c0_i32, %c0_i32_0 : i32, i32
  }
  func.func @transform_5(%arg0: i32) -> (i32, i32, i32) {
    %c0_i32 = arith.constant 0 : i32
    %c0_i32_0 = arith.constant 0 : i32
    %c0_i32_1 = arith.constant 0 : i32
    return %arg0, %c0_i32, %c0_i32_0 : i32, i32, i32
  }
}

</mosaic_0001>

<bundles_post_ra>
// kernel: tdnn_forward.1
= control target key start
LH: loop header
LB: loop body
LE: loop exit
PB: predicated region body
PF: predicated region fallthrough
CT: control target
= control target key end

     0   :  { %10 = vsyncpa [#allocation3], 0  ;;  %s13029_s0 = inlined_call_operand.vmem [shape: bf16[4864,488], index: 0, kind: input, shape index: {}]   ;;  %s13030_s1 = inlined_call_operand.vmem [shape: bf16[488,24], index: 1, kind: input, shape index: {}]   ;;  %s13031_s2 = inlined_call_operand.vmem [shape: bf16[4,16,40], index: 2, kind: input, shape index: {}]   ;;  %s13032_s3 = inlined_call_operand.vmem [shape: f32[8,302], index: 3, kind: input, shape index: {}]   ;;  %s13033_s4 = inlined_call_operand.vmem [shape: f32[64,13], index: 4, kind: input, shape index: {}]   ;;  %s13034_s5 = inlined_call_operand.hbm [shape: f32[16,16,288], index: 5, kind: output, shape index: {}]  }
   0x1   :  { %12 = vsyncpa [#allocation3 + $0x1], 0  ;;  %s9314_s18 = smov 0   ;;  %s9316_s19 = smov 0  }
   0x2   :  { %s9318_s20 = smov 0   ;;  %s9320_s21 = smov 0  }
   0x3 LB: > { %s9335_s22 = sadd.s32 4294967295, %s9259_s21   ;;  %s7915_s23 = sadd.s32 4294967294, %s9259_s21   ;;  %s9259_s21 = sphi %s9320_s21, %s13279_s21   ;;  %s9255_s20 = sphi %s9318_s20, %s13278_s20   ;;  %s9251_s19 = sphi %s9316_s19, %s13277_s19   ;;  %s9247_s18 = sphi %s9314_s18, %s13276_s18  }
   0x4   : > { %s9339_s24 = sadd.s32 1, %s9259_s21   ;;  %s135_s25 = sadd.s32 1, %s9255_s20 }
   0x5   : > { %s132_s26 = ssub.s32 %s9259_s21, %s9339_s24  ;;  %p145_p0 = scmp.ne.s32.totalorder %s9255_s20, %s9251_s19 }
   0x6   : > { %p133_p1 = scmp.eq.s32.totalorder %s132_s26, 0  ;;  %p146_p2 = scmp.eq.s32.totalorder %s9335_s22, 3 }
   0x7   : > { %p151_p3 = scmp.ne.s32.totalorder %s9251_s19, %s9247_s18  ;;  %p152_p4 = scmp.eq.s32.totalorder %s7915_s23, 3 }
   0x8   : > { %s9350_s27 = scalar_select %p133_p1, %s9255_s20, %s135_s25  }
   0x9   : > { %p9352_p5 = por %p146_p2, %p145_p0  ;;  %p9356_p6 = por %p152_p4, %p151_p3 }
   0xa   : > { %p7918_p7 = scmp.ge.s32.totalorder %s9259_s21, 1  ;;  %p192_p8 = scmp.lt.s32.totalorder %s9259_s21, 5 }
   0xc   : > { %p193_p9 = pnand %p7918_p7, %p192_p8 }
   0xe   : > { %196 = sbr.rel (%p193_p9) target bundleno = 3410 (0xd52), region = 40 }
  0x13   : > { %v8616_v0 = vld [vmem:[%s13030_s1 + $0x38] sm:$0xff]   ;;  %v13035_v1 = vmov 0   ;;  %v8618_v3 = vld [vmem:[%s13030_s1 + $0x30] sm:$0xff]   ;;  %v8620_v5 = vld [vmem:[%s13030_s1 + $0x28] sm:$0xff]   ;;  %s221_s30 = smul.u32 152, %s9335_s22  ;;  %vm2474_vm0 = vcmask 1043456  }
  0x14   : > { %2478 = vmatprep.subr.bf16.mxu0 %v13035_v1  ;;  %3119 = vmatprep.subr.bf16.mxu1 %v13035_v1  ;;  %v8617_v2 = vld [vmem:[%s13030_s1 + $0xb8] sm:$0xff]   ;;  %v8619_v4 = vld [vmem:[%s13030_s1 + $0xb0] sm:$0xff]   ;;  %v8621_v6 = vld [vmem:[%s13030_s1 + $0xa8] sm:$0xff]   ;;  %vm2245_vm1 = vcmask 850944   ;;  %v9262_v51 = vmov 1   ;;  %v9263_v56 = vmov 2  }
  0x15   : > { %2479 = vmatpush1.bf16.msra.mxu0 %v8616_v0  ;;  %8480 = vset.pattern.permute.xlu1 %v13035_v1  ;;  %v8622_v7 = vld [vmem:[%s13030_s1 + $0x20] sm:$0xff]   ;;  %v8624_v9 = vld [vmem:[%s13030_s1 + $0x18] sm:$0xff]   ;;  %p222_p10 = scmp.lt.s32.totalorder %s221_s30, 607  ;;  %v8626_v11 = vld [vmem:[%s13030_s1 + $0x10] sm:$0xff]   ;;  %v9264_v0 = vmov 3   ;;  %s9269_s15 = smov 127  }
  0x16   : > { %3120 = vmatpush1.bf16.msra.mxu1 %v8617_v2  ;;  %2480 = vmatprep.subr.bf16.mxu0 %v13035_v1  ;;  %v8623_v8 = vld [vmem:[%s13030_s1 + $0xa0] sm:$0xff]   ;;  %v8625_v10 = vld [vmem:[%s13030_s1 + $0x98] sm:$0xff]   ;;  %v8627_v12 = vld [vmem:[%s13030_s1 + $0x90] sm:$0xff]   ;;  %s9270_s16 = smov 126   ;;  %vm4180_vm2 = vcmask 1039360   ;;  %vm4249_vm3 = vcmask 1031168  }
  0x17   : > { %3121 = vmatprep.subr.bf16.mxu1 %v13035_v1  ;;  %8481 = vset.pattern.permute.xlu0 %v13035_v1  ;;  %s13281_s30 = smov (!%p222_p10, %s221_s30), 607  ;;  %v8628_v13 = vld [vmem:[%s13030_s1 + $0x8] sm:$0xff]   ;;  %v8630_v15 = vld [vmem:[%s13030_s1] sm:$0xff]   ;;  %v8633_v17 = vld [vmem:[%s13030_s1 + $0xf0] ss:$0 sps:$4 sm:$0xff]   ;;  %vm4283_vm4 = vcmask 375808  }
  0x18   : > { %v8629_v14 = vld [vmem:[%s13030_s1 + $0x88] sm:$0xff]   ;;  %s8360_s23 = sshll.u32 %s13281_s30, 4  ;;  %v8631_v16 = vld [vmem:[%s13030_s1 + $0x80] sm:$0xff]   ;;  %v8632_v18 = vld [vmem:[%s13030_s1 + $0x78] sm:$0xff]   ;;  %v2476_v20 = vsel %vm2474_vm0, %v8633_v17, 0  ;;  %s9271_s26 = smov 125  }
  0x19   : > { %2481 = vmatpush1.bf16.msra.mxu0 %v8618_v3  ;;  %s9431_s10 = scalar_lea.vmem %s13029_s0, %s8360_s23  ;;  %v8634_v22 = vld [vmem:[%s13030_s1 + $0x70] sm:$0xff]   ;;  %v8635_v23 = vld [vmem:[%s13030_s1 + $0xe8] sm:$0xff]   ;;  %v8637_v25 = vld [vmem:[%s13030_s1 + $0xe0] sm:$0xff]   ;;  %s9272_s6 = smov 124   ;;  %vm4649_vm8 = vcmask 1014784   ;;  %vm9274_vm12 = vmmov 0  }
  0x1a   : > { %3122 = vmatpush1.bf16.msra.mxu1 %v8619_v4  ;;  %2482 = vmatprep.subr.bf16.mxu0 %v13035_v1  ;;  %v8648_v19 = vld [vmem:[%s9431_s10 + $0xc] ss:$16 sps:$4 sm:$0xff]   ;;  %v8652_v21 = vld [vmem:[%s9431_s10 + $0x4] ss:$16 sps:$4 sm:$0xff]   ;;  %v8646_v37 = vld [vmem:[%s9431_s10 + $0x8] ss:$16 sps:$4 sm:$0xff]  }
  0x1b   : > { %3123 = vmatprep.subr.bf16.mxu1 %v13035_v1  ;;  %8263 = vmatprep.mubr.msk.bf16.mxu1 %vm2245_vm1, %v8648_v19  ;;  %v8636_v24 = vld [vmem:[%s13030_s1 + $0x68] sm:$0xff]   ;;  %v8638_v26 = vld [vmem:[%s13030_s1 + $0x60] sm:$0xff]   ;;  %v8639_v27 = vld [vmem:[%s13030_s1 + $0xd8] sm:$0xff]   ;;  %vm4604_vm13 = vcmask 1022976   ;;  %vm4719_vm14 = vcmask 326656   ;;  %s9276_s14 = smov 122  }
  0x1c   : > { %2510 = vmatprep.mubr.bf16.mxu0 %v8652_v21  ;;  %v8640_v28 = vld [vmem:[%s13030_s1 + $0x58] sm:$0xff]   ;;  %v8641_v29 = vld [vmem:[%s13030_s1 + $0xd0] sm:$0xff]   ;;  %v9484_v31 = vld [vmem:[%s13033_s4] sm:$0xff]  ;;  %s218_s7 = sand.u32 1, %s9251_s19   ;;  %s8418_s30 = smul.u32 3072, %s9335_s22 }
  0x1d   : > { %2483 = vmatpush1.bf16.msra.mxu0 %v8620_v5  ;;  %v8642_v30 = vld [vmem:[%s13030_s1 + $0x50] sm:$0xff]   ;;  %v8643_v32 = vld [vmem:[%s13030_s1 + $0xc8] sm:$0xff]   ;;  %5121 = vperm.xlu1 %8480, %v9484_v31   ;;  %v8645_v35 = vld [vmem:[%s13030_s1 + $0xc0] sm:$0xff]   ;;  %s8417_s8 = smul.u32 192, %s218_s7 }
  0x1e   : > { %3124 = vmatpush1.bf16.msra.mxu1 %v8621_v6  ;;  %2484 = vmatprep.subr.bf16.mxu0 %v13035_v1  ;;  %v9495_v33 = vld [vmem:[%s13033_s4 + $0x10] sm:$0xff]  ;;  %v8644_v34 = vld [vmem:[%s13030_s1 + $0x48] sm:$0xff]   ;;  %v9509_v36 = vld [vmem:[%s13033_s4 + $0x18] sm:$0xff]  ;;  %s12981_s13 = scalar_lea.hbm %s13034_s5, %s8418_s30 }
  0x1f   : > { %3125 = vmatprep.subr.bf16.mxu1 %v13035_v1  ;;  %v8649_v38 = vld [vmem:[%s13030_s1 + $0x40] sm:$0xff]   ;;  %v8653_v39 = vld [vmem:[%s9431_s10 + $0x2c] ss:$16 sps:$4 sm:$0xff]   ;;  %v9547_v46 = vld [vmem:[%s13033_s4 + $0x30] sm:$0xff]  ;;  %s12875_s9 = scalar_lea.vmem [#allocation2], %s8417_s8 }
  0x20   : > { %v9520_v40 = vld [vmem:[%s13033_s4 + $0x8] sm:$0xff]  ;;  %v8650_v41 = vld [vmem:[%s9431_s10] ss:$16 sps:$4 sm:$0xff]   ;;  %v8656_v44 = vld [vmem:[%s9431_s10 + $0x24] ss:$16 sps:$4 sm:$0xff]   ;;  %s7853_s11 = sshll.u32 %s12875_s9, 4  ;;  %s12976_s11 = int_to_ptr.vmem [resolvable:$true] %s7853_s11 }
  0x21   : > { %2485 = vmatpush1.bf16.msra.mxu0 %v8622_v7  ;;  %5131 = vperm.xlu1 %8480, %v9495_v33   ;;  %v9528_v42 = vld [vmem:[%s13033_s4 + $0x28] sm:$0xff]  ;;  %v9533_v43 = vld [vmem:[%s13033_s4 + $0x20] sm:$0xff]  ;;  %v9541_v45 = vld [vmem:[%s13033_s4 + $0x38] sm:$0xff] }
  0x22   : > { %3126 = vmatpush1.bf16.msra.mxu1 %v8623_v8  ;;  %2486 = vmatprep.subr.bf16.mxu0 %v13035_v1  ;;  %v8655_v47 = vld [vmem:[%s9431_s10 + $0x28] ss:$16 sps:$4 sm:$0xff]   ;;  %v8659_v48 = vld [vmem:[%s9431_s10 + $0x4c] ss:$16 sps:$4 sm:$0xff]   ;;  %v8658_v49 = vld [vmem:[%s9431_s10 + $0x20] ss:$16 sps:$4 sm:$0xff]  }
  0x23   : > { %3127 = vmatprep.subr.bf16.mxu1 %v13035_v1  ;;  %5126 = vperm.xlu0 %8481, %v9520_v40   ;;  %v8662_v50 = vld [vmem:[%s9431_s10 + $0x44] ss:$16 sps:$4 sm:$0xff]   ;;  %v8661_v52 = vld [vmem:[%s9431_s10 + $0x48] ss:$16 sps:$4 sm:$0xff]   ;;  %v8665_v53 = vld [vmem:[%s9431_s10 + $0x6c] ss:$16 sps:$4 sm:$0xff]  }
  0x24   : > { %v8664_v54 = vld [vmem:[%s9431_s10 + $0x40] ss:$16 sps:$4 sm:$0xff]   ;;  %v8668_v55 = vld [vmem:[%s9431_s10 + $0x64] ss:$16 sps:$4 sm:$0xff]   ;;  %v8667_v57 = vld [vmem:[%s9431_s10 + $0x68] ss:$16 sps:$4 sm:$0xff]  }
  0x25   : > { %2487 = vmatpush1.bf16.msra.mxu0 %v8624_v9  ;;  %5136 = vperm.xlu1 %8480, %v9509_v36   ;;  %v8670_v58 = vld [vmem:[%s9431_s10 + $0x60] ss:$16 sps:$4 sm:$0xff]   ;;  %v8671_v59 = vld [vmem:[%s9431_s10 + $0x8c] ss:$16 sps:$4 sm:$0xff]   ;;  %v8674_v60 = vld [vmem:[%s9431_s10 + $0x84] ss:$16 sps:$4 sm:$0xff]  }
  0x26   : > { %3128 = vmatpush1.bf16.msra.mxu1 %v8625_v10  ;;  %2488 = vmatprep.subr.bf16.mxu0 %v13035_v1  ;;  %v8673_v61 = vld [vmem:[%s9431_s10 + $0x88] ss:$16 sps:$4 sm:$0xff]   ;;  %v8677_v62 = vld [vmem:[%s9431_s10 + $0xac] ss:$16 sps:$4 sm:$0xff]   ;;  %v8676_v63 = vld [vmem:[%s9431_s10 + $0x80] ss:$16 sps:$4 sm:$0xff]  }
  0x27   : > { %3129 = vmatprep.subr.bf16.mxu1 %v13035_v1  ;;  %5141 = vperm.xlu0 %8481, %v9533_v43   ;;  %v8680_v2 = vld [vmem:[%s9431_s10 + $0xa4] ss:$16 sps:$4 sm:$0xff]   ;;  %v8679_v3 = vld [vmem:[%s9431_s10 + $0xa8] ss:$16 sps:$4 sm:$0xff]   ;;  %v8683_v4 = vld [vmem:[%s9431_s10 + $0xcc] ss:$16 sps:$4 sm:$0xff]  }
  0x28   : > { %v8682_v5 = vld [vmem:[%s9431_s10 + $0xa0] ss:$16 sps:$4 sm:$0xff]   ;;  %v8686_v6 = vld [vmem:[%s9431_s10 + $0xc4] ss:$16 sps:$4 sm:$0xff]   ;;  %v8685_v7 = vld [vmem:[%s9431_s10 + $0xc8] ss:$16 sps:$4 sm:$0xff]  }
  0x29   : > { %2489 = vmatpush1.bf16.msra.mxu0 %v8626_v11  ;;  %5146 = vperm.xlu1 %8480, %v9528_v42   ;;  %v9265_v8 = vmov 4   ;;  %v8689_v9 = vld [vmem:[%s9431_s10 + $0xec] ss:$16 sps:$4 sm:$0xff]   ;;  %v8688_v10 = vld [vmem:[%s9431_s10 + $0xc0] ss:$16 sps:$4 sm:$0xff]  }
  0x2a   : > { %3130 = vmatpush1.bf16.msra.mxu1 %v8627_v12  ;;  %2490 = vmatprep.subr.bf16.mxu0 %v13035_v1  ;;  %v8692_v11 = vld [vmem:[%s9431_s10 + $0xe4] ss:$16 sps:$4 sm:$0xff]   ;;  %v8691_v12 = vld [vmem:[%s9431_s10 + $0xe8] ss:$16 sps:$4 sm:$0xff]   ;;  %v8703_v17 = vld [vmem:[%s9431_s10 + $0x12c] ss:$16 sps:$4 sm:$0xff]  }
  0x2b   : > { %3131 = vmatprep.subr.bf16.mxu1 %v13035_v1  ;;  %5151 = vperm.xlu0 %8481, %v9547_v46   ;;  %v8699_v19 = vld [vmem:[%s9431_s10 + $0x100] ss:$16 sps:$4 sm:$0xff]   ;;  %v8706_v21 = vld [vmem:[%s9431_s10 + $0x128] ss:$16 sps:$4 sm:$0xff]  }
  0x2d   : > { %2491 = vmatpush1.bf16.msra.mxu0 %v8628_v13  ;;  %5156 = vperm.xlu1 %8480, %v9541_v45   ;;  %v8697_v13 = vld [vmem:[%s9431_s10 + $0x10c] ss:$16 sps:$4 sm:$0xff]  }
  0x2e   : > { %3132 = vmatpush1.bf16.msra.mxu1 %v8629_v14  ;;  %2492 = vmatprep.subr.bf16.mxu0 %v13035_v1  ;;  %v8694_v14 = vld [vmem:[%s9431_s10 + $0xe0] ss:$16 sps:$4 sm:$0xff]  }
  0x2f   : > { %3133 = vmatprep.subr.bf16.mxu1 %v13035_v1  ;;  %8483 = vset.pattern.permute.xlu0 %v9262_v51 }
  0x30   : > { %5550 = vperm.xlu0 %8483, %v9520_v40  }
  0x31   : > { %2493 = vmatpush1.bf16.msra.mxu0 %v8630_v15  ;;  %8482 = vset.pattern.permute.xlu1 %v9262_v51  ;;  %v8695_v15 = vld [vmem:[%s9431_s10 + $0x104] ss:$16 sps:$4 sm:$0xff]   ;;  %v8736_v51 = vld [vmem:[%s9431_s10 + $0x1c8] ss:$16 sps:$4 sm:$0xff]  }
  0x32   : > { %3134 = vmatpush1.bf16.msra.mxu1 %v8631_v16  ;;  %2494 = vmatprep.subr.bf16.mxu0 %v13035_v1  ;;  %v8700_v16 = vld [vmem:[%s9431_s10 + $0x108] ss:$16 sps:$4 sm:$0xff]  }
  0x33   : > { %3137 = vmatprep.subr.bf16.mxu1 %v13035_v1  ;;  %5546 = vperm.xlu1 %8482, %v9484_v31  }
  0x34   : > { %8485 = vset.pattern.permute.xlu0 %v9263_v56 }
  0x35   : > { %2495 = vmatpush2.bf16.msra.mxu0 %v8632_v18  ;;  %5610 = vperm.xlu0 %8485, %v9495_v33   ;;  %v9266_v18 = vmov 5  }
  0x36   : > { %3138 = vmatpush2.bf16.msra.mxu1 %v2476_v20  ;;  %2496 = vmatprep.subr.bf16.mxu0 %v13035_v1  ;;  %v8701_v20 = vld [vmem:[%s9431_s10 + $0x124] ss:$16 sps:$4 sm:$0xff]  }
  0x37   : > { %3139 = vmatprep.subr.bf16.mxu1 %v13035_v1  ;;  %5554 = vperm.xlu1 %8482, %v9495_v33  }
  0x39   : > { %2497 = vmatpush2.bf16.msra.mxu0 %v8634_v22  ;;  %5622 = vperm.xlu0 %8485, %v9528_v42   ;;  %v9267_v22 = vmov 6  }
  0x3a   : > { %3140 = vmatpush2.bf16.msra.mxu1 %v8635_v23  ;;  %2498 = vmatprep.subr.bf16.mxu0 %v13035_v1  ;;  %v8709_v23 = vld [vmem:[%s9431_s10 + $0x14c] ss:$16 sps:$4 sm:$0xff]  }
  0x3b   : > { %3141 = vmatprep.subr.bf16.mxu1 %v13035_v1  ;;  %5558 = vperm.xlu1 %8482, %v9509_v36  }
  0x3d   : > { %2499 = vmatpush2.bf16.msra.mxu0 %v8636_v24  ;;  %5630 = vperm.xlu0 %8485, %v9541_v45   ;;  %v8705_v24 = vld [vmem:[%s9431_s10 + $0x120] ss:$16 sps:$4 sm:$0xff]  }
  0x3e   : > { %3142 = vmatpush2.bf16.msra.mxu1 %v8637_v25  ;;  %2500 = vmatprep.subr.bf16.mxu0 %v13035_v1  ;;  %v8707_v25 = vld [vmem:[%s9431_s10 + $0x144] ss:$16 sps:$4 sm:$0xff]  }
  0x3f   : > { %3143 = vmatprep.subr.bf16.mxu1 %v13035_v1  ;;  %5562 = vperm.xlu1 %8482, %v9533_v43  }
  0x41   : > { %2501 = vmatpush2.bf16.msra.mxu0 %v8638_v26  ;;  %8487 = vset.pattern.permute.xlu0 %v9264_v0  ;;  %v8712_v26 = vld [vmem:[%s9431_s10 + $0x148] ss:$16 sps:$4 sm:$0xff]  }
  0x42   : > { %3144 = vmatpush2.bf16.msra.mxu1 %v8639_v27  ;;  %2502 = vmatprep.subr.bf16.mxu0 %v13035_v1  ;;  %v8715_v27 = vld [vmem:[%s9431_s10 + $0x16c] ss:$16 sps:$4 sm:$0xff]  }
  0x43   : > { %3145 = vmatprep.subr.bf16.mxu1 %v13035_v1  ;;  %5566 = vperm.xlu1 %8482, %v9528_v42  }
  0x44   : > { %5798 = vperm.xlu0 %8487, %v9520_v40  }
  0x45   : > { %2503 = vmatpush2.bf16.msra.mxu0 %v8640_v28  ;;  %v8711_v28 = vld [vmem:[%s9431_s10 + $0x140] ss:$16 sps:$4 sm:$0xff]  }
  0x46   : > { %3146 = vmatpush2.bf16.msra.mxu1 %v8641_v29  ;;  %2504 = vmatprep.subr.bf16.mxu0 %v13035_v1  ;;  %v8713_v29 = vld [vmem:[%s9431_s10 + $0x164] ss:$16 sps:$4 sm:$0xff]  }
  0x47   : > { %3147 = vmatprep.subr.bf16.mxu1 %v13035_v1  ;;  %5570 = vperm.xlu1 %8482, %v9547_v46  }
  0x48   : > { %5810 = vperm.xlu0 %8487, %v9533_v43  }
  0x49   : > { %2505 = vmatpush2.bf16.msra.mxu0 %v8642_v30  ;;  %v9268_v30 = vmov 7  }
  0x4a   : > { %3148 = vmatpush2.bf16.msra.mxu1 %v8643_v32  ;;  %2506 = vmatprep.subr.bf16.mxu0 %v13035_v1  ;;  %v8718_v32 = vld [vmem:[%s9431_s10 + $0x168] ss:$16 sps:$4 sm:$0xff]  }
  0x4b   : > { %3149 = vmatprep.subr.bf16.mxu1 %v13035_v1  ;;  %5574 = vperm.xlu1 %8482, %v9541_v45  }
  0x4c   : > { %5818 = vperm.xlu0 %8487, %v9547_v46  }
  0x4d   : > { %2507 = vmatpush2.bf16.msra.mxu0 %v8644_v34  ;;  %v8721_v34 = vld [vmem:[%s9431_s10 + $0x18c] ss:$16 sps:$4 sm:$0xff]  }
  0x4e   : > { %3150 = vmatpush2.bf16.msra.mxu1 %v8645_v35  ;;  %2508 = vmatprep.subr.bf16.mxu0 %v13035_v1  ;;  %v8717_v35 = vld [vmem:[%s9431_s10 + $0x160] ss:$16 sps:$4 sm:$0xff]  }
  0x4f   : > { %8484 = vset.pattern.permute.xlu1 %v9263_v56  ;;  %v8741_v56 = vld [vmem:[%s9431_s10 + $0x1e0] ss:$16 sps:$4 sm:$0xff]  }
  0x50   : > { %5602 = vperm.xlu1 %8484, %v9484_v31   ;;  %8488 = vset.pattern.permute.xlu0 %v9265_v8 }
  0x51   : > { %3152 = vmatmul.mubr.bf16.vlgmr.msra.gmra.mxu1 %v8646_v37  ;;  %2509 = vmatpush2.bf16.msra.mxu0 %v8649_v38  ;;  %v8719_v37 = vld [vmem:[%s9431_s10 + $0x184] ss:$16 sps:$4 sm:$0xff]   ;;  %v8724_v38 = vld [vmem:[%s9431_s10 + $0x188] ss:$16 sps:$4 sm:$0xff]  }
  0x52   : > { %8264 = vmatprep.mubr.msk.bf16.mxu1 %vm2245_vm1, %v8653_v39  ;;  %5986 = vperm.xlu0 %8488, %v9484_v31   ;;  %v8727_v39 = vld [vmem:[%s9431_s10 + $0x1ac] ss:$16 sps:$4 sm:$0xff]  }
  0x54   : > { %2511 = vmatmul.mubr.bf16.vlgmr.msra.gmra.mxu0 %v8650_v41  ;;  %5606 = vperm.xlu1 %8484, %v9520_v40   ;;  %v8723_v41 = vld [vmem:[%s9431_s10 + $0x180] ss:$16 sps:$4 sm:$0xff]  }
  0x55   : > { %2518 = vmatprep.mubr.bf16.mxu0 %v8656_v44  ;;  %v8725_v44 = vld [vmem:[%s9431_s10 + $0x1a4] ss:$16 sps:$4 sm:$0xff]  }
  0x56   : > { %5998 = vperm.xlu0 %8488, %v9509_v36  }
  0x58   : > { %5614 = vperm.xlu1 %8484, %v9509_v36  }
  0x59   : > { %3160 = vmatmul.mubr.bf16.gmra.mxu1 %v8655_v47  ;;  %v8730_v47 = vld [vmem:[%s9431_s10 + $0x1a8] ss:$16 sps:$4 sm:$0xff]  }
  0x5a   : > { %8265 = vmatprep.mubr.msk.bf16.mxu1 %vm2245_vm1, %v8659_v48  ;;  %6006 = vperm.xlu0 %8488, %v9528_v42   ;;  %v8733_v48 = vld [vmem:[%s9431_s10 + $0x1cc] ss:$16 sps:$4 sm:$0xff]  }
  0x5c   : > { %2519 = vmatmul.mubr.bf16.gmra.mxu0 %v8658_v49  ;;  %5618 = vperm.xlu1 %8484, %v9533_v43   ;;  %v8729_v49 = vld [vmem:[%s9431_s10 + $0x1a0] ss:$16 sps:$4 sm:$0xff]  }
  0x5d   : > { %2526 = vmatprep.mubr.bf16.mxu0 %v8662_v50  ;;  %v8731_v50 = vld [vmem:[%s9431_s10 + $0x1c4] ss:$16 sps:$4 sm:$0xff]  }
  0x5e   : > { %6014 = vperm.xlu0 %8488, %v9541_v45  }
  0x60   : > { %5626 = vperm.xlu1 %8484, %v9547_v46  }
  0x61   : > { %3168 = vmatmul.mubr.bf16.gmra.mxu1 %v8661_v52  ;;  %v8739_v52 = vld [vmem:[%s9431_s10 + $0x1ec] ss:$16 sps:$4 sm:$0xff]  }
  0x62   : > { %8266 = vmatprep.mubr.msk.bf16.mxu1 %vm2245_vm1, %v8665_v53  ;;  %8491 = vset.pattern.permute.xlu0 %v9266_v18  ;;  %v8735_v53 = vld [vmem:[%s9431_s10 + $0x1c0] ss:$16 sps:$4 sm:$0xff]  }
  0x63   : > { %6408 = vperm.xlu0 %8491, %v9520_v40  }
  0x64   : > { %2527 = vmatmul.mubr.bf16.gmra.mxu0 %v8664_v54  ;;  %8486 = vset.pattern.permute.xlu1 %v9264_v0  ;;  %v8742_v54 = vld [vmem:[%s9431_s10 + $0x1e8] ss:$16 sps:$4 sm:$0xff]   ;;  %v8763_v0 = vld [vmem:[%s9431_s10 + $0x26c] ss:$16 sps:$4 sm:$0xff]  }
  0x65   : > { %2534 = vmatprep.mubr.bf16.mxu0 %v8668_v55  ;;  %5794 = vperm.xlu1 %8486, %v9484_v31   ;;  %v8745_v55 = vld [vmem:[%s9431_s10 + $0x20c] ss:$16 sps:$4 sm:$0xff]  }
  0x67   : > { %8493 = vset.pattern.permute.xlu0 %v9267_v22 }
  0x68   : > { %6468 = vperm.xlu0 %8493, %v9495_v33  }
  0x69   : > { %3176 = vmatmul.mubr.bf16.gmra.mxu1 %v8667_v57  ;;  %5802 = vperm.xlu1 %8486, %v9495_v33   ;;  %v8743_v57 = vld [vmem:[%s9431_s10 + $0x204] ss:$16 sps:$4 sm:$0xff]  }
  0x6a   : > { %8267 = vmatprep.mubr.msk.bf16.mxu1 %vm2245_vm1, %v8671_v59  ;;  %v8747_v59 = vld [vmem:[%s9431_s10 + $0x200] ss:$16 sps:$4 sm:$0xff]  }
  0x6c   : > { %2535 = vmatmul.mubr.bf16.gmra.mxu0 %v8670_v58  ;;  %6480 = vperm.xlu0 %8493, %v9528_v42   ;;  %v8751_v58 = vld [vmem:[%s9431_s10 + $0x22c] ss:$16 sps:$4 sm:$0xff]  }
  0x6d   : > { %2542 = vmatprep.mubr.bf16.mxu0 %v8674_v60  ;;  %5806 = vperm.xlu1 %8486, %v9509_v36   ;;  %v8749_v60 = vld [vmem:[%s9431_s10 + $0x224] ss:$16 sps:$4 sm:$0xff]  }
  0x70   : > { %6488 = vperm.xlu0 %8493, %v9541_v45  }
  0x71   : > { %3184 = vmatmul.mubr.bf16.gmra.mxu1 %v8673_v61  ;;  %5814 = vperm.xlu1 %8486, %v9528_v42   ;;  %v8754_v61 = vld [vmem:[%s9431_s10 + $0x228] ss:$16 sps:$4 sm:$0xff]  }
  0x72   : > { %8268 = vmatprep.mubr.msk.bf16.mxu1 %vm2245_vm1, %v8677_v62  ;;  %v8753_v62 = vld [vmem:[%s9431_s10 + $0x220] ss:$16 sps:$4 sm:$0xff]  }
  0x74   : > { %2543 = vmatmul.mubr.bf16.gmra.mxu0 %v8676_v63  ;;  %8495 = vset.pattern.permute.xlu0 %v9268_v30  ;;  %v8755_v63 = vld [vmem:[%s9431_s10 + $0x244] ss:$16 sps:$4 sm:$0xff]  }
  0x75   : > { %2550 = vmatprep.mubr.bf16.mxu0 %v8680_v2  ;;  %5822 = vperm.xlu1 %8486, %v9541_v45   ;;  %v8759_v2 = vld [vmem:[%s9431_s10 + $0x240] ss:$16 sps:$4 sm:$0xff]  }
  0x76   : > { %6656 = vperm.xlu0 %8495, %v9520_v40  }
  0x79   : > { %3192 = vmatmul.mubr.bf16.gmra.mxu1 %v8679_v3  ;;  %8489 = vset.pattern.permute.xlu1 %v9265_v8  ;;  %v8769_v3 = vld [vmem:[%s9431_s10 + $0x28c] ss:$16 sps:$4 sm:$0xff]  }
  0x7a   : > { %8269 = vmatprep.mubr.msk.bf16.mxu1 %vm2245_vm1, %v8683_v4  ;;  %5990 = vperm.xlu1 %8489, %v9520_v40   ;;  %v8765_v4 = vld [vmem:[%s9431_s10 + $0x260] ss:$16 sps:$4 sm:$0xff]   ;;  %v8775_v8 = vld [vmem:[%s9431_s10 + $0x2ac] ss:$16 sps:$4 sm:$0xff]  }
  0x7c   : > { %2551 = vmatmul.mubr.bf16.gmra.mxu0 %v8682_v5 }
  0x7d   : > { %2558 = vmatprep.mubr.bf16.mxu0 %v8686_v6  ;;  %v9180_v6 = vld [vmem:[%s13033_s4 + $0x10] sm:$0xff] }
  0x7e   : > { %5994 = vperm.xlu1 %8489, %v9495_v33  }
  0x81   : > { %3200 = vmatmul.mubr.bf16.gmra.mxu1 %v8685_v7  ;;  %v8772_v7 = vld [vmem:[%s9431_s10 + $0x288] ss:$16 sps:$4 sm:$0xff]  }
  0x82   : > { %8270 = vmatprep.mubr.msk.bf16.mxu1 %vm2245_vm1, %v8689_v9  ;;  %6002 = vperm.xlu1 %8489, %v9533_v43  }
  0x84   : > { %2559 = vmatmul.mubr.bf16.gmra.mxu0 %v8688_v10  ;;  %v8771_v10 = vld [vmem:[%s9431_s10 + $0x280] ss:$16 sps:$4 sm:$0xff]  }
  0x85   : > { %2566 = vmatprep.mubr.bf16.mxu0 %v8692_v11  ;;  %v8773_v11 = vld [vmem:[%s9431_s10 + $0x2a4] ss:$16 sps:$4 sm:$0xff]  }
  0x86   : > { %6010 = vperm.xlu1 %8489, %v9547_v46  }
  0x89   : > { %3208 = vmatmul.mubr.bf16.gmra.mxu1 %v8691_v12  ;;  %v8778_v12 = vld [vmem:[%s9431_s10 + $0x2a8] ss:$16 sps:$4 sm:$0xff]  }
  0x8a   : > { %8271 = vmatprep.mubr.msk.bf16.mxu1 %vm2245_vm1, %v8697_v13  ;;  %8490 = vset.pattern.permute.xlu1 %v9266_v18  ;;  %v8784_v18 = vld [vmem:[%s9431_s10 + $0x2c8] ss:$16 sps:$4 sm:$0xff]  }
  0x8b   : > { %6404 = vperm.xlu1 %8490, %v9484_v31  }
  0x8c   : > { %2567 = vmatmul.mubr.bf16.gmra.mxu0 %v8694_v14  ;;  %v8781_v14 = vld [vmem:[%s9431_s10 + $0x2cc] ss:$16 sps:$4 sm:$0xff]  }
  0x8d   : > { %2574 = vmatprep.mubr.bf16.mxu0 %v8695_v15  ;;  %v8777_v15 = vld [vmem:[%s9431_s10 + $0x2a0] ss:$16 sps:$4 sm:$0xff]  }
  0x8f   : > { %6412 = vperm.xlu1 %8490, %v9495_v33   ;;  %v8737_v33 = vld [vmem:[%s9431_s10 + $0x1e4] ss:$16 sps:$4 sm:$0xff]  }
  0x91   : > { %3216 = vmatmul.mubr.bf16.gmra.mxu1 %v8700_v16  ;;  %v8779_v16 = vld [vmem:[%s9431_s10 + $0x2c4] ss:$16 sps:$4 sm:$0xff]  }
  0x92   : > { %8272 = vmatprep.mubr.msk.bf16.mxu1 %vm2245_vm1, %v8703_v17 }
  0x93   : > { %6416 = vperm.xlu1 %8490, %v9509_v36  }
  0x94   : > { %2575 = vmatmul.mubr.bf16.gmra.mxu0 %v8699_v19  ;;  %v8787_v19 = vld [vmem:[%s9431_s10 + $0x2ec] ss:$16 sps:$4 sm:$0xff]  }
  0x95   : > { %2582 = vmatprep.mubr.bf16.mxu0 %v8701_v20  ;;  %v8783_v20 = vld [vmem:[%s9431_s10 + $0x2c0] ss:$16 sps:$4 sm:$0xff]  }
  0x97   : > { %6420 = vperm.xlu1 %8490, %v9533_v43  }
  0x98   : > { %v9703_v5 = vpop.permute.xlu1 %5121 }
  0x99   : > { %3224 = vmatmul.mubr.bf16.gmra.mxu1 %v8706_v21  ;;  %v8785_v21 = vld [vmem:[%s9431_s10 + $0x2e4] ss:$16 sps:$4 sm:$0xff]  }
  0x9a   : > { %8273 = vmatprep.mubr.msk.bf16.mxu1 %vm2245_vm1, %v8709_v23  ;;  %v8790_v23 = vld [vmem:[%s9431_s10 + $0x2e8] ss:$16 sps:$4 sm:$0xff]  }
  0x9b   : > { %6424 = vperm.xlu1 %8490, %v9528_v42   ;;  %v8748_v42 = vld [vmem:[%s9431_s10 + $0x208] ss:$16 sps:$4 sm:$0xff]  }
  0x9c   : > { %2583 = vmatmul.mubr.bf16.gmra.mxu0 %v8705_v24  ;;  %v9711_v9 = vpop.permute.xlu1 %5131  ;;  %v8793_v24 = vld [vmem:[%s9431_s10 + $0x30c] ss:$16 sps:$4 sm:$0xff]  }
  0x9d   : > { %2590 = vmatprep.mubr.bf16.mxu0 %v8707_v25 }
  0x9f   : > { %6428 = vperm.xlu1 %8490, %v9547_v46  }
  0xa0   : > { %v9717_v13 = vpop.permute.xlu1 %5136 }
  0xa1   : > { %3232 = vmatmul.mubr.bf16.gmra.mxu1 %v8712_v26  ;;  %v8789_v26 = vld [vmem:[%s9431_s10 + $0x2e0] ss:$16 sps:$4 sm:$0xff]  }
  0xa2   : > { %8274 = vmatprep.mubr.msk.bf16.mxu1 %vm2245_vm1, %v8715_v27  ;;  %v8791_v27 = vld [vmem:[%s9431_s10 + $0x304] ss:$16 sps:$4 sm:$0xff]  }
  0xa3   : > { %6432 = vperm.xlu1 %8490, %v9541_v45   ;;  %v8757_v45 = vld [vmem:[%s9431_s10 + $0x24c] ss:$16 sps:$4 sm:$0xff]  }
  0xa4   : > { %2591 = vmatmul.mubr.bf16.gmra.mxu0 %v8711_v28  ;;  %v9723_v17 = vpop.permute.xlu1 %5146  ;;  %v8796_v28 = vld [vmem:[%s9431_s10 + $0x308] ss:$16 sps:$4 sm:$0xff]  }
  0xa5   : > { %2598 = vmatprep.mubr.bf16.mxu0 %v8713_v29  ;;  %13122 = vst [vmem:[#allocation5_spill] sm:$0xff] %v9723_v17 }
  0xa7   : > { %8492 = vset.pattern.permute.xlu1 %v9267_v22 }
  0xa8   : > { %6460 = vperm.xlu1 %8492, %v9484_v31   ;;  %v8760_v31 = vld [vmem:[%s9431_s10 + $0x248] ss:$16 sps:$4 sm:$0xff]   ;;  %v9729_v22 = vpop.permute.xlu1 %5156 }
  0xa9   : > { %3240 = vmatmul.mubr.bf16.gmra.mxu1 %v8718_v32  ;;  %13123 = vst [vmem:[#allocation6_spill] sm:$0xff] %v9729_v22  ;;  %v8795_v32 = vld [vmem:[%s9431_s10 + $0x300] ss:$16 sps:$4 sm:$0xff]  }
  0xaa   : > { %8275 = vmatprep.mubr.msk.bf16.mxu1 %vm2245_vm1, %v8721_v34 }
  0xac   : > { %2599 = vmatmul.mubr.bf16.gmra.mxu0 %v8717_v35  ;;  %6464 = vperm.xlu1 %8492, %v9520_v40   ;;  %v8761_v40 = vld [vmem:[%s9431_s10 + $0x264] ss:$16 sps:$4 sm:$0xff]  }
  0xad   : > { %2606 = vmatprep.mubr.bf16.mxu0 %v8719_v37  ;;  %v8797_v35 = vld [vmem:[%s9431_s10 + $0x324] ss:$16 sps:$4 sm:$0xff]  }
  0xae   : > { %v9734_v25 = vpop.permute.xlu1 %5546 }
  0xaf   : > { %13124 = vst [vmem:[#allocation7_spill] sm:$0xff] %v9734_v25 }
  0xb0   : > { %6472 = vperm.xlu1 %8492, %v9509_v36   ;;  %v8766_v36 = vld [vmem:[%s9431_s10 + $0x268] ss:$16 sps:$4 sm:$0xff]  }
  0xb1   : > { %3248 = vmatmul.mubr.bf16.gmra.mxu1 %v8724_v38 }
  0xb2   : > { %8276 = vmatprep.mubr.msk.bf16.mxu1 %vm2245_vm1, %v8727_v39  ;;  %v9740_v29 = vpop.permute.xlu1 %5554 }
  0xb3   : > { %13125 = vst [vmem:[#allocation8_spill] sm:$0xff] %v9740_v29  ;;  %v9030_v29 = vld [vmem:[%s9431_s10 + $0x7e8] ss:$16 sps:$4 sm:$0xff]  }
  0xb4   : > { %2607 = vmatmul.mubr.bf16.gmra.mxu0 %v8723_v41  ;;  %6476 = vperm.xlu1 %8492, %v9533_v43   ;;  %v9179_v43 = vld [vmem:[%s13033_s4] sm:$0xff] }
  0xb5   : > { %2614 = vmatprep.mubr.bf16.mxu0 %v8725_v44 }
  0xb6   : > { %v9746_v39 = vpop.permute.xlu1 %5558 }
  0xb7   : > { %13126 = vst [vmem:[#allocation9_spill] sm:$0xff] %v9746_v39 }
  0xb8   : > { %6484 = vperm.xlu1 %8492, %v9547_v46   ;;  %v8767_v46 = vld [vmem:[%s9431_s10 + $0x284] ss:$16 sps:$4 sm:$0xff]  }
  0xb9   : > { %3256 = vmatmul.mubr.bf16.gmra.mxu1 %v8730_v47  ;;  %v8802_v47 = vld [vmem:[%s9431_s10 + $0x328] ss:$16 sps:$4 sm:$0xff]  }
  0xba   : > { %8277 = vmatprep.mubr.msk.bf16.mxu1 %vm2245_vm1, %v8733_v48 }
  0xbc   : > { %2615 = vmatmul.mubr.bf16.gmra.mxu0 %v8729_v49  ;;  %8494 = vset.pattern.permute.xlu1 %v9268_v30  ;;  %v8799_v30 = vld [vmem:[%s9431_s10 + $0x32c] ss:$16 sps:$4 sm:$0xff]  }
  0xbd   : > { %2622 = vmatprep.mubr.bf16.mxu0 %v8731_v50  ;;  %6652 = vperm.xlu1 %8494, %v9179_v43   ;;  %v8805_v49 = vld [vmem:[%s9431_s10 + $0x34c] ss:$16 sps:$4 sm:$0xff]  }
  0xc1   : > { %3264 = vmatmul.mubr.bf16.gmra.mxu1 %v8736_v51  ;;  %6660 = vperm.xlu1 %8494, %v9180_v6  }
  0xc2   : > { %8278 = vmatprep.mubr.msk.bf16.mxu1 %vm2245_vm1, %v8739_v52  ;;  %v8801_v52 = vld [vmem:[%s9431_s10 + $0x320] ss:$16 sps:$4 sm:$0xff]  }
  0xc4   : > { %2623 = vmatmul.mubr.bf16.gmra.mxu0 %v8735_v53 }
  0xc5   : > { %2630 = vmatprep.mubr.bf16.mxu0 %v8737_v33 }
  0xc9   : > { %3272 = vmatmul.mubr.bf16.gmra.mxu1 %v8742_v54  ;;  %v8803_v54 = vld [vmem:[%s9431_s10 + $0x344] ss:$16 sps:$4 sm:$0xff]  }
  0xca   : > { %8279 = vmatprep.mubr.msk.bf16.mxu1 %vm2245_vm1, %v8745_v55 }
  0xcc   : > { %2631 = vmatmul.mubr.bf16.gmra.mxu0 %v8741_v56  ;;  %v9752_v56 = vpop.permute.xlu1 %5562 }
  0xcd   : > { %2638 = vmatprep.mubr.bf16.mxu0 %v8743_v57  ;;  %13127 = vst [vmem:[#allocation10_spill] sm:$0xff] %v9752_v56  ;;  %v8883_v56 = vld [vmem:[%s9431_s10 + $0x4e4] ss:$16 sps:$4 sm:$0xff]  }
  0xd1   : > { %3280 = vmatmul.mubr.bf16.gmra.mxu1 %v8748_v42 }
  0xd2   : > { %8280 = vmatprep.mubr.msk.bf16.mxu1 %vm2245_vm1, %v8751_v58 }
  0xd4   : > { %2639 = vmatmul.mubr.bf16.gmra.mxu0 %v8747_v59 }
  0xd5   : > { %2646 = vmatprep.mubr.bf16.mxu0 %v8749_v60  ;;  %v8808_v60 = vld [vmem:[%s9431_s10 + $0x348] ss:$16 sps:$4 sm:$0xff]  }
  0xd9   : > { %3288 = vmatmul.mubr.bf16.gmra.mxu1 %v8754_v61 }
  0xda   : > { %8281 = vmatprep.mubr.msk.bf16.mxu1 %vm2245_vm1, %v8757_v45  ;;  %v8811_v45 = vld [vmem:[%s9431_s10 + $0x36c] ss:$16 sps:$4 sm:$0xff]  }
  0xdc   : > { %2647 = vmatmul.mubr.bf16.gmra.mxu0 %v8753_v62 }
  0xdd   : > { %2654 = vmatprep.mubr.bf16.mxu0 %v8755_v63 }
  0xe1   : > { %3296 = vmatmul.mubr.bf16.gmra.mxu1 %v8760_v31  ;;  %v9757_v31 = vpop.permute.xlu1 %5566 }
  0xe2   : > { %8282 = vmatprep.mubr.msk.bf16.mxu1 %vm2245_vm1, %v8763_v0  ;;  %13128 = vst [vmem:[#allocation11_spill] sm:$0xff] %v9757_v31  ;;  %v8807_v0 = vld [vmem:[%s9431_s10 + $0x340] ss:$16 sps:$4 sm:$0xff]  }
  0xe4   : > { %2655 = vmatmul.mubr.bf16.gmra.mxu0 %v8759_v2 }
  0xe5   : > { %2662 = vmatprep.mubr.bf16.mxu0 %v8761_v40 }
  0xe9   : > { %3304 = vmatmul.mubr.bf16.gmra.mxu1 %v8766_v36  ;;  %v8809_v36 = vld [vmem:[%s9431_s10 + $0x364] ss:$16 sps:$4 sm:$0xff]  }
  0xea   : > { %8283 = vmatprep.mubr.msk.bf16.mxu1 %vm2245_vm1, %v8769_v3 }
  0xec   : > { %2663 = vmatmul.mubr.bf16.gmra.mxu0 %v8765_v4 }
  0xed   : > { %2670 = vmatprep.mubr.bf16.mxu0 %v8767_v46 }
  0xf1   : > { %3312 = vmatmul.mubr.bf16.gmra.mxu1 %v8772_v7  ;;  %v8814_v7 = vld [vmem:[%s9431_s10 + $0x368] ss:$16 sps:$4 sm:$0xff]  }
  0xf2   : > { %8284 = vmatprep.mubr.msk.bf16.mxu1 %vm2245_vm1, %v8775_v8 }
  0xf4   : > { %2671 = vmatmul.mubr.bf16.gmra.mxu0 %v8771_v10  ;;  %v9763_v10 = vpop.permute.xlu1 %5570 }
  0xf5   : > { %2678 = vmatprep.mubr.bf16.mxu0 %v8773_v11  ;;  %13129 = vst [vmem:[#allocation12_spill] sm:$0xff] %v9763_v10  ;;  %v8818_v11 = vld [vmem:[%s9431_s10 + $0x38c] ss:$16 sps:$4 sm:$0xff]  }
  0xf9   : > { %3320 = vmatmul.mubr.bf16.gmra.mxu1 %v8778_v12  ;;  %v9766_v12 = vpop.permute.xlu0 %5126 }
  0xfa   : > { %8285 = vmatprep.mubr.msk.bf16.mxu1 %vm2245_vm1, %v8781_v14 }
  0xfc   : > { %2679 = vmatmul.mubr.bf16.gmra.mxu0 %v8777_v15 }
  0xfd   : > { %2686 = vmatprep.mubr.bf16.mxu0 %v8779_v16  ;;  %v8813_v16 = vld [vmem:[%s9431_s10 + $0x360] ss:$16 sps:$4 sm:$0xff]  }
 0x101   : > { %3328 = vmatmul.mubr.bf16.gmra.mxu1 %v8784_v18 }
 0x102   : > { %8286 = vmatprep.mubr.msk.bf16.mxu1 %vm2245_vm1, %v8787_v19 }
 0x104   : > { %2687 = vmatmul.mubr.bf16.gmra.mxu0 %v8783_v20  ;;  %v8817_v20 = vld [vmem:[%s9431_s10 + $0x384] ss:$16 sps:$4 sm:$0xff]  }
 0x105   : > { %2694 = vmatprep.mubr.bf16.mxu0 %v8785_v21 }
 0x109   : > { %3336 = vmatmul.mubr.bf16.gmra.mxu1 %v8790_v23 }
 0x10a   : > { %8287 = vmatprep.mubr.msk.bf16.mxu1 %vm2245_vm1, %v8793_v24 }
 0x10c   : > { %2695 = vmatmul.mubr.bf16.gmra.mxu0 %v8789_v26  ;;  %v9771_v26 = vpop.permute.xlu1 %5574 }
 0x10d   : > { %2702 = vmatprep.mubr.bf16.mxu0 %v8791_v27  ;;  %13130 = vst [vmem:[#allocation13_spill] sm:$0xff] %v9771_v26  ;;  %v9773_v27 = vpop.permute.xlu0 %5141 }
 0x10e   : > { %13131 = vst [vmem:[#allocation14_spill] sm:$0xff] %v9773_v27 }
 0x111   : > { %v3153_v34 = vpop.f32.mrf.mxu1  ;;  %3344 = vmatmul.mubr.bf16.gmra.mxu1 %v8796_v28 }
 0x112   : > { %8288 = vmatprep.mubr.msk.bf16.mxu1 %vm2245_vm1, %v8799_v30 }
 0x113   : > { %v3155_v37 = vpop.f32.mrf.mxu1 }
 0x114   : > { %v2512_v38 = vpop.f32.mrf.mxu0  ;;  %2703 = vmatmul.mubr.bf16.gmra.mxu0 %v8795_v32  ;;  %v8820_v32 = vld [vmem:[%s9431_s10 + $0x388] ss:$16 sps:$4 sm:$0xff]  }
 0x115   : > { %v3154_v41 = vadd.f32 %v3153_v34, %v2512_v38  ;;  %v3156_v44 = vpop.f32.mrf.mxu1  ;;  %2710 = vmatprep.mubr.bf16.mxu0 %v8797_v35  ;;  %v8824_v35 = vld [vmem:[%s9431_s10 + $0x3ac] ss:$16 sps:$4 sm:$0xff]  }
 0x116   : > { %v2514_v48 = vpop.f32.mrf.mxu0 }
 0x117   : > { %v3158_v50 = vpop.f32.mrf.mxu1  ;;  %3760 = vxpose.xlu0.b32.start [1/16] (narrow) %v3154_v41, 24  ;;  %v9777_v41 = vpop.permute.xlu1 %5602 }
 0x118   : > { %v2515_v51 = vpop.f32.mrf.mxu0  ;;  %13132 = vst [vmem:[#allocation15_spill] sm:$0xff] %v9777_v41 }
 0x119   : > { %v3157_v53 = vadd.f32 %v3156_v44, %v2515_v51  ;;  %v3161_v33 = vpop.f32.mrf.mxu1  ;;  %3352 = vmatmul.mubr.bf16.gmra.mxu1 %v8802_v47  ;;  %v8815_v44 = vld [vmem:[%s9431_s10 + $0x380] ss:$16 sps:$4 sm:$0xff]   ;;  %v9782_v51 = vpop.permute.xlu0 %5151 }
 0x11a   : > { %v2517_v55 = vpop.f32.mrf.mxu0  ;;  %8289 = vmatprep.mubr.msk.bf16.mxu1 %vm2245_vm1, %v8805_v49  ;;  %v8823_v49 = vld [vmem:[%s9431_s10 + $0x3a4] ss:$16 sps:$4 sm:$0xff]   ;;  %13133 = vst [vmem:[#allocation16_spill] sm:$0xff] %v9782_v51  ;;  %v9028_v51 = vld [vmem:[%s9431_s10 + $0x7ec] ss:$16 sps:$4 sm:$0xff]  }
 0x11b   : > { %v3163_v57 = vpop.f32.mrf.mxu1  ;;  %3761 = vxpose.xlu0.b32.cont [2/16] (narrow) %v3157_v53, 24  ;;  %v8826_v55 = vld [vmem:[%s9431_s10 + $0x3a8] ss:$16 sps:$4 sm:$0xff]  }
 0x11c   : > { %v2520_v42 = vpop.f32.mrf.mxu0  ;;  %2711 = vmatmul.mubr.bf16.gmra.mxu0 %v8801_v52 }
 0x11d   : > { %v3162_v58 = vadd.f32 %v3161_v33, %v2520_v42  ;;  %v3164_v59 = vpop.f32.mrf.mxu1  ;;  %2718 = vmatprep.mubr.bf16.mxu0 %v8803_v54  ;;  %v9785_v42 = vpop.permute.xlu1 %5606 }
 0x11e   : > { %v2522_v61 = vpop.f32.mrf.mxu0  ;;  %13134 = vst [vmem:[#allocation17_spill] sm:$0xff] %v9785_v42 }
 0x11f   : > { %v3166_v62 = vpop.f32.mrf.mxu1  ;;  %3762 = vxpose.xlu0.b32.cont [3/16] (narrow) %v3162_v58, 24  ;;  %v8830_v58 = vld [vmem:[%s9431_s10 + $0x3cc] ss:$16 sps:$4 sm:$0xff]   ;;  %v8821_v61 = vld [vmem:[%s9431_s10 + $0x3a0] ss:$16 sps:$4 sm:$0xff]  }
 0x120   : > { %v2523_v63 = vpop.f32.mrf.mxu0 }
 0x121   : > { %v3165_v2 = vadd.f32 %v3164_v59, %v2523_v63  ;;  %v3169_v40 = vpop.f32.mrf.mxu1  ;;  %3360 = vmatmul.mubr.bf16.gmra.mxu1 %v8808_v60 }
 0x122   : > { %v2525_v43 = vpop.f32.mrf.mxu0  ;;  %8290 = vmatprep.mubr.msk.bf16.mxu1 %vm2245_vm1, %v8811_v45  ;;  %v9789_v45 = vpop.permute.xlu0 %5550 }
 0x123   : > { %v3171_v3 = vpop.f32.mrf.mxu1  ;;  %3763 = vxpose.xlu0.b32.cont [4/16] (narrow) %v3165_v2, 24  ;;  %13135 = vst [vmem:[#allocation18_spill] sm:$0xff] %v9789_v45  ;;  %v9793_v43 = vpop.permute.xlu1 %5614 }
 0x124   : > { %v2528_v4 = vpop.f32.mrf.mxu0  ;;  %2719 = vmatmul.mubr.bf16.gmra.mxu0 %v8807_v0  ;;  %v8829_v0 = vld [vmem:[%s9431_s10 + $0x3c4] ss:$16 sps:$4 sm:$0xff]   ;;  %13136 = vst [vmem:[#allocation19_spill] sm:$0xff] %v9793_v43 }
 0x125   : > { %v3170_v46 = vadd.f32 %v3169_v40, %v2528_v4  ;;  %v3172_v6 = vpop.f32.mrf.mxu1  ;;  %2726 = vmatprep.mubr.bf16.mxu0 %v8809_v36 }
 0x126   : > { %v2530_v8 = vpop.f32.mrf.mxu0 }
 0x127   : > { %v3174_v14 = vpop.f32.mrf.mxu1  ;;  %3764 = vxpose.xlu0.b32.cont [5/16] (narrow) %v3170_v46, 24  ;;  %v8832_v46 = vld [vmem:[%s9431_s10 + $0x3c8] ss:$16 sps:$4 sm:$0xff]   ;;  %v9797_v8 = vpop.permute.xlu0 %5610 }
 0x128   : > { %v2531_v15 = vpop.f32.mrf.mxu0  ;;  %13137 = vst [vmem:[#allocation20_spill] sm:$0xff] %v9797_v8 }
 0x129   : > { %v3173_v18 = vadd.f32 %v3172_v6, %v2531_v15  ;;  %v3177_v19 = vpop.f32.mrf.mxu1  ;;  %3368 = vmatmul.mubr.bf16.gmra.mxu1 %v8814_v7  ;;  %v8836_v7 = vld [vmem:[%s9431_s10 + $0x3ec] ss:$16 sps:$4 sm:$0xff]   ;;  %v8827_v15 = vld [vmem:[%s9431_s10 + $0x3c0] ss:$16 sps:$4 sm:$0xff]  }
 0x12a   : > { %v2533_v21 = vpop.f32.mrf.mxu0  ;;  %8291 = vmatprep.mubr.msk.bf16.mxu1 %vm2245_vm1, %v8818_v11 }
 0x12b   : > { %v3179_v23 = vpop.f32.mrf.mxu1  ;;  %3765 = vxpose.xlu0.b32.cont [6/16] (narrow) %v3173_v18, 24  ;;  %v9801_v21 = vpop.permute.xlu1 %5618 }
 0x12c   : > { %v2536_v24 = vpop.f32.mrf.mxu0  ;;  %2727 = vmatmul.mubr.bf16.gmra.mxu0 %v8813_v16  ;;  %13138 = vst [vmem:[#allocation21_spill] sm:$0xff] %v9801_v21  ;;  %v8901_v21 = vld [vmem:[%s9431_s10 + $0x544] ss:$16 sps:$4 sm:$0xff]  }
 0x12d   : > { %v3178_v28 = vadd.f32 %v3177_v19, %v2536_v24  ;;  %v3180_v30 = vpop.f32.mrf.mxu1  ;;  %2734 = vmatprep.mubr.bf16.mxu0 %v8817_v20  ;;  %v8835_v19 = vld [vmem:[%s9431_s10 + $0x3e4] ss:$16 sps:$4 sm:$0xff]  }
 0x12e   : > { %v2538_v34 = vpop.f32.mrf.mxu0 }
 0x12f   : > { %v3182_v37 = vpop.f32.mrf.mxu1  ;;  %3766 = vxpose.xlu0.b32.cont [7/16] (narrow) %v3178_v28, 24  ;;  %v9804_v28 = vpop.permute.xlu0 %5622  ;;  %v8838_v34 = vld [vmem:[%s9431_s10 + $0x3e8] ss:$16 sps:$4 sm:$0xff]  }
 0x130   : > { %v2539_v38 = vpop.f32.mrf.mxu0  ;;  %13139 = vst [vmem:[#allocation22_spill] sm:$0xff] %v9804_v28  ;;  %v8842_v37 = vld [vmem:[%s9431_s10 + $0x40c] ss:$16 sps:$4 sm:$0xff]   ;;  %v8895_v28 = vld [vmem:[%s9431_s10 + $0x524] ss:$16 sps:$4 sm:$0xff]  }
 0x131   : > { %v3181_v47 = vadd.f32 %v3180_v30, %v2539_v38  ;;  %v3185_v48 = vpop.f32.mrf.mxu1  ;;  %3376 = vmatmul.mubr.bf16.gmra.mxu1 %v8820_v32 }
 0x132   : > { %v2541_v50 = vpop.f32.mrf.mxu0  ;;  %8292 = vmatprep.mubr.msk.bf16.mxu1 %vm2245_vm1, %v8824_v35 }
 0x133   : > { %v3187_v52 = vpop.f32.mrf.mxu1  ;;  %3767 = vxpose.xlu0.b32.cont [8/16] (narrow) %v3181_v47, 24  ;;  %v9808_v47 = vpop.permute.xlu1 %5626 }
 0x134   : > { %v2544_v53 = vpop.f32.mrf.mxu0  ;;  %2735 = vmatmul.mubr.bf16.gmra.mxu0 %v8815_v44  ;;  %13140 = vst [vmem:[#allocation23_spill] sm:$0xff] %v9808_v47  ;;  %v8841_v52 = vld [vmem:[%s9431_s10 + $0x404] ss:$16 sps:$4 sm:$0xff]  }
 0x135   : > { %v3186_v33 = vadd.f32 %v3185_v48, %v2544_v53  ;;  %v3188_v54 = vpop.f32.mrf.mxu1  ;;  %2742 = vmatprep.mubr.bf16.mxu0 %v8823_v49  ;;  %v8833_v48 = vld [vmem:[%s9431_s10 + $0x3e0] ss:$16 sps:$4 sm:$0xff]  }
 0x136   : > { %v2546_v57 = vpop.f32.mrf.mxu0 }
 0x137   : > { %v3190_v59 = vpop.f32.mrf.mxu1  ;;  %3768 = vxpose.xlu0.b32.cont [9/16] (narrow) %v3186_v33, 24  ;;  %v9813_v33 = vpop.permute.xlu0 %5630 }
 0x138   : > { %v2547_v60 = vpop.f32.mrf.mxu0  ;;  %13141 = vst [vmem:[#allocation24_spill] sm:$0xff] %v9813_v33  ;;  %v8844_v59 = vld [vmem:[%s9431_s10 + $0x408] ss:$16 sps:$4 sm:$0xff]  }
 0x139   : > { %v3189_v62 = vadd.f32 %v3188_v54, %v2547_v60  ;;  %v3193_v63 = vpop.f32.mrf.mxu1  ;;  %3384 = vmatmul.mubr.bf16.gmra.mxu1 %v8826_v55 }
 0x13a   : > { %v2549_v2 = vpop.f32.mrf.mxu0  ;;  %8293 = vmatprep.mubr.msk.bf16.mxu1 %vm2245_vm1, %v8830_v58 }
 0x13b   : > { %v3195_v40 = vpop.f32.mrf.mxu1  ;;  %3769 = vxpose.xlu0.b32.cont [10/16] (narrow) %v3189_v62, 24  ;;  %v8848_v62 = vld [vmem:[%s9431_s10 + $0x42c] ss:$16 sps:$4 sm:$0xff]   ;;  %v8839_v2 = vld [vmem:[%s9431_s10 + $0x400] ss:$16 sps:$4 sm:$0xff]  }
 0x13c   : > { %v2552_v36 = vpop.f32.mrf.mxu0  ;;  %2743 = vmatmul.mubr.bf16.gmra.mxu0 %v8821_v61  ;;  %v9816_v61 = vpop.permute.xlu1 %5794 }
 0x13d   : > { %v3194_v3 = vadd.f32 %v3193_v63, %v2552_v36  ;;  %v3196_v4 = vpop.f32.mrf.mxu1  ;;  %2750 = vmatprep.mubr.bf16.mxu0 %v8829_v0  ;;  %13142 = vst [vmem:[#allocation25_spill] sm:$0xff] %v9816_v61  ;;  %v9820_v40 = vpop.permute.xlu0 %5798 }
 0x13e   : > { %v2554_v6 = vpop.f32.mrf.mxu0  ;;  %13143 = vst [vmem:[#allocation26_spill] sm:$0xff] %v9820_v40 }
 0x13f   : > { %v3198_v11 = vpop.f32.mrf.mxu1  ;;  %3770 = vxpose.xlu0.b32.cont [11/16] (narrow) %v3194_v3, 24 }
 0x140   : > { %v2555_v14 = vpop.f32.mrf.mxu0  ;;  %v9824_v11 = vpop.permute.xlu1 %5802 }
 0x141   : > { %v3197_v16 = vadd.f32 %v3196_v4, %v2555_v14  ;;  %v3201_v18 = vpop.f32.mrf.mxu1  ;;  %3392 = vmatmul.mubr.bf16.gmra.mxu1 %v8832_v46  ;;  %v8847_v4 = vld [vmem:[%s9431_s10 + $0x424] ss:$16 sps:$4 sm:$0xff]   ;;  %13144 = vst [vmem:[#allocation27_spill] sm:$0xff] %v9824_v11 }
 0x142   : > { %v2557_v20 = vpop.f32.mrf.mxu0  ;;  %8294 = vmatprep.mubr.msk.bf16.mxu1 %vm2245_vm1, %v8836_v7 }
 0x143   : > { %v3203_v23 = vpop.f32.mrf.mxu1  ;;  %3771 = vxpose.xlu0.b32.cont [12/16] (narrow) %v3197_v16, 24  ;;  %v8850_v16 = vld [vmem:[%s9431_s10 + $0x428] ss:$16 sps:$4 sm:$0xff]   ;;  %v9828_v20 = vpop.permute.xlu0 %5810 }
 0x144   : > { %v2560_v24 = vpop.f32.mrf.mxu0  ;;  %2751 = vmatmul.mubr.bf16.gmra.mxu0 %v8827_v15  ;;  %13145 = vst [vmem:[#allocation28_spill] sm:$0xff] %v9828_v20  ;;  %v8896_v20 = vld [vmem:[%s9431_s10 + $0x52c] ss:$16 sps:$4 sm:$0xff]  }
 0x145   : > { %v3202_v30 = vadd.f32 %v3201_v18, %v2560_v24  ;;  %v3204_v32 = vpop.f32.mrf.mxu1  ;;  %2758 = vmatprep.mubr.bf16.mxu0 %v8835_v19  ;;  %v8854_v19 = vld [vmem:[%s9431_s10 + $0x44c] ss:$16 sps:$4 sm:$0xff]  }
 0x146   : > { %v2562_v35 = vpop.f32.mrf.mxu0 }
 0x147   : > { %v3206_v38 = vpop.f32.mrf.mxu1  ;;  %3772 = vxpose.xlu0.b32.cont [13/16] (narrow) %v3202_v30, 24  ;;  %v8845_v30 = vld [vmem:[%s9431_s10 + $0x420] ss:$16 sps:$4 sm:$0xff]   ;;  %v8853_v35 = vld [vmem:[%s9431_s10 + $0x444] ss:$16 sps:$4 sm:$0xff]  }
 0x148   : > { %v2563_v44 = vpop.f32.mrf.mxu0  ;;  %v9832_v38 = vpop.permute.xlu1 %5806 }
 0x149   : > { %v3205_v49 = vadd.f32 %v3204_v32, %v2563_v44  ;;  %v3209_v50 = vpop.f32.mrf.mxu1  ;;  %3400 = vmatmul.mubr.bf16.gmra.mxu1 %v8838_v34  ;;  %13146 = vst [vmem:[#allocation29_spill] sm:$0xff] %v9832_v38  ;;  %v9033_v38 = vld [vmem:[%s9431_s10 + $0x804] ss:$16 sps:$4 sm:$0xff]  }
 0x14a   : > { %v2565_v53 = vpop.f32.mrf.mxu0  ;;  %8295 = vmatprep.mubr.msk.bf16.mxu1 %vm2245_vm1, %v8842_v37 }
 0x14b   : > { %v3211_v54 = vpop.f32.mrf.mxu1  ;;  %3773 = vxpose.xlu0.b32.cont [14/16] (narrow) %v3205_v49, 24  ;;  %v9835_v49 = vpop.permute.xlu0 %5818  ;;  %v8856_v53 = vld [vmem:[%s9431_s10 + $0x448] ss:$16 sps:$4 sm:$0xff]  }
 0x14c   : > { %v2568_v55 = vpop.f32.mrf.mxu0  ;;  %2759 = vmatmul.mubr.bf16.gmra.mxu0 %v8833_v48  ;;  %13147 = vst [vmem:[#allocation30_spill] sm:$0xff] %v9835_v49 }
 0x14d   : > { %v3210_v57 = vadd.f32 %v3209_v50, %v2568_v55  ;;  %v3212_v58 = vpop.f32.mrf.mxu1  ;;  %2766 = vmatprep.mubr.bf16.mxu0 %v8841_v52  ;;  %v8860_v55 = vld [vmem:[%s9431_s10 + $0x46c] ss:$16 sps:$4 sm:$0xff]  }
 0x14e   : > { %v2570_v60 = vpop.f32.mrf.mxu0 }
 0x14f   : > { %v3214_v63 = vpop.f32.mrf.mxu1  ;;  %3774 = vxpose.xlu0.b32.cont [15/16] (narrow) %v3210_v57, 24  ;;  %v8851_v60 = vld [vmem:[%s9431_s10 + $0x440] ss:$16 sps:$4 sm:$0xff]  }
 0x150   : > { %v2571_v0 = vpop.f32.mrf.mxu0 }
 0x151   : > { %v3213_v36 = vadd.f32 %v3212_v58, %v2571_v0  ;;  %v3217_v3 = vpop.f32.mrf.mxu1  ;;  %3408 = vmatmul.mubr.bf16.gmra.mxu1 %v8844_v59  ;;  %v9839_v58 = vpop.permute.xlu1 %5814  ;;  %v8859_v0 = vld [vmem:[%s9431_s10 + $0x464] ss:$16 sps:$4 sm:$0xff]  }
 0x152   : > { %v2573_v46 = vpop.f32.mrf.mxu0  ;;  %8296 = vmatprep.mubr.msk.bf16.mxu1 %vm2245_vm1, %v8848_v62  ;;  %13148 = vst [vmem:[#allocation31_spill] sm:$0xff] %v9839_v58  ;;  %v8890_v58 = vld [vmem:[%s9431_s10 + $0x50c] ss:$16 sps:$4 sm:$0xff]  }
 0x153   : > { %3775 = vxpose.xlu0.b32.end [16/16] (narrow) %v3213_v36, 24  ;;  %v3219_v6 = vpop.f32.mrf.mxu1  ;;  %v9844_v36 = vpop.permute.xlu0 %5986 }
 0x154   : > { %v2576_v7 = vpop.f32.mrf.mxu0  ;;  %2767 = vmatmul.mubr.bf16.gmra.mxu0 %v8839_v2  ;;  %13149 = vst [vmem:[#allocation32_spill] sm:$0xff] %v9844_v36 }
 0x155   : > { %v3218_v14 = vadd.f32 %v3217_v3, %v2576_v7  ;;  %v3220_v15 = vpop.f32.mrf.mxu1  ;;  %2774 = vmatprep.mubr.bf16.mxu0 %v8847_v4  ;;  %v8862_v7 = vld [vmem:[%s9431_s10 + $0x468] ss:$16 sps:$4 sm:$0xff]  }
 0x156   : > { %v2578_v18 = vpop.f32.mrf.mxu0 }
 0x157   : > { %3792 = vxpose.xlu1.b32.start [1/16] (narrow) %v3218_v14, 24  ;;  %v3222_v23 = vpop.f32.mrf.mxu1  ;;  %v9847_v14 = vpop.permute.xlu1 %5822 }
 0x158   : > { %v2579_v24 = vpop.f32.mrf.mxu0  ;;  %13150 = vst [vmem:[#allocation33_spill] sm:$0xff] %v9847_v14  ;;  %v8857_v23 = vld [vmem:[%s9431_s10 + $0x460] ss:$16 sps:$4 sm:$0xff]  }
 0x159   : > { %v3221_v32 = vadd.f32 %v3220_v15, %v2579_v24  ;;  %v3225_v34 = vpop.f32.mrf.mxu1  ;;  %3416 = vmatmul.mubr.bf16.gmra.mxu1 %v8850_v16  ;;  %v8866_v16 = vld [vmem:[%s9431_s10 + $0x48c] ss:$16 sps:$4 sm:$0xff]   ;;  %v9851_v24 = vpop.permute.xlu0 %5998 }
 0x15a   : > { %v2581_v37 = vpop.f32.mrf.mxu0  ;;  %8297 = vmatprep.mubr.msk.bf16.mxu1 %vm2245_vm1, %v8854_v19  ;;  %13151 = vst [vmem:[#allocation34_spill] sm:$0xff] %v9851_v24  ;;  %v9006_v24 = vld [vmem:[%s9431_s10 + $0x768] ss:$16 sps:$4 sm:$0xff]  }
 0x15b   : > { %3793 = vxpose.xlu1.b32.cont [2/16] (narrow) %v3221_v32, 24  ;;  %v3227_v44 = vpop.f32.mrf.mxu1 }
 0x15c   : > { %v2584_v48 = vpop.f32.mrf.mxu0  ;;  %2775 = vmatmul.mubr.bf16.gmra.mxu0 %v8845_v30  ;;  %v9855_v44 = vpop.permute.xlu1 %5990 }
 0x15d   : > { %v3226_v50 = vadd.f32 %v3225_v34, %v2584_v48  ;;  %v3228_v52 = vpop.f32.mrf.mxu1  ;;  %2782 = vmatprep.mubr.bf16.mxu0 %v8853_v35  ;;  %v8865_v34 = vld [vmem:[%s9431_s10 + $0x484] ss:$16 sps:$4 sm:$0xff]   ;;  %13152 = vst [vmem:[#allocation35_spill] sm:$0xff] %v9855_v44 }
 0x15e   : > { %v2586_v54 = vpop.f32.mrf.mxu0 }
 0x15f   : > { %3794 = vxpose.xlu1.b32.cont [3/16] (narrow) %v3226_v50, 24  ;;  %v3230_v57 = vpop.f32.mrf.mxu1 }
 0x160   : > { %v2587_v59 = vpop.f32.mrf.mxu0  ;;  %v9859_v57 = vpop.permute.xlu0 %6006 }
 0x161   : > { %v3229_v62 = vadd.f32 %v3228_v52, %v2587_v59  ;;  %v3233_v63 = vpop.f32.mrf.mxu1  ;;  %3424 = vmatmul.mubr.bf16.gmra.mxu1 %v8856_v53  ;;  %v8868_v53 = vld [vmem:[%s9431_s10 + $0x488] ss:$16 sps:$4 sm:$0xff]   ;;  %13153 = vst [vmem:[#allocation36_spill] sm:$0xff] %v9859_v57 }
 0x162   : > { %v2589_v2 = vpop.f32.mrf.mxu0  ;;  %8298 = vmatprep.mubr.msk.bf16.mxu1 %vm2245_vm1, %v8860_v55  ;;  %v8872_v55 = vld [vmem:[%s9431_s10 + $0x4ac] ss:$16 sps:$4 sm:$0xff]  }
 0x163   : > { %3795 = vxpose.xlu1.b32.cont [4/16] (narrow) %v3229_v62, 24  ;;  %v3235_v3 = vpop.f32.mrf.mxu1  ;;  %v8863_v62 = vld [vmem:[%s9431_s10 + $0x480] ss:$16 sps:$4 sm:$0xff]   ;;  %v8871_v2 = vld [vmem:[%s9431_s10 + $0x4a4] ss:$16 sps:$4 sm:$0xff]  }
 0x164   : > { %v2592_v4 = vpop.f32.mrf.mxu0  ;;  %2783 = vmatmul.mubr.bf16.gmra.mxu0 %v8851_v60  ;;  %v9863_v3 = vpop.permute.xlu1 %5994 }
 0x165   : > { %v3234_v46 = vadd.f32 %v3233_v63, %v2592_v4  ;;  %v3236_v6 = vpop.f32.mrf.mxu1  ;;  %2790 = vmatprep.mubr.bf16.mxu0 %v8859_v0  ;;  %13154 = vst [vmem:[#allocation37_spill] sm:$0xff] %v9863_v3 }
 0x166   : > { %v2594_v15 = vpop.f32.mrf.mxu0 }
 0x167   : > { %3796 = vxpose.xlu1.b32.cont [5/16] (narrow) %v3234_v46, 24  ;;  %v3238_v18 = vpop.f32.mrf.mxu1 }
 0x168   : > { %v2595_v19 = vpop.f32.mrf.mxu0  ;;  %v8874_v18 = vld [vmem:[%s9431_s10 + $0x4a8] ss:$16 sps:$4 sm:$0xff]  }
 0x169   : > { %v3237_v30 = vadd.f32 %v3236_v6, %v2595_v19  ;;  %v3241_v32 = vpop.f32.mrf.mxu1  ;;  %3432 = vmatmul.mubr.bf16.gmra.mxu1 %v8862_v7  ;;  %v9866_v7 = vpop.permute.xlu0 %6014 }
 0x16a   : > { %v2597_v35 = vpop.f32.mrf.mxu0  ;;  %8299 = vmatprep.mubr.msk.bf16.mxu1 %vm2245_vm1, %v8866_v16  ;;  %13155 = vst [vmem:[#allocation38_spill] sm:$0xff] %v9866_v7 }
 0x16b   : > { %3797 = vxpose.xlu1.b32.cont [6/16] (narrow) %v3237_v30, 24  ;;  %v3243_v37 = vpop.f32.mrf.mxu1  ;;  %v9869_v30 = vpop.permute.xlu1 %6002 }
 0x16c   : > { %v2600_v48 = vpop.f32.mrf.mxu0  ;;  %2791 = vmatmul.mubr.bf16.gmra.mxu0 %v8857_v23  ;;  %13156 = vst [vmem:[#allocation39_spill] sm:$0xff] %v9869_v30 }
 0x16d   : > { %v3242_v50 = vadd.f32 %v3241_v32, %v2600_v48  ;;  %v3244_v52 = vpop.f32.mrf.mxu1  ;;  %2798 = vmatprep.mubr.bf16.mxu0 %v8865_v34  ;;  %v8869_v34 = vld [vmem:[%s9431_s10 + $0x4a0] ss:$16 sps:$4 sm:$0xff]   ;;  %v9872_v35 = vpop.permute.xlu0 %6408 }
 0x16e   : > { %v2602_v54 = vpop.f32.mrf.mxu0  ;;  %13157 = vst [vmem:[#allocation40_spill] sm:$0xff] %v9872_v35  ;;  %v8886_v35 = vld [vmem:[%s9431_s10 + $0x4e8] ss:$16 sps:$4 sm:$0xff]  }
 0x16f   : > { %3798 = vxpose.xlu1.b32.cont [7/16] (narrow) %v3242_v50, 24  ;;  %v3246_v59 = vpop.f32.mrf.mxu1 }
 0x170   : > { %v2603_v60 = vpop.f32.mrf.mxu0  ;;  %v9874_v59 = vpop.permute.xlu1 %6010 }
 0x171   : > { %v3245_v63 = vadd.f32 %v3244_v52, %v2603_v60  ;;  %v3249_v0 = vpop.f32.mrf.mxu1  ;;  %3440 = vmatmul.mubr.bf16.gmra.mxu1 %v8868_v53  ;;  %13158 = vst [vmem:[#allocation41_spill] sm:$0xff] %v9874_v59 }
 0x172   : > { %v2605_v4 = vpop.f32.mrf.mxu0  ;;  %8300 = vmatprep.mubr.msk.bf16.mxu1 %vm2245_vm1, %v8872_v55 }
 0x173   : > { %3799 = vxpose.xlu1.b32.cont [8/16] (narrow) %v3245_v63, 24  ;;  %v3251_v46 = vpop.f32.mrf.mxu1 }
 0x174   : > { %v2608_v6 = vpop.f32.mrf.mxu0  ;;  %2799 = vmatmul.mubr.bf16.gmra.mxu0 %v8863_v62  ;;  %v9876_v62 = vpop.permute.xlu0 %6468 }
 0x175   : > { %v3250_v15 = vadd.f32 %v3249_v0, %v2608_v6  ;;  %v3252_v16 = vpop.f32.mrf.mxu1  ;;  %2806 = vmatprep.mubr.bf16.mxu0 %v8871_v2  ;;  %13159 = vst [vmem:[#allocation42_spill] sm:$0xff] %v9876_v62 }
 0x176   : > { %v2610_v19 = vpop.f32.mrf.mxu0 }
 0x177   : > { %3800 = vxpose.xlu1.b32.cont [9/16] (narrow) %v3250_v15, 24  ;;  %v3254_v23 = vpop.f32.mrf.mxu1  ;;  %v9878_v15 = vpop.permute.xlu1 %6404 }
 0x178   : > { %v2611_v32 = vpop.f32.mrf.mxu0  ;;  %13160 = vst [vmem:[#allocation43_spill] sm:$0xff] %v9878_v15  ;;  %v8889_v15 = vld [vmem:[%s9431_s10 + $0x504] ss:$16 sps:$4 sm:$0xff]  }
 0x179   : > { %v3253_v37 = vadd.f32 %v3252_v16, %v2611_v32  ;;  %v3257_v48 = vpop.f32.mrf.mxu1  ;;  %3448 = vmatmul.mubr.bf16.gmra.mxu1 %v8874_v18  ;;  %v9880_v18 = vpop.permute.xlu0 %6480 }
 0x17a   : > { %v2613_v50 = vpop.f32.mrf.mxu0  ;;  %13161 = vst [vmem:[#allocation44_spill] sm:$0xff] %v9880_v18 }
 0x17b   : > { %3801 = vxpose.xlu1.b32.cont [10/16] (narrow) %v3253_v37, 24  ;;  %v3259_v52 = vpop.f32.mrf.mxu1 }
 0x17c   : > { %v2616_v53 = vpop.f32.mrf.mxu0  ;;  %2807 = vmatmul.mubr.bf16.gmra.mxu0 %v8869_v34  ;;  %v9882_v52 = vpop.permute.xlu1 %6412 }
 0x17d   : > { %v3258_v54 = vadd.f32 %v3257_v48, %v2616_v53  ;;  %v3260_v55 = vpop.f32.mrf.mxu1  ;;  %13162 = vst [vmem:[#allocation45_spill] sm:$0xff] %v9882_v52 }
 0x17e   : > { %v2618_v60 = vpop.f32.mrf.mxu0 }
 0x17f   : > { %3802 = vxpose.xlu1.b32.cont [11/16] (narrow) %v3258_v54, 24  ;;  %v3262_v63 = vpop.f32.mrf.mxu1  ;;  %v9884_v54 = vpop.permute.xlu0 %6488 }
 0x180   : > { %v2619_v0 = vpop.f32.mrf.mxu0  ;;  %13163 = vst [vmem:[#allocation46_spill] sm:$0xff] %v9884_v54 }
 0x181   : > { %v3261_v2 = vadd.f32 %v3260_v55, %v2619_v0  ;;  %v3265_v4 = vpop.f32.mrf.mxu1 }
 0x182   : > { %v2621_v46 = vpop.f32.mrf.mxu0 }
 0x183   : > { %3803 = vxpose.xlu1.b32.cont [12/16] (narrow) %v3261_v2, 24  ;;  %v3267_v6 = vpop.f32.mrf.mxu1  ;;  %v9886_v46 = vpop.permute.xlu0 %6656 }
 0x184   : > { %v2624_v16 = vpop.f32.mrf.mxu0  ;;  %13164 = vst [vmem:[#allocation47_spill] sm:$0xff] %v9886_v46  ;;  %v9888_v6 = vpop.permute.xlu1 %6416  ;;  %v8902_v46 = vld [vmem:[%s9431_s10 + $0x54c] ss:$16 sps:$4 sm:$0xff]  }
 0x185   : > { %v3266_v19 = vadd.f32 %v3265_v4, %v2624_v16  ;;  %v3268_v23 = vpop.f32.mrf.mxu1  ;;  %13165 = vst [vmem:[#allocation48_spill] sm:$0xff] %v9888_v6 }
 0x186   : > { %v2626_v32 = vpop.f32.mrf.mxu0 }
 0x187   : > { %3804 = vxpose.xlu1.b32.cont [13/16] (narrow) %v3266_v19, 24  ;;  %v3270_v34 = vpop.f32.mrf.mxu1 }
 0x188   : > { %v2627_v37 = vpop.f32.mrf.mxu0 }
 0x189   : > { %v3269_v48 = vadd.f32 %v3268_v23, %v2627_v37  ;;  %v3273_v50 = vpop.f32.mrf.mxu1 }
 0x18a   : > { %v2629_v53 = vpop.f32.mrf.mxu0 }
 0x18b   : > { %3805 = vxpose.xlu1.b32.cont [14/16] (narrow) %v3269_v48, 24  ;;  %v3275_v55 = vpop.f32.mrf.mxu1 }
 0x18c   : > { %v2632_v60 = vpop.f32.mrf.mxu0  ;;  %v9892_v55 = vpop.permute.xlu1 %6420 }
 0x18d   : > { %v3274_v63 = vadd.f32 %v3273_v50, %v2632_v60  ;;  %v3276_v0 = vpop.f32.mrf.mxu1  ;;  %13166 = vst [vmem:[#allocation49_spill] sm:$0xff] %v9892_v55 }
 0x18e   : > { %v2634_v2 = vpop.f32.mrf.mxu0 }
 0x18f   : > { %3806 = vxpose.xlu1.b32.cont [15/16] (narrow) %v3274_v63, 24  ;;  %v3278_v4 = vpop.f32.mrf.mxu1 }
 0x190   : > { %v2635_v16 = vpop.f32.mrf.mxu0 }
 0x191   : > { %v3277_v19 = vadd.f32 %v3276_v0, %v2635_v16  ;;  %v3281_v23 = vpop.f32.mrf.mxu1 }
 0x192   : > { %v2637_v32 = vpop.f32.mrf.mxu0 }
 0x193   : > { %v9890_v34 = vpop.trf.xlu0  ;;  %3807 = vxpose.xlu1.b32.end [16/16] (narrow) %v3277_v19, 24  ;;  %v3283_v37 = vpop.f32.mrf.mxu1 }
 0x194   : > { %v2640_v48 = vpop.f32.mrf.mxu0  ;;  %v9895_v32 = vpop.permute.xlu1 %6424 }
 0x195   : > { %v3284_v53 = vpop.f32.mrf.mxu1  ;;  %13167 = vst [vmem:[#allocation50_spill] sm:$0xff] %v9895_v32 }
 0x196   : > { %v2642_v50 = vpop.f32.mrf.mxu0 }
 0x197   : > { %v3777_v60 = vpop.trf.xlu0  ;;  %v3286_v2 = vpop.f32.mrf.mxu1 }
 0x198   : > { %4156 = vrot.lane.b32.xlu0 %v3777_v60, %s9269_s15  ;;  %v2643_v63 = vpop.f32.mrf.mxu0  ;;  %v9897_v55 = vpop.permute.xlu1 %6428 }
 0x199   : > { %v3289_v4 = vpop.f32.mrf.mxu1  ;;  %13168 = vst [vmem:[#allocation51_spill] sm:$0xff] %v9897_v55 }
 0x19a   : > { %v2645_v1 = vpop.f32.mrf.mxu0 }
 0x19b   : > { %v3291_v0 = vpop.f32.mrf.mxu1 }
 0x19c   : > { %v2648_v16 = vpop.f32.mrf.mxu0  ;;  %v9899_v52 = vpop.permute.xlu1 %6432 }
 0x19d   : > { %v3292_v54 = vpop.f32.mrf.mxu1  ;;  %13169 = vst [vmem:[#allocation52_spill] sm:$0xff] %v9899_v52  ;;  %v3282_v52 = vadd.f32 %v3281_v23, %v2640_v48 }
 0x19e   : > { %v2650_v19 = vpop.f32.mrf.mxu0 }
 0x19f   : > { %v3294_v37 = vpop.f32.mrf.mxu1 }
 0x1a0   : > { %v2651_v18 = vpop.f32.mrf.mxu0  ;;  %v9901_v33 = vpop.permute.xlu1 %6460 }
 0x1a1   : > { %v3297_v7 = vpop.f32.mrf.mxu1  ;;  %13170 = vst [vmem:[#allocation53_spill] sm:$0xff] %v9901_v33 }
 0x1a2   : > { %v2653_v26 = vpop.f32.mrf.mxu0 }
 0x1a3   : > { %v3299_v50 = vpop.f32.mrf.mxu1  ;;  %v3778_v26 = vpop.trf.xlu0 }
 0x1a4   : > { %v2656_v2 = vpop.f32.mrf.mxu0 }
 0x1a5   : > { %v3300_v59 = vpop.f32.mrf.mxu1 }
 0x1a6   : > { %v2658_v10 = vpop.f32.mrf.mxu0 }
 0x1a7   : > { %v3302_v60 = vpop.f32.mrf.mxu1 }
 0x1a8   : > { %v2659_v6 = vpop.f32.mrf.mxu0 }
 0x1a9   : > { %v3305_v1 = vpop.f32.mrf.mxu1 }
 0x1aa   : > { %v2661_v0 = vpop.f32.mrf.mxu0 }
 0x1ab   : > { %v3307_v14 = vpop.f32.mrf.mxu1  ;;  %v9908_v0 = vpop.permute.xlu1 %6464 }
 0x1ac   : > { %v2664_v32 = vpop.f32.mrf.mxu0  ;;  %13171 = vst [vmem:[#allocation54_spill] sm:$0xff] %v9908_v0  ;;  %v8907_v0 = vld [vmem:[%s9431_s10 + $0x564] ss:$16 sps:$4 sm:$0xff]  }
 0x1ad   : > { %v9903_v19 = vadd.f32 %v3305_v1, %v2664_v32  ;;  %v3308_v37 = vpop.f32.mrf.mxu1 }
 0x1ae   : > { %v2666_v49 = vpop.f32.mrf.mxu0 }
 0x1af   : > { %v3310_v55 = vpop.f32.mrf.mxu1  ;;  %v9912_v30 = vpop.permute.xlu1 %6472 }
 0x1b0   : > { %v2667_v50 = vpop.f32.mrf.mxu0  ;;  %v3285_v55 = vadd.f32 %v3284_v53, %v2643_v63  ;;  %13172 = vst [vmem:[#allocation55_spill] sm:$0xff] %v9912_v30  ;;  %v3293_v53 = vadd.f32 %v3292_v54, %v2651_v18  ;;  %v8880_v30 = vld [vmem:[%s9431_s10 + $0x4c8] ss:$16 sps:$4 sm:$0xff]  }
 0x1b1   : > { %4225 = vrot.lane.b32.xlu1 %v3778_v26, %s9270_s16  ;;  %v9906_v10 = vadd.f32 %v3308_v37, %v2667_v50  ;;  %v3313_v60 = vpop.f32.mrf.mxu1  ;;  %v3290_v50 = vadd.f32 %v3289_v4, %v2648_v16 }
 0x1b2   : > { %v2669_v47 = vpop.f32.mrf.mxu0 }
 0x1b3   : > { %v3315_v14 = vpop.f32.mrf.mxu1 }
 0x1b4   : > { %v2672_v62 = vpop.f32.mrf.mxu0 }
 0x1b5   : > { %v9910_v57 = vadd.f32 %v3313_v60, %v2672_v62  ;;  %v3316_v32 = vpop.f32.mrf.mxu1 }
 0x1b6   : > { %3824 = vxpose.xlu0.b32.start [1/6] (short) (narrow) %v3282_v52, 24  ;;  %v2674_v1 = vpop.f32.mrf.mxu0  ;;  %v9918_v52 = vpop.permute.xlu1 %6476 }
 0x1b7   : > { %v3318_v49 = vpop.f32.mrf.mxu1  ;;  %13173 = vst [vmem:[#allocation56_spill] sm:$0xff] %v9918_v52 }
 0x1b8   : > { %v2675_v31 = vpop.f32.mrf.mxu0 }
 0x1b9   : > { %v9914_v26 = vadd.f32 %v3316_v32, %v2675_v31  ;;  %v3321_v37 = vpop.f32.mrf.mxu1  ;;  %v3298_v32 = vadd.f32 %v3297_v7, %v2656_v2 }
 0x1ba   : > { %3825 = vxpose.xlu0.b32.cont [2/6] (short) (narrow) %v3285_v55, 24  ;;  %v2677_v47 = vpop.f32.mrf.mxu0 }
 0x1bb   : > { %v3323_v23 = vpop.f32.mrf.mxu1  ;;  %v9922_v47 = vpop.permute.xlu1 %6484 }
 0x1bc   : > { %v2680_v48 = vpop.f32.mrf.mxu0  ;;  %13174 = vst [vmem:[#allocation57_spill] sm:$0xff] %v9922_v47  ;;  %v8877_v47 = vld [vmem:[%s9431_s10 + $0x4c4] ss:$16 sps:$4 sm:$0xff]  }
 0x1bd   : > { %v9916_v14 = vadd.f32 %v3321_v37, %v2680_v48  ;;  %v3324_v62 = vpop.f32.mrf.mxu1  ;;  %2814 = vmatprep.mubr.bf16.mxu0 %v8877_v47  ;;  %v8884_v47 = vld [vmem:[%s9431_s10 + $0x4ec] ss:$16 sps:$4 sm:$0xff]  }
 0x1be   : > { %3826 = vxpose.xlu0.b32.cont [3/6] (short) (narrow) %v3290_v50, 24  ;;  %v2682_v60 = vpop.f32.mrf.mxu0 }
 0x1bf   : > { %v3326_v1 = vpop.f32.mrf.mxu1  ;;  %v3301_v60 = vadd.f32 %v3300_v59, %v2659_v6  ;;  %v9926_v18 = vpop.permute.xlu1 %6652 }
 0x1c0   : > { %v2683_v63 = vpop.f32.mrf.mxu0  ;;  %13175 = vst [vmem:[#allocation58_spill] sm:$0xff] %v9926_v18  ;;  %v8908_v18 = vld [vmem:[%s9431_s10 + $0x56c] ss:$16 sps:$4 sm:$0xff]  }
 0x1c1   : > { %v9920_v49 = vadd.f32 %v3324_v62, %v2683_v63  ;;  %v3329_v31 = vpop.f32.mrf.mxu1 }
 0x1c2   : > { %3827 = vxpose.xlu0.b32.cont [4/6] (short) (narrow) %v3293_v53, 24  ;;  %v2685_v4 = vpop.f32.mrf.mxu0 }
 0x1c3   : > { %v3331_v16 = vpop.f32.mrf.mxu1 }
 0x1c4   : > { %v2688_v55 = vpop.f32.mrf.mxu0  ;;  %v9932_v16 = vpop.permute.xlu1 %6660 }
 0x1c5   : > { %v9924_v37 = vadd.f32 %v3329_v31, %v2688_v55  ;;  %v3332_v23 = vpop.f32.mrf.mxu1  ;;  %13176 = vst [vmem:[#allocation59_spill] sm:$0xff] %v9932_v16 }
 0x1c6   : > { %3828 = vxpose.xlu0.b32.cont [5/6] (short) (narrow) %v3298_v32, 24  ;;  %v2690_v50 = vpop.f32.mrf.mxu0 }
 0x1c7   : > { %v3334_v48 = vpop.f32.mrf.mxu1 }
 0x1c8   : > { %v2691_v1 = vpop.f32.mrf.mxu0 }
 0x1c9   : > { %v9928_v54 = vadd.f32 %v3332_v23, %v2691_v1  ;;  %v3337_v62 = vpop.f32.mrf.mxu1 }
 0x1ca   : > { %3829 = vxpose.xlu0.b32.end [6/6] (short) (narrow) %v3301_v60, 24  ;;  %v2693_v7 = vpop.f32.mrf.mxu0 }
 0x1cb   : > { %v3339_v2 = vpop.f32.mrf.mxu1 }
 0x1cc   : > { %v2696_v53 = vpop.f32.mrf.mxu0 }
 0x1cd   : > { %v9930_v63 = vadd.f32 %v3337_v62, %v2696_v53  ;;  %v3340_v4 = vpop.f32.mrf.mxu1 }
 0x1ce   : > { %v2698_v31 = vpop.f32.mrf.mxu0 }
 0x1cf   : > { %v3342_v32 = vpop.f32.mrf.mxu1 }
 0x1d0   : > { %v2699_v55 = vpop.f32.mrf.mxu0 }
 0x1d1   : > { %v9934_v59 = vadd.f32 %v3340_v4, %v2699_v55  ;;  %v3345_v6 = vpop.f32.mrf.mxu1  ;;  %v8875_v55 = vld [vmem:[%s9431_s10 + $0x4c0] ss:$16 sps:$4 sm:$0xff]  }
 0x1d2   : > { %v2701_v23 = vpop.f32.mrf.mxu0  ;;  %2815 = vmatmul.mubr.bf16.gmra.mxu0 %v8875_v55 }
 0x1d3   : > { %v9936_v50 = vpop.trf.xlu1  ;;  %v3347_v48 = vpop.f32.mrf.mxu1  ;;  %v8878_v23 = vld [vmem:[%s9431_s10 + $0x4cc] ss:$16 sps:$4 sm:$0xff]   ;;  %2822 = vmatprep.mubr.bf16.mxu0 %v8883_v56 }
 0x1d4   : > { %v2704_v60 = vpop.f32.mrf.mxu0  ;;  %8301 = vmatprep.mubr.msk.bf16.mxu1 %vm2245_vm1, %v8878_v23 }
 0x1d5   : > { %v9938_v1 = vadd.f32 %v3345_v6, %v2704_v60  ;;  %v3348_v62 = vpop.f32.mrf.mxu1  ;;  %3456 = vmatmul.mubr.bf16.gmra.mxu1 %v8880_v30 }
 0x1d6   : > { %v2706_v7 = vpop.f32.mrf.mxu0  ;;  %8302 = vmatprep.mubr.msk.bf16.mxu1 %vm2245_vm1, %v8884_v47 }
 0x1d7   : > { %v3809_v2 = vpop.trf.xlu1  ;;  %v3350_v53 = vpop.f32.mrf.mxu1 }
 0x1d8   : > { %4158 = vrot.lane.b32.xlu1 %v3809_v2, %s9269_s15  ;;  %v2707_v31 = vpop.f32.mrf.mxu0 }
 0x1d9   : > { %v9941_v4 = vadd.f32 %v3348_v62, %v2707_v31  ;;  %v3353_v32 = vpop.f32.mrf.mxu1 }
 0x1da   : > { %v2709_v52 = vpop.f32.mrf.mxu0 }
 0x1db   : > { %v3810_v48 = vpop.trf.xlu1  ;;  %v3355_v6 = vpop.f32.mrf.mxu1 }
 0x1dc   : > { %4227 = vrot.lane.b32.xlu1 %v3810_v48, %s9270_s16  ;;  %v2712_v60 = vpop.f32.mrf.mxu0  ;;  %v8881_v6 = vld [vmem:[%s9431_s10 + $0x4e0] ss:$16 sps:$4 sm:$0xff]  }
 0x1dd   : > { %v9949_v62 = vadd.f32 %v3353_v32, %v2712_v60  ;;  %v3356_v7 = vpop.f32.mrf.mxu1  ;;  %2823 = vmatmul.mubr.bf16.gmra.mxu0 %v8881_v6  ;;  %3464 = vmatmul.mubr.bf16.gmra.mxu1 %v8886_v35 }
 0x1de   : > { %v2714_v2 = vpop.f32.mrf.mxu0  ;;  %2830 = vmatprep.mubr.bf16.mxu0 %v8889_v15  ;;  %8303 = vmatprep.mubr.msk.bf16.mxu1 %vm2245_vm1, %v8890_v58 }
 0x1df   : > { %v3358_v52 = vpop.f32.mrf.mxu1 }
 0x1e0   : > { %v2715_v53 = vpop.f32.mrf.mxu0 }
 0x1e1   : > { %v9951_v31 = vadd.f32 %v3356_v7, %v2715_v53  ;;  %v3361_v16 = vpop.f32.mrf.mxu1 }
 0x1e2   : > { %v2717_v23 = vpop.f32.mrf.mxu0 }
 0x1e3   : > { %v3363_v48 = vpop.f32.mrf.mxu1  ;;  %v8887_v23 = vld [vmem:[%s9431_s10 + $0x500] ss:$16 sps:$4 sm:$0xff]  }
 0x1e4   : > { %v2720_v30 = vpop.f32.mrf.mxu0  ;;  %v8892_v48 = vld [vmem:[%s9431_s10 + $0x508] ss:$16 sps:$4 sm:$0xff]  }
 0x1e5   : > { %v9958_v32 = vadd.f32 %v3361_v16, %v2720_v30  ;;  %v3364_v55 = vpop.f32.mrf.mxu1  ;;  %2831 = vmatmul.mubr.bf16.gmra.mxu0 %v8887_v23  ;;  %3472 = vmatmul.mubr.bf16.gmra.mxu1 %v8892_v48 }
 0x1e6   : > { %v2722_v60 = vpop.f32.mrf.mxu0  ;;  %2838 = vmatprep.mubr.bf16.mxu0 %v8895_v28  ;;  %8304 = vmatprep.mubr.msk.bf16.mxu1 %vm2245_vm1, %v8896_v20 }
 0x1e7   : > { %v3366_v7 = vpop.f32.mrf.mxu1 }
 0x1e8   : > { %v2723_v2 = vpop.f32.mrf.mxu0 }
 0x1e9   : > { %v9960_v52 = vadd.f32 %v3364_v55, %v2723_v2  ;;  %v3369_v53 = vpop.f32.mrf.mxu1 }
 0x1ea   : > { %v2725_v56 = vpop.f32.mrf.mxu0 }
 0x1eb   : > { %v3371_v47 = vpop.f32.mrf.mxu1  ;;  %v8893_v56 = vld [vmem:[%s9431_s10 + $0x520] ss:$16 sps:$4 sm:$0xff]  }
 0x1ec   : > { %v2728_v35 = vpop.f32.mrf.mxu0  ;;  %v8898_v47 = vld [vmem:[%s9431_s10 + $0x528] ss:$16 sps:$4 sm:$0xff]  }
 0x1ed   : > { %v9967_v16 = vadd.f32 %v3369_v53, %v2728_v35  ;;  %v3372_v6 = vpop.f32.mrf.mxu1  ;;  %2839 = vmatmul.mubr.bf16.gmra.mxu0 %v8893_v56  ;;  %3480 = vmatmul.mubr.bf16.gmra.mxu1 %v8898_v47 }
 0x1ee   : > { %v2730_v30 = vpop.f32.mrf.mxu0  ;;  %2846 = vmatprep.mubr.bf16.mxu0 %v8901_v21  ;;  %8305 = vmatprep.mubr.msk.bf16.mxu1 %vm2245_vm1, %v8902_v46  ;;  %v8910_v21 = vld [vmem:[%s9431_s10 + $0x568] ss:$16 sps:$4 sm:$0xff]  }
 0x1ef   : > { %v3374_v55 = vpop.f32.mrf.mxu1 }
 0x1f0   : > { %v2731_v60 = vpop.f32.mrf.mxu0 }
 0x1f1   : > { %v9969_v7 = vadd.f32 %v3372_v6, %v2731_v60  ;;  %v3377_v2 = vpop.f32.mrf.mxu1 }
 0x1f2   : > { %v2733_v15 = vpop.f32.mrf.mxu0 }
 0x1f3   : > { %v3379_v58 = vpop.f32.mrf.mxu1  ;;  %v8899_v15 = vld [vmem:[%s9431_s10 + $0x540] ss:$16 sps:$4 sm:$0xff]  }
 0x1f4   : > { %v2736_v53 = vpop.f32.mrf.mxu0  ;;  %v8904_v58 = vld [vmem:[%s9431_s10 + $0x548] ss:$16 sps:$4 sm:$0xff]  }
 0x1f5   : > { %v9976_v23 = vadd.f32 %v3377_v2, %v2736_v53  ;;  %v3380_v48 = vpop.f32.mrf.mxu1  ;;  %2847 = vmatmul.mubr.bf16.gmra.mxu0 %v8899_v15  ;;  %3488 = vmatmul.mubr.bf16.gmra.mxu1 %v8904_v58 }
 0x1f6   : > { %v2738_v35 = vpop.f32.mrf.mxu0  ;;  %2854 = vmatprep.mubr.bf16.mxu0 %v8907_v0  ;;  %8306 = vmatprep.mubr.msk.bf16.mxu1 %vm2245_vm1, %v8908_v18  ;;  %v8913_v18 = vld [vmem:[%s9431_s10 + $0x584] ss:$16 sps:$4 sm:$0xff]  }
 0x1f7   : > { %v3382_v6 = vpop.f32.mrf.mxu1 }
 0x1f8   : > { %v2739_v30 = vpop.f32.mrf.mxu0 }
 0x1f9   : > { %v9978_v55 = vadd.f32 %v3380_v48, %v2739_v30  ;;  %v3385_v60 = vpop.f32.mrf.mxu1 }
 0x1fa   : > { %v2741_v28 = vpop.f32.mrf.mxu0 }
 0x1fb   : > { %v3387_v20 = vpop.f32.mrf.mxu1  ;;  %v8905_v28 = vld [vmem:[%s9431_s10 + $0x560] ss:$16 sps:$4 sm:$0xff]  }
 0x1fc   : > { %v2744_v2 = vpop.f32.mrf.mxu0 }
 0x1fd   : > { %v9985_v56 = vadd.f32 %v3385_v60, %v2744_v2  ;;  %v3388_v47 = vpop.f32.mrf.mxu1  ;;  %2855 = vmatmul.mubr.bf16.gmra.mxu0 %v8905_v28  ;;  %3496 = vmatmul.mubr.bf16.gmra.mxu1 %v8910_v21 }
 0x1fe   : > { %v2746_v53 = vpop.f32.mrf.mxu0  ;;  %2862 = vmatprep.mubr.bf16.mxu0 %v8913_v18  ;;  %v8919_v18 = vld [vmem:[%s9431_s10 + $0x5a4] ss:$16 sps:$4 sm:$0xff]  }
 0x1ff   : > { %v3390_v48 = vpop.f32.mrf.mxu1  ;;  %v8911_v53 = vld [vmem:[%s9431_s10 + $0x580] ss:$16 sps:$4 sm:$0xff]  }
 0x200   : > { %v2747_v35 = vpop.f32.mrf.mxu0 }
 0x201   : > { %v9987_v6 = vadd.f32 %v3388_v47, %v2747_v35  ;;  %v3393_v30 = vpop.f32.mrf.mxu1  ;;  %v8914_v35 = vld [vmem:[%s9431_s10 + $0x58c] ss:$16 sps:$4 sm:$0xff]  }
 0x202   : > { %v2749_v20 = vpop.f32.mrf.mxu0  ;;  %8307 = vmatprep.mubr.msk.bf16.mxu1 %vm2245_vm1, %v8914_v35  ;;  %v8922_v35 = vld [vmem:[%s9431_s10 + $0x5a8] ss:$16 sps:$4 sm:$0xff]  }
 0x203   : > { %v3395_v33 = vpop.f32.mrf.mxu1  ;;  %v8916_v20 = vld [vmem:[%s9431_s10 + $0x588] ss:$16 sps:$4 sm:$0xff]  }
 0x204   : > { %v2752_v46 = vpop.f32.mrf.mxu0 }
 0x205   : > { %3856 = vxpose.xlu1.b32.start [1/16] (narrow) %v9903_v19, 24  ;;  %v9995_v60 = vadd.f32 %v3393_v30, %v2752_v46  ;;  %v3396_v15 = vpop.f32.mrf.mxu1  ;;  %2863 = vmatmul.mubr.bf16.gmra.mxu0 %v8911_v53  ;;  %v8920_v53 = vld [vmem:[%s9431_s10 + $0x5ac] ss:$16 sps:$4 sm:$0xff]  }
 0x206   : > { %v2754_v58 = vpop.f32.mrf.mxu0  ;;  %3504 = vmatmul.mubr.bf16.gmra.mxu1 %v8916_v20  ;;  %2870 = vmatprep.mubr.bf16.mxu0 %v8919_v18 }
 0x207   : > { %v3398_v2 = vpop.f32.mrf.mxu1  ;;  %8308 = vmatprep.mubr.msk.bf16.mxu1 %vm2245_vm1, %v8920_v53  ;;  %v8932_v53 = vld [vmem:[%s9431_s10 + $0x5ec] ss:$16 sps:$4 sm:$0xff]  }
 0x208   : > { %v2755_v47 = vpop.f32.mrf.mxu0 }
 0x209   : > { %3857 = vxpose.xlu1.b32.cont [2/16] (narrow) %v9906_v10, 24  ;;  %v9998_v33 = vadd.f32 %v3396_v15, %v2755_v47  ;;  %v3401_v0 = vpop.f32.mrf.mxu1  ;;  %v8917_v47 = vld [vmem:[%s9431_s10 + $0x5a0] ss:$16 sps:$4 sm:$0xff]  }
 0x20a   : > { %v2757_v48 = vpop.f32.mrf.mxu0 }
 0x20b   : > { %v3403_v28 = vpop.f32.mrf.mxu1 }
 0x20c   : > { %v2760_v19 = vpop.f32.mrf.mxu0  ;;  %v8925_v28 = vld [vmem:[%s9431_s10 + $0x5c4] ss:$16 sps:$4 sm:$0xff]  }
 0x20d   : > { %3858 = vxpose.xlu1.b32.cont [3/16] (narrow) %v9910_v57, 24  ;;  %v10006_v10 = vadd.f32 %v3401_v0, %v2760_v19  ;;  %v3404_v30 = vpop.f32.mrf.mxu1  ;;  %2871 = vmatmul.mubr.bf16.gmra.mxu0 %v8917_v47 }
 0x20e   : > { %v2762_v21 = vpop.f32.mrf.mxu0  ;;  %3512 = vmatmul.mubr.bf16.gmra.mxu1 %v8922_v35  ;;  %2878 = vmatprep.mubr.bf16.mxu0 %v8925_v28 }
 0x20f   : > { %v3406_v46 = vpop.f32.mrf.mxu1 }
 0x210   : > { %v2763_v15 = vpop.f32.mrf.mxu0 }
 0x211   : > { %3859 = vxpose.xlu1.b32.cont [4/16] (narrow) %v9914_v26, 24  ;;  %v10009_v58 = vadd.f32 %v3404_v30, %v2763_v15  ;;  %v3409_v2 = vpop.f32.mrf.mxu1  ;;  %v8926_v30 = vld [vmem:[%s9431_s10 + $0x5cc] ss:$16 sps:$4 sm:$0xff]   ;;  %v8923_v15 = vld [vmem:[%s9431_s10 + $0x5c0] ss:$16 sps:$4 sm:$0xff]  }
 0x212   : > { %v2765_v48 = vpop.f32.mrf.mxu0  ;;  %8309 = vmatprep.mubr.msk.bf16.mxu1 %vm2245_vm1, %v8926_v30  ;;  %v8929_v30 = vld [vmem:[%s9431_s10 + $0x5e0] ss:$16 sps:$4 sm:$0xff]  }
 0x213   : > { %v3411_v57 = vpop.f32.mrf.mxu1  ;;  %v8931_v48 = vld [vmem:[%s9431_s10 + $0x5e4] ss:$16 sps:$4 sm:$0xff]  }
 0x214   : > { %v2768_v0 = vpop.f32.mrf.mxu0 }
 0x215   : > { %3860 = vxpose.xlu1.b32.cont [5/16] (narrow) %v9916_v14, 24  ;;  %v10017_v26 = vadd.f32 %v3409_v2, %v2768_v0  ;;  %v3412_v20 = vpop.f32.mrf.mxu1  ;;  %v8928_v2 = vld [vmem:[%s9431_s10 + $0x5c8] ss:$16 sps:$4 sm:$0xff]   ;;  %2879 = vmatmul.mubr.bf16.gmra.mxu0 %v8923_v15 }
 0x216   : > { %v2770_v19 = vpop.f32.mrf.mxu0  ;;  %3520 = vmatmul.mubr.bf16.gmra.mxu1 %v8928_v2  ;;  %2886 = vmatprep.mubr.bf16.mxu0 %v8931_v48 }
 0x217   : > { %v3414_v21 = vpop.f32.mrf.mxu1  ;;  %8310 = vmatprep.mubr.msk.bf16.mxu1 %vm2245_vm1, %v8932_v53 }
 0x218   : > { %v2771_v46 = vpop.f32.mrf.mxu0 }
 0x219   : > { %3861 = vxpose.xlu1.b32.cont [6/16] (narrow) %v9920_v49, 24  ;;  %v10024_v47 = vadd.f32 %v3412_v20, %v2771_v46  ;;  %v3417_v14 = vpop.f32.mrf.mxu1 }
 0x21a   : > { %v2773_v18 = vpop.f32.mrf.mxu0 }
 0x21b   : > { %v3419_v35 = vpop.f32.mrf.mxu1  ;;  %v8934_v18 = vld [vmem:[%s9431_s10 + $0x5e8] ss:$16 sps:$4 sm:$0xff]  }
 0x21c   : > { %v2776_v57 = vpop.f32.mrf.mxu0 }
 0x21d   : > { %3862 = vxpose.xlu1.b32.cont [7/16] (narrow) %v9924_v37, 24  ;;  %v10030_v0 = vadd.f32 %v3417_v14, %v2776_v57  ;;  %v3420_v28 = vpop.f32.mrf.mxu1  ;;  %2887 = vmatmul.mubr.bf16.gmra.mxu0 %v8929_v30  ;;  %v10047_v30 = vpop.permute.xlu0 %4156 }
 0x21e   : > { %v2778_v19 = vpop.f32.mrf.mxu0  ;;  %3528 = vmatmul.mubr.bf16.gmra.mxu1 %v8934_v18 }
 0x21f   : > { %v3422_v49 = vpop.f32.mrf.mxu1 }
 0x220   : > { %v2779_v20 = vpop.f32.mrf.mxu0 }
 0x221   : > { %3863 = vxpose.xlu1.b32.cont [8/16] (narrow) %v9928_v54, 24  ;;  %v10035_v21 = vadd.f32 %v3420_v28, %v2779_v20  ;;  %v3425_v46 = vpop.f32.mrf.mxu1 }
 0x222   : > { %v2781_v15 = vpop.f32.mrf.mxu0 }
 0x223   : > { %v3427_v35 = vpop.f32.mrf.mxu1  ;;  %v8935_v15 = vld [vmem:[%s9431_s10 + $0x600] ss:$16 sps:$4 sm:$0xff]  }
 0x224   : > { %v2784_v37 = vpop.f32.mrf.mxu0  ;;  %v8937_v35 = vld [vmem:[%s9431_s10 + $0x604] ss:$16 sps:$4 sm:$0xff]  }
 0x225   : > { %3864 = vxpose.xlu1.b32.cont [9/16] (narrow) %v9930_v63, 24  ;;  %v10039_v14 = vadd.f32 %v3425_v46, %v2784_v37  ;;  %v3428_v2 = vpop.f32.mrf.mxu1  ;;  %v8938_v37 = vld [vmem:[%s9431_s10 + $0x60c] ss:$16 sps:$4 sm:$0xff]   ;;  %2894 = vmatprep.mubr.bf16.mxu0 %v8937_v35  ;;  %v8941_v35 = vld [vmem:[%s9431_s10 + $0x620] ss:$16 sps:$4 sm:$0xff]  }
 0x226   : > { %v2786_v48 = vpop.f32.mrf.mxu0  ;;  %8311 = vmatprep.mubr.msk.bf16.mxu1 %vm2245_vm1, %v8938_v37  ;;  %2895 = vmatmul.mubr.bf16.gmra.mxu0 %v8935_v15 }
 0x227   : > { %v3430_v53 = vpop.f32.mrf.mxu1 }
 0x228   : > { %v2787_v54 = vpop.f32.mrf.mxu0  ;;  %v8940_v53 = vld [vmem:[%s9431_s10 + $0x608] ss:$16 sps:$4 sm:$0xff]  }
 0x229   : > { %3865 = vxpose.xlu1.b32.cont [10/16] (narrow) %v9934_v59, 24  ;;  %v10042_v57 = vadd.f32 %v3428_v2, %v2787_v54  ;;  %v3433_v28 = vpop.f32.mrf.mxu1  ;;  %3536 = vmatmul.mubr.bf16.gmra.mxu1 %v8940_v53 }
 0x22a   : > { %v2789_v19 = vpop.f32.mrf.mxu0 }
 0x22b   : > { %v3435_v49 = vpop.f32.mrf.mxu1 }
 0x22c   : > { %v2792_v20 = vpop.f32.mrf.mxu0 }
 0x22d   : > { %3866 = vxpose.xlu1.b32.cont [11/16] (narrow) %v9938_v1, 24  ;;  %v10045_v63 = vadd.f32 %v3433_v28, %v2792_v20  ;;  %v3436_v18 = vpop.f32.mrf.mxu1 }
 0x22e   : > { %v2794_v46 = vpop.f32.mrf.mxu0 }
 0x22f   : > { %v3438_v2 = vpop.f32.mrf.mxu1 }
 0x230   : > { %v2795_v48 = vpop.f32.mrf.mxu0  ;;  %v8944_v2 = vld [vmem:[%s9431_s10 + $0x62c] ss:$16 sps:$4 sm:$0xff]  }
 0x231   : > { %3867 = vxpose.xlu1.b32.cont [12/16] (narrow) %v9941_v4, 24  ;;  %v10054_v59 = vadd.f32 %v3436_v18, %v2795_v48  ;;  %v3441_v28 = vpop.f32.mrf.mxu1  ;;  %v8943_v48 = vld [vmem:[%s9431_s10 + $0x624] ss:$16 sps:$4 sm:$0xff]   ;;  %8312 = vmatprep.mubr.msk.bf16.mxu1 %vm2245_vm1, %v8944_v2  ;;  %v8952_v2 = vld [vmem:[%s9431_s10 + $0x648] ss:$16 sps:$4 sm:$0xff]  }
 0x232   : > { %v10056_v1 = vpop.trf.xlu0  ;;  %v2797_v54 = vpop.f32.mrf.mxu0  ;;  %2902 = vmatprep.mubr.bf16.mxu0 %v8943_v48  ;;  %v8949_v48 = vld [vmem:[%s9431_s10 + $0x644] ss:$16 sps:$4 sm:$0xff]  }
 0x233   : > { %v3443_v49 = vpop.f32.mrf.mxu1  ;;  %v8946_v54 = vld [vmem:[%s9431_s10 + $0x628] ss:$16 sps:$4 sm:$0xff]   ;;  %2903 = vmatmul.mubr.bf16.gmra.mxu0 %v8941_v35 }
 0x234   : > { %v2800_v19 = vpop.f32.mrf.mxu0  ;;  %3544 = vmatmul.mubr.bf16.gmra.mxu1 %v8946_v54  ;;  %2910 = vmatprep.mubr.bf16.mxu0 %v8949_v48  ;;  %v8964_v48 = vld [vmem:[%s9431_s10 + $0x688] ss:$16 sps:$4 sm:$0xff]  }
 0x235   : > { %3868 = vxpose.xlu1.b32.cont [13/16] (narrow) %v9949_v62, 24  ;;  %v10060_v4 = vadd.f32 %v3441_v28, %v2800_v19  ;;  %v3444_v18 = vpop.f32.mrf.mxu1 }
 0x236   : > { %v3841_v20 = vpop.trf.xlu0  ;;  %v2802_v46 = vpop.f32.mrf.mxu0 }
 0x237   : > { %v3446_v15 = vpop.f32.mrf.mxu1 }
 0x238   : > { %v2803_v22 = vpop.f32.mrf.mxu0  ;;  %v8950_v15 = vld [vmem:[%s9431_s10 + $0x64c] ss:$16 sps:$4 sm:$0xff]  }
 0x239   : > { %3869 = vxpose.xlu1.b32.cont [14/16] (narrow) %v9951_v31, 24  ;;  %v10067_v37 = vadd.f32 %v3444_v18, %v2803_v22  ;;  %v3449_v28 = vpop.f32.mrf.mxu1  ;;  %v8947_v18 = vld [vmem:[%s9431_s10 + $0x640] ss:$16 sps:$4 sm:$0xff]   ;;  %8313 = vmatprep.mubr.msk.bf16.mxu1 %vm2245_vm1, %v8950_v15  ;;  %v8968_v15 = vld [vmem:[%s9431_s10 + $0x6ac] ss:$16 sps:$4 sm:$0xff]  }
 0x23a   : > { %v3842_v62 = vpop.trf.xlu0  ;;  %v2805_v53 = vpop.f32.mrf.mxu0 }
 0x23b   : > { %4229 = vrot.lane.b32.xlu0 %v3842_v62, %s9270_s16  ;;  %v3451_v31 = vpop.f32.mrf.mxu1  ;;  %2911 = vmatmul.mubr.bf16.gmra.mxu0 %v8947_v18  ;;  %v8955_v53 = vld [vmem:[%s9431_s10 + $0x664] ss:$16 sps:$4 sm:$0xff]  }
 0x23c   : > { %v2808_v19 = vpop.f32.mrf.mxu0  ;;  %3552 = vmatmul.mubr.bf16.gmra.mxu1 %v8952_v2  ;;  %2918 = vmatprep.mubr.bf16.mxu0 %v8955_v53  ;;  %v8959_v31 = vld [vmem:[%s9431_s10 + $0x680] ss:$16 sps:$4 sm:$0xff]   ;;  %v8967_v18 = vld [vmem:[%s9431_s10 + $0x6a4] ss:$16 sps:$4 sm:$0xff]   ;;  %v8970_v2 = vld [vmem:[%s9431_s10 + $0x6a8] ss:$16 sps:$4 sm:$0xff]  }
 0x23d   : > { %3870 = vxpose.xlu1.b32.cont [15/16] (narrow) %v9958_v32, 24  ;;  %v10072_v22 = vadd.f32 %v3449_v28, %v2808_v19  ;;  %v3452_v46 = vpop.f32.mrf.mxu1  ;;  %v8956_v28 = vld [vmem:[%s9431_s10 + $0x66c] ss:$16 sps:$4 sm:$0xff]   ;;  %v8958_v19 = vld [vmem:[%s9431_s10 + $0x668] ss:$16 sps:$4 sm:$0xff]  }
 0x23e   : > { %v2810_v49 = vpop.f32.mrf.mxu0  ;;  %8314 = vmatprep.mubr.msk.bf16.mxu1 %vm2245_vm1, %v8956_v28  ;;  %v8985_v53 = vld [vmem:[%s9431_s10 + $0x704] ss:$16 sps:$4 sm:$0xff]   ;;  %v8986_v28 = vld [vmem:[%s9431_s10 + $0x70c] ss:$16 sps:$4 sm:$0xff]  }
 0x23f   : > { %v3454_v32 = vpop.f32.mrf.mxu1  ;;  %v8961_v49 = vld [vmem:[%s9431_s10 + $0x684] ss:$16 sps:$4 sm:$0xff]  }
 0x240   : > { %v2811_v35 = vpop.f32.mrf.mxu0 }
 0x241   : > { %3871 = vxpose.xlu1.b32.end [16/16] (narrow) %v9960_v52, 24  ;;  %v10079_v54 = vadd.f32 %v3452_v46, %v2811_v35  ;;  %v8953_v52 = vld [vmem:[%s9431_s10 + $0x660] ss:$16 sps:$4 sm:$0xff]   ;;  %v8962_v46 = vld [vmem:[%s9431_s10 + $0x68c] ss:$16 sps:$4 sm:$0xff]  }
 0x242   : > { %v2813_v62 = vpop.f32.mrf.mxu0  ;;  %v8965_v35 = vld [vmem:[%s9431_s10 + $0x6a0] ss:$16 sps:$4 sm:$0xff]  }
 0x243   : > { %2919 = vmatmul.mubr.bf16.gmra.mxu0 %v8953_v52  ;;  %v8982_v62 = vld [vmem:[%s9431_s10 + $0x6e8] ss:$16 sps:$4 sm:$0xff]  }
 0x244   : > { %3560 = vmatmul.mubr.bf16.gmra.mxu1 %v8958_v19  ;;  %2926 = vmatprep.mubr.bf16.mxu0 %v8961_v49  ;;  %v8988_v19 = vld [vmem:[%s9431_s10 + $0x708] ss:$16 sps:$4 sm:$0xff]  }
 0x245   : > { %8315 = vmatprep.mubr.msk.bf16.mxu1 %vm2245_vm1, %v8962_v46 }
 0x24b   : > { %2927 = vmatmul.mubr.bf16.gmra.mxu0 %v8959_v31 }
 0x24c   : > { %3568 = vmatmul.mubr.bf16.gmra.mxu1 %v8964_v48  ;;  %2934 = vmatprep.mubr.bf16.mxu0 %v8967_v18 }
 0x24d   : > { %8316 = vmatprep.mubr.msk.bf16.mxu1 %vm2245_vm1, %v8968_v15 }
 0x253   : > { %2935 = vmatmul.mubr.bf16.gmra.mxu0 %v8965_v35 }
 0x254   : > { %3576 = vmatmul.mubr.bf16.gmra.mxu1 %v8970_v2 }
 0x259   : > { %3888 = vxpose.xlu0.b32.start [1/16] (narrow) %v9967_v16, 24  ;;  %v10104_v16 = vpop.permute.xlu1 %4225 }
 0x25d   : > { %3889 = vxpose.xlu0.b32.cont [2/16] (narrow) %v9969_v7, 24  ;;  %v10108_v7 = vpop.permute.xlu1 %4158 }
 0x25f   : > { %4160 = vrot.lane.b32.xlu1 %v3841_v20, %s9269_s15  ;;  %v8971_v20 = vld [vmem:[%s9431_s10 + $0x6c0] ss:$16 sps:$4 sm:$0xff]  }
 0x261   : > { %3890 = vxpose.xlu0.b32.cont [3/16] (narrow) %v9976_v23, 24  ;;  %v8973_v23 = vld [vmem:[%s9431_s10 + $0x6c4] ss:$16 sps:$4 sm:$0xff]   ;;  %v10118_v32 = vpop.permute.xlu1 %4227 }
 0x262   : > { %2942 = vmatprep.mubr.bf16.mxu0 %v8973_v23 }
 0x263   : > { %2943 = vmatmul.mubr.bf16.gmra.mxu0 %v8971_v20 }
 0x265   : > { %3891 = vxpose.xlu0.b32.cont [4/16] (narrow) %v9978_v55, 24  ;;  %v8974_v55 = vld [vmem:[%s9431_s10 + $0x6cc] ss:$16 sps:$4 sm:$0xff]  }
 0x266   : > { %8317 = vmatprep.mubr.msk.bf16.mxu1 %vm2245_vm1, %v8974_v55 }
 0x269   : > { %3892 = vxpose.xlu0.b32.cont [5/16] (narrow) %v9985_v56, 24  ;;  %v8976_v56 = vld [vmem:[%s9431_s10 + $0x6c8] ss:$16 sps:$4 sm:$0xff]  }
 0x26a   : > { %3584 = vmatmul.mubr.bf16.gmra.mxu1 %v8976_v56 }
 0x26d   : > { %3893 = vxpose.xlu0.b32.cont [6/16] (narrow) %v9987_v6, 24  ;;  %v8979_v6 = vld [vmem:[%s9431_s10 + $0x6e4] ss:$16 sps:$4 sm:$0xff]  }
 0x26e   : > { %2950 = vmatprep.mubr.bf16.mxu0 %v8979_v6 }
 0x271   : > { %3894 = vxpose.xlu0.b32.cont [7/16] (narrow) %v9995_v60, 24  ;;  %v8980_v60 = vld [vmem:[%s9431_s10 + $0x6ec] ss:$16 sps:$4 sm:$0xff]  }
 0x272   : > { %8318 = vmatprep.mubr.msk.bf16.mxu1 %vm2245_vm1, %v8980_v60 }
 0x273   : > { %3592 = vmatmul.mubr.bf16.gmra.mxu1 %v8982_v62 }
 0x274   : > { %8319 = vmatprep.mubr.msk.bf16.mxu1 %vm2245_vm1, %v8986_v28 }
 0x275   : > { %3895 = vxpose.xlu0.b32.cont [8/16] (narrow) %v9998_v33, 24  ;;  %v8977_v33 = vld [vmem:[%s9431_s10 + $0x6e0] ss:$16 sps:$4 sm:$0xff]  }
 0x276   : > { %2951 = vmatmul.mubr.bf16.gmra.mxu0 %v8977_v33 }
 0x277   : > { %2958 = vmatprep.mubr.bf16.mxu0 %v8985_v53 }
 0x279   : > { %3896 = vxpose.xlu0.b32.cont [9/16] (narrow) %v10006_v10, 24 }
 0x27b   : > { %3600 = vmatmul.mubr.bf16.gmra.mxu1 %v8988_v19 }
 0x27d   : > { %3897 = vxpose.xlu0.b32.cont [10/16] (narrow) %v10009_v58, 24  ;;  %v8983_v58 = vld [vmem:[%s9431_s10 + $0x700] ss:$16 sps:$4 sm:$0xff]  }
 0x27e   : > { %2959 = vmatmul.mubr.bf16.gmra.mxu0 %v8983_v58 }
 0x281   : > { %v10123_v10 = vpop.trf.xlu1  ;;  %3898 = vxpose.xlu0.b32.cont [11/16] (narrow) %v10017_v26, 24 }
 0x285   : > { %v3873_v52 = vpop.trf.xlu1  ;;  %3899 = vxpose.xlu0.b32.cont [12/16] (narrow) %v10024_v47, 24 }
 0x286   : > { %4162 = vrot.lane.b32.xlu1 %v3873_v52, %s9269_s15 }
 0x289   : > { %3900 = vxpose.xlu0.b32.cont [13/16] (narrow) %v10030_v0, 24 }
 0x28d   : > { %3901 = vxpose.xlu0.b32.cont [14/16] (narrow) %v10035_v21, 24 }
 0x291   : > { %3902 = vxpose.xlu0.b32.cont [15/16] (narrow) %v10039_v14, 24 }
 0x292   : > { %v2816_v26 = vpop.f32.mrf.mxu0 }
 0x294   : > { %v2818_v49 = vpop.f32.mrf.mxu0 }
 0x295   : > { %3903 = vxpose.xlu0.b32.end [16/16] (narrow) %v10042_v57, 24  ;;  %v3457_v47 = vpop.f32.mrf.mxu1 }
 0x296   : > { %v10138_v31 = vadd.f32 %v3457_v47, %v2816_v26  ;;  %v2819_v48 = vpop.f32.mrf.mxu0 }
 0x297   : > { %v3459_v46 = vpop.f32.mrf.mxu1 }
 0x298   : > { %v2821_v0 = vpop.f32.mrf.mxu0 }
 0x299   : > { %v3460_v18 = vpop.f32.mrf.mxu1 }
 0x29a   : > { %v10140_v15 = vadd.f32 %v3460_v18, %v2819_v48 }
 0x29b   : > { %v3462_v35 = vpop.f32.mrf.mxu1 }
 0x29d   : > { %v2824_v2 = vpop.f32.mrf.mxu0  ;;  %v3465_v20 = vpop.f32.mrf.mxu1 }
 0x29e   : > { %v10142_v21 = vadd.f32 %v3465_v20, %v2824_v2 }
 0x29f   : > { %v2826_v23 = vpop.f32.mrf.mxu0  ;;  %v3467_v14 = vpop.f32.mrf.mxu1 }
 0x2a1   : > { %v2827_v55 = vpop.f32.mrf.mxu0  ;;  %v3468_v57 = vpop.f32.mrf.mxu1 }
 0x2a2   : > { %v10144_v56 = vadd.f32 %v3468_v57, %v2827_v55  ;;  %v3874_v57 = vpop.trf.xlu1 }
 0x2a3   : > { %v2829_v6 = vpop.f32.mrf.mxu0  ;;  %v3470_v60 = vpop.f32.mrf.mxu1 }
 0x2a5   : > { %v2832_v33 = vpop.f32.mrf.mxu0  ;;  %v3473_v62 = vpop.f32.mrf.mxu1 }
 0x2a6   : > { %v10146_v53 = vadd.f32 %v3473_v62, %v2832_v33 }
 0x2a7   : > { %v2834_v28 = vpop.f32.mrf.mxu0  ;;  %v3475_v52 = vpop.f32.mrf.mxu1 }
 0x2a9   : > { %v2835_v58 = vpop.f32.mrf.mxu0  ;;  %v3476_v19 = vpop.f32.mrf.mxu1 }
 0x2aa   : > { %v10149_v26 = vadd.f32 %v3476_v19, %v2835_v58 }
 0x2ab   : > { %v2837_v47 = vpop.f32.mrf.mxu0  ;;  %v3478_v49 = vpop.f32.mrf.mxu1 }
 0x2ad   : > { %v2840_v46 = vpop.f32.mrf.mxu0  ;;  %v3481_v48 = vpop.f32.mrf.mxu1 }
 0x2ae   : > { %v10152_v18 = vadd.f32 %v3481_v48, %v2840_v46 }
 0x2af   : > { %3920 = vxpose.xlu1.b32.start [1/6] (short) (narrow) %v10045_v63, 24  ;;  %v2842_v0 = vpop.f32.mrf.mxu0  ;;  %v3483_v35 = vpop.f32.mrf.mxu1 }
 0x2b1   : > { %v2843_v2 = vpop.f32.mrf.mxu0  ;;  %v3484_v20 = vpop.f32.mrf.mxu1 }
 0x2b2   : > { %v10155_v63 = vadd.f32 %v3484_v20, %v2843_v2 }
 0x2b3   : > { %3921 = vxpose.xlu1.b32.cont [2/6] (short) (narrow) %v10054_v59, 24  ;;  %v2845_v23 = vpop.f32.mrf.mxu0  ;;  %v3486_v14 = vpop.f32.mrf.mxu1 }
 0x2b5   : > { %v2848_v55 = vpop.f32.mrf.mxu0  ;;  %v3489_v59 = vpop.f32.mrf.mxu1 }
 0x2b6   : > { %v10159_v6 = vadd.f32 %v3489_v59, %v2848_v55 }
 0x2b7   : > { %3922 = vxpose.xlu1.b32.cont [3/6] (short) (narrow) %v10060_v4, 24  ;;  %v2850_v60 = vpop.f32.mrf.mxu0  ;;  %v3491_v4 = vpop.f32.mrf.mxu1 }
 0x2b9   : > { %v2851_v33 = vpop.f32.mrf.mxu0  ;;  %v3492_v62 = vpop.f32.mrf.mxu1 }
 0x2ba   : > { %v10162_v28 = vadd.f32 %v3492_v62, %v2851_v33 }
 0x2bb   : > { %3923 = vxpose.xlu1.b32.cont [4/6] (short) (narrow) %v10067_v37, 24  ;;  %v2853_v52 = vpop.f32.mrf.mxu0  ;;  %v3494_v37 = vpop.f32.mrf.mxu1 }
 0x2bd   : > { %v2856_v58 = vpop.f32.mrf.mxu0  ;;  %v3497_v19 = vpop.f32.mrf.mxu1 }
 0x2be   : > { %4231 = vrot.lane.b32.xlu0 %v3874_v57, %s9270_s16  ;;  %v10165_v47 = vadd.f32 %v3497_v19, %v2856_v58 }
 0x2bf   : > { %3924 = vxpose.xlu1.b32.cont [5/6] (short) (narrow) %v10072_v22, 24  ;;  %v2858_v49 = vpop.f32.mrf.mxu0  ;;  %v3499_v46 = vpop.f32.mrf.mxu1 }
 0x2c1   : > { %v2859_v48 = vpop.f32.mrf.mxu0  ;;  %v3500_v0 = vpop.f32.mrf.mxu1 }
 0x2c2   : > { %v10167_v35 = vadd.f32 %v3500_v0, %v2859_v48 }
 0x2c3   : > { %3925 = vxpose.xlu1.b32.end [6/6] (short) (narrow) %v10079_v54, 24  ;;  %v2861_v22 = vpop.f32.mrf.mxu0  ;;  %v3502_v2 = vpop.f32.mrf.mxu1 }
 0x2c4   : > { %v4230_v54 = vpop.permute.xlu0 %4229 }
 0x2c5   : > { %v2864_v20 = vpop.f32.mrf.mxu0 }
 0x2c6   : > { %v3505_v23 = vpop.f32.mrf.mxu1 }
 0x2c7   : > { %v10169_v14 = vadd.f32 %v3505_v23, %v2864_v20  ;;  %v2866_v55 = vpop.f32.mrf.mxu0 }
 0x2c8   : > { %v3507_v57 = vpop.f32.mrf.mxu1 }
 0x2c9   : > { %v2867_v59 = vpop.f32.mrf.mxu0 }
 0x2ca   : > { %v3508_v60 = vpop.f32.mrf.mxu1 }
 0x2cb   : > { %v10171_v4 = vadd.f32 %v3508_v60, %v2867_v59  ;;  %v2869_v33 = vpop.f32.mrf.mxu0  ;;  %v4181_v60 = vsel %vm4180_vm2, %v10047_v30, %v10108_v7  ;;  %v8991_v30 = vld [vmem:[%s9431_s10 + $0x724] ss:$16 sps:$4 sm:$0xff]  }
 0x2cc   : > { %v3510_v62 = vpop.f32.mrf.mxu1  ;;  %v4250_v33 = vsel %vm4249_vm3, %v10104_v16, %v10118_v32  ;;  %2966 = vmatprep.mubr.bf16.mxu0 %v8991_v30 }
 0x2cd   : > { %v2872_v58 = vpop.f32.mrf.mxu0  ;;  %v4251_v62 = vsel %vm4249_vm3, %v10118_v32, %v4230_v54  ;;  %v8997_v32 = vld [vmem:[%s9431_s10 + $0x744] ss:$16 sps:$4 sm:$0xff]  }
 0x2ce   : > { %v3513_v19 = vpop.f32.mrf.mxu1 }
 0x2cf   : > { %v10175_v49 = vadd.f32 %v3513_v19, %v2872_v58  ;;  %v2874_v46 = vpop.f32.mrf.mxu0  ;;  %v4201_v19 = vadd.f32 %v4181_v60, %v9890_v34 }
 0x2d0   : > { %v3515_v48 = vpop.f32.mrf.mxu1 }
 0x2d1   : > { %v4161_v52 = vpop.permute.xlu1 %4160  ;;  %v2875_v2 = vpop.f32.mrf.mxu0  ;;  %v10195_v46 = vadd.f32 %v4250_v33, %v4201_v19  ;;  %v8995_v19 = vld [vmem:[%s9431_s10 + $0x740] ss:$16 sps:$4 sm:$0xff]  }
 0x2d2   : > { %v4182_v0 = vsel %vm4180_vm2, %v10108_v7, %v4161_v52  ;;  %v3516_v20 = vpop.f32.mrf.mxu1  ;;  %v4203_v58 = vadd.f32 %v4161_v52, %v10056_v1  ;;  %v8992_v7 = vld [vmem:[%s9431_s10 + $0x72c] ss:$16 sps:$4 sm:$0xff]  }
 0x2d3   : > { %v10180_v23 = vadd.f32 %v3516_v20, %v2875_v2  ;;  %v4202_v55 = vadd.f32 %v4182_v0, %v9936_v50  ;;  %v2877_v57 = vpop.f32.mrf.mxu0  ;;  %v8994_v20 = vld [vmem:[%s9431_s10 + $0x728] ss:$16 sps:$4 sm:$0xff]   ;;  %8320 = vmatprep.mubr.msk.bf16.mxu1 %vm2245_vm1, %v8992_v7 }
 0x2d4   : > { %v3518_v59 = vpop.f32.mrf.mxu1  ;;  %v10200_v2 = vadd.f32 %v4230_v54, %v4203_v58  ;;  %3608 = vmatmul.mubr.bf16.gmra.mxu1 %v8994_v20 }
 0x2d5   : > { %v10173_v37 = vpop.trf.xlu0  ;;  %v10193_v50 = vadd.f32 %v4251_v62, %v4202_v55  ;;  %v2880_v48 = vpop.f32.mrf.mxu0  ;;  %v8998_v55 = vld [vmem:[%s9431_s10 + $0x74c] ss:$16 sps:$4 sm:$0xff]  }
 0x2d6   : > { %v3521_v0 = vpop.f32.mrf.mxu1  ;;  %8321 = vmatprep.mubr.msk.bf16.mxu1 %vm2245_vm1, %v8998_v55  ;;  %v4284_v59 = vsel %vm4283_vm4, %v10200_v2, 0.0 }
 0x2d7   : > { %v10202_v16 = vadd.f32 %v3521_v0, %v2880_v48  ;;  %v4282_v1 = vadd.f32 %v10193_v50, %v10195_v46  ;;  %v2882_v34 = vpop.f32.mrf.mxu0  ;;  %v9000_v48 = vld [vmem:[%s9431_s10 + $0x748] ss:$16 sps:$4 sm:$0xff]  }
 0x2d8   : > { %v3523_v52 = vpop.f32.mrf.mxu1 }
 0x2d9   : > { %v3905_v22 = vpop.trf.xlu0  ;;  %v2883_v54 = vpop.f32.mrf.mxu0  ;;  %v4285_v33 = vadd.f32 %v4284_v59, %v4282_v1  ;;  %v4309_v1 = vmul.f32 %v10193_v50, %v10193_v50  ;;  %v4310_v59 = vmul.f32 %v10200_v2, %v10200_v2 }
 0x2da   : > { %4164 = vrot.lane.b32.xlu0 %v3905_v22, %s9269_s15  ;;  %v8989_v22 = vld [vmem:[%s9431_s10 + $0x720] ss:$16 sps:$4 sm:$0xff]   ;;  %v3524_v57 = vpop.f32.mrf.mxu1 }
 0x2db   : > { %2967 = vmatmul.mubr.bf16.gmra.mxu0 %v8989_v22  ;;  %v10213_v60 = vadd.f32 %v3524_v57, %v2883_v54  ;;  %v2885_v62 = vpop.f32.mrf.mxu0  ;;  %v4308_v57 = vmul.f32 %v10195_v46, %v10195_v46 }
 0x2dc   : > { %2974 = vmatprep.mubr.bf16.mxu0 %v8997_v32  ;;  %v3526_v58 = vpop.f32.mrf.mxu1  ;;  %3616 = vmatmul.mubr.bf16.gmra.mxu1 %v9000_v48 }
 0x2dd   : > { %v2888_v0 = vpop.f32.mrf.mxu0 }
 0x2de   : > { %v3529_v30 = vpop.f32.mrf.mxu1 }
 0x2df   : > { %v10217_v22 = vadd.f32 %v3529_v30, %v2888_v0  ;;  %v2890_v7 = vpop.f32.mrf.mxu0 }
 0x2e0   : > { %v3531_v20 = vpop.f32.mrf.mxu1 }
 0x2e1   : > { %v2891_v34 = vpop.f32.mrf.mxu0  ;;  %v9003_v20 = vld [vmem:[%s9431_s10 + $0x764] ss:$16 sps:$4 sm:$0xff]  }
 0x2e2   : > { %v3532_v32 = vpop.f32.mrf.mxu1 }
 0x2e3   : > { %2975 = vmatmul.mubr.bf16.gmra.mxu0 %v8995_v19  ;;  %v10221_v52 = vadd.f32 %v3532_v32, %v2891_v34  ;;  %v2893_v55 = vpop.f32.mrf.mxu0  ;;  %v4321_v19 = vsel %vm4283_vm4, %v4310_v59, 0.0  ;;  %v9004_v32 = vld [vmem:[%s9431_s10 + $0x76c] ss:$16 sps:$4 sm:$0xff]   ;;  %v3906_v34 = vpop.trf.xlu0 }
 0x2e4   : > { %v3534_v54 = vpop.f32.mrf.mxu1  ;;  %2982 = vmatprep.mubr.bf16.mxu0 %v9003_v20  ;;  %8322 = vmatprep.mubr.msk.bf16.mxu1 %vm2245_vm1, %v9004_v32 }
 0x2e5   : > { %v9001_v54 = vld [vmem:[%s9431_s10 + $0x760] ss:$16 sps:$4 sm:$0xff]   ;;  %3624 = vmatmul.mubr.bf16.gmra.mxu1 %v9006_v24 }
 0x2e6   : > { %v2896_v48 = vpop.f32.mrf.mxu0 }
 0x2e8   : > { %v2898_v55 = vpop.f32.mrf.mxu0 }
 0x2e9   : > { %v3537_v62 = vpop.f32.mrf.mxu1  ;;  %v9012_v55 = vld [vmem:[%s9431_s10 + $0x788] ss:$16 sps:$4 sm:$0xff]  }
 0x2ea   : > { %4286 = vadd.xlane.f32.xlu1 %v4285_v33  ;;  %v4320_v33 = vadd.f32 %v4309_v1, %v4308_v57  ;;  %v10228_v30 = vadd.f32 %v3537_v62, %v2896_v48  ;;  %v9009_v57 = vld [vmem:[%s9431_s10 + $0x784] ss:$16 sps:$4 sm:$0xff]   ;;  %v2899_v39 = vpop.f32.mrf.mxu0 }
 0x2eb   : > { %v3539_v58 = vpop.f32.mrf.mxu1  ;;  %2983 = vmatmul.mubr.bf16.gmra.mxu0 %v9001_v54 }
 0x2ec   : > { %v4322_v0 = vadd.f32 %v4321_v19, %v4320_v33  ;;  %v9010_v58 = vld [vmem:[%s9431_s10 + $0x78c] ss:$16 sps:$4 sm:$0xff]   ;;  %v2901_v62 = vpop.f32.mrf.mxu0  ;;  %2990 = vmatprep.mubr.bf16.mxu0 %v9009_v57 }
 0x2ed   : > { %v3540_v7 = vpop.f32.mrf.mxu1  ;;  %8323 = vmatprep.mubr.msk.bf16.mxu1 %vm2245_vm1, %v9010_v58  ;;  %v9016_v57 = vld [vmem:[%s9431_s10 + $0x7ac] ss:$16 sps:$4 sm:$0xff]   ;;  %v9013_v58 = vld [vmem:[%s9431_s10 + $0x7a0] ss:$16 sps:$4 sm:$0xff]   ;;  %v9018_v62 = vld [vmem:[%s9431_s10 + $0x7a8] ss:$16 sps:$4 sm:$0xff]  }
 0x2ee   : > { %v10238_v59 = vadd.f32 %v3540_v7, %v2899_v39  ;;  %3632 = vmatmul.mubr.bf16.gmra.mxu1 %v9012_v55 }
 0x2ef   : > { %v3542_v1 = vpop.f32.mrf.mxu1  ;;  %8324 = vmatprep.mubr.msk.bf16.mxu1 %vm2245_vm1, %v9016_v57  ;;  %v9027_v57 = vld [vmem:[%s9431_s10 + $0x7e4] ss:$16 sps:$4 sm:$0xff]  }
 0x2f0   : > { %v9015_v1 = vld [vmem:[%s9431_s10 + $0x7a4] ss:$16 sps:$4 sm:$0xff]  }
 0x2f3   : > { %v2904_v48 = vpop.f32.mrf.mxu0 }
 0x2f4   : > { %v3545_v33 = vpop.f32.mrf.mxu1 }
 0x2f5   : > { %v10242_v20 = vadd.f32 %v3545_v33, %v2904_v48  ;;  %v9021_v48 = vld [vmem:[%s9431_s10 + $0x7c4] ss:$16 sps:$4 sm:$0xff]  }
 0x2f6   : > { %v3547_v19 = vpop.f32.mrf.mxu1  ;;  %3640 = vmatmul.mubr.bf16.gmra.mxu1 %v9018_v62 }
 0x2f8   : > { %v3548_v32 = vpop.f32.mrf.mxu1 }
 0x2f9   : > { %4323 = vadd.xlane.f32.xlu0 %v4322_v0  ;;  %v9007_v0 = vld [vmem:[%s9431_s10 + $0x780] ss:$16 sps:$4 sm:$0xff]  }
 0x2fa   : > { %v3550_v39 = vpop.f32.mrf.mxu1  ;;  %2991 = vmatmul.mubr.bf16.gmra.mxu0 %v9007_v0  ;;  %v9022_v0 = vld [vmem:[%s9431_s10 + $0x7cc] ss:$16 sps:$4 sm:$0xff]  }
 0x2fb   : > { %4233 = vrot.lane.b32.xlu1 %v3906_v34, %s9270_s16  ;;  %v2906_v34 = vpop.f32.mrf.mxu0  ;;  %2998 = vmatprep.mubr.bf16.mxu0 %v9015_v1  ;;  %v9019_v39 = vld [vmem:[%s9431_s10 + $0x7c0] ss:$16 sps:$4 sm:$0xff]   ;;  %v9024_v1 = vld [vmem:[%s9431_s10 + $0x7c8] ss:$16 sps:$4 sm:$0xff]  }
 0x2fc   : > { %v3553_v19 = vpop.f32.mrf.mxu1  ;;  %8325 = vmatprep.mubr.msk.bf16.mxu1 %vm2245_vm1, %v9022_v0 }
 0x2fd   : > { %v2907_v24 = vpop.f32.mrf.mxu0 }
 0x2fe   : > { %v10245_v7 = vadd.f32 %v3548_v32, %v2907_v24  ;;  %v3555_v34 = vpop.f32.mrf.mxu1  ;;  %3648 = vmatmul.mubr.bf16.gmra.mxu1 %v9024_v1 }
 0x2ff   : > { %v2909_v54 = vpop.f32.mrf.mxu0  ;;  %8326 = vmatprep.mubr.msk.bf16.mxu1 %vm2245_vm1, %v9028_v51  ;;  %v9025_v34 = vld [vmem:[%s9431_s10 + $0x7e0] ss:$16 sps:$4 sm:$0xff]  }
 0x300   : > { %v3556_v54 = vpop.f32.mrf.mxu1 }
 0x301   : > { %v2912_v33 = vpop.f32.mrf.mxu0 }
 0x302   : > { %2999 = vmatmul.mubr.bf16.gmra.mxu0 %v9013_v58  ;;  %v10254_v32 = vadd.f32 %v3553_v19, %v2912_v33  ;;  %v3558_v3 = vpop.f32.mrf.mxu1 }
 0x303   : > { %v2914_v55 = vpop.f32.mrf.mxu0  ;;  %3006 = vmatprep.mubr.bf16.mxu0 %v9021_v48  ;;  %v9034_v3 = vld [vmem:[%s9431_s10 + $0x80c] ss:$16 sps:$4 sm:$0xff]  }
 0x304   : > { %v3561_v33 = vpop.f32.mrf.mxu1 }
 0x305   : > { %v2915_v24 = vpop.f32.mrf.mxu0 }
 0x306   : > { %v10260_v58 = vadd.f32 %v3556_v54, %v2915_v24  ;;  %v3563_v55 = vpop.f32.mrf.mxu1  ;;  %3656 = vmatmul.mubr.bf16.gmra.mxu1 %v9030_v29 }
 0x307   : > { %v2917_v62 = vpop.f32.mrf.mxu0  ;;  %8327 = vmatprep.mubr.msk.bf16.mxu1 %vm2245_vm1, %v9034_v3 }
 0x308   : > { %v3564_v54 = vpop.f32.mrf.mxu1 }
 0x309   : > { %v2920_v19 = vpop.f32.mrf.mxu0 }
 0x30a   : > { %3007 = vmatmul.mubr.bf16.gmra.mxu0 %v9019_v39  ;;  %v10263_v48 = vadd.f32 %v3561_v33, %v2920_v19  ;;  %v3566_v43 = vpop.f32.mrf.mxu1 }
 0x30b   : > { %3014 = vmatprep.mubr.bf16.mxu0 %v9027_v57  ;;  %v2922_v0 = vpop.f32.mrf.mxu0 }
 0x30c   : > { %v3569_v57 = vpop.f32.mrf.mxu1  ;;  %v9031_v0 = vld [vmem:[%s9431_s10 + $0x800] ss:$16 sps:$4 sm:$0xff]  }
 0x30d   : > { %v2923_v24 = vpop.f32.mrf.mxu0 }
 0x30e   : > { %v10269_v62 = vadd.f32 %v3564_v54, %v2923_v24  ;;  %v3571_v19 = vpop.f32.mrf.mxu1  ;;  %v9036_v54 = vld [vmem:[%s9431_s10 + $0x808] ss:$16 sps:$4 sm:$0xff]  }
 0x30f   : > { %v2925_v39 = vpop.f32.mrf.mxu0  ;;  %3664 = vmatmul.mubr.bf16.gmra.mxu1 %v9036_v54  ;;  %v9039_v19 = vld [vmem:[%s9431_s10 + $0x824] ss:$16 sps:$4 sm:$0xff]  }
 0x310   : > { %v3572_v24 = vpop.f32.mrf.mxu1  ;;  %v10279_v39 = vpop.permute.xlu1 %4162 }
 0x311   : > { %v2928_v1 = vpop.f32.mrf.mxu0 }
 0x312   : > { %3015 = vmatmul.mubr.bf16.gmra.mxu0 %v9025_v34  ;;  %v10272_v51 = vadd.f32 %v3569_v57, %v2928_v1  ;;  %v3574_v34 = vpop.f32.mrf.mxu1 }
 0x313   : > { %3022 = vmatprep.mubr.bf16.mxu0 %v9033_v38  ;;  %v2930_v33 = vpop.f32.mrf.mxu0 }
 0x314   : > { %v3577_v38 = vpop.f32.mrf.mxu1  ;;  %v9037_v33 = vld [vmem:[%s9431_s10 + $0x820] ss:$16 sps:$4 sm:$0xff]  }
 0x315   : > { %v2931_v55 = vpop.f32.mrf.mxu0 }
 0x316   : > { %v10277_v11 = vadd.f32 %v3572_v24, %v2931_v55  ;;  %v3579_v57 = vpop.f32.mrf.mxu1 }
 0x317   : > { %v2933_v43 = vpop.f32.mrf.mxu0  ;;  %v9043_v57 = vld [vmem:[%s9431_s10 + $0x840] ss:$16 sps:$4 sm:$0xff]  }
 0x318   : > { %v3580_v24 = vpop.f32.mrf.mxu1  ;;  %v9040_v43 = vld [vmem:[%s9431_s10 + $0x82c] ss:$16 sps:$4 sm:$0xff]  }
 0x319   : > { %v2936_v29 = vpop.f32.mrf.mxu0  ;;  %8328 = vmatprep.mubr.msk.bf16.mxu1 %vm2245_vm1, %v9040_v43  ;;  %v9057_v43 = vld [vmem:[%s9431_s10 + $0x884] ss:$16 sps:$4 sm:$0xff]  }
 0x31a   : > { %3023 = vmatmul.mubr.bf16.gmra.mxu0 %v9031_v0  ;;  %v10281_v3 = vadd.f32 %v3577_v38, %v2936_v29  ;;  %v9042_v0 = vld [vmem:[%s9431_s10 + $0x828] ss:$16 sps:$4 sm:$0xff]   ;;  %v3582_v29 = vpop.f32.mrf.mxu1  ;;  %v9045_v38 = vld [vmem:[%s9431_s10 + $0x844] ss:$16 sps:$4 sm:$0xff]  }
 0x31b   : > { %v2938_v1 = vpop.f32.mrf.mxu0  ;;  %3030 = vmatprep.mubr.bf16.mxu0 %v9039_v19  ;;  %3672 = vmatmul.mubr.bf16.gmra.mxu1 %v9042_v0  ;;  %v9058_v0 = vld [vmem:[%s9431_s10 + $0x88c] ss:$16 sps:$4 sm:$0xff]  }
 0x31c   : > { %v9046_v1 = vld [vmem:[%s9431_s10 + $0x84c] ss:$16 sps:$4 sm:$0xff]  }
 0x31d   : > { %v2939_v55 = vpop.f32.mrf.mxu0  ;;  %8329 = vmatprep.mubr.msk.bf16.mxu1 %vm2245_vm1, %v9046_v1  ;;  %v9060_v1 = vld [vmem:[%s9431_s10 + $0x888] ss:$16 sps:$4 sm:$0xff]  }
 0x31e   : > { %v10288_v34 = vadd.f32 %v3580_v24, %v2939_v55  ;;  %v9048_v55 = vld [vmem:[%s9431_s10 + $0x848] ss:$16 sps:$4 sm:$0xff]   ;;  %v9051_v24 = vld [vmem:[%s9431_s10 + $0x864] ss:$16 sps:$4 sm:$0xff]  }
 0x31f   : > { %v2941_v54 = vpop.f32.mrf.mxu0 }
 0x322   : > { %3031 = vmatmul.mubr.bf16.gmra.mxu0 %v9037_v33  ;;  %v9054_v33 = vld [vmem:[%s9431_s10 + $0x868] ss:$16 sps:$4 sm:$0xff]  }
 0x323   : > { %3038 = vmatprep.mubr.bf16.mxu0 %v9045_v38  ;;  %3680 = vmatmul.mubr.bf16.gmra.mxu1 %v9048_v55  ;;  %v9064_v55 = vld [vmem:[%s9431_s10 + $0x8ac] ss:$16 sps:$4 sm:$0xff]  }
 0x326   : > { %3952 = vxpose.xlu0.b32.start [1/16] (narrow) %v10138_v31, 24 }
 0x32a   : > { %3953 = vxpose.xlu0.b32.cont [2/16] (narrow) %v10140_v15, 24  ;;  %v9052_v15 = vld [vmem:[%s9431_s10 + $0x86c] ss:$16 sps:$4 sm:$0xff]   ;;  %3039 = vmatmul.mubr.bf16.gmra.mxu0 %v9043_v57  ;;  %v3585_v54 = vpop.f32.mrf.mxu1  ;;  %v9063_v57 = vld [vmem:[%s9431_s10 + $0x8a4] ss:$16 sps:$4 sm:$0xff]  }
 0x32b   : > { %v10292_v31 = vpop.trf.xlu1  ;;  %3046 = vmatprep.mubr.bf16.mxu0 %v9051_v24  ;;  %8330 = vmatprep.mubr.msk.bf16.mxu1 %vm2245_vm1, %v9052_v15 }
 0x32c   : > { %3688 = vmatmul.mubr.bf16.gmra.mxu1 %v9054_v33 }
 0x32d   : > { %8331 = vmatprep.mubr.msk.bf16.mxu1 %vm2245_vm1, %v9058_v0 }
 0x32e   : > { %3954 = vxpose.xlu0.b32.cont [3/16] (narrow) %v10142_v21, 24  ;;  %v9049_v21 = vld [vmem:[%s9431_s10 + $0x860] ss:$16 sps:$4 sm:$0xff]  }
 0x32f   : > { %v3937_v19 = vpop.trf.xlu1 }
 0x330   : > { %4166 = vrot.lane.b32.xlu1 %v3937_v19, %s9269_s15  ;;  %v3587_v19 = vpop.f32.mrf.mxu1 }
 0x332   : > { %3955 = vxpose.xlu0.b32.cont [4/16] (narrow) %v10144_v56, 24  ;;  %3047 = vmatmul.mubr.bf16.gmra.mxu0 %v9049_v21  ;;  %v2944_v56 = vpop.f32.mrf.mxu0  ;;  %v3588_v15 = vpop.f32.mrf.mxu1 }
 0x333   : > { %3054 = vmatprep.mubr.bf16.mxu0 %v9057_v43  ;;  %v10314_v29 = vadd.f32 %v3585_v54, %v2944_v56  ;;  %v9069_v56 = vld [vmem:[%s9431_s10 + $0x8c4] ss:$16 sps:$4 sm:$0xff]   ;;  %v9070_v54 = vld [vmem:[%s9431_s10 + $0x8cc] ss:$16 sps:$4 sm:$0xff]  }
 0x334   : > { %v2946_v38 = vpop.f32.mrf.mxu0  ;;  %3696 = vmatmul.mubr.bf16.gmra.mxu1 %v9060_v1  ;;  %v3590_v33 = vpop.f32.mrf.mxu1  ;;  %v9072_v1 = vld [vmem:[%s9431_s10 + $0x8c8] ss:$16 sps:$4 sm:$0xff]  }
 0x335   : > { %8332 = vmatprep.mubr.msk.bf16.mxu1 %vm2245_vm1, %v9064_v55 }
 0x336   : > { %3956 = vxpose.xlu0.b32.cont [5/16] (narrow) %v10146_v53, 24  ;;  %v9055_v53 = vld [vmem:[%s9431_s10 + $0x880] ss:$16 sps:$4 sm:$0xff]   ;;  %v2947_v24 = vpop.f32.mrf.mxu0  ;;  %v3593_v0 = vpop.f32.mrf.mxu1 }
 0x337   : > { %v10325_v21 = vadd.f32 %v3588_v15, %v2947_v24  ;;  %v9075_v15 = vld [vmem:[%s9431_s10 + $0x8e4] ss:$16 sps:$4 sm:$0xff]  }
 0x33a   : > { %3957 = vxpose.xlu0.b32.cont [6/16] (narrow) %v10149_v26, 24  ;;  %3055 = vmatmul.mubr.bf16.gmra.mxu0 %v9055_v53  ;;  %v9061_v26 = vld [vmem:[%s9431_s10 + $0x8a0] ss:$16 sps:$4 sm:$0xff]  }
 0x33b   : > { %3062 = vmatprep.mubr.bf16.mxu0 %v9063_v57  ;;  %v9067_v53 = vld [vmem:[%s9431_s10 + $0x8c0] ss:$16 sps:$4 sm:$0xff]  }
 0x33e   : > { %3958 = vxpose.xlu0.b32.cont [7/16] (narrow) %v10152_v18, 24  ;;  %v9066_v18 = vld [vmem:[%s9431_s10 + $0x8a8] ss:$16 sps:$4 sm:$0xff]  }
 0x33f   : > { %3704 = vmatmul.mubr.bf16.gmra.mxu1 %v9066_v18 }
 0x340   : > { %8333 = vmatprep.mubr.msk.bf16.mxu1 %vm2245_vm1, %v9070_v54 }
 0x342   : > { %3959 = vxpose.xlu0.b32.cont [8/16] (narrow) %v10155_v63, 24  ;;  %3063 = vmatmul.mubr.bf16.gmra.mxu0 %v9061_v26  ;;  %v2949_v63 = vpop.f32.mrf.mxu0 }
 0x343   : > { %3070 = vmatprep.mubr.bf16.mxu0 %v9069_v56  ;;  %v9076_v63 = vld [vmem:[%s9431_s10 + $0x8ec] ss:$16 sps:$4 sm:$0xff]   ;;  %v9078_v56 = vld [vmem:[%s9431_s10 + $0x8e8] ss:$16 sps:$4 sm:$0xff]  }
 0x344   : > { %v2952_v43 = vpop.f32.mrf.mxu0 }
 0x346   : > { %3960 = vxpose.xlu0.b32.cont [9/16] (narrow) %v10159_v6, 24  ;;  %v10330_v6 = vadd.f32 %v3593_v0, %v2952_v43  ;;  %v2954_v38 = vpop.f32.mrf.mxu0  ;;  %v9073_v43 = vld [vmem:[%s9431_s10 + $0x8e0] ss:$16 sps:$4 sm:$0xff]  }
 0x347   : > { %3712 = vmatmul.mubr.bf16.gmra.mxu1 %v9072_v1  ;;  %v9081_v1 = vld [vmem:[%s9431_s10 + $0x904] ss:$16 sps:$4 sm:$0xff]  }
 0x348   : > { %v2955_v57 = vpop.f32.mrf.mxu0  ;;  %8334 = vmatprep.mubr.msk.bf16.mxu1 %vm2245_vm1, %v9076_v63  ;;  %v9091_v63 = vld [vmem:[%s9431_s10 + $0x940] ss:$16 sps:$4 sm:$0xff]  }
 0x34a   : > { %3961 = vxpose.xlu0.b32.cont [10/16] (narrow) %v10162_v28, 24  ;;  %v3595_v28 = vpop.f32.mrf.mxu1  ;;  %3071 = vmatmul.mubr.bf16.gmra.mxu0 %v9067_v53 }
 0x34b   : > { %3078 = vmatprep.mubr.bf16.mxu0 %v9075_v15 }
 0x34c   : > { %v3596_v19 = vpop.f32.mrf.mxu1 }
 0x34d   : > { %v10336_v55 = vadd.f32 %v3596_v19, %v2955_v57  ;;  %v9079_v57 = vld [vmem:[%s9431_s10 + $0x900] ss:$16 sps:$4 sm:$0xff]   ;;  %v9082_v19 = vld [vmem:[%s9431_s10 + $0x90c] ss:$16 sps:$4 sm:$0xff]  }
 0x34e   : > { %3962 = vxpose.xlu0.b32.cont [11/16] (narrow) %v10165_v47, 24  ;;  %v2957_v47 = vpop.f32.mrf.mxu0  ;;  %v3598_v26 = vpop.f32.mrf.mxu1 }
 0x34f   : > { %3720 = vmatmul.mubr.bf16.gmra.mxu1 %v9078_v56  ;;  %v9084_v47 = vld [vmem:[%s9431_s10 + $0x908] ss:$16 sps:$4 sm:$0xff]  }
 0x350   : > { %v2960_v18 = vpop.f32.mrf.mxu0  ;;  %v3601_v24 = vpop.f32.mrf.mxu1  ;;  %8335 = vmatprep.mubr.msk.bf16.mxu1 %vm2245_vm1, %v9082_v19 }
 0x351   : > { %v10341_v33 = vadd.f32 %v3601_v24, %v2960_v18 }
 0x352   : > { %3963 = vxpose.xlu0.b32.cont [12/16] (narrow) %v10167_v35, 24  ;;  %v2962_v0 = vpop.f32.mrf.mxu0  ;;  %v3603_v35 = vpop.f32.mrf.mxu1  ;;  %3079 = vmatmul.mubr.bf16.gmra.mxu0 %v9073_v43 }
 0x353   : > { %3086 = vmatprep.mubr.bf16.mxu0 %v9081_v1  ;;  %v9096_v0 = vld [vmem:[%s9431_s10 + $0x948] ss:$16 sps:$4 sm:$0xff]   ;;  %v9099_v35 = vld [vmem:[%s9431_s10 + $0x964] ss:$16 sps:$4 sm:$0xff]  }
 0x354   : > { %v2963_v54 = vpop.f32.mrf.mxu0  ;;  %v3604_v53 = vpop.f32.mrf.mxu1 }
 0x356   : > { %3964 = vxpose.xlu0.b32.cont [13/16] (narrow) %v10169_v14, 24  ;;  %v10348_v14 = vadd.f32 %v3604_v53, %v2963_v54  ;;  %v2965_v38 = vpop.f32.mrf.mxu0  ;;  %v3606_v28 = vpop.f32.mrf.mxu1  ;;  %v9100_v54 = vld [vmem:[%s9431_s10 + $0x96c] ss:$16 sps:$4 sm:$0xff]  }
 0x357   : > { %3728 = vmatmul.mubr.bf16.gmra.mxu1 %v9084_v47 }
 0x359   : > { %3984 = vxpose.xlu1.b32.start [1/16] (narrow) %v10202_v16, 24 }
 0x35a   : > { %3965 = vxpose.xlu0.b32.cont [14/16] (narrow) %v10171_v4, 24  ;;  %3087 = vmatmul.mubr.bf16.gmra.mxu0 %v9079_v57  ;;  %v3938_v4 = vpop.trf.xlu1 }
 0x35d   : > { %3985 = vxpose.xlu1.b32.cont [2/16] (narrow) %v10213_v60, 24 }
 0x35e   : > { %3966 = vxpose.xlu0.b32.cont [15/16] (narrow) %v10175_v49, 24  ;;  %v10372_v49 = vpop.permute.xlu0 %4231 }
 0x361   : > { %3986 = vxpose.xlu1.b32.cont [3/16] (narrow) %v10217_v22, 24 }
 0x362   : > { %3967 = vxpose.xlu0.b32.end [16/16] (narrow) %v10180_v23, 24  ;;  %v10375_v23 = vpop.permute.xlu0 %4164 }
 0x365   : > { %3987 = vxpose.xlu1.b32.cont [4/16] (narrow) %v10221_v52, 24 }
 0x369   : > { %3988 = vxpose.xlu1.b32.cont [5/16] (narrow) %v10228_v30, 24 }
 0x36d   : > { %3989 = vxpose.xlu1.b32.cont [6/16] (narrow) %v10238_v59, 24  ;;  %v9085_v59 = vld [vmem:[%s9431_s10 + $0x920] ss:$16 sps:$4 sm:$0xff]  }
 0x371   : > { %3990 = vxpose.xlu1.b32.cont [7/16] (narrow) %v10242_v20, 24  ;;  %v9087_v20 = vld [vmem:[%s9431_s10 + $0x924] ss:$16 sps:$4 sm:$0xff]  }
 0x372   : > { %3094 = vmatprep.mubr.bf16.mxu0 %v9087_v20 }
 0x373   : > { %3095 = vmatmul.mubr.bf16.gmra.mxu0 %v9085_v59 }
 0x375   : > { %3991 = vxpose.xlu1.b32.cont [8/16] (narrow) %v10245_v7, 24  ;;  %v9088_v7 = vld [vmem:[%s9431_s10 + $0x92c] ss:$16 sps:$4 sm:$0xff]  }
 0x376   : > { %8336 = vmatprep.mubr.msk.bf16.mxu1 %vm2245_vm1, %v9088_v7 }
 0x379   : > { %3992 = vxpose.xlu1.b32.cont [9/16] (narrow) %v10254_v32, 24  ;;  %v9090_v32 = vld [vmem:[%s9431_s10 + $0x928] ss:$16 sps:$4 sm:$0xff]  }
 0x37a   : > { %3736 = vmatmul.mubr.bf16.gmra.mxu1 %v9090_v32 }
 0x37d   : > { %3993 = vxpose.xlu1.b32.cont [10/16] (narrow) %v10260_v58, 24  ;;  %v9093_v58 = vld [vmem:[%s9431_s10 + $0x944] ss:$16 sps:$4 sm:$0xff]  }
 0x37e   : > { %3102 = vmatprep.mubr.bf16.mxu0 %v9093_v58  ;;  %v13177_v58 = vmov 0  }
 0x37f   : > { %3103 = vmatmul.mubr.bf16.gmra.mxu0 %v9091_v63 }
 0x380   : > { %3110 = vmatprep.mubr.bf16.mxu0 %v9099_v35 }
 0x381   : > { %3994 = vxpose.xlu1.b32.cont [11/16] (narrow) %v10263_v48, 24 }
 0x382   : > { %v10377_v16 = vpop.xlane.xlu0 %4323 }
 0x385   : > { %3995 = vxpose.xlu1.b32.cont [12/16] (narrow) %v10269_v62, 24 }
 0x389   : > { %3996 = vxpose.xlu1.b32.cont [13/16] (narrow) %v10272_v51, 24  ;;  %v9094_v51 = vld [vmem:[%s9431_s10 + $0x94c] ss:$16 sps:$4 sm:$0xff]  }
 0x38a   : > { %8337 = vmatprep.mubr.msk.bf16.mxu1 %vm2245_vm1, %v9094_v51 }
 0x38b   : > { %4235 = vrot.lane.b32.xlu0 %v3938_v4, %s9270_s16  ;;  %3744 = vmatmul.mubr.bf16.gmra.mxu1 %v9096_v0 }
 0x38c   : > { %8338 = vmatprep.mubr.msk.bf16.mxu1 %vm2245_vm1, %v9100_v54 }
 0x38d   : > { %3997 = vxpose.xlu1.b32.cont [14/16] (narrow) %v10277_v11, 24 }
 0x391   : > { %3998 = vxpose.xlu1.b32.cont [15/16] (narrow) %v10281_v3, 24 }
 0x394   : > { %v3609_v30 = vpop.f32.mrf.mxu1 }
 0x395   : > { %3999 = vxpose.xlu1.b32.end [16/16] (narrow) %v10288_v34, 24 }
 0x396   : > { %v3611_v3 = vpop.f32.mrf.mxu1 }
 0x398   : > { %v3612_v26 = vpop.f32.mrf.mxu1 }
 0x39a   : > { %v3614_v15 = vpop.f32.mrf.mxu1 }
 0x39b   : > { %v2968_v52 = vpop.f32.mrf.mxu0 }
 0x39c   : > { %v10384_v11 = vadd.f32 %v3609_v30, %v2968_v52  ;;  %v3617_v56 = vpop.f32.mrf.mxu1  ;;  %v9097_v52 = vld [vmem:[%s9431_s10 + $0x960] ss:$16 sps:$4 sm:$0xff]   ;;  %v9102_v30 = vld [vmem:[%s9431_s10 + $0x968] ss:$16 sps:$4 sm:$0xff]  }
 0x39d   : > { %v2970_v62 = vpop.f32.mrf.mxu0  ;;  %3111 = vmatmul.mubr.bf16.gmra.mxu0 %v9097_v52  ;;  %3752 = vmatmul.mubr.bf16.gmra.mxu1 %v9102_v30 }
 0x39e   : > { %v3619_v28 = vpop.f32.mrf.mxu1  ;;  %4764 = vmatprep.mubr.bf16.mxu1 %v13177_v58 }
 0x39f   : > { %v2971_v34 = vpop.f32.mrf.mxu0 }
 0x3a0   : > { %v10392_v18 = vadd.f32 %v3612_v26, %v2971_v34  ;;  %v3620_v57 = vpop.f32.mrf.mxu1 }
 0x3a1   : > { %v2973_v24 = vpop.f32.mrf.mxu0 }
 0x3a2   : > { %v10379_v60 = vpop.trf.xlu0  ;;  %v3622_v4 = vpop.f32.mrf.mxu1 }
 0x3a3   : > { %v2976_v43 = vpop.f32.mrf.mxu0 }
 0x3a4   : > { %v10398_v53 = vadd.f32 %v3617_v56, %v2976_v43 }
 0x3a5   : > { %v2978_v38 = vpop.f32.mrf.mxu0  ;;  %v3625_v20 = vpop.f32.mrf.mxu1 }
 0x3a6   : > { %v3969_v22 = vpop.trf.xlu0 }
 0x3a7   : > { %v2979_v1 = vpop.f32.mrf.mxu0  ;;  %v3627_v32 = vpop.f32.mrf.mxu1 }
 0x3a8   : > { %v10402_v19 = vadd.f32 %v3620_v57, %v2979_v1 }
 0x3a9   : > { %v2981_v47 = vpop.f32.mrf.mxu0  ;;  %v3628_v62 = vpop.f32.mrf.mxu1 }
 0x3aa   : > { %v3970_v48 = vpop.trf.xlu0 }
 0x3ab   : > { %4237 = vrot.lane.b32.xlu0 %v3970_v48, %s9270_s16  ;;  %v2984_v59 = vpop.f32.mrf.mxu0  ;;  %v3630_v34 = vpop.f32.mrf.mxu1 }
 0x3ac   : > { %v10406_v7 = vadd.f32 %v3625_v20, %v2984_v59 }
 0x3ae   : > { %v3633_v24 = vpop.f32.mrf.mxu1 }
 0x3b0   : > { %v3635_v43 = vpop.f32.mrf.mxu1 }
 0x3b2   : > { %v3636_v35 = vpop.f32.mrf.mxu1 }
 0x3b3   : > { %4168 = vrot.lane.b32.xlu1 %v3969_v22, %s9269_s15  ;;  %v2986_v22 = vpop.f32.mrf.mxu0 }
 0x3b4   : > { %v3638_v38 = vpop.f32.mrf.mxu1 }
 0x3b5   : > { %v2987_v48 = vpop.f32.mrf.mxu0 }
 0x3b6   : > { %v10409_v51 = vadd.f32 %v3628_v62, %v2987_v48  ;;  %v3641_v1 = vpop.f32.mrf.mxu1 }
 0x3b7   : > { %v2989_v3 = vpop.f32.mrf.mxu0 }
 0x3b8   : > { %v3643_v4 = vpop.f32.mrf.mxu1 }
 0x3b9   : > { %v4287_v4 = vpop.xlane.xlu1 %4286 }
 0x3ba   : > { %v2992_v26 = vpop.f32.mrf.mxu0  ;;  %v3644_v30 = vpop.f32.mrf.mxu1 }
 0x3bb   : > { %v10411_v15 = vadd.f32 %v3633_v24, %v2992_v26 }
 0x3bc   : > { %v2994_v63 = vpop.f32.mrf.mxu0  ;;  %v3646_v22 = vpop.f32.mrf.mxu1 }
 0x3bd   : > { %v10435_v22 = vmul.f32 0.0033112583, %v4287_v4 }
 0x3be   : > { %v2995_v0 = vpop.f32.mrf.mxu0  ;;  %v3649_v48 = vpop.f32.mrf.mxu1 }
 0x3bf   : > { %v10413_v56 = vadd.f32 %v3636_v35, %v2995_v0 }
 0x3c0   : > { %v2997_v54 = vpop.f32.mrf.mxu0  ;;  %v3651_v3 = vpop.f32.mrf.mxu1 }
 0x3c2   : > { %v3000_v28 = vpop.f32.mrf.mxu0  ;;  %v3652_v26 = vpop.f32.mrf.mxu1 }
 0x3c3   : > { %v10416_v57 = vadd.f32 %v3641_v1, %v3000_v28 }
 0x3c4   : > { %v3002_v47 = vpop.f32.mrf.mxu0  ;;  %v3654_v63 = vpop.f32.mrf.mxu1 }
 0x3c6   : > { %v3003_v52 = vpop.f32.mrf.mxu0  ;;  %v3657_v0 = vpop.f32.mrf.mxu1 }
 0x3c7   : > { %v10419_v59 = vadd.f32 %v3644_v30, %v3003_v52 }
 0x3c8   : > { %v3005_v20 = vpop.f32.mrf.mxu0  ;;  %v3659_v54 = vpop.f32.mrf.mxu1 }
 0x3c9   : > { %4016 = vxpose.xlu0.b32.start [1/6] (short) (narrow) %v10314_v29, 24 }
 0x3ca   : > { %v3008_v32 = vpop.f32.mrf.mxu0  ;;  %v3660_v28 = vpop.f32.mrf.mxu1 }
 0x3cb   : > { %v10422_v29 = vadd.f32 %v3649_v48, %v3008_v32 }
 0x3cc   : > { %v3010_v62 = vpop.f32.mrf.mxu0  ;;  %v3662_v47 = vpop.f32.mrf.mxu1 }
 0x3cd   : > { %4017 = vxpose.xlu0.b32.cont [2/6] (short) (narrow) %v10325_v21, 24  ;;  %v4340_v62 = vmul.f32 0.0033112583, %v10377_v16 }
 0x3ce   : > { %v3011_v34 = vpop.f32.mrf.mxu0 }
 0x3cf   : > { %v10425_v21 = vadd.f32 %v3652_v26, %v3011_v34  ;;  %v3665_v30 = vpop.f32.mrf.mxu1  ;;  %v4344_v26 = vmul.f32 %v10435_v22, %v10435_v22 }
 0x3d0   : > { %v3013_v24 = vpop.f32.mrf.mxu0 }
 0x3d1   : > { %4018 = vxpose.xlu0.b32.cont [3/6] (short) (narrow) %v10330_v6, 24  ;;  %v3667_v32 = vpop.f32.mrf.mxu1 }
 0x3d2   : > { %v3016_v43 = vpop.f32.mrf.mxu0 }
 0x3d3   : > { %v10428_v6 = vadd.f32 %v3657_v0, %v3016_v43  ;;  %v4348_v43 = vsub.f32 %v4340_v62, %v4344_v26 }
 0x3d4   : > { %v3018_v35 = vpop.f32.mrf.mxu0 }
 0x3d5   : > { %4019 = vxpose.xlu0.b32.cont [4/6] (short) (narrow) %v10336_v55, 24 }
 0x3d6   : > { %v3019_v38 = vpop.f32.mrf.mxu0 }
 0x3d7   : > { %v10431_v55 = vadd.f32 %v3660_v28, %v3019_v38 }
 0x3d8   : > { %v3021_v1 = vpop.f32.mrf.mxu0 }
 0x3d9   : > { %4020 = vxpose.xlu0.b32.cont [5/6] (short) (narrow) %v10341_v33, 24  ;;  %v4352_v1 = vmax.f32 %v4348_v43, 0.0  ;;  %v4183_v43 = vsel %vm4180_vm2, %v10279_v39, %v10375_v23 }
 0x3da   : > { %v3024_v52 = vpop.f32.mrf.mxu0 }
 0x3db   : > { %v10433_v20 = vadd.f32 %v3665_v30, %v3024_v52  ;;  %v4368_v32 = vadd.f32 1e-05, %v4352_v1 }
 0x3dc   : > { %v3026_v33 = vpop.f32.mrf.mxu0 }
 0x3dd   : > { %4021 = vxpose.xlu0.b32.end [6/6] (short) (narrow) %v10348_v14, 24  ;;  %v3668_v14 = vpop.f32.mrf.mxu1  ;;  %v4234_v33 = vpop.permute.xlu1 %4233  ;;  %9107 = vrsqrt.f32 %v4368_v32 }
 0x3de   : > { %v3027_v48 = vpop.f32.mrf.mxu0 }
 0x3df   : > { %v10438_v3 = vadd.f32 %v3668_v14, %v3027_v48  ;;  %v3670_v24 = vpop.f32.mrf.mxu1 }
 0x3e0   : > { %v3029_v34 = vpop.f32.mrf.mxu0 }
 0x3e1   : > { %v3673_v0 = vpop.f32.mrf.mxu1  ;;  %v4167_v24 = vpop.permute.xlu1 %4166 }
 0x3e2   : > { %v3032_v63 = vpop.f32.mrf.mxu0  ;;  %v4184_v1 = vsel %vm4180_vm2, %v10375_v23, %v4167_v24  ;;  %v4206_v32 = vadd.f32 %v4167_v24, %v10292_v31 }
 0x3e3   : > { %v10442_v35 = vadd.f32 %v3673_v0, %v3032_v63  ;;  %v3675_v38 = vpop.f32.mrf.mxu1 }
 0x3e4   : > { %v3034_v54 = vpop.f32.mrf.mxu0 }
 0x3e5   : > { %v3676_v47 = vpop.f32.mrf.mxu1 }
 0x3e6   : > { %v3035_v28 = vpop.f32.mrf.mxu0 }
 0x3e7   : > { %v10444_v4 = vadd.f32 %v3676_v47, %v3035_v28  ;;  %v3678_v52 = vpop.f32.mrf.mxu1  ;;  %v4252_v28 = vsel %vm4249_vm3, %v10372_v49, %v4234_v33  ;;  %v4389_v47 = vlaneseq }
 0x3e8   : > { %v3037_v16 = vpop.f32.mrf.mxu0  ;;  %v4204_v52 = vadd.f32 %v4183_v43, %v10123_v10 }
 0x3e9   : > { %v3681_v48 = vpop.f32.mrf.mxu1  ;;  %v4390_v23 = vshrl.u32 %v4389_v47, 7 }
 0x3ea   : > { %v3040_v30 = vpop.f32.mrf.mxu0 }
 0x3eb   : > { %v10446_v14 = vadd.f32 %v3681_v48, %v3040_v30  ;;  %v3683_v62 = vpop.f32.mrf.mxu1 }
 0x3ec   : > { %v3042_v34 = vpop.f32.mrf.mxu0  ;;  %v4205_v62 = vadd.f32 %v4184_v1, %v10173_v37  ;;  %v10477_v1 = vsub.s32 0, %v4390_v23 }
 0x3ed   : > { %v3684_v63 = vpop.f32.mrf.mxu1  ;;  %v10461_v34 = vadd.f32 %v4252_v28, %v4204_v52  ;;  %v230_v52 = vld [vmem:[%s13032_s3] ss:$8 sm:$0x7] }
 0x3ee   : > { %v3043_v26 = vpop.f32.mrf.mxu0  ;;  %13178 = vst [vmem:[#allocation60_spill] sm:$0xff] %v10477_v1 }
 0x3ef   : > { %v10451_v0 = vadd.f32 %v3684_v63, %v3043_v26  ;;  %v3686_v38 = vpop.f32.mrf.mxu1  ;;  %v4311_v37 = vmul.f32 %v10461_v34, %v10461_v34 }
 0x3f0   : > { %v3045_v54 = vpop.f32.mrf.mxu0 }
 0x3f1   : > { %v3689_v30 = vpop.f32.mrf.mxu1 }
 0x3f2   : > { %v3048_v16 = vpop.f32.mrf.mxu0 }
 0x3f3   : > { %v10459_v48 = vadd.f32 %v3689_v30, %v3048_v16  ;;  %v3691_v63 = vpop.f32.mrf.mxu1  ;;  %v10482_v30 = vsub.s32 1, %v4390_v23 }
 0x3f4   : > { %v3050_v39 = vpop.f32.mrf.mxu0 }
 0x3f5   : > { %v3692_v10 = vpop.f32.mrf.mxu1  ;;  %13179 = vst [vmem:[#allocation61_spill] sm:$0xff] %v10482_v30  ;;  %v9108_v39 = vpop.eup %9107 }
 0x3f6   : > { %v3051_v38 = vpop.f32.mrf.mxu0 }
 0x3f7   : > { %v10471_v24 = vadd.f32 %v3692_v10, %v3051_v38  ;;  %v4356_v38 = vsub.f32 %v10195_v46, %v10435_v22  ;;  %v4357_v10 = vsub.f32 %v10193_v50, %v10435_v22  ;;  %v7921_v50 = vld [vmem:[%s13032_s3 + $0x1] ss:$8 sm:$0x7] }
 0x3f8   : > { %v3053_v43 = vpop.f32.mrf.mxu0  ;;  %v10511_v44 = vrot.slane %v7921_v50, %v10477_v1 }
 0x3f9   : > { %v4376_v17 = vmul.f32 %v9108_v39, %v4356_v38 }
 0x3fa   : > { %v3056_v47 = vpop.f32.mrf.mxu0 }
 0x3fd   : > { %v4236_v26 = vpop.permute.xlu0 %4235 }
 0x3fe   : > { %v4253_v49 = vsel %vm4249_vm3, %v4234_v33, %v4236_v26  ;;  %v10465_v54 = vadd.f32 %v4236_v26, %v4206_v32  ;;  %v3694_v33 = vpop.f32.mrf.mxu1 }
 0x3ff   : > { %v10467_v8 = vadd.f32 %v4253_v49, %v4205_v62  ;;  %v3058_v49 = vpop.f32.mrf.mxu0 }
 0x400   : > { %v4313_v31 = vmul.f32 %v10465_v54, %v10465_v54  ;;  %v3697_v32 = vpop.f32.mrf.mxu1 }
 0x401   : > { %v4312_v28 = vmul.f32 %v10467_v8, %v10467_v8  ;;  %v4288_v26 = vadd.f32 %v10467_v8, %v10461_v34  ;;  %v10487_v63 = vadd.f32 %v3697_v32, %v3056_v47  ;;  %v3059_v33 = vpop.f32.mrf.mxu0  ;;  %v4377_v47 = vmul.f32 %v9108_v39, %v4357_v10 }
 0x402   : > { %v4326_v62 = vsel %vm4283_vm4, %v4313_v31, 0.0  ;;  %v4289_v31 = vsel %vm4283_vm4, %v10465_v54, 0.0  ;;  %v10499_v32 = vrot.slane %v230_v52, %v10482_v30 }
 0x403   : > { %v4325_v16 = vadd.f32 %v4312_v28, %v4311_v37  ;;  %v3699_v37 = vpop.f32.mrf.mxu1  ;;  %v10494_v28 = vrot.slane %v230_v52, %v10477_v1  ;;  %v4290_v46 = vadd.f32 %v4289_v31, %v4288_v26  ;;  %v10514_v26 = vrot.slane %v7921_v50, %v10482_v30 }
 0x404   : > { %v10506_v37 = vpop.trf.xlu1  ;;  %v4405_v10 = vmul.f32 %v10499_v32, %v4377_v47  ;;  %v10522_v30 = vsub.s32 2, %v4390_v23 }
 0x405   : > { %v4327_v43 = vadd.f32 %v4326_v62, %v4325_v16  ;;  %v3700_v49 = vpop.f32.mrf.mxu1  ;;  %v3061_v62 = vpop.f32.mrf.mxu0  ;;  %v4404_v38 = vmul.f32 %v10494_v28, %v4376_v17 }
 0x406   : > { %v10504_v16 = vadd.f32 %v3700_v49, %v3059_v33  ;;  %13180 = vst [vmem:[#allocation62_spill] sm:$0xff] %v10522_v30 }
 0x407   : > { %4328 = vadd.xlane.f32.xlu1 %v4327_v43  ;;  %v3702_v43 = vpop.f32.mrf.mxu1  ;;  %v3064_v27 = vpop.f32.mrf.mxu0 }
 0x408   : > { %v4001_v36 = vpop.trf.xlu1  ;;  %v4433_v43 = vadd.f32 %v10514_v26, %v4405_v10 }
 0x409   : > { %v3705_v31 = vpop.f32.mrf.mxu1  ;;  %v3066_v33 = vpop.f32.mrf.mxu0 }
 0x40a   : > { %4291 = vadd.xlane.f32.xlu0 %v4290_v46  ;;  %v10516_v45 = vadd.f32 %v3705_v31, %v3064_v27  ;;  %v4432_v46 = vadd.f32 %v10511_v44, %v4404_v38  ;;  %v4457_v41 = vmul.f32 0.2, %v4433_v43  ;;  %vm4445_vm6 = vcmp.ge.f32.partialorder %v4433_v43, 0.0 }
 0x40b   : > { %v3707_v49 = vpop.f32.mrf.mxu1  ;;  %v3067_v62 = vpop.f32.mrf.mxu0  ;;  %v4358_v38 = vsub.f32 %v10200_v2, %v10435_v22 }
 0x40c   : > { %v4456_v61 = vmul.f32 0.2, %v4432_v46  ;;  %vm4444_vm5 = vcmp.ge.f32.partialorder %v4432_v46, 0.0  ;;  %v4002_v10 = vpop.trf.xlu1 }
 0x40d   : > { %v3708_v17 = vpop.f32.mrf.mxu1  ;;  %v3069_v47 = vpop.f32.mrf.mxu0 }
 0x40e   : > { %v10520_v25 = vadd.f32 %v3708_v17, %v3067_v62  ;;  %v10528_v62 = vsel %vm4444_vm5, %v4432_v46, %v4456_v61  ;;  %v10530_v17 = vsel %vm4445_vm6, %v4433_v43, %v4457_v41  ;;  %v10533_v47 = vrot.slane %v230_v52, %v10522_v30 }
 0x40f   : > { %v3710_v40 = vpop.f32.mrf.mxu1  ;;  %v3072_v42 = vpop.f32.mrf.mxu0  ;;  %v8501_v2 = vpack.i.bf16 %v10530_v17, %v10528_v62  ;;  %v10542_v41 = vrot.slane %v7921_v50, %v10522_v30  ;;  %vm5184_vm5 = vcmask 343040  }
 0x410   : > { %v4378_v40 = vmul.f32 %v9108_v39, %v4358_v38 }
 0x411   : > { %v3713_v27 = vpop.f32.mrf.mxu1  ;;  %v3074_v33 = vpop.f32.mrf.mxu0 }
 0x412   : > { %v10524_v31 = vadd.f32 %v3713_v27, %v3072_v42  ;;  %v4406_v61 = vmul.f32 %v10533_v47, %v4378_v40 }
 0x413   : > { %v3715_v49 = vpop.f32.mrf.mxu1  ;;  %v3075_v23 = vpop.f32.mrf.mxu0 }
 0x415   : > { %v3716_v1 = vpop.f32.mrf.mxu1  ;;  %v3077_v33 = vpop.f32.mrf.mxu0 }
 0x416   : > { %v10536_v42 = vadd.f32 %v3716_v1, %v3075_v23  ;;  %v4434_v1 = vadd.f32 %v10542_v41, %v4406_v61 }
 0x417   : > { %v3718_v27 = vpop.f32.mrf.mxu1  ;;  %v3080_v22 = vpop.f32.mrf.mxu0 }
 0x418   : > { %4239 = vrot.lane.b32.xlu1 %v4002_v10, %s9270_s16  ;;  %v4458_v23 = vmul.f32 0.2, %v4434_v1  ;;  %vm4446_vm7 = vcmp.ge.f32.partialorder %v4434_v1, 0.0 }
 0x419   : > { %v3721_v39 = vpop.f32.mrf.mxu1  ;;  %v3082_v43 = vpop.f32.mrf.mxu0 }
 0x41a   : > { %v10545_v52 = vadd.f32 %v3721_v39, %v3080_v22  ;;  %v13096_v22 = vmov 0.0  }
 0x41b   : > { %v3723_v46 = vpop.f32.mrf.mxu1  ;;  %v3083_v10 = vpop.f32.mrf.mxu0  ;;  %8377 = vmatprep.subr.bf16.mxu0 %v13096_v22 }
 0x41c   : > { %8502 = vrot.lane.b32.xlu1 %v8501_v2, %s9270_s16  ;;  %v10557_v46 = vsel %vm4446_vm7, %v4434_v1, %v4458_v23 }
 0x41d   : > { %v3724_v38 = vpop.f32.mrf.mxu1  ;;  %v3085_v40 = vpop.f32.mrf.mxu0 }
 0x41e   : > { %v10550_v49 = vadd.f32 %v3724_v38, %v3083_v10  ;;  %v10563_v40 = vpop.permute.xlu0 %4237 }
 0x41f   : > { %v3726_v50 = vpop.f32.mrf.mxu1  ;;  %v3088_v33 = vpop.f32.mrf.mxu0 }
 0x420   : > { %8507 = vrot.lane.b32.xlu1 %v8501_v2, %s9271_s26  ;;  %4170 = vrot.lane.b32.xlu0 %v4001_v36, %s9269_s15 }
 0x421   : > { %v3729_v27 = vpop.f32.mrf.mxu1  ;;  %v3090_v39 = vpop.f32.mrf.mxu0 }
 0x422   : > { %v10554_v61 = vadd.f32 %v3729_v27, %v3088_v33 }
 0x423   : > { %v3731_v36 = vpop.f32.mrf.mxu1  ;;  %v3091_v38 = vpop.f32.mrf.mxu0 }
 0x424   : > { %8512 = vrot.lane.b32.xlu1 %v8501_v2, %s9272_s6  ;;  %8497 = vrot.lane.b32.xlu0 %v8501_v2, %s9269_s15 }
 0x425   : > { %v3732_v43 = vpop.f32.mrf.mxu1  ;;  %v3093_v2 = vpop.f32.mrf.mxu0 }
 0x426   : > { %v10561_v10 = vadd.f32 %v3732_v43, %v3091_v38 }
 0x427   : > { %v3734_v50 = vpop.f32.mrf.mxu1 }
 0x428   : > { %4629 = vrot.lane.b32.xlu0 %v10557_v46, %s9272_s6 }
 0x43a   : > { %v3737_v1 = vpop.f32.mrf.mxu1 }
 0x445   : > { %v10565_v27 = vpop.trf.xlu0 }
 0x449   : > { %v10567_v33 = vpop.trf.xlu0 }
 0x44d   : > { %v4034_v22 = vpop.trf.xlu0  ;;  %4048 = vxpose.xlu1.b32.start [1/16] (narrow) %v10384_v11, 24  ;;  %v3096_v11 = vpop.f32.mrf.mxu0 }
 0x44e   : > { %4241 = vrot.lane.b32.xlu0 %v4034_v22, %s9270_s16  ;;  %v10580_v23 = vadd.f32 %v3737_v1, %v3096_v11 }
 0x451   : > { %4049 = vxpose.xlu1.b32.cont [2/16] (narrow) %v10392_v18, 24  ;;  %v3098_v18 = vpop.f32.mrf.mxu0 }
 0x455   : > { %4050 = vxpose.xlu1.b32.cont [3/16] (narrow) %v10398_v53, 24  ;;  %v3739_v53 = vpop.f32.mrf.mxu1 }
 0x459   : > { %4051 = vxpose.xlu1.b32.cont [4/16] (narrow) %v10402_v19, 24  ;;  %v3099_v19 = vpop.f32.mrf.mxu0 }
 0x45d   : > { %4052 = vxpose.xlu1.b32.cont [5/16] (narrow) %v10406_v7, 24  ;;  %v3740_v7 = vpop.f32.mrf.mxu1 }
 0x461   : > { %4053 = vxpose.xlu1.b32.cont [6/16] (narrow) %v10409_v51, 24  ;;  %v3101_v51 = vpop.f32.mrf.mxu0 }
 0x465   : > { %4054 = vxpose.xlu1.b32.cont [7/16] (narrow) %v10411_v15, 24  ;;  %v3742_v15 = vpop.f32.mrf.mxu1 }
 0x469   : > { %4055 = vxpose.xlu1.b32.cont [8/16] (narrow) %v10413_v56, 24  ;;  %v10586_v56 = vadd.f32 %v3740_v7, %v3099_v19 }
 0x46c   : > { %4080 = vxpose.xlu0.b32.start [1/16] (narrow) %v10442_v35, 24  ;;  %v3745_v35 = vpop.f32.mrf.mxu1 }
 0x46d   : > { %4056 = vxpose.xlu1.b32.cont [9/16] (narrow) %v10416_v57, 24  ;;  %v3104_v57 = vpop.f32.mrf.mxu0 }
 0x46e   : > { %v10590_v36 = vadd.f32 %v3745_v35, %v3104_v57 }
 0x46f   : > { %v3106_v22 = vpop.f32.mrf.mxu0 }
 0x470   : > { %4081 = vxpose.xlu0.b32.cont [2/16] (narrow) %v10444_v4, 24  ;;  %v3747_v4 = vpop.f32.mrf.mxu1 }
 0x471   : > { %4057 = vxpose.xlu1.b32.cont [10/16] (narrow) %v10419_v59, 24  ;;  %v3107_v59 = vpop.f32.mrf.mxu0 }
 0x474   : > { %4082 = vxpose.xlu0.b32.cont [3/16] (narrow) %v10446_v14, 24  ;;  %v3748_v14 = vpop.f32.mrf.mxu1 }
 0x475   : > { %4058 = vxpose.xlu1.b32.cont [11/16] (narrow) %v10422_v29, 24  ;;  %v3109_v29 = vpop.f32.mrf.mxu0  ;;  %v3749_v43 = vadd.f32 %v3748_v14, %v3107_v59 }
 0x476   : > { %v3750_v39 = vpop.f32.mrf.mxu1 }
 0x478   : > { %4083 = vxpose.xlu0.b32.cont [4/16] (narrow) %v10451_v0, 24  ;;  %v3112_v0 = vpop.f32.mrf.mxu0  ;;  %v3753_v38 = vpop.f32.mrf.mxu1 }
 0x479   : > { %4059 = vxpose.xlu1.b32.cont [12/16] (narrow) %v10425_v21, 24  ;;  %v3754_v2 = vadd.f32 %v3753_v38, %v3112_v0 }
 0x47a   : > { %v3114_v21 = vpop.f32.mrf.mxu0  ;;  %v3755_v50 = vpop.f32.mrf.mxu1 }
 0x47c   : > { %4084 = vxpose.xlu0.b32.cont [5/16] (narrow) %v10459_v48, 24  ;;  %v3115_v11 = vpop.f32.mrf.mxu0  ;;  %v3756_v48 = vpop.f32.mrf.mxu1 }
 0x47d   : > { %4060 = vxpose.xlu1.b32.cont [13/16] (narrow) %v10428_v6, 24  ;;  %v3757_v18 = vadd.f32 %v3756_v48, %v3115_v11 }
 0x47e   : > { %v3758_v1 = vpop.f32.mrf.mxu1  ;;  %v3117_v6 = vpop.f32.mrf.mxu0 }
 0x480   : > { %4085 = vxpose.xlu0.b32.cont [6/16] (narrow) %v10471_v24, 24  ;;  %v4169_v24 = vpop.permute.xlu1 %4168 }
 0x481   : > { %4061 = vxpose.xlu1.b32.cont [14/16] (narrow) %v10431_v55, 24 }
 0x484   : > { %4086 = vxpose.xlu0.b32.cont [7/16] (narrow) %v10487_v63, 24 }
 0x485   : > { %4062 = vxpose.xlu1.b32.cont [15/16] (narrow) %v10433_v20, 24 }
 0x488   : > { %4087 = vxpose.xlu0.b32.cont [8/16] (narrow) %v10504_v16, 24 }
 0x489   : > { %4063 = vxpose.xlu1.b32.end [16/16] (narrow) %v10438_v3, 24 }
 0x48c   : > { %4088 = vxpose.xlu0.b32.cont [9/16] (narrow) %v10516_v45, 24 }
 0x490   : > { %v4329_v55 = vpop.xlane.xlu1 %4328  ;;  %4089 = vxpose.xlu0.b32.cont [10/16] (narrow) %v10520_v25, 24 }
 0x491   : > { %v4341_v0 = vmul.f32 0.0033112583, %v4329_v55 }
 0x493   : > { %v4292_v53 = vpop.xlane.xlu0 %4291 }
 0x494   : > { %v4240_v19 = vpop.permute.xlu1 %4239  ;;  %4090 = vxpose.xlu0.b32.cont [11/16] (narrow) %v10524_v31, 24 }
 0x497   : > { %v4171_v63 = vpop.permute.xlu0 %4170 }
 0x498   : > { %v10603_v7 = vpop.permute.xlu1 %8502  ;;  %4091 = vxpose.xlu0.b32.cont [12/16] (narrow) %v10536_v42, 24  ;;  %v4185_v11 = vsel %vm4180_vm2, %v4169_v24, %v4171_v63 }
 0x499   : > { %v4207_v48 = vadd.f32 %v4185_v11, %v10379_v60  ;;  %v9182_v11 = vld [vmem:[%s13033_s4 + $0x30] sm:$0xff] }
 0x49b   : > { %v10606_v20 = vpop.permute.xlu0 %8497 }
 0x49c   : > { %v10608_v16 = vpop.permute.xlu1 %8507  ;;  %4092 = vxpose.xlu0.b32.cont [13/16] (narrow) %v10545_v52, 24  ;;  %v13181_v52 = vmov 0.0  }
 0x49d   : > { %8383 = vmatprep.mubr.msk.bf16.mxu0 %vm9274_vm12, %v13181_v52 }
 0x49f   : > { %v4630_v3 = vpop.permute.xlu0 %4629 }
 0x4a0   : > { %v4678_v45 = vpack.c.bf16 %v4630_v3, %v4630_v3  ;;  %v8513_v51 = vpop.permute.xlu1 %8512  ;;  %4093 = vxpose.xlu0.b32.cont [14/16] (narrow) %v10550_v49, 24 }
 0x4a1   : > { %v8515_v25 = vunpack.i.h.bf16 %v8513_v51  ;;  %v8514_v15 = vunpack.i.l.bf16 %v8513_v51 }
 0x4a2   : > { %v4730_v31 = vsel %vm2474_vm0, %v4678_v45, 0 }
 0x4a3   : > { %8378 = vmatpush3.bf16.msra.mxu0 %v4730_v31  ;;  %v4651_v57 = vsel %vm4649_vm8, %v8515_v25, %v4630_v3  ;;  %v4650_v42 = vsel %vm4649_vm8, %v8514_v15, %v8515_v25 }
 0x4a4   : > { %4094 = vxpose.xlu0.b32.cont [15/16] (narrow) %v10554_v61, 24  ;;  %v4677_v35 = vpack.c.bf16 %v4651_v57, %v4651_v57  ;;  %v4676_v22 = vpack.c.bf16 %v4650_v42, %v4650_v42  ;;  %8379 = vmatprep.subr.bf16.mxu0 %v13181_v52 }
 0x4a6   : > { %8340 = vmatprep.subr.msk.bf16.mxu1 %vm2474_vm0, %v4677_v35  ;;  %v4724_v49 = vsel %vm2474_vm0, %v4676_v22, 0 }
 0x4a7   : > { %4743 = vmatpush1.bf16.msra.mxu1 %v4724_v49  ;;  %4172 = vrot.lane.b32.xlu1 %v10567_v33, %s9269_s15 }
 0x4a8   : > { %4095 = vxpose.xlu0.b32.end [16/16] (narrow) %v10561_v10, 24  ;;  %v4305_v10 = vmul.f32 0.0033112583, %v4292_v53 }
 0x4aa   : > { %v4345_v33 = vmul.f32 %v4305_v10, %v4305_v10  ;;  %v4361_v31 = vsub.f32 %v10465_v54, %v4305_v10 }
 0x4ac   : > { %v4349_v38 = vsub.f32 %v4341_v0, %v4345_v33 }
 0x4ae   : > { %v4353_v21 = vmax.f32 %v4349_v38, 0.0 }
 0x4b0   : > { %v4369_v50 = vadd.f32 1e-05, %v4353_v21  ;;  %v9181_v21 = vld [vmem:[%s13033_s4 + $0x20] sm:$0xff] }
 0x4b2   : > { %9109 = vrsqrt.f32 %v4369_v50 }
 0x4c0   : > { %v4242_v14 = vpop.permute.xlu0 %4241 }
 0x4c1   : > { %v4255_v6 = vsel %vm4249_vm3, %v4240_v19, %v4242_v14 }
 0x4c9   : > { %v10622_v4 = vpop.trf.xlu1 }
 0x4cd   : > { %v4065_v59 = vpop.trf.xlu1 }
 0x4ce   : > { %4174 = vrot.lane.b32.xlu1 %v4065_v59, %s9269_s15 }
 0x4d1   : > { %v4066_v61 = vpop.trf.xlu1 }
 0x4d2   : > { %4243 = vrot.lane.b32.xlu0 %v4066_v61, %s9270_s16 }
 0x4e8   : > { %v10626_v29 = vpop.trf.xlu0 }
 0x4ec   : > { %v4097_v39 = vpop.trf.xlu0 }
 0x4ed   : > { %4176 = vrot.lane.b32.xlu0 %v4097_v39, %s9269_s15 }
 0x4f7   : > { %4112 = vxpose.xlu1.b32.start [1/6] (short) (narrow) %v10580_v23, 24  ;;  %v4254_v23 = vsel %vm4249_vm3, %v10563_v40, %v4240_v19  ;;  %v4359_v19 = vsub.f32 %v10461_v34, %v4305_v10  ;;  %v4360_v34 = vsub.f32 %v10467_v8, %v4305_v10  ;;  %v4098_v8 = vpop.trf.xlu0 }
 0x4fb   : > { %4113 = vxpose.xlu1.b32.cont [2/6] (short) (narrow) %v10586_v56, 24 }
 0x4ff   : > { %4114 = vxpose.xlu1.b32.cont [3/6] (short) (narrow) %v10590_v36, 24 }
 0x503   : > { %4115 = vxpose.xlu1.b32.cont [4/6] (short) (narrow) %v3749_v43, 24  ;;  %v10638_v43 = vadd.f32 %v4254_v23, %v4207_v48  ;;  %v9275_v48 = vmov 8   ;;  %v9184_v23 = vld [vmem:[%s13033_s4 + $0x18] sm:$0xff] }
 0x505   : > { %v4314_v40 = vmul.f32 %v10638_v43, %v10638_v43 }
 0x507   : > { %4116 = vxpose.xlu1.b32.cont [5/6] (short) (narrow) %v3754_v2, 24 }
 0x50b   : > { %4117 = vxpose.xlu1.b32.end [6/6] (short) (narrow) %v3757_v18, 24 }
 0x519   : > { %v4173_v1 = vpop.permute.xlu1 %4172 }
 0x51a   : > { %v4186_v56 = vsel %vm4180_vm2, %v4171_v63, %v4173_v1  ;;  %v4209_v36 = vadd.f32 %v4173_v1, %v10565_v27  ;;  %v9110_v63 = vpop.eup %9109  ;;  %v9183_v1 = vld [vmem:[%s13033_s4] sm:$0xff] }
 0x51b   : > { %v4208_v2 = vadd.f32 %v4186_v56, %v10506_v37  ;;  %v4379_v3 = vmul.f32 %v9110_v63, %v4359_v19  ;;  %v4381_v42 = vmul.f32 %v9110_v63, %v4361_v31  ;;  %v4380_v22 = vmul.f32 %v9110_v63, %v4360_v34 }
 0x51c   : > { %v10642_v18 = vadd.f32 %v4242_v14, %v4209_v36  ;;  %v9185_v36 = vld [vmem:[%s13033_s4 + $0x28] sm:$0xff]  ;;  %v8504_v31 = vunpack.i.l.bf16 %v10603_v7 }
 0x51d   : > { %v10644_v24 = vadd.f32 %v4255_v6, %v4208_v2  ;;  %v4407_v45 = vmul.f32 %v10494_v28, %v4379_v3  ;;  %v4409_v59 = vmul.f32 %v10533_v47, %v4381_v42  ;;  %v4408_v14 = vmul.f32 %v10499_v32, %v4380_v22 }
 0x51e   : > { %v4316_v60 = vmul.f32 %v10642_v18, %v10642_v18  ;;  %v4294_v15 = vsel %vm4283_vm4, %v10642_v18, 0.0 }
 0x51f   : > { %v4315_v55 = vmul.f32 %v10644_v24, %v10644_v24  ;;  %v4293_v51 = vadd.f32 %v10644_v24, %v10638_v43  ;;  %v4435_v25 = vadd.f32 %v10511_v44, %v4407_v45  ;;  %v4437_v39 = vadd.f32 %v10542_v41, %v4409_v59 }
 0x520   : > { %v4331_v53 = vsel %vm4283_vm4, %v4316_v60, 0.0  ;;  %v4436_v54 = vadd.f32 %v10514_v26, %v4408_v14  ;;  %v8510_v45 = vunpack.i.h.bf16 %v10608_v16 }
 0x521   : > { %v4330_v27 = vadd.f32 %v4315_v55, %v4314_v40  ;;  %v4295_v57 = vadd.f32 %v4294_v15, %v4293_v51  ;;  %v4459_v35 = vmul.f32 0.2, %v4435_v25  ;;  %vm4447_vm9 = vcmp.ge.f32.partialorder %v4435_v25, 0.0  ;;  %v9186_v55 = vld [vmem:[%s13033_s4 + $0x38] sm:$0xff] }
 0x522   : > { %v4461_v33 = vmul.f32 0.2, %v4437_v39  ;;  %vm4449_vm10 = vcmp.ge.f32.partialorder %v4437_v39, 0.0  ;;  %v4460_v0 = vmul.f32 0.2, %v4436_v54  ;;  %vm4448_vm11 = vcmp.ge.f32.partialorder %v4436_v54, 0.0 }
 0x523   : > { %v4332_v37 = vadd.f32 %v4331_v53, %v4330_v27  ;;  %v10662_v49 = vsel %vm4447_vm9, %v4435_v25, %v4459_v35  ;;  %v9187_v27 = vld [vmem:[%s13033_s4 + $0x8] sm:$0xff]  ;;  %v9188_v53 = vld [vmem:[%s13033_s4 + $0x10] sm:$0xff]  ;;  %v8509_v51 = vunpack.i.l.bf16 %v10608_v16  ;;  %v8505_v15 = vunpack.i.h.bf16 %v10603_v7 }
 0x524   : > { %v8526_v61 = vpack.i.bf16 %v10662_v49, %v10557_v46  ;;  %v10672_v10 = vsel %vm4449_vm10, %v4437_v39, %v4461_v33  ;;  %v10677_v38 = vsel %vm4448_vm11, %v4436_v54, %v4460_v0  ;;  %v8500_v54 = vunpack.i.h.bf16 %v10606_v20 }
 0x525   : > { %4333 = vadd.xlane.f32.xlu0 %v4332_v37  ;;  %v8521_v50 = vpack.i.bf16 %v10672_v10, %v10677_v38  ;;  %v8546_v56 = vpack.i.bf16 %v10677_v38, %v10662_v49  ;;  %v4605_v35 = vsel %vm4604_vm13, %v8509_v51, %v8510_v45  ;;  %v4560_v16 = vsel %vm4249_vm3, %v8504_v31, %v8505_v15 }
 0x526   : > { %v4673_v39 = vpack.c.bf16 %v4605_v35, %v4560_v16  ;;  %v8499_v33 = vunpack.i.l.bf16 %v10606_v20  ;;  %v9103_v20 = vld [vmem:[%s13031_s2] sm:$0xff]  }
 0x532   : > { %4296 = vadd.xlane.f32.xlu1 %v4295_v57 }
 0x53b   : > { %8527 = vrot.lane.b32.xlu0 %v8526_v61, %s9270_s16 }
 0x53f   : > { %8537 = vrot.lane.b32.xlu0 %v8526_v61, %s9271_s26 }
 0x540   : > { %v10705_v2 = vpop.permute.xlu1 %4174 }
 0x543   : > { %4635 = vrot.lane.b32.xlu0 %v10672_v10, %s9272_s6  ;;  %4245 = vrot.lane.b32.xlu1 %v4098_v8, %s9270_s16 }
 0x544   : > { %v10720_v63 = vpop.permute.xlu0 %4243 }
 0x547   : > { %6668 = vperm.xlu0 %8495, %v9181_v21   ;;  %8517 = vrot.lane.b32.xlu1 %v8526_v61, %s9269_s15 }
 0x54b   : > { %6676 = vperm.xlu0 %8495, %v9182_v11   ;;  %8522 = vrot.lane.b32.xlu1 %v8521_v50, %s9269_s15 }
 0x54f   : > { %8532 = vrot.lane.b32.xlu1 %v8521_v50, %s9270_s16  ;;  %8551 = vset.pattern.permute.xlu0 %v9275_v48 }
 0x550   : > { %6845 = vperm.xlu0 %8551, %v9183_v1  }
 0x553   : > { %8542 = vrot.lane.b32.xlu1 %v8521_v50, %s9271_s26  ;;  %v4516_v50 = vsel %vm4180_vm2, %v8499_v33, %v8500_v54 }
 0x554   : > { %6857 = vperm.xlu0 %8551, %v9184_v23  }
 0x557   : > { %8547 = vrot.lane.b32.xlu1 %v8546_v56, %s9272_s6 }
 0x558   : > { %6865 = vperm.xlu0 %8551, %v9185_v36  }
 0x55f   : > { %v10722_v37 = vpop.permute.xlu0 %4176 }
 0x573   : > { %v10707_v6 = vpop.trf.xlu1 }
 0x577   : > { %v4129_v60 = vpop.trf.xlu1 }
 0x578   : > { %4178 = vrot.lane.b32.xlu1 %v4129_v60, %s9269_s15 }
 0x57b   : > { %v4130_v40 = vpop.trf.xlu1 }
 0x57c   : > { %6664 = vperm.xlu1 %8494, %v9184_v23   ;;  %4247 = vrot.lane.b32.xlu0 %v4130_v40, %s9270_s16 }
 0x580   : > { %6672 = vperm.xlu1 %8494, %v9185_v36   ;;  %6873 = vperm.xlu0 %8551, %v9186_v55   ;;  %v4670_v36 = vpack.c.bf16 %v4516_v50, %v10528_v62 }
 0x584   : > { %6680 = vperm.xlu1 %8494, %v9186_v55  }
 0x588   : > { %8552 = vset.pattern.permute.xlu1 %v9275_v48 }
 0x589   : > { %6849 = vperm.xlu1 %8552, %v9187_v27  }
 0x58d   : > { %6853 = vperm.xlu1 %8552, %v9188_v53  }
 0x591   : > { %6861 = vperm.xlu1 %8552, %v9181_v21  }
 0x595   : > { %6869 = vperm.xlu1 %8552, %v9182_v11  }
 0x5ae   : > { %v10724_v19 = vpop.xlane.xlu0 %4333 }
 0x5b2   : > { %v10726_v3 = vpop.permute.xlu0 %8527 }
 0x5b3   : > { %v8529_v25 = vunpack.i.l.bf16 %v10726_v3 }
 0x5b5   : > { %v4561_v22 = vsel %vm4249_vm3, %v8505_v15, %v8529_v25 }
 0x5b6   : > { %v10733_v57 = vpop.permute.xlu0 %8537 }
 0x5b7   : > { %v8539_v42 = vunpack.i.l.bf16 %v10733_v57  ;;  %v8540_v33 = vunpack.i.h.bf16 %v10733_v57 }
 0x5b9   : > { %v4675_v34 = vpack.c.bf16 %v8539_v42, %v8529_v25  ;;  %v4606_v59 = vsel %vm4604_vm13, %v8510_v45, %v8539_v42 }
 0x5ba   : > { %v4674_v61 = vpack.c.bf16 %v4606_v59, %v4561_v22  ;;  %v4636_v0 = vpop.permute.xlu0 %4635 }
 0x5bb   : > { %8380 = vmatpush3.bf16.msra.mxu0 %v4675_v34  ;;  %v4297_v14 = vpop.xlane.xlu1 %4296  ;;  %v4687_v1 = vpack.c.bf16 %v4636_v0, %v4636_v0  ;;  %v4342_v34 = vmul.f32 0.0033112583, %v10724_v19 }
 0x5bc   : > { %4744 = vmatprep.subr.bf16.mxu1 %v4674_v61  ;;  %8381 = vmatprep.subr.bf16.mxu0 %v13181_v52 }
 0x5bd   : > { %4745 = vmatpush1.bf16.msra.mxu1 %v4673_v39  ;;  %v4831_v60 = vsel %vm2474_vm0, %v4687_v1, 0 }
 0x5bf   : > { %v10741_v7 = vpop.permute.xlu1 %4245 }
 0x5c2   : > { %v10768_v27 = vpop.permute.xlu0 %6668 }
 0x5c3   : > { %v10745_v8 = vpop.permute.xlu1 %8517  ;;  %13182 = vst [vmem:[#allocation63_spill] sm:$0xff] %v10768_v27 }
 0x5c4   : > { %v8519_v21 = vunpack.i.l.bf16 %v10745_v8 }
 0x5c6   : > { %v4672_v11 = vpack.c.bf16 %v8519_v21, %v10557_v46  ;;  %v4517_v48 = vsel %vm4180_vm2, %v8500_v54, %v8519_v21  ;;  %v9104_v54 = vld [vmem:[%s13031_s2 + $0x8] sm:$0xff]   ;;  %v10784_v50 = vpop.permute.xlu0 %6676 }
 0x5c7   : > { %v10751_v23 = vpop.permute.xlu1 %8522  ;;  %v4671_v56 = vpack.c.bf16 %v4517_v48, %v10530_v17  ;;  %v10766_v17 = vmul.f32 0.0033112583, %v4297_v14  ;;  %13183 = vst [vmem:[#allocation64_spill] sm:$0xff] %v10784_v50 }
 0x5c8   : > { %8382 = vmatpush3.bf16.msra.mxu0 %v4672_v11  ;;  %v8525_v53 = vunpack.i.h.bf16 %v10751_v23  ;;  %v8524_v16 = vunpack.i.l.bf16 %v10751_v23 }
 0x5c9   : > { %4746 = vmatprep.subr.bf16.mxu1 %v4671_v56  ;;  %8387 = vmatprep.subr.bf16.mxu0 %v13181_v52  ;;  %v4346_v15 = vmul.f32 %v10766_v17, %v10766_v17  ;;  %v8520_v56 = vunpack.i.h.bf16 %v10745_v8 }
 0x5ca   : > { %4747 = vmatpush1.bf16.msra.mxu1 %v4670_v36  ;;  %v4681_v22 = vpack.c.bf16 %v8525_v53, %v10672_v10  ;;  %v4519_v57 = vsel %vm4180_vm2, %v8524_v16, %v8525_v53  ;;  %v4187_v53 = vsel %vm4180_vm2, %v10705_v2, %v10722_v37 }
 0x5cb   : > { %v8533_v46 = vpop.permute.xlu1 %8532  ;;  %8384 = vmatmul.mubr.msk.bf16.vlgmr.msra.gmra.mxu0 %vm4719_vm14, %v9103_v20  ;;  %v4350_v21 = vsub.f32 %v4342_v34, %v4346_v15  ;;  %v10796_v36 = vpop.permute.xlu0 %6845 }
 0x5cc   : > { %8388 = vmatpush3.bf16.msra.mxu0 %v4831_v60  ;;  %8393 = vmatprep.mubr.msk.bf16.mxu0 %vm9274_vm12, %v13181_v52  ;;  %v8535_v40 = vunpack.i.h.bf16 %v8533_v46  ;;  %v8534_v42 = vunpack.i.l.bf16 %v8533_v46  ;;  %v4518_v46 = vsel %vm4180_vm2, %v8520_v56, %v8524_v16  ;;  %v4680_v60 = vpack.c.bf16 %v4519_v57, %v10677_v38 }
 0x5cd   : > { %8341 = vmatmul.mubr.msk.bf16.vlgmr.msra.gmra.mxu1 %vm4719_vm14, %v9103_v20  ;;  %8389 = vmatprep.subr.bf16.mxu0 %v13181_v52  ;;  %v4354_v23 = vmax.f32 %v4350_v21, 0.0 }
 0x5ce   : > { %4865 = vmatprep.mubr.bf16.mxu1 %v13177_v58  ;;  %v4563_v19 = vsel %vm4249_vm3, %v8534_v42, %v8535_v40 }
 0x5cf   : > { %v8543_v62 = vpop.permute.xlu1 %8542 }
 0x5d0   : > { %v8545_v55 = vunpack.i.h.bf16 %v8543_v62  ;;  %v8544_v51 = vunpack.i.l.bf16 %v8543_v62  ;;  %v4370_v62 = vadd.f32 1e-05, %v4354_v23 }
 0x5d2   : > { %v4684_v45 = vpack.c.bf16 %v8545_v55, %v8535_v40  ;;  %v4608_v39 = vsel %vm4604_vm13, %v8544_v51, %v8545_v55  ;;  %v4607_v11 = vsel %vm4604_vm13, %v8540_v33, %v8544_v51  ;;  %v4679_v40 = vpack.c.bf16 %v4518_v46, %v10662_v49  ;;  %v10803_v55 = vpop.permute.xlu0 %6857 }
 0x5d3   : > { %v8548_v25 = vpop.permute.xlu1 %8547  ;;  %v4683_v1 = vpack.c.bf16 %v4608_v39, %v4563_v19  ;;  %13184 = vst [vmem:[#allocation65_spill] sm:$0xff] %v10803_v55  ;;  %9111 = vrsqrt.f32 %v4370_v62  ;;  %v4210_v51 = vadd.f32 %v4187_v53, %v10622_v4 }
 0x5d4   : > { %v8550_v31 = vunpack.i.h.bf16 %v8548_v25  ;;  %8390 = vmatpush3.bf16.msra.mxu0 %v4684_v45  ;;  %v8549_v35 = vunpack.i.l.bf16 %v8548_v25  ;;  %v4256_v45 = vsel %vm4249_vm3, %v10720_v63, %v10741_v7 }
 0x5d5   : > { %8391 = vmatprep.subr.bf16.mxu0 %v13181_v52  ;;  %v10819_v15 = vadd.f32 %v4256_v45, %v4210_v51 }
 0x5d6   : > { %v4653_v59 = vsel %vm4649_vm8, %v8550_v31, %v4636_v0  ;;  %v4652_v14 = vsel %vm4649_vm8, %v8549_v35, %v8550_v31  ;;  %v8530_v0 = vunpack.i.h.bf16 %v10726_v3  ;;  %v10807_v8 = vpop.permute.xlu0 %6865 }
 0x5d7   : > { %v4686_v61 = vpack.c.bf16 %v4653_v59, %v4653_v59  ;;  %v4685_v10 = vpack.c.bf16 %v4652_v14, %v4652_v14  ;;  %13185 = vst [vmem:[#allocation66_spill] sm:$0xff] %v10807_v8 }
 0x5d8   : > { %8392 = vmatpush3.bf16.msra.mxu0 %v4681_v22  ;;  %v4562_v20 = vsel %vm4249_vm3, %v8530_v0, %v8534_v42 }
 0x5d9   : > { %8344 = vmatprep.subr.msk.bf16.mxu1 %vm2474_vm0, %v4686_v61  ;;  %8397 = vmatprep.subr.bf16.mxu0 %v13181_v52  ;;  %v4825_v48 = vsel %vm2474_vm0, %v4685_v10, 0  ;;  %v4682_v3 = vpack.c.bf16 %v4607_v11, %v4562_v20 }
 0x5da   : > { %4844 = vmatpush1.bf16.msra.mxu1 %v4825_v48 }
 0x5db   : > { %8394 = vmatmul.mubr.msk.bf16.vlgmr.msra.gmra.mxu0 %vm4719_vm14, %v9104_v54  ;;  %4845 = vmatprep.subr.bf16.mxu1 %v4683_v1  ;;  %v4364_v1 = vsub.f32 %v10642_v18, %v10766_v17 }
 0x5dc   : > { %8403 = vmatprep.mubr.msk.bf16.mxu0 %vm9274_vm12, %v13181_v52 }
 0x5de   : > { %4846 = vmatpush1.bf16.msra.mxu1 %v4682_v3 }
 0x5df   : > { %4847 = vmatprep.subr.bf16.mxu1 %v4680_v60 }
 0x5e0   : > { %v9112_v63 = vpop.eup %9111 }
 0x5e1   : > { %v4384_v57 = vmul.f32 %v9112_v63, %v4364_v1 }
 0x5e2   : > { %4848 = vmatpush1.bf16.msra.mxu1 %v4679_v40 }
 0x5e3   : > { %v4412_v56 = vmul.f32 %v10533_v47, %v4384_v57 }
 0x5e5   : > { %8345 = vmatmul.mubr.msk.bf16.vlgmr.msra.gmra.mxu1 %vm4719_vm14, %v9104_v54  ;;  %v4440_v20 = vadd.f32 %v10542_v41, %v4412_v56 }
 0x5e6   : > { %4966 = vmatprep.mubr.bf16.mxu1 %v13177_v58 }
 0x5e7   : > { %v4464_v3 = vmul.f32 0.2, %v4440_v20 }
 0x5ea   : > { %v4179_v38 = vpop.permute.xlu1 %4178 }
 0x5eb   : > { %v4188_v49 = vsel %vm4180_vm2, %v10722_v37, %v4179_v38  ;;  %v4212_v25 = vadd.f32 %v4179_v38, %v10707_v6  ;;  %v4362_v37 = vsub.f32 %v10638_v43, %v10766_v17  ;;  %v4363_v6 = vsub.f32 %v10644_v24, %v10766_v17 }
 0x5ec   : > { %v4211_v31 = vadd.f32 %v4188_v49, %v10626_v29 }
 0x5ed   : > { %v4382_v16 = vmul.f32 %v9112_v63, %v4362_v37  ;;  %v4383_v43 = vmul.f32 %v9112_v63, %v4363_v6 }
 0x5ee   : > { %v4248_v42 = vpop.permute.xlu0 %4247 }
 0x5ef   : > { %v4257_v2 = vsel %vm4249_vm3, %v10741_v7, %v4248_v42  ;;  %v10824_v35 = vadd.f32 %v4248_v42, %v4212_v25  ;;  %v4317_v7 = vmul.f32 %v10819_v15, %v10819_v15  ;;  %v4410_v54 = vmul.f32 %v10494_v28, %v4382_v16 }
 0x5f0   : > { %v10826_v34 = vadd.f32 %v4257_v2, %v4211_v31  ;;  %v4411_v33 = vmul.f32 %v10499_v32, %v4383_v43 }
 0x5f1   : > { %v4319_v4 = vmul.f32 %v10824_v35, %v10824_v35  ;;  %v4299_v59 = vsel %vm4283_vm4, %v10824_v35, 0.0  ;;  %v4438_v21 = vadd.f32 %v10511_v44, %v4410_v54 }
 0x5f2   : > { %v4298_v29 = vadd.f32 %v10826_v34, %v10819_v15  ;;  %v4318_v22 = vmul.f32 %v10826_v34, %v10826_v34  ;;  %v4439_v10 = vadd.f32 %v10514_v26, %v4411_v33 }
 0x5f3   : > { %v4336_v39 = vsel %vm4283_vm4, %v4319_v4, 0.0  ;;  %v4462_v19 = vmul.f32 0.2, %v4438_v21  ;;  %vm4450_vm15 = vcmp.ge.f32.partialorder %v4438_v21, 0.0  ;;  %vm4452_vm4 = vcmp.ge.f32.partialorder %v4440_v20, 0.0 }
 0x5f4   : > { %v4300_v61 = vadd.f32 %v4299_v59, %v4298_v29  ;;  %v4335_v14 = vadd.f32 %v4318_v22, %v4317_v7  ;;  %v4463_v0 = vmul.f32 0.2, %v4439_v10  ;;  %vm4451_vm1 = vcmp.ge.f32.partialorder %v4439_v10, 0.0 }
 0x5f5   : > { %v10847_v11 = vsel %vm4450_vm15, %v4438_v21, %v4462_v19  ;;  %v10861_v46 = vsel %vm4452_vm4, %v4440_v20, %v4464_v3 }
 0x5f6   : > { %4301 = vadd.xlane.f32.xlu0 %v4300_v61  ;;  %v4337_v24 = vadd.f32 %v4336_v39, %v4335_v14  ;;  %v10849_v48 = vsel %vm4451_vm1, %v4439_v10, %v4463_v0 }
 0x5f7   : > { %v8568_v23 = vpack.i.bf16 %v10849_v48, %v10847_v11  ;;  %v10865_v18 = vpop.permute.xlu1 %6664 }
 0x5f8   : > { %4338 = vadd.xlane.f32.xlu1 %v4337_v24  ;;  %13186 = vst [vmem:[#allocation67_spill] sm:$0xff] %v10865_v18 }
 0x5fb   : > { %v10867_v17 = vpop.permute.xlu1 %6672  ;;  %v10877_v38 = vpop.permute.xlu0 %6873 }
 0x5fc   : > { %13187 = vst [vmem:[#allocation68_spill] sm:$0xff] %v10867_v17  ;;  %13191 = vst [vmem:[#allocation72_spill] sm:$0xff] %v10877_v38  ;;  %v13212_v17 = vld [vmem:[#allocation16_spill] sm:$0xff] }
 0x5ff   : > { %v10869_v60 = vpop.permute.xlu1 %6680 }
 0x600   : > { %13188 = vst [vmem:[#allocation69_spill] sm:$0xff] %v10869_v60 }
 0x604   : > { %v10871_v62 = vpop.permute.xlu1 %6849 }
 0x608   : > { %v10873_v40 = vpop.permute.xlu1 %6853 }
 0x609   : > { %8569 = vrot.lane.b32.xlu1 %v8568_v23, %s9272_s6  ;;  %13189 = vst [vmem:[#allocation70_spill] sm:$0xff] %v10873_v40 }
 0x60c   : > { %8554 = vrot.lane.b32.xlu0 %v8568_v23, %s9269_s15  ;;  %v10875_v53 = vpop.permute.xlu1 %6861 }
 0x60d   : > { %13190 = vst [vmem:[#allocation71_spill] sm:$0xff] %v10875_v53 }
 0x610   : > { %8559 = vrot.lane.b32.xlu0 %v8568_v23, %s9270_s16  ;;  %v10879_v45 = vpop.permute.xlu1 %6869 }
 0x611   : > { %13192 = vst [vmem:[#allocation73_spill] sm:$0xff] %v10879_v45 }
 0x614   : > { %8564 = vrot.lane.b32.xlu0 %v8568_v23, %s9271_s26 }
 0x618   : > { %4641 = vrot.lane.b32.xlu0 %v10861_v46, %s9272_s6 }
 0x67f   : > { %v4302_v49 = vpop.xlane.xlu0 %4301 }
 0x680   : > { %v10881_v51 = vmul.f32 0.0033112583, %v4302_v49 }
 0x681   : > { %v4339_v25 = vpop.xlane.xlu1 %4338 }
 0x682   : > { %v4347_v31 = vmul.f32 %v10881_v51, %v10881_v51  ;;  %v4343_v42 = vmul.f32 0.0033112583, %v4339_v25 }
 0x683   : > { %v10885_v2 = vpop.permute.xlu0 %8554 }
 0x684   : > { %v4351_v63 = vsub.f32 %v4343_v42, %v4347_v31 }
 0x685   : > { %v8570_v37 = vpop.permute.xlu1 %8569 }
 0x686   : > { %v4355_v4 = vmax.f32 %v4351_v63, 0.0  ;;  %v8572_v29 = vunpack.i.h.bf16 %v8570_v37  ;;  %v8571_v7 = vunpack.i.l.bf16 %v8570_v37 }
 0x687   : > { %v10887_v6 = vpop.permute.xlu0 %8559 }
 0x688   : > { %v4371_v22 = vadd.f32 1e-05, %v4355_v4  ;;  %v4654_v43 = vsel %vm4649_vm8, %v8571_v7, %v8572_v29 }
 0x689   : > { %v4694_v21 = vpack.c.bf16 %v4654_v43, %v4654_v43 }
 0x68a   : > { %9113 = vrsqrt.f32 %v4371_v22 }
 0x68b   : > { %v10889_v59 = vpop.permute.xlu0 %8564  ;;  %v4809_v16 = vpop.f32.mrf.mxu0  ;;  %v4926_v37 = vsel %vm2474_vm0, %v4694_v21, 0 }
 0x68c   : > { %v10893_v61 = vadd.f32 %v9703_v5, %v4809_v16 }
 0x68d   : > { %v4766_v14 = vpop.f32.mrf.mxu1  ;;  %v8385_v39 = vpop.f32.mrf.mxu0 }
 0x68e   : > { %v10896_v24 = vadd.f32 %v9703_v5, %v4766_v14  ;;  %v5235_v57 = vmul.f32 %v10893_v61, %v10893_v61  ;;  %v5185_v4 = vsel %vm5184_vm5, %v10893_v61, 0.0 }
 0x68f   : > { %v4642_v54 = vpop.permute.xlu0 %4641  ;;  %v4768_v33 = vpop.f32.mrf.mxu1 }
 0x690   : > { %v4655_v10 = vsel %vm4649_vm8, %v8572_v29, %v4642_v54  ;;  %v4696_v19 = vpack.c.bf16 %v4642_v54, %v4642_v54  ;;  %v10900_v0 = vadd.f32 %v9703_v5, %v4768_v33  ;;  %v4812_v1 = vpop.f32.mrf.mxu0  ;;  %v5233_v23 = vmul.f32 %v10896_v24, %v10896_v24 }
 0x691   : > { %v4695_v56 = vpack.c.bf16 %v4655_v10, %v4655_v10  ;;  %v10907_v20 = vadd.f32 %v9766_v12, %v4812_v1  ;;  %v4770_v3 = vpop.f32.mrf.mxu1  ;;  %v5258_v43 = vsel %vm5184_vm5, %v5235_v57, 0.0  ;;  %v4365_v33 = vsub.f32 %v10819_v15, %v10881_v51 }
 0x692   : > { %v5183_v49 = vadd.f32 %v10900_v0, %v10896_v24  ;;  %v5234_v5 = vmul.f32 %v10900_v0, %v10900_v0  ;;  %v10914_v25 = vadd.f32 %v9766_v12, %v4770_v3  ;;  %v4932_v31 = vsel %vm2474_vm0, %v4696_v19, 0  ;;  %v8386_v42 = vpop.f32.mrf.mxu0 }
 0x693   : > { %v4772_v63 = vpop.f32.mrf.mxu1  ;;  %8348 = vmatprep.subr.msk.bf16.mxu1 %vm2474_vm0, %v4695_v56  ;;  %8398 = vmatpush3.bf16.msra.mxu0 %v4932_v31  ;;  %v5238_v16 = vmul.f32 %v10907_v20, %v10907_v20  ;;  %v5190_v1 = vsel %vm5184_vm5, %v10907_v20, 0.0  ;;  %v4366_v3 = vsub.f32 %v10826_v34, %v10881_v51 }
 0x694   : > { %v10922_v29 = vadd.f32 %v9766_v12, %v4772_v63  ;;  %4945 = vmatpush1.bf16.msra.mxu1 %v4926_v37  ;;  %v5186_v7 = vadd.f32 %v5185_v4, %v5183_v49  ;;  %v5257_v22 = vadd.f32 %v5234_v5, %v5233_v23  ;;  %8399 = vmatprep.subr.bf16.mxu0 %v13181_v52 }
 0x695   : > { %v5236_v14 = vmul.f32 %v10914_v25, %v10914_v25  ;;  %v5263_v19 = vsel %vm5184_vm5, %v5238_v16, 0.0  ;;  %v4367_v49 = vsub.f32 %v10824_v35, %v10881_v51 }
 0x696   : > { %v5189_v39 = vadd.f32 %v10922_v29, %v10914_v25  ;;  %v5237_v12 = vmul.f32 %v10922_v29, %v10922_v29  ;;  %5187 = vadd.xlane.f32.xlu0 %v5186_v7  ;;  %v5259_v54 = vadd.f32 %v5258_v43, %v5257_v22 }
 0x697   : > { %v9114_v21 = vpop.eup %9113 }
 0x698   : > { %5260 = vadd.xlane.f32.xlu1 %v5259_v54  ;;  %v5262_v10 = vadd.f32 %v5237_v12, %v5236_v14  ;;  %v4385_v57 = vmul.f32 %v9114_v21, %v4365_v33  ;;  %v5191_v56 = vadd.f32 %v5190_v1, %v5189_v39  ;;  %v4386_v42 = vmul.f32 %v9114_v21, %v4366_v3 }
 0x699   : > { %v4387_v63 = vmul.f32 %v9114_v21, %v4367_v49 }
 0x69a   : > { %v5264_v23 = vadd.f32 %v5263_v19, %v5262_v10  ;;  %v4413_v15 = vmul.f32 %v10494_v28, %v4385_v57  ;;  %v4414_v7 = vmul.f32 %v10499_v32, %v4386_v42 }
 0x69b   : > { %v4910_v5 = vpop.f32.mrf.mxu0  ;;  %v4415_v22 = vmul.f32 %v10533_v47, %v4387_v63 }
 0x69c   : > { %5265 = vadd.xlane.f32.xlu0 %v5264_v23  ;;  %5192 = vadd.xlane.f32.xlu1 %v5191_v56  ;;  %v4441_v4 = vadd.f32 %v10511_v44, %v4413_v15  ;;  %v4442_v35 = vadd.f32 %v10514_v26, %v4414_v7  ;;  %v10977_v10 = vadd.f32 %v9711_v9, %v4910_v5 }
 0x69d   : > { %v8395_v31 = vpop.f32.mrf.mxu0  ;;  %v4443_v51 = vadd.f32 %v10542_v41, %v4415_v22 }
 0x69e   : > { %v4465_v34 = vmul.f32 0.2, %v4441_v4  ;;  %vm4453_vm6 = vcmp.ge.f32.partialorder %v4441_v4, 0.0  ;;  %v4466_v28 = vmul.f32 0.2, %v4442_v35  ;;  %vm4454_vm7 = vcmp.ge.f32.partialorder %v4442_v35, 0.0 }
 0x69f   : > { %v4913_v37 = vpop.f32.mrf.mxu0  ;;  %v4467_v14 = vmul.f32 0.2, %v4443_v51  ;;  %vm4455_vm9 = vcmp.ge.f32.partialorder %v4443_v51, 0.0  ;;  %v5241_v23 = vmul.f32 %v10977_v10, %v10977_v10  ;;  %v5195_v31 = vsel %vm5184_vm5, %v10977_v10, 0.0 }
 0x6a0   : > { %v10949_v43 = vsel %vm4453_vm6, %v4441_v4, %v4465_v34  ;;  %v10954_v32 = vsel %vm4454_vm7, %v4442_v35, %v4466_v28  ;;  %v10994_v5 = vadd.f32 %v9717_v13, %v4913_v37 }
 0x6a1   : > { %v8396_v16 = vpop.f32.mrf.mxu0  ;;  %v8573_v44 = vpack.i.bf16 %v10949_v43, %v10861_v46  ;;  %v10956_v47 = vsel %vm4455_vm9, %v4443_v51, %v4467_v14  ;;  %v8603_v41 = vpack.i.bf16 %v10954_v32, %v10949_v43  ;;  %v5268_v15 = vsel %vm5184_vm5, %v5241_v23, 0.0 }
 0x6a2   : > { %v8578_v26 = vpack.i.bf16 %v10956_v47, %v10954_v32  ;;  %v5200_v37 = vsel %vm5184_vm5, %v10994_v5, 0.0 }
 0x6a5   : > { %v4867_v39 = vpop.f32.mrf.mxu1 }
 0x6a6   : > { %v10974_v21 = vadd.f32 %v9711_v9, %v4867_v39 }
 0x6a7   : > { %v4869_v12 = vpop.f32.mrf.mxu1 }
 0x6a8   : > { %v10971_v54 = vadd.f32 %v9711_v9, %v4869_v12  ;;  %v5239_v57 = vmul.f32 %v10974_v21, %v10974_v21 }
 0x6a9   : > { %v4871_v33 = vpop.f32.mrf.mxu1 }
 0x6aa   : > { %v5240_v19 = vmul.f32 %v10971_v54, %v10971_v54  ;;  %v5194_v56 = vadd.f32 %v10971_v54, %v10974_v21  ;;  %v10991_v9 = vadd.f32 %v9717_v13, %v4871_v33 }
 0x6ab   : > { %v4873_v1 = vpop.f32.mrf.mxu1 }
 0x6ac   : > { %v10988_v3 = vadd.f32 %v9717_v13, %v4873_v1  ;;  %v5267_v49 = vadd.f32 %v5240_v19, %v5239_v57  ;;  %v5196_v7 = vadd.f32 %v5195_v31, %v5194_v56  ;;  %v5242_v22 = vmul.f32 %v10991_v9, %v10991_v9 }
 0x6ad   : > { %8574 = vrot.lane.b32.xlu1 %v8573_v44, %s9269_s15  ;;  %v5244_v13 = vmul.f32 %v10994_v5, %v10994_v5  ;;  %v8557_v56 = vunpack.i.h.bf16 %v10885_v2 }
 0x6ae   : > { %v5199_v42 = vadd.f32 %v10988_v3, %v10991_v9  ;;  %v5243_v63 = vmul.f32 %v10988_v3, %v10988_v3  ;;  %v5269_v4 = vadd.f32 %v5268_v15, %v5267_v49 }
 0x6af   : > { %v5273_v35 = vsel %vm5184_vm5, %v5244_v13, 0.0  ;;  %v8561_v13 = vunpack.i.l.bf16 %v10887_v6 }
 0x6b0   : > { %v5201_v16 = vadd.f32 %v5200_v37, %v5199_v42  ;;  %v5272_v34 = vadd.f32 %v5243_v63, %v5242_v22  ;;  %v8556_v42 = vunpack.i.l.bf16 %v10885_v2  ;;  %v8567_v63 = vunpack.i.h.bf16 %v10889_v59 }
 0x6b1   : > { %8584 = vrot.lane.b32.xlu1 %v8573_v44, %s9270_s16  ;;  %v8562_v22 = vunpack.i.h.bf16 %v10887_v6 }
 0x6b2   : > { %8579 = vrot.lane.b32.xlu0 %v8578_v26, %s9269_s15  ;;  %v5274_v51 = vadd.f32 %v5273_v35, %v5272_v34  ;;  %v11033_v35 = vsel %vm4180_vm2, %v8556_v42, %v8557_v56 }
 0x6b3   : > { %v4564_v6 = vsel %vm4249_vm3, %v8561_v13, %v8562_v22 }
 0x6b5   : > { %8594 = vrot.lane.b32.xlu1 %v8573_v44, %s9271_s26 }
 0x6b6   : > { %8589 = vrot.lane.b32.xlu0 %v8578_v26, %s9270_s16 }
 0x6b9   : > { %8604 = vrot.lane.b32.xlu1 %v8603_v41, %s9272_s6 }
 0x6ba   : > { %8599 = vrot.lane.b32.xlu0 %v8578_v26, %s9271_s26 }
 0x6be   : > { %4647 = vrot.lane.b32.xlu0 %v10956_v47, %s9272_s6 }
 0x6dd   : > { %5270 = vadd.xlane.f32.xlu1 %v5269_v4  ;;  %5197 = vadd.xlane.f32.xlu0 %v5196_v7  ;;  %v8566_v4 = vunpack.i.l.bf16 %v10889_v59  ;;  %v7922_v59 = vld [vmem:[%s13032_s3 + $0x2] ss:$8 sm:$0x7] }
 0x6de   : > { %v11054_v42 = vrot.slane %v7922_v59, %v10522_v30 }
 0x6df   : > { %v4609_v2 = vsel %vm4604_vm13, %v8566_v4, %v8567_v63 }
 0x6e1   : > { %5202 = vadd.xlane.f32.xlu0 %v5201_v16 }
 0x6e5   : > { %5275 = vadd.xlane.f32.xlu0 %v5274_v51 }
 0x71f   : > { %v5188_v28 = vpop.xlane.xlu0 %5187 }
 0x720   : > { %v11010_v14 = vmul.f32 0.0033557047, %v5188_v28  ;;  %v7923_v28 = vld [vmem:[%s13032_s3 + $0x3] ss:$8 sm:$0x7] }
 0x721   : > { %v5261_v44 = vpop.xlane.xlu1 %5260 }
 0x722   : > { %v5297_v26 = vmul.f32 0.0033557047, %v5261_v44  ;;  %v5305_v41 = vmul.f32 %v11010_v14, %v11010_v14 }
 0x724   : > { %v5313_v39 = vsub.f32 %v5297_v26, %v5305_v41  ;;  %v13193_v41 = vld [vmem:[#allocation60_spill] sm:$0xff] }
 0x725   : > { %v5266_v12 = vpop.xlane.xlu0 %5265  ;;  %v5193_v33 = vpop.xlane.xlu1 %5192 }
 0x726   : > { %v11014_v19 = vmul.f32 0.0033557047, %v5193_v33  ;;  %v5321_v1 = vmax.f32 %v5313_v39, 0.0  ;;  %v5298_v57 = vmul.f32 0.0033557047, %v5266_v12  ;;  %v11046_v39 = vrot.slane %v7922_v59, %v13193_v41  ;;  %v13194_v12 = vld [vmem:[#allocation61_spill] sm:$0xff] }
 0x727   : > { %v11049_v33 = vrot.slane %v7922_v59, %v13194_v12  ;;  %v11060_v13 = vrot.slane %v7923_v28, %v13194_v12 }
 0x728   : > { %v5306_v23 = vmul.f32 %v11014_v19, %v11014_v19  ;;  %v5353_v49 = vadd.f32 1e-05, %v5321_v1  ;;  %v5332_v45 = vsub.f32 %v10914_v25, %v11014_v19 }
 0x729   : > { %v11019_v15 = vpop.permute.xlu0 %8579  ;;  %v11021_v31 = vpop.permute.xlu1 %8574  ;;  %13195 = vst [vmem:[#allocation74_spill] sm:$0xff] %v11060_v13 }
 0x72a   : > { %v5314_v7 = vsub.f32 %v5298_v57, %v5306_v23  ;;  %9115 = vrsqrt.f32 %v5353_v49  ;;  %v8576_v44 = vunpack.i.l.bf16 %v11021_v31  ;;  %v4691_v23 = vpack.c.bf16 %v4609_v2, %v4564_v6 }
 0x72b   : > { %v4688_v49 = vpack.c.bf16 %v11033_v35, %v10847_v11  ;;  %v5331_v2 = vsub.f32 %v10893_v61, %v11010_v14  ;;  %v11069_v11 = vrot.slane %v7923_v28, %v10522_v30 }
 0x72c   : > { %v5322_v37 = vmax.f32 %v5314_v7, 0.0  ;;  %v11057_v7 = vrot.slane %v7923_v28, %v13193_v41  ;;  %v4521_v38 = vsel %vm4180_vm2, %v8557_v56, %v8576_v44  ;;  %v4690_v56 = vpack.c.bf16 %v8576_v44, %v10861_v46  ;;  %v9105_v46 = vld [vmem:[%s13031_s2 + $0x10] sm:$0xff]  }
 0x72d   : > { %v11028_v16 = vpop.permute.xlu0 %8589  ;;  %v11030_v34 = vpop.permute.xlu1 %8584  ;;  %v8577_v44 = vunpack.i.h.bf16 %v11021_v31 }
 0x72e   : > { %v5354_v51 = vadd.f32 1e-05, %v5322_v37  ;;  %v8586_v26 = vunpack.i.l.bf16 %v11030_v34  ;;  %v5329_v37 = vsub.f32 %v10896_v24, %v11010_v14  ;;  %v5333_v24 = vsub.f32 %v10922_v29, %v11014_v19 }
 0x72f   : > { %v8592_v25 = vunpack.i.h.bf16 %v11028_v16  ;;  %v4689_v29 = vpack.c.bf16 %v4521_v38, %v10849_v48 }
 0x730   : > { %9117 = vrsqrt.f32 %v5354_v51  ;;  %v5330_v51 = vsub.f32 %v10900_v0, %v11010_v14  ;;  %v4565_v59 = vsel %vm4249_vm3, %v8562_v22, %v8586_v26  ;;  %v5334_v0 = vsub.f32 %v10907_v20, %v11014_v19 }
 0x731   : > { %v8600_v1 = vpop.permute.xlu0 %8599  ;;  %v8595_v57 = vpop.permute.xlu1 %8594  ;;  %v8591_v19 = vunpack.i.l.bf16 %v11028_v16 }
 0x732   : > { %v8596_v4 = vunpack.i.l.bf16 %v8595_v57  ;;  %v8602_v28 = vunpack.i.h.bf16 %v8600_v1  ;;  %v8601_v60 = vunpack.i.l.bf16 %v8600_v1 }
 0x733   : > { %v4567_v31 = vsel %vm4249_vm3, %v8591_v19, %v8592_v25 }
 0x734   : > { %v4693_v35 = vpack.c.bf16 %v8596_v4, %v8586_v26  ;;  %v4610_v6 = vsel %vm4604_vm13, %v8567_v63, %v8596_v4  ;;  %v8582_v63 = vunpack.i.h.bf16 %v11019_v15  ;;  %v8597_v26 = vunpack.i.h.bf16 %v8595_v57 }
 0x735   : > { %v8605_v61 = vpop.permute.xlu1 %8604  ;;  %v4692_v14 = vpack.c.bf16 %v4610_v6, %v4565_v59  ;;  %v4648_v50 = vpop.permute.xlu0 %4647  ;;  %v4612_v57 = vsel %vm4604_vm13, %v8601_v60, %v8602_v28  ;;  %v8587_v6 = vunpack.i.h.bf16 %v11030_v34 }
 0x736   : > { %v8607_v8 = vunpack.i.h.bf16 %v8605_v61  ;;  %v8606_v22 = vunpack.i.l.bf16 %v8605_v61  ;;  %8400 = vmatpush3.bf16.msra.mxu0 %v4693_v35  ;;  %v8581_v35 = vunpack.i.l.bf16 %v11019_v15  ;;  %v4705_v59 = vpack.c.bf16 %v4648_v50, %v4648_v50 }
 0x737   : > { %4946 = vmatprep.subr.bf16.mxu1 %v4692_v14  ;;  %8401 = vmatprep.subr.bf16.mxu0 %v13181_v52  ;;  %v9116_v20 = vpop.eup %9115  ;;  %v4702_v14 = vpack.c.bf16 %v8602_v28, %v8592_v25 }
 0x738   : > { %4947 = vmatpush1.bf16.msra.mxu1 %v4691_v23  ;;  %v4657_v1 = vsel %vm4649_vm8, %v8607_v8, %v4648_v50  ;;  %v4656_v4 = vsel %vm4649_vm8, %v8606_v22, %v8607_v8  ;;  %v5369_v48 = vmul.f32 %v9116_v20, %v5329_v37  ;;  %v5370_v38 = vmul.f32 %v9116_v20, %v5330_v51 }
 0x739   : > { %4948 = vmatprep.subr.bf16.mxu1 %v4689_v29  ;;  %v4703_v16 = vpack.c.bf16 %v4656_v4, %v4656_v4  ;;  %v5371_v23 = vmul.f32 %v9116_v20, %v5331_v2  ;;  %v4704_v8 = vpack.c.bf16 %v4657_v1, %v4657_v1  ;;  %v4611_v37 = vsel %vm4604_vm13, %v8597_v26, %v8601_v60 }
 0x73a   : > { %8402 = vmatpush3.bf16.msra.mxu0 %v4690_v56  ;;  %v5409_v50 = vmul.f32 %v11046_v39, %v5369_v48  ;;  %v5410_v61 = vmul.f32 %v11049_v33, %v5370_v38  ;;  %v5033_v34 = vsel %vm2474_vm0, %v4705_v59, 0  ;;  %v4701_v2 = vpack.c.bf16 %v4612_v57, %v4567_v31 }
 0x73b   : > { %8407 = vmatprep.subr.bf16.mxu0 %v13181_v52  ;;  %v5411_v51 = vmul.f32 %v11054_v42, %v5371_v23  ;;  %v5027_v60 = vsel %vm2474_vm0, %v4703_v16, 0  ;;  %v4566_v38 = vsel %vm4249_vm3, %v8587_v6, %v8591_v19  ;;  %v13196_v16 = vld [vmem:[#allocation15_spill] sm:$0xff]  ;;  %v9106_v19 = vld [vmem:[%s13031_s2 + $0x18] sm:$0xff]  }
 0x73c   : > { %4949 = vmatpush1.bf16.msra.mxu1 %v4688_v49  ;;  %v5449_v56 = vadd.f32 %v11057_v7, %v5409_v50  ;;  %v5450_v29 = vadd.f32 %v11060_v13, %v5410_v61  ;;  %v4700_v50 = vpack.c.bf16 %v4611_v37, %v4566_v38 }
 0x73d   : > { %v9118_v22 = vpop.eup %9117  ;;  %8404 = vmatmul.mubr.msk.bf16.vlgmr.msra.gmra.mxu0 %vm4719_vm14, %v9105_v46  ;;  %8352 = vmatprep.subr.msk.bf16.mxu1 %vm2474_vm0, %v4704_v8  ;;  %v5451_v49 = vadd.f32 %v11069_v11, %v5411_v51  ;;  %v4522_v8 = vsel %vm4180_vm2, %v8577_v44, %v8581_v35 }
 0x73e   : > { %v5372_v28 = vmul.f32 %v9118_v22, %v5332_v45  ;;  %v5373_v20 = vmul.f32 %v9118_v22, %v5333_v24  ;;  %8408 = vmatpush3.bf16.msra.mxu0 %v5033_v34  ;;  %vm5473_vm10 = vcmp.ge.f32.partialorder %v5449_v56, 0.0  ;;  %v5497_v25 = vmul.f32 0.2, %v5449_v56  ;;  %8413 = vmatprep.mubr.msk.bf16.mxu0 %vm9274_vm12, %v13181_v52 }
 0x73f   : > { %8349 = vmatmul.mubr.msk.bf16.vlgmr.msra.gmra.mxu1 %vm4719_vm14, %v9105_v46  ;;  %8409 = vmatprep.subr.bf16.mxu0 %v13181_v52  ;;  %vm5474_vm11 = vcmp.ge.f32.partialorder %v5450_v29, 0.0  ;;  %v5498_v26 = vmul.f32 0.2, %v5450_v29  ;;  %v5374_v1 = vmul.f32 %v9118_v22, %v5334_v0  ;;  %vm5475_vm15 = vcmp.ge.f32.partialorder %v5451_v49, 0.0 }
 0x740   : > { %v5412_v4 = vmul.f32 %v11046_v39, %v5372_v28  ;;  %v5413_v59 = vmul.f32 %v11049_v33, %v5373_v20  ;;  %5046 = vmatpush1.bf16.msra.mxu1 %v5027_v60  ;;  %v11114_v45 = vsel %vm5473_vm10, %v5449_v56, %v5497_v25  ;;  %v4523_v46 = vsel %vm4180_vm2, %v8581_v35, %v8582_v63  ;;  %v13197_v35 = vld [vmem:[#allocation25_spill] sm:$0xff]  ;;  %v13199_v20 = vld [vmem:[#allocation26_spill] sm:$0xff] }
 0x741   : > { %5047 = vmatprep.subr.bf16.mxu1 %v4701_v2  ;;  %v11116_v24 = vsel %vm5474_vm11, %v5450_v29, %v5498_v26  ;;  %v5499_v48 = vmul.f32 0.2, %v5451_v49  ;;  %5067 = vmatprep.mubr.bf16.mxu1 %v13177_v58  ;;  %v4699_v0 = vpack.c.bf16 %v8582_v63, %v10956_v47  ;;  %v5633_v57 = vmul.f32 %v13196_v16, %v11114_v45  ;;  %v13198_v2 = vld [vmem:[#allocation17_spill] sm:$0xff] }
 0x742   : > { %8410 = vmatpush3.bf16.msra.mxu0 %v4702_v14  ;;  %v5634_v23 = vmul.f32 %v13196_v16, %v11116_v24  ;;  %v5453_v61 = vadd.f32 %v11060_v13, %v5413_v59  ;;  %v5414_v47 = vmul.f32 %v11054_v42, %v5374_v1  ;;  %v4698_v15 = vpack.c.bf16 %v4523_v46, %v10954_v32 }
 0x743   : > { %8411 = vmatprep.subr.bf16.mxu0 %v13181_v52  ;;  %v5523_v58 = vsel %vm5475_vm15, %v5451_v49, %v5499_v48  ;;  %5681 = vrot.lane.b32.xlu1 %v5633_v57, %s9270_s16  ;;  %v5452_v63 = vadd.f32 %v11057_v7, %v5412_v4  ;;  %v5825_v44 = vmul.f32 %v13197_v35, %v11114_v45 }
 0x744   : > { %5683 = vrot.lane.b32.xlu0 %v5634_v23, %s9270_s16  ;;  %5048 = vmatpush1.bf16.msra.mxu1 %v4700_v50  ;;  %v5635_v52 = vmul.f32 %v13196_v16, %v5523_v58  ;;  %v4697_v6 = vpack.c.bf16 %v4522_v8, %v10949_v43  ;;  %v5501_v14 = vmul.f32 0.2, %v5453_v61  ;;  %vm5477_vm0 = vcmp.ge.f32.partialorder %v5453_v61, 0.0  ;;  %v13200_v23 = vld [vmem:[#allocation7_spill] sm:$0xff] }
 0x745   : > { %5049 = vmatprep.subr.bf16.mxu1 %v4698_v15  ;;  %v5500_v32 = vmul.f32 0.2, %v5452_v63  ;;  %v5454_v37 = vadd.f32 %v11069_v11, %v5414_v47  ;;  %vm5476_vm2 = vcmp.ge.f32.partialorder %v5452_v63, 0.0  ;;  %v5826_v31 = vmul.f32 %v13197_v35, %v11116_v24 }
 0x746   : > { %8412 = vmatpush3.bf16.msra.mxu0 %v4699_v0  ;;  %v5827_v51 = vmul.f32 %v13197_v35, %v5523_v58  ;;  %v5525_v22 = vsel %vm5477_vm0, %v5453_v61, %v5501_v14  ;;  %v5577_v8 = vmul.f32 %v13200_v23, %v11114_v45  ;;  %v5579_v50 = vmul.f32 %v13200_v23, %v5523_v58  ;;  %v13201_v45 = vld [vmem:[#allocation32_spill] sm:$0xff] }
 0x747   : > { %5685 = vrot.lane.b32.xlu1 %v5635_v52, %s9270_s16  ;;  %v5524_v43 = vsel %vm5476_vm2, %v5452_v63, %v5500_v32  ;;  %v5502_v34 = vmul.f32 0.2, %v5454_v37  ;;  %vm5478_vm12 = vcmp.ge.f32.partialorder %v5454_v37, 0.0  ;;  %v5637_v56 = vmul.f32 %v13198_v2, %v5525_v22 }
 0x748   : > { %5873 = vrot.lane.b32.xlu0 %v5825_v44, %s9272_s6  ;;  %5050 = vmatpush1.bf16.msra.mxu1 %v4697_v6  ;;  %v5636_v29 = vmul.f32 %v13198_v2, %v5524_v43  ;;  %v5828_v60 = vmul.f32 %v13199_v20, %v5524_v43  ;;  %v5829_v26 = vmul.f32 %v13199_v20, %v5525_v22 }
 0x749   : > { %8414 = vmatmul.mubr.msk.bf16.vlgmr.msra.gmra.mxu0 %vm4719_vm14, %v9106_v19  ;;  %v5526_v28 = vsel %vm5478_vm12, %v5454_v37, %v5502_v34  ;;  %v5578_v47 = vmul.f32 %v13200_v23, %v11116_v24 }
 0x74a   : > { %v5638_v49 = vmul.f32 %v13198_v2, %v5526_v28  ;;  %v5830_v25 = vmul.f32 %v13199_v20, %v5526_v28 }
 0x74b   : > { %8353 = vmatmul.mubr.msk.bf16.vlgmr.msra.gmra.mxu1 %vm4719_vm14, %v9106_v19  ;;  %5875 = vrot.lane.b32.xlu1 %v5826_v31, %s9272_s6  ;;  %vm6042_vm14 = vcmask 310272  }
 0x74c   : > { %5877 = vrot.lane.b32.xlu0 %v5827_v51, %s9272_s6 }
 0x74f   : > { %5689 = vrot.lane.b32.xlu1 %v5637_v56, %s9270_s16 }
 0x750   : > { %5687 = vrot.lane.b32.xlu0 %v5636_v29, %s9270_s16 }
 0x753   : > { %5879 = vrot.lane.b32.xlu1 %v5828_v60, %s9272_s6 }
 0x754   : > { %5691 = vrot.lane.b32.xlu0 %v5638_v49, %s9270_s16 }
 0x757   : > { %5883 = vrot.lane.b32.xlu1 %v5830_v25, %s9272_s6  ;;  %v13202_v25 = vld [vmem:[#allocation18_spill] sm:$0xff] }
 0x758   : > { %5881 = vrot.lane.b32.xlu0 %v5829_v26, %s9272_s6  ;;  %v5582_v26 = vmul.f32 %v13202_v25, %v5526_v28  ;;  %v5580_v23 = vmul.f32 %v13202_v25, %v5524_v43  ;;  %v13203_v43 = vld [vmem:[#allocation35_spill] sm:$0xff] }
 0x766   : > { %v11168_v1 = vpop.xlane.xlu0 %5197  ;;  %v11172_v59 = vpop.xlane.xlu1 %5270 }
 0x76a   : > { %v11170_v4 = vpop.xlane.xlu0 %5202 }
 0x76e   : > { %v11174_v46 = vpop.xlane.xlu0 %5275 }
 0x7b5   : > { %v5682_v48 = vpop.permute.xlu1 %5681 }
 0x7b6   : > { %v5684_v0 = vpop.permute.xlu0 %5683 }
 0x7b7   : > { %v5729_v57 = vsel %vm4249_vm3, %v5682_v48, %v5684_v0 }
 0x7b8   : > { %v5769_v15 = vadd.f32 %v5729_v57, %v5577_v8  ;;  %v5581_v8 = vmul.f32 %v13202_v25, %v5525_v22  ;;  %v5227_v25 = vmul.f32 0.0033557047, %v11168_v1 }
 0x7b9   : > { %v5686_v38 = vpop.permute.xlu1 %5685 }
 0x7ba   : > { %v5874_v16 = vpop.permute.xlu0 %5873  ;;  %v5730_v61 = vsel %vm4249_vm3, %v5684_v0, %v5686_v38  ;;  %v5771_v63 = vadd.f32 %v5686_v38, %v5579_v50 }
 0x7bb   : > { %v5770_v52 = vadd.f32 %v5730_v61, %v5578_v47 }
 0x7bd   : > { %v5876_v19 = vpop.permute.xlu1 %5875 }
 0x7be   : > { %v5921_v35 = vsel %vm4649_vm8, %v5874_v16, %v5876_v19  ;;  %v5878_v44 = vpop.permute.xlu0 %5877 }
 0x7bf   : > { %v5961_v6 = vadd.f32 %v5921_v35, %v5769_v15  ;;  %v5922_v14 = vsel %vm4649_vm8, %v5876_v19, %v5878_v44  ;;  %v5963_v32 = vadd.f32 %v5878_v44, %v5771_v63 }
 0x7c0   : > { %v5962_v37 = vadd.f32 %v5922_v14, %v5770_v52 }
 0x7c1   : > { %v11186_v31 = vadd.f32 %v13201_v45, %v5961_v6  ;;  %v11189_v58 = vadd.f32 %v13201_v45, %v5963_v32  ;;  %v5690_v51 = vpop.permute.xlu1 %5689 }
 0x7c2   : > { %v11192_v24 = vadd.f32 %v13201_v45, %v5962_v37  ;;  %v5688_v34 = vpop.permute.xlu0 %5687 }
 0x7c3   : > { %v6091_v2 = vmul.f32 %v11186_v31, %v11186_v31  ;;  %v6043_v60 = vsel %vm6042_vm14, %v11189_v58, 0.0  ;;  %v6093_v49 = vmul.f32 %v11189_v58, %v11189_v58  ;;  %v5731_v16 = vsel %vm4249_vm3, %v5688_v34, %v5690_v51 }
 0x7c4   : > { %v6041_v56 = vadd.f32 %v11192_v24, %v11186_v31  ;;  %v6092_v29 = vmul.f32 %v11192_v24, %v11192_v24  ;;  %v5772_v15 = vadd.f32 %v5731_v16, %v5580_v23  ;;  %v11235_v16 = vmul.f32 0.0033557047, %v11170_v4 }
 0x7c5   : > { %v5880_v20 = vpop.permute.xlu1 %5879  ;;  %v6116_v47 = vsel %vm6042_vm14, %v6093_v49, 0.0 }
 0x7c6   : > { %v5692_v48 = vpop.permute.xlu0 %5691  ;;  %v6044_v0 = vadd.f32 %v6043_v60, %v6041_v56  ;;  %v6115_v38 = vadd.f32 %v6092_v29, %v6091_v2 }
 0x7c7   : > { %v5732_v57 = vsel %vm4249_vm3, %v5690_v51, %v5692_v48  ;;  %v5774_v50 = vadd.f32 %v5692_v48, %v5582_v26  ;;  %v5307_v26 = vmul.f32 %v5227_v25, %v5227_v25  ;;  %v5299_v48 = vmul.f32 0.0033557047, %v11172_v59 }
 0x7c8   : > { %6045 = vadd.xlane.f32.xlu1 %v6044_v0  ;;  %v5773_v63 = vadd.f32 %v5732_v57, %v5581_v8  ;;  %v6117_v52 = vadd.f32 %v6116_v47, %v6115_v38  ;;  %v5300_v57 = vmul.f32 0.0033557047, %v11174_v46  ;;  %v5308_v8 = vmul.f32 %v11235_v16, %v11235_v16 }
 0x7c9   : > { %v5884_v61 = vpop.permute.xlu1 %5883  ;;  %v5315_v0 = vsub.f32 %v5299_v48, %v5307_v26 }
 0x7ca   : > { %v5966_v19 = vadd.f32 %v5884_v61, %v5774_v50  ;;  %v5882_v28 = vpop.permute.xlu0 %5881  ;;  %v5316_v50 = vsub.f32 %v5300_v57, %v5308_v8 }
 0x7cb   : > { %v5923_v35 = vsel %vm4649_vm8, %v5880_v20, %v5882_v28  ;;  %v5924_v44 = vsel %vm4649_vm8, %v5882_v28, %v5884_v61  ;;  %v5323_v38 = vmax.f32 %v5315_v0, 0.0 }
 0x7cc   : > { %v5964_v6 = vadd.f32 %v5923_v35, %v5772_v15  ;;  %v5965_v14 = vadd.f32 %v5924_v44, %v5773_v63  ;;  %6118 = vadd.xlane.f32.xlu1 %v6117_v52  ;;  %v11213_v32 = vadd.f32 %v13203_v43, %v5966_v19  ;;  %v5324_v61 = vmax.f32 %v5316_v50, 0.0  ;;  %v13204_v19 = vld [vmem:[#allocation14_spill] sm:$0xff] }
 0x7cd   : > { %v5355_v23 = vadd.f32 1e-05, %v5323_v38 }
 0x7ce   : > { %v11216_v22 = vadd.f32 %v13203_v43, %v5964_v6  ;;  %v11219_v37 = vadd.f32 %v13203_v43, %v5965_v14  ;;  %v6048_v2 = vsel %vm6042_vm14, %v11213_v32, 0.0  ;;  %v6096_v56 = vmul.f32 %v11213_v32, %v11213_v32 }
 0x7cf   : > { %9119 = vrsqrt.f32 %v5355_v23  ;;  %v5356_v15 = vadd.f32 1e-05, %v5324_v61 }
 0x7d0   : > { %v6047_v45 = vadd.f32 %v11219_v37, %v11216_v22  ;;  %v6094_v51 = vmul.f32 %v11216_v22, %v11216_v22  ;;  %v6095_v34 = vmul.f32 %v11219_v37, %v11219_v37  ;;  %v6121_v60 = vsel %vm6042_vm14, %v6096_v56, 0.0 }
 0x7d1   : > { %9121 = vrsqrt.f32 %v5356_v15 }
 0x7d2   : > { %v6049_v29 = vadd.f32 %v6048_v2, %v6047_v45  ;;  %v6120_v20 = vadd.f32 %v6095_v34, %v6094_v51  ;;  %v13205_v45 = vld [vmem:[#allocation5_spill] sm:$0xff] }
 0x7d4   : > { %6050 = vadd.xlane.f32.xlu0 %v6049_v29  ;;  %v6122_v49 = vadd.f32 %v6121_v60, %v6120_v20  ;;  %v5335_v60 = vsub.f32 %v10974_v21, %v5227_v25 }
 0x7d8   : > { %6123 = vadd.xlane.f32.xlu0 %v6122_v49 }
 0x7dc   : > { %v9120_v34 = vpop.eup %9119 }
 0x7dd   : > { %v5375_v0 = vmul.f32 %v9120_v34, %v5335_v60 }
 0x7fd   : > { %v5011_v47 = vpop.f32.mrf.mxu0 }
 0x7fe   : > { %v11244_v28 = vadd.f32 %v13204_v19, %v5011_v47  ;;  %v5337_v47 = vsub.f32 %v10977_v10, %v5227_v25 }
 0x7ff   : > { %v4968_v1 = vpop.f32.mrf.mxu1  ;;  %v8405_v63 = vpop.f32.mrf.mxu0 }
 0x800   : > { %v11241_v59 = vadd.f32 %v13204_v19, %v4968_v1  ;;  %v5247_v2 = vmul.f32 %v11244_v28, %v11244_v28  ;;  %v5205_v20 = vsel %vm5184_vm5, %v11244_v28, 0.0 }
 0x801   : > { %v4970_v4 = vpop.f32.mrf.mxu1  ;;  %v5014_v52 = vpop.f32.mrf.mxu0 }
 0x802   : > { %v11247_v46 = vadd.f32 %v13204_v19, %v4970_v4  ;;  %v5245_v6 = vmul.f32 %v11241_v59, %v11241_v59  ;;  %v11261_v56 = vadd.f32 %v13205_v45, %v5014_v52  ;;  %v5278_v50 = vsel %vm5184_vm5, %v5247_v2, 0.0  ;;  %v9122_v2 = vpop.eup %9121 }
 0x803   : > { %v4972_v35 = vpop.f32.mrf.mxu1  ;;  %v8406_v44 = vpop.f32.mrf.mxu0  ;;  %v5377_v4 = vmul.f32 %v9120_v34, %v5337_v47  ;;  %v5415_v52 = vmul.f32 %v11046_v39, %v5375_v0 }
 0x804   : > { %v5204_v14 = vadd.f32 %v11247_v46, %v11241_v59  ;;  %v5246_v43 = vmul.f32 %v11247_v46, %v11247_v46  ;;  %v11256_v51 = vadd.f32 %v13205_v45, %v4972_v35  ;;  %v5250_v8 = vmul.f32 %v11261_v56, %v11261_v56 }
 0x805   : > { %v4974_v29 = vpop.f32.mrf.mxu1  ;;  %v5210_v61 = vsel %vm5184_vm5, %v11261_v56, 0.0  ;;  %v5336_v35 = vsub.f32 %v10971_v54, %v5227_v25  ;;  %v5417_v10 = vmul.f32 %v11054_v42, %v5377_v4 }
 0x806   : > { %v11267_v49 = vadd.f32 %v13205_v45, %v4974_v29  ;;  %v5206_v26 = vadd.f32 %v5205_v20, %v5204_v14  ;;  %v5277_v48 = vadd.f32 %v5246_v43, %v5245_v6  ;;  %v5248_v38 = vmul.f32 %v11256_v51, %v11256_v51 }
 0x807   : > { %v5283_v6 = vsel %vm5184_vm5, %v5250_v8, 0.0  ;;  %v5376_v43 = vmul.f32 %v9120_v34, %v5336_v35  ;;  %v5455_v29 = vadd.f32 %v11057_v7, %v5415_v52  ;;  %v5339_v20 = vsub.f32 %v10988_v3, %v11235_v16  ;;  %v13206_v8 = vld [vmem:[#allocation20_spill] sm:$0xff]  ;;  %v13207_v52 = vld [vmem:[#allocation27_spill] sm:$0xff] }
 0x808   : > { %v5209_v57 = vadd.f32 %v11267_v49, %v11256_v51  ;;  %v5249_v23 = vmul.f32 %v11267_v49, %v11267_v49  ;;  %5207 = vadd.xlane.f32.xlu1 %v5206_v26  ;;  %v5279_v15 = vadd.f32 %v5278_v50, %v5277_v48  ;;  %v5457_v54 = vadd.f32 %v11069_v11, %v5417_v10 }
 0x809   : > { %v11277_v21 = vpop.f32.mrf.mxu0  ;;  %v5416_v60 = vmul.f32 %v11049_v33, %v5376_v43  ;;  %v5503_v26 = vmul.f32 0.2, %v5455_v29  ;;  %v5379_v25 = vmul.f32 %v9122_v2, %v5339_v20  ;;  %vm5479_vm1 = vcmp.ge.f32.partialorder %v5455_v29, 0.0 }
 0x80a   : > { %v5211_v1 = vadd.f32 %v5210_v61, %v5209_v57  ;;  %v5282_v63 = vadd.f32 %v5249_v23, %v5248_v38  ;;  %v5338_v34 = vsub.f32 %v10991_v9, %v11235_v16  ;;  %v5505_v38 = vmul.f32 0.2, %v5457_v54 }
 0x80b   : > { %v8415_v19 = vpop.f32.mrf.mxu0  ;;  %v5456_v48 = vadd.f32 %v11060_v13, %v5416_v60  ;;  %v11297_v0 = vsel %vm5479_vm1, %v5455_v29, %v5503_v26  ;;  %v5419_v57 = vmul.f32 %v11049_v33, %v5379_v25  ;;  %vm5481_vm4 = vcmp.ge.f32.partialorder %v5457_v54, 0.0  ;;  %v13209_v26 = vld [vmem:[#allocation29_spill] sm:$0xff] }
 0x80c   : > { %5280 = vadd.xlane.f32.xlu1 %v5279_v15  ;;  %5212 = vadd.xlane.f32.xlu0 %v5211_v1  ;;  %v5284_v14 = vadd.f32 %v5283_v6, %v5282_v63  ;;  %v5378_v23 = vmul.f32 %v9122_v2, %v5338_v34  ;;  %v5340_v3 = vsub.f32 %v10994_v5, %v11235_v16 }
 0x80d   : > { %v11285_v44 = vpop.f32.mrf.mxu0  ;;  %v5639_v50 = vmul.f32 %v13206_v8, %v11297_v0  ;;  %v5504_v61 = vmul.f32 0.2, %v5456_v48  ;;  %v11304_v47 = vsel %vm5481_vm4, %v5457_v54, %v5505_v38  ;;  %v5459_v9 = vadd.f32 %v11060_v13, %v5419_v57 }
 0x80e   : > { %v5418_v15 = vmul.f32 %v11046_v39, %v5378_v23  ;;  %v5380_v1 = vmul.f32 %v9122_v2, %v5340_v3  ;;  %vm5480_vm6 = vcmp.ge.f32.partialorder %v5456_v48, 0.0  ;;  %v5641_v63 = vmul.f32 %v13206_v8, %v11304_v47  ;;  %v13208_v2 = vld [vmem:[#allocation19_spill] sm:$0xff] }
 0x80f   : > { %v8416_v45 = vpop.f32.mrf.mxu0  ;;  %v11311_v19 = vsel %vm5480_vm6, %v5456_v48, %v5504_v61  ;;  %v5507_v5 = vmul.f32 0.2, %v5459_v9  ;;  %vm5483_vm7 = vcmp.ge.f32.partialorder %v5459_v9, 0.0  ;;  %v5831_v29 = vmul.f32 %v13207_v52, %v11297_v0 }
 0x810   : > { %5285 = vadd.xlane.f32.xlu0 %v5284_v14  ;;  %v5458_v16 = vadd.f32 %v11057_v7, %v5418_v15  ;;  %v5420_v4 = vmul.f32 %v11054_v42, %v5380_v1  ;;  %v5832_v35 = vmul.f32 %v13207_v52, %v11311_v19  ;;  %v5640_v6 = vmul.f32 %v13206_v8, %v11311_v19 }
 0x811   : > { %v11320_v14 = vsel %vm5483_vm7, %v5459_v9, %v5507_v5  ;;  %v5833_v25 = vmul.f32 %v13207_v52, %v11304_v47 }
 0x812   : > { %v5506_v43 = vmul.f32 0.2, %v5458_v16  ;;  %v5460_v45 = vadd.f32 %v11069_v11, %v5420_v4  ;;  %vm5482_vm9 = vcmp.ge.f32.partialorder %v5458_v16, 0.0  ;;  %v5643_v10 = vmul.f32 %v13208_v2, %v11320_v14 }
 0x813   : > { %v5835_v23 = vmul.f32 %v13209_v26, %v11320_v14 }
 0x814   : > { %v11329_v20 = vsel %vm5482_vm9, %v5458_v16, %v5506_v43  ;;  %v5508_v60 = vmul.f32 0.2, %v5460_v45  ;;  %vm5484_vm10 = vcmp.ge.f32.partialorder %v5460_v45, 0.0 }
 0x815   : > { %v5834_v54 = vmul.f32 %v13209_v26, %v11329_v20  ;;  %v5642_v38 = vmul.f32 %v13208_v2, %v11329_v20 }
 0x816   : > { %v5532_v34 = vsel %vm5484_vm10, %v5460_v45, %v5508_v60 }
 0x817   : > { %v5836_v48 = vmul.f32 %v13209_v26, %v5532_v34  ;;  %v5644_v57 = vmul.f32 %v13208_v2, %v5532_v34  ;;  %v5069_v26 = vpop.f32.mrf.mxu1 }
 0x81d   : > { %5693 = vrot.lane.b32.xlu1 %v5639_v50, %s9270_s16 }
 0x821   : > { %5697 = vrot.lane.b32.xlu1 %v5641_v63, %s9270_s16 }
 0x825   : > { %5887 = vrot.lane.b32.xlu1 %v5832_v35, %s9272_s6 }
 0x826   : > { %5695 = vrot.lane.b32.xlu0 %v5640_v6, %s9270_s16 }
 0x829   : > { %5701 = vrot.lane.b32.xlu1 %v5643_v10, %s9270_s16 }
 0x82a   : > { %5885 = vrot.lane.b32.xlu0 %v5831_v29, %s9272_s6  ;;  %v13210_v29 = vld [vmem:[#allocation8_spill] sm:$0xff] }
 0x82b   : > { %v5583_v60 = vmul.f32 %v13210_v29, %v11297_v0 }
 0x82d   : > { %5891 = vrot.lane.b32.xlu1 %v5834_v54, %s9272_s6 }
 0x82e   : > { %5889 = vrot.lane.b32.xlu0 %v5833_v25, %s9272_s6 }
 0x831   : > { %5895 = vrot.lane.b32.xlu1 %v5836_v48, %s9272_s6 }
 0x832   : > { %5699 = vrot.lane.b32.xlu0 %v5642_v38, %s9270_s16 }
 0x836   : > { %5703 = vrot.lane.b32.xlu0 %v5644_v57, %s9270_s16 }
 0x83a   : > { %5893 = vrot.lane.b32.xlu0 %v5835_v23, %s9272_s6  ;;  %v5585_v23 = vmul.f32 %v13210_v29, %v11304_v47 }
 0x851   : > { %v6046_v3 = vpop.xlane.xlu1 %6045 }
 0x852   : > { %v11349_v15 = vmul.f32 0.0034013605, %v6046_v3 }
 0x854   : > { %v6163_v16 = vmul.f32 %v11349_v15, %v11349_v15 }
 0x855   : > { %v6119_v50 = vpop.xlane.xlu1 %6118 }
 0x856   : > { %v6155_v1 = vmul.f32 0.0034013605, %v6119_v50 }
 0x858   : > { %v6171_v4 = vsub.f32 %v6155_v1, %v6163_v16  ;;  %v5584_v1 = vmul.f32 %v13210_v29, %v11311_v19  ;;  %v5071_v16 = vpop.f32.mrf.mxu1 }
 0x859   : > { %v11375_v27 = vadd.f32 %v13212_v17, %v5071_v16  ;;  %v11398_v16 = vadd.f32 %v13212_v17, %v11277_v21 }
 0x85a   : > { %v6179_v6 = vmax.f32 %v6171_v4, 0.0 }
 0x85b   : > { %13213 = vst [vmem:[#allocation15_spill] sm:$0xff] %v11375_v27 }
 0x85c   : > { %v6211_v54 = vadd.f32 1e-05, %v6179_v6 }
 0x85d   : > { %v6051_v8 = vpop.xlane.xlu0 %6050 }
 0x85e   : > { %v11358_v10 = vmul.f32 0.0034013605, %v6051_v8  ;;  %9123 = vrsqrt.f32 %v6211_v54 }
 0x860   : > { %v6164_v8 = vmul.f32 %v11358_v10, %v11358_v10 }
 0x861   : > { %v6124_v61 = vpop.xlane.xlu0 %6123 }
 0x862   : > { %v6156_v25 = vmul.f32 0.0034013605, %v6124_v61 }
 0x864   : > { %v6172_v4 = vsub.f32 %v6156_v25, %v6164_v8 }
 0x866   : > { %v6180_v29 = vmax.f32 %v6172_v4, 0.0 }
 0x891   : > { %v5208_v9 = vpop.xlane.xlu1 %5207 }
 0x895   : > { %v5281_v63 = vpop.xlane.xlu1 %5280  ;;  %v11351_v5 = vpop.xlane.xlu0 %5212 }
 0x896   : > { %v5301_v4 = vmul.f32 0.0033557047, %v5281_v63 }
 0x899   : > { %v5694_v52 = vpop.permute.xlu1 %5693  ;;  %v11355_v35 = vpop.xlane.xlu0 %5285 }
 0x89d   : > { %v5698_v43 = vpop.permute.xlu1 %5697  ;;  %v5696_v45 = vpop.permute.xlu0 %5695 }
 0x89e   : > { %v5733_v2 = vsel %vm4249_vm3, %v5694_v52, %v5696_v45  ;;  %v5734_v3 = vsel %vm4249_vm3, %v5696_v45, %v5698_v43  ;;  %v5777_v61 = vadd.f32 %v5698_v43, %v5585_v23  ;;  %v13211_v45 = vld [vmem:[#allocation37_spill] sm:$0xff] }
 0x89f   : > { %v5775_v48 = vadd.f32 %v5733_v2, %v5583_v60  ;;  %v5776_v52 = vadd.f32 %v5734_v3, %v5584_v1 }
 0x8a1   : > { %v5888_v38 = vpop.permute.xlu1 %5887  ;;  %v5886_v57 = vpop.permute.xlu0 %5885 }
 0x8a2   : > { %v5925_v50 = vsel %vm4649_vm8, %v5886_v57, %v5888_v38 }
 0x8a3   : > { %v5967_v0 = vadd.f32 %v5925_v50, %v5775_v48  ;;  %v13214_v48 = vld [vmem:[#allocation9_spill] sm:$0xff]  ;;  %v11388_v50 = vmul.f32 0.0033557047, %v5208_v9 }
 0x8a4   : > { %v5588_v23 = vmul.f32 %v13214_v48, %v5532_v34  ;;  %v5252_v34 = vmul.f32 %v11375_v27, %v11375_v27  ;;  %v5586_v63 = vmul.f32 %v13214_v48, %v11329_v20 }
 0x8a5   : > { %v5702_v6 = vpop.permute.xlu1 %5701  ;;  %v5890_v2 = vpop.permute.xlu0 %5889  ;;  %v11372_v53 = vadd.f32 %v13211_v45, %v5967_v0  ;;  %v5309_v55 = vmul.f32 %v11388_v50, %v11388_v50 }
 0x8a6   : > { %v5926_v47 = vsel %vm4649_vm8, %v5888_v38, %v5890_v2  ;;  %v5969_v60 = vadd.f32 %v5890_v2, %v5777_v61  ;;  %v5587_v38 = vmul.f32 %v13214_v48, %v11320_v14  ;;  %v11401_v14 = vadd.f32 %v13212_v17, %v5069_v26  ;;  %v5073_v26 = vpop.f32.mrf.mxu1 }
 0x8a7   : > { %v5968_v57 = vadd.f32 %v5926_v47, %v5776_v52  ;;  %v6097_v1 = vmul.f32 %v11372_v53, %v11372_v53  ;;  %v6212_v61 = vadd.f32 1e-05, %v6180_v29  ;;  %v5317_v20 = vsub.f32 %v5301_v4, %v5309_v55  ;;  %v13215_v4 = vld [vmem:[#allocation34_spill] sm:$0xff] }
 0x8a8   : > { %v11378_v19 = vadd.f32 %v13211_v45, %v5969_v60  ;;  %v5214_v17 = vadd.f32 %v11375_v27, %v11401_v14  ;;  %v5075_v18 = vpop.f32.mrf.mxu1 }
 0x8a9   : > { %v11381_v43 = vadd.f32 %v13211_v45, %v5968_v57  ;;  %v5892_v54 = vpop.permute.xlu1 %5891  ;;  %v5700_v25 = vpop.permute.xlu0 %5699  ;;  %9125 = vrsqrt.f32 %v6212_v61 }
 0x8aa   : > { %v6099_v3 = vmul.f32 %v11378_v19, %v11378_v19  ;;  %v6053_v9 = vsel %vm6042_vm14, %v11378_v19, 0.0  ;;  %v5735_v60 = vsel %vm4249_vm3, %v5700_v25, %v5702_v6  ;;  %v5253_v25 = vmul.f32 %v11398_v16, %v11398_v16 }
 0x8ab   : > { %v6052_v8 = vadd.f32 %v11381_v43, %v11372_v53  ;;  %v6098_v0 = vmul.f32 %v11381_v43, %v11381_v43  ;;  %v5778_v48 = vadd.f32 %v5735_v60, %v5586_v63 }
 0x8ac   : > { %v6126_v57 = vsel %vm6042_vm14, %v6099_v3, 0.0  ;;  %v5215_v3 = vsel %vm5184_vm5, %v11398_v16, 0.0 }
 0x8ad   : > { %v5704_v52 = vpop.permute.xlu0 %5703  ;;  %v6054_v2 = vadd.f32 %v6053_v9, %v6052_v8  ;;  %v6125_v47 = vadd.f32 %v6098_v0, %v6097_v1  ;;  %v5896_v29 = vpop.permute.xlu1 %5895  ;;  %v7924_v1 = vld [vmem:[%s13032_s3 + $0x4] ss:$8 sm:$0x7]  ;;  %v5216_v55 = vadd.f32 %v5215_v3, %v5214_v17  ;;  %v5288_v17 = vsel %vm5184_vm5, %v5253_v25, 0.0 }
 0x8ae   : > { %v5736_v45 = vsel %vm4249_vm3, %v5702_v6, %v5704_v52  ;;  %v5780_v21 = vadd.f32 %v5704_v52, %v5588_v23  ;;  %v5251_v6 = vmul.f32 %v11401_v14, %v11401_v14  ;;  %v9124_v0 = vpop.eup %9123  ;;  %v6189_v3 = vsub.f32 %v11189_v58, %v11349_v15 }
 0x8af   : > { %6055 = vadd.xlane.f32.xlu0 %v6054_v2  ;;  %v6127_v8 = vadd.f32 %v6126_v57, %v6125_v47  ;;  %v5779_v9 = vadd.f32 %v5736_v45, %v5587_v38  ;;  %v7925_v2 = vld [vmem:[%s13032_s3 + $0x5] ss:$8 sm:$0x7]  ;;  %v6187_v47 = vsub.f32 %v11186_v31, %v11349_v15  ;;  %v11433_v38 = vrot.slane %v7924_v1, %v13193_v41 }
 0x8b0   : > { %v5972_v23 = vadd.f32 %v5896_v29, %v5780_v21  ;;  %v5287_v40 = vadd.f32 %v5252_v34, %v5251_v6  ;;  %v11439_v63 = vrot.slane %v7925_v2, %v13193_v41  ;;  %v11442_v31 = vrot.slane %v7924_v1, %v10522_v30 }
 0x8b1   : > { %6128 = vadd.xlane.f32.xlu1 %v6127_v8  ;;  %v5894_v52 = vpop.permute.xlu0 %5893  ;;  %v6227_v45 = vmul.f32 %v9124_v0, %v6187_v47  ;;  %v13216_v8 = vld [vmem:[#allocation6_spill] sm:$0xff]  ;;  %v6229_v58 = vmul.f32 %v9124_v0, %v6189_v3 }
 0x8b2   : > { %v5927_v21 = vsel %vm4649_vm8, %v5892_v54, %v5894_v52  ;;  %v5928_v57 = vsel %vm4649_vm8, %v5894_v52, %v5896_v29  ;;  %v11436_v60 = vadd.f32 %v13215_v4, %v5972_v23  ;;  %v5325_v54 = vmax.f32 %v5317_v20, 0.0 }
 0x8b3   : > { %v5970_v27 = vadd.f32 %v5927_v21, %v5778_v48  ;;  %v5971_v61 = vadd.f32 %v5928_v57, %v5779_v9  ;;  %v11452_v6 = vadd.f32 %v13216_v8, %v5073_v26  ;;  %v11455_v23 = vadd.f32 %v13216_v8, %v5075_v18 }
 0x8b4   : > { %v5289_v48 = vadd.f32 %v5288_v17, %v5287_v40  ;;  %v11460_v20 = vmul.f32 0.0033557047, %v11351_v5  ;;  %v6058_v18 = vsel %vm6042_vm14, %v11436_v60, 0.0  ;;  %v6102_v25 = vmul.f32 %v11436_v60, %v11436_v60 }
 0x8b5   : > { %v11445_v34 = vadd.f32 %v13215_v4, %v5970_v27  ;;  %v11448_v29 = vadd.f32 %v13215_v4, %v5971_v61  ;;  %5217 = vadd.xlane.f32.xlu1 %v5216_v55  ;;  %v6267_v40 = vmul.f32 %v11433_v38, %v6227_v45  ;;  %v5357_v5 = vadd.f32 1e-05, %v5325_v54 }
 0x8b6   : > { %v5302_v52 = vmul.f32 0.0033557047, %v11355_v35  ;;  %v6188_v57 = vsub.f32 %v11192_v24, %v11349_v15  ;;  %v11477_v61 = vrot.slane %v7924_v1, %v13194_v12  ;;  %v11481_v55 = vadd.f32 %v13216_v8, %v11285_v44  ;;  %v9126_v3 = vpop.eup %9125 }
 0x8b7   : > { %v6057_v27 = vadd.f32 %v11448_v29, %v11445_v34  ;;  %v6100_v9 = vmul.f32 %v11445_v34, %v11445_v34  ;;  %v6101_v26 = vmul.f32 %v11448_v29, %v11448_v29  ;;  %v5219_v4 = vadd.f32 %v11455_v23, %v11452_v6 }
 0x8b8   : > { %13217 = vst [vmem:[#allocation25_spill] sm:$0xff] %v11481_v55  ;;  %v5310_v45 = vmul.f32 %v11460_v20, %v11460_v20  ;;  %v11488_v35 = vrot.slane %v7925_v2, %v10522_v30  ;;  %v5255_v24 = vmul.f32 %v11455_v23, %v11455_v23  ;;  %v6131_v15 = vsel %vm6042_vm14, %v6102_v25, 0.0 }
 0x8b9   : > { %5290 = vadd.xlane.f32.xlu1 %v5289_v48  ;;  %v6059_v47 = vadd.f32 %v6058_v18, %v6057_v27  ;;  %v6130_v21 = vadd.f32 %v6101_v26, %v6100_v9  ;;  %v6269_v1 = vmul.f32 %v11442_v31, %v6229_v58  ;;  %v6228_v54 = vmul.f32 %v9124_v0, %v6188_v57 }
 0x8ba   : > { %9127 = vrsqrt.f32 %v5357_v5  ;;  %v5318_v44 = vsub.f32 %v5302_v52, %v5310_v45  ;;  %v6307_v8 = vadd.f32 %v11439_v63, %v6267_v40  ;;  %v5254_v48 = vmul.f32 %v11452_v6, %v11452_v6 }
 0x8bb   : > { %6060 = vadd.xlane.f32.xlu0 %v6059_v47  ;;  %v6132_v17 = vadd.f32 %v6131_v15, %v6130_v21  ;;  %v5256_v27 = vmul.f32 %v11481_v55, %v11481_v55  ;;  %v6191_v9 = vsub.f32 %v11219_v37, %v11358_v10  ;;  %v11502_v26 = vrot.slane %v7925_v2, %v13194_v12 }
 0x8bc   : > { %v5220_v0 = vsel %vm5184_vm5, %v11481_v55, 0.0  ;;  %v5292_v18 = vadd.f32 %v5255_v24, %v5254_v48  ;;  %v6309_v25 = vadd.f32 %v11488_v35, %v6269_v1  ;;  %v6268_v40 = vmul.f32 %v11477_v61, %v6228_v54 }
 0x8bd   : > { %v5326_v58 = vmax.f32 %v5318_v44, 0.0  ;;  %v5221_v5 = vadd.f32 %v5220_v0, %v5219_v4  ;;  %v6355_v52 = vmul.f32 0.2, %v6307_v8  ;;  %v6231_v47 = vmul.f32 %v9126_v3, %v6191_v9 }
 0x8be   : > { %vm6331_vm11 = vcmp.ge.f32.partialorder %v6307_v8, 0.0  ;;  %v6190_v37 = vsub.f32 %v11216_v22, %v11358_v10  ;;  %v5293_v2 = vsel %vm5184_vm5, %v5256_v27, 0.0  ;;  %v6357_v57 = vmul.f32 0.2, %v6309_v25  ;;  %v13218_v22 = vld [vmem:[#allocation53_spill] sm:$0xff] }
 0x8bf   : > { %6133 = vadd.xlane.f32.xlu0 %v6132_v17  ;;  %v5294_v21 = vadd.f32 %v5293_v2, %v5292_v18  ;;  %v6308_v45 = vadd.f32 %v11502_v26, %v6268_v40  ;;  %v5358_v24 = vadd.f32 1e-05, %v5326_v58  ;;  %v11512_v15 = vsel %vm6331_vm11, %v6307_v8, %v6355_v52  ;;  %v13219_v52 = vld [vmem:[#allocation58_spill] sm:$0xff] }
 0x8c0   : > { %v6271_v1 = vmul.f32 %v11477_v61, %v6231_v47  ;;  %v6230_v54 = vmul.f32 %v9126_v3, %v6190_v37  ;;  %v6192_v4 = vsub.f32 %v11213_v32, %v11358_v10  ;;  %vm6333_vm15 = vcmp.ge.f32.partialorder %v6309_v25, 0.0 }
 0x8c1   : > { %v6491_v44 = vmul.f32 %v13218_v22, %v11512_v15  ;;  %v6356_v17 = vmul.f32 0.2, %v6308_v45  ;;  %9129 = vrsqrt.f32 %v5358_v24  ;;  %v11519_v27 = vsel %vm6333_vm15, %v6309_v25, %v6357_v57 }
 0x8c2   : > { %v6232_v48 = vmul.f32 %v9126_v3, %v6192_v4  ;;  %v6311_v9 = vadd.f32 %v11502_v26, %v6271_v1  ;;  %v6270_v8 = vmul.f32 %v11433_v38, %v6230_v54  ;;  %vm6332_vm5 = vcmp.ge.f32.partialorder %v6308_v45, 0.0 }
 0x8c3   : > { %5222 = vadd.xlane.f32.xlu0 %v5221_v5  ;;  %v5341_v32 = vsub.f32 %v11241_v59, %v11388_v50  ;;  %v6493_v10 = vmul.f32 %v13218_v22, %v11519_v27  ;;  %v11529_v3 = vsel %vm6332_vm5, %v6308_v45, %v6356_v17  ;;  %v5343_v5 = vsub.f32 %v11244_v28, %v11388_v50  ;;  %v13220_v28 = vld [vmem:[#allocation54_spill] sm:$0xff] }
 0x8c4   : > { %v6272_v18 = vmul.f32 %v11442_v31, %v6232_v48  ;;  %v6359_v25 = vmul.f32 0.2, %v6311_v9  ;;  %v6310_v40 = vadd.f32 %v11439_v63, %v6270_v8  ;;  %vm6335_vm0 = vcmp.ge.f32.partialorder %v6311_v9, 0.0 }
 0x8c5   : > { %v6684_v59 = vmul.f32 %v13219_v52, %v11529_v3  ;;  %v5342_v45 = vsub.f32 %v11247_v46, %v11388_v50  ;;  %v5345_v46 = vsub.f32 %v11267_v49, %v11460_v20  ;;  %v13221_v50 = vld [vmem:[#allocation47_spill] sm:$0xff]  ;;  %v6492_v49 = vmul.f32 %v13218_v22, %v11529_v3  ;;  %v13222_v22 = vld [vmem:[#allocation21_spill] sm:$0xff] }
 0x8c6   : > { %v6312_v47 = vadd.f32 %v11488_v35, %v6272_v18  ;;  %v11538_v37 = vsel %vm6335_vm0, %v6311_v9, %v6359_v25  ;;  %v6358_v2 = vmul.f32 0.2, %v6310_v40  ;;  %vm6334_vm2 = vcmp.ge.f32.partialorder %v6310_v40, 0.0 }
 0x8c7   : > { %5295 = vadd.xlane.f32.xlu0 %v5294_v21  ;;  %v9128_v0 = vpop.eup %9127  ;;  %v6495_v24 = vmul.f32 %v13220_v28, %v11538_v37  ;;  %v5344_v25 = vsub.f32 %v11256_v51, %v11460_v20  ;;  %v6683_v51 = vmul.f32 %v13219_v52, %v11512_v15  ;;  %vm6779_vm11 = vcmask 998400  }
 0x8c8   : > { %v5381_v58 = vmul.f32 %v9128_v0, %v5341_v32  ;;  %v5383_v57 = vmul.f32 %v9128_v0, %v5343_v5  ;;  %v5382_v1 = vmul.f32 %v9128_v0, %v5342_v45  ;;  %v11546_v54 = vsel %vm6334_vm2, %v6310_v40, %v6358_v2 }
 0x8c9   : > { %v6360_v4 = vmul.f32 0.2, %v6312_v47  ;;  %vm6336_vm12 = vcmp.ge.f32.partialorder %v6312_v47, 0.0  ;;  %v6686_v9 = vmul.f32 %v13221_v50, %v11546_v54  ;;  %vm6901_vm15 = vcmask 261120  }
 0x8ca   : > { %6539 = vrot.lane.b32.xlu1 %v6491_v44, %s9271_s26  ;;  %v5421_v21 = vmul.f32 %v11046_v39, %v5381_v58  ;;  %v5423_v17 = vmul.f32 %v11054_v42, %v5383_v57  ;;  %v5422_v8 = vmul.f32 %v11049_v33, %v5382_v1 }
 0x8cb   : > { %v11556_v0 = vsel %vm6336_vm12, %v6312_v47, %v6360_v4 }
 0x8cc   : > { %v5461_v44 = vadd.f32 %v11057_v7, %v5421_v21  ;;  %v6688_v40 = vmul.f32 %v13221_v50, %v11556_v0  ;;  %v5462_v58 = vadd.f32 %v11060_v13, %v5422_v8  ;;  %v5346_v21 = vsub.f32 %v11261_v56, %v11460_v20 }
 0x8cd   : > { %v6685_v56 = vmul.f32 %v13219_v52, %v11519_v27  ;;  %v6494_v8 = vmul.f32 %v13220_v28, %v11546_v54  ;;  %v13223_v52 = vld [vmem:[#allocation28_spill] sm:$0xff] }
 0x8ce   : > { %6543 = vrot.lane.b32.xlu1 %v6493_v10, %s9271_s26  ;;  %v9130_v48 = vpop.eup %9129  ;;  %v5509_v32 = vmul.f32 0.2, %v5461_v44  ;;  %v5463_v10 = vadd.f32 %v11069_v11, %v5423_v17  ;;  %vm5485_vm1 = vcmp.ge.f32.partialorder %v5461_v44, 0.0  ;;  %v5510_v1 = vmul.f32 0.2, %v5462_v58 }
 0x8cf   : > { %v5385_v18 = vmul.f32 %v9130_v48, %v5345_v46  ;;  %v5384_v2 = vmul.f32 %v9130_v48, %v5344_v25  ;;  %v5386_v45 = vmul.f32 %v9130_v48, %v5346_v21  ;;  %vm5486_vm6 = vcmp.ge.f32.partialorder %v5462_v58, 0.0  ;;  %v13225_v21 = vld [vmem:[#allocation31_spill] sm:$0xff] }
 0x8d0   : > { %v11568_v5 = vsel %vm5485_vm1, %v5461_v44, %v5509_v32  ;;  %vm5487_vm4 = vcmp.ge.f32.partialorder %v5463_v10, 0.0  ;;  %v11589_v17 = vsel %vm5486_vm6, %v5462_v58, %v5510_v1 }
 0x8d1   : > { %v5425_v47 = vmul.f32 %v11049_v33, %v5385_v18  ;;  %v5645_v57 = vmul.f32 %v13222_v22, %v11568_v5  ;;  %v5424_v44 = vmul.f32 %v11046_v39, %v5384_v2  ;;  %v5838_v32 = vmul.f32 %v13223_v52, %v11589_v17 }
 0x8d2   : > { %6733 = vrot.lane.b32.xlu1 %v6684_v59, %s9276_s14  ;;  %v5511_v59 = vmul.f32 0.2, %v5463_v10  ;;  %v6687_v2 = vmul.f32 %v13221_v50, %v11538_v37  ;;  %v5837_v50 = vmul.f32 %v13223_v52, %v11568_v5 }
 0x8d3   : > { %v5465_v4 = vadd.f32 %v11060_v13, %v5425_v47  ;;  %v5464_v46 = vadd.f32 %v11057_v7, %v5424_v44 }
 0x8d5   : > { %v5513_v48 = vmul.f32 0.2, %v5465_v4  ;;  %vm5489_vm7 = vcmp.ge.f32.partialorder %v5465_v4, 0.0  ;;  %v5512_v18 = vmul.f32 0.2, %v5464_v46  ;;  %vm5488_vm9 = vcmp.ge.f32.partialorder %v5464_v46, 0.0 }
 0x8d6   : > { %6547 = vrot.lane.b32.xlu1 %v6495_v24, %s9271_s26  ;;  %v11579_v24 = vsel %vm5487_vm4, %v5463_v10, %v5511_v59 }
 0x8d7   : > { %v5647_v20 = vmul.f32 %v13222_v22, %v11579_v24  ;;  %v11599_v10 = vsel %vm5489_vm7, %v5465_v4, %v5513_v48  ;;  %v11608_v59 = vsel %vm5488_vm9, %v5464_v46, %v5512_v18  ;;  %v5839_v1 = vmul.f32 %v13223_v52, %v11579_v24 }
 0x8d8   : > { %v5841_v44 = vmul.f32 %v13225_v21, %v11599_v10 }
 0x8da   : > { %6737 = vrot.lane.b32.xlu1 %v6686_v9, %s9276_s14  ;;  %v5426_v9 = vmul.f32 %v11054_v42, %v5386_v45 }
 0x8dc   : > { %v5466_v25 = vadd.f32 %v11069_v11, %v5426_v9 }
 0x8dd   : > { %6541 = vrot.lane.b32.xlu0 %v6492_v49, %s9271_s26  ;;  %v6496_v49 = vmul.f32 %v13220_v28, %v11556_v0 }
 0x8de   : > { %6741 = vrot.lane.b32.xlu1 %v6688_v40, %s9276_s14  ;;  %v13224_v40 = vld [vmem:[#allocation22_spill] sm:$0xff]  ;;  %v5514_v47 = vmul.f32 0.2, %v5466_v25  ;;  %vm5490_vm10 = vcmp.ge.f32.partialorder %v5466_v25, 0.0 }
 0x8df   : > { %v5649_v58 = vmul.f32 %v13224_v40, %v11599_v10 }
 0x8e0   : > { %v11616_v28 = vsel %vm5490_vm10, %v5466_v25, %v5514_v47 }
 0x8e1   : > { %6731 = vrot.lane.b32.xlu0 %v6683_v51, %s9276_s14  ;;  %v5840_v51 = vmul.f32 %v13225_v21, %v11608_v59  ;;  %v5842_v45 = vmul.f32 %v13225_v21, %v11616_v28  ;;  %v5650_v4 = vmul.f32 %v13224_v40, %v11616_v28 }
 0x8e2   : > { %5705 = vrot.lane.b32.xlu1 %v5645_v57, %s9270_s16  ;;  %v5646_v57 = vmul.f32 %v13222_v22, %v11589_v17  ;;  %v5648_v22 = vmul.f32 %v13224_v40, %v11608_v59 }
 0x8e5   : > { %6735 = vrot.lane.b32.xlu0 %v6685_v56, %s9276_s14 }
 0x8e6   : > { %5709 = vrot.lane.b32.xlu1 %v5647_v20, %s9270_s16 }
 0x8e9   : > { %6545 = vrot.lane.b32.xlu0 %v6494_v8, %s9271_s26 }
 0x8ea   : > { %5899 = vrot.lane.b32.xlu1 %v5838_v32, %s9272_s6 }
 0x8ed   : > { %6549 = vrot.lane.b32.xlu0 %v6496_v49, %s9271_s26 }
 0x8ee   : > { %5713 = vrot.lane.b32.xlu1 %v5649_v58, %s9270_s16 }
 0x8f1   : > { %6739 = vrot.lane.b32.xlu0 %v6687_v2, %s9276_s14  ;;  %v13226_v2 = vld [vmem:[#allocation43_spill] sm:$0xff] }
 0x8f2   : > { %5903 = vrot.lane.b32.xlu1 %v5840_v51, %s9272_s6  ;;  %v6435_v21 = vmul.f32 %v13226_v2, %v11512_v15 }
 0x8f5   : > { %5707 = vrot.lane.b32.xlu0 %v5646_v57, %s9270_s16 }
 0x8f6   : > { %5907 = vrot.lane.b32.xlu1 %v5842_v45, %s9272_s6 }
 0x8f9   : > { %5897 = vrot.lane.b32.xlu0 %v5837_v50, %s9272_s6  ;;  %v6437_v50 = vmul.f32 %v13226_v2, %v11519_v27 }
 0x8fd   : > { %5901 = vrot.lane.b32.xlu0 %v5839_v1, %s9272_s6 }
 0x901   : > { %5711 = vrot.lane.b32.xlu0 %v5648_v22, %s9270_s16 }
 0x905   : > { %5715 = vrot.lane.b32.xlu0 %v5650_v4, %s9270_s16  ;;  %v6436_v4 = vmul.f32 %v13226_v2, %v11529_v3 }
 0x909   : > { %5905 = vrot.lane.b32.xlu0 %v5841_v44, %s9272_s6 }
 0x938   : > { %v6056_v48 = vpop.xlane.xlu0 %6055 }
 0x93a   : > { %v6129_v56 = vpop.xlane.xlu1 %6128 }
 0x93e   : > { %v11640_v20 = vpop.xlane.xlu1 %5217 }
 0x942   : > { %v11642_v46 = vpop.xlane.xlu1 %5290 }
 0x944   : > { %v11644_v9 = vpop.xlane.xlu0 %6060 }
 0x946   : > { %v6540_v8 = vpop.permute.xlu1 %6539 }
 0x948   : > { %v11646_v52 = vpop.xlane.xlu0 %6133 }
 0x94a   : > { %v6544_v32 = vpop.permute.xlu1 %6543 }
 0x94c   : > { %v11648_v18 = vpop.xlane.xlu0 %5222 }
 0x94e   : > { %v6734_v25 = vpop.permute.xlu1 %6733 }
 0x950   : > { %v11650_v49 = vpop.xlane.xlu0 %5295 }
 0x952   : > { %v6548_v40 = vpop.permute.xlu1 %6547 }
 0x954   : > { %v6542_v58 = vpop.permute.xlu0 %6541 }
 0x955   : > { %v6587_v47 = vsel %vm4604_vm13, %v6540_v8, %v6542_v58  ;;  %v6588_v1 = vsel %vm4604_vm13, %v6542_v58, %v6544_v32  ;;  %v6629_v8 = vadd.f32 %v6544_v32, %v6437_v50  ;;  %v6157_v32 = vmul.f32 0.0034013605, %v6129_v56 }
 0x956   : > { %v6738_v51 = vpop.permute.xlu1 %6737  ;;  %v6627_v57 = vadd.f32 %v6587_v47, %v6435_v21  ;;  %v6628_v12 = vadd.f32 %v6588_v1, %v6436_v4  ;;  %v11662_v47 = vmul.f32 0.0034013605, %v6056_v48 }
 0x958   : > { %v6732_v45 = vpop.permute.xlu0 %6731 }
 0x959   : > { %v6780_v22 = vsel %vm6779_vm11, %v6732_v45, %v6734_v25 }
 0x95a   : > { %v6820_v44 = vadd.f32 %v6780_v22, %v6627_v57  ;;  %v6742_v30 = vpop.permute.xlu1 %6741 }
 0x95c   : > { %v6736_v41 = vpop.permute.xlu0 %6735  ;;  %v11665_v21 = vadd.f32 %v10796_v36, %v6820_v44 }
 0x95d   : > { %v6781_v15 = vsel %vm6779_vm11, %v6734_v25, %v6736_v41  ;;  %v6822_v55 = vadd.f32 %v6736_v41, %v6629_v8  ;;  %v6165_v41 = vmul.f32 %v11662_v47, %v11662_v47 }
 0x95e   : > { %13227 = vst [vmem:[#allocation17_spill] sm:$0xff] %v11665_v21  ;;  %v6821_v27 = vadd.f32 %v6781_v15, %v6628_v12  ;;  %v5706_v3 = vpop.permute.xlu1 %5705  ;;  %v6950_v12 = vmul.f32 %v11665_v21, %v11665_v21 }
 0x95f   : > { %v11668_v58 = vadd.f32 %v10796_v36, %v6822_v55  ;;  %v13230_v55 = vld [vmem:[#allocation40_spill] sm:$0xff] }
 0x960   : > { %v11671_v45 = vadd.f32 %v10796_v36, %v6821_v27  ;;  %v6546_v2 = vpop.permute.xlu0 %6545  ;;  %v6440_v57 = vmul.f32 %v13230_v55, %v11556_v0  ;;  %v6173_v27 = vsub.f32 %v6157_v32, %v6165_v41  ;;  %v6439_v0 = vmul.f32 %v13230_v55, %v11538_v37 }
 0x961   : > { %13228 = vst [vmem:[#allocation26_spill] sm:$0xff] %v11668_v58  ;;  %v6952_v25 = vmul.f32 %v11668_v58, %v11668_v58  ;;  %v6902_v56 = vsel %vm6901_vm15, %v11668_v58, 0.0  ;;  %v6589_v4 = vsel %vm4604_vm13, %v6546_v2, %v6548_v40 }
 0x962   : > { %13229 = vst [vmem:[#allocation7_spill] sm:$0xff] %v11671_v45  ;;  %v6900_v48 = vadd.f32 %v11671_v45, %v11665_v21  ;;  %v6951_v36 = vmul.f32 %v11671_v45, %v11671_v45  ;;  %v6438_v45 = vmul.f32 %v13230_v55, %v11546_v54  ;;  %v5710_v21 = vpop.permute.xlu1 %5709 }
 0x963   : > { %v6975_v15 = vsel %vm6901_vm15, %v6952_v25, 0.0  ;;  %v6181_v25 = vmax.f32 %v6173_v27, 0.0 }
 0x964   : > { %v6550_v50 = vpop.permute.xlu0 %6549  ;;  %v6903_v1 = vadd.f32 %v6902_v56, %v6900_v48  ;;  %v6974_v22 = vadd.f32 %v6951_v36, %v6950_v12  ;;  %v6630_v48 = vadd.f32 %v6589_v4, %v6438_v45 }
 0x965   : > { %v6590_v44 = vsel %vm4604_vm13, %v6548_v40, %v6550_v50  ;;  %v6632_v8 = vadd.f32 %v6550_v50, %v6440_v57  ;;  %v11700_v57 = vmul.f32 0.0034013605, %v11644_v9 }
 0x966   : > { %6904 = vadd.xlane.f32.xlu1 %v6903_v1  ;;  %v6976_v58 = vadd.f32 %v6975_v15, %v6974_v22  ;;  %v6631_v12 = vadd.f32 %v6590_v44, %v6439_v0  ;;  %v5900_v37 = vpop.permute.xlu1 %5899  ;;  %v13231_v1 = vld [vmem:[#allocation10_spill] sm:$0xff] }
 0x967   : > { %v6825_v13 = vadd.f32 %v6742_v30, %v6632_v8  ;;  %v6166_v50 = vmul.f32 %v11700_v57, %v11700_v57  ;;  %v5589_v22 = vmul.f32 %v13231_v1, %v11568_v5  ;;  %v5591_v44 = vmul.f32 %v13231_v1, %v11579_v24 }
 0x968   : > { %6977 = vadd.xlane.f32.xlu0 %v6976_v58  ;;  %v6740_v2 = vpop.permute.xlu0 %6739  ;;  %v5590_v27 = vmul.f32 %v13231_v1, %v11589_v17  ;;  %v13233_v1 = vld [vmem:[#allocation11_spill] sm:$0xff] }
 0x969   : > { %v6782_v40 = vsel %vm6779_vm11, %v6738_v51, %v6740_v2  ;;  %v6783_v36 = vsel %vm6779_vm11, %v6740_v2, %v6742_v30  ;;  %v11697_v54 = vadd.f32 %v10871_v62, %v6825_v13  ;;  %v6213_v51 = vadd.f32 1e-05, %v6181_v25 }
 0x96a   : > { %v6823_v32 = vadd.f32 %v6782_v40, %v6630_v48  ;;  %v6824_v41 = vadd.f32 %v6783_v36, %v6631_v12  ;;  %v6158_v30 = vmul.f32 0.0034013605, %v11646_v52  ;;  %v5714_v15 = vpop.permute.xlu1 %5713  ;;  %v5783_v48 = vadd.f32 %v5710_v21, %v5591_v44 }
 0x96b   : > { %v6907_v9 = vsel %vm6901_vm15, %v11697_v54, 0.0  ;;  %9131 = vrsqrt.f32 %v6213_v51 }
 0x96c   : > { %v11703_v55 = vadd.f32 %v10871_v62, %v6823_v32  ;;  %v11706_v58 = vadd.f32 %v10871_v62, %v6824_v41  ;;  %v5708_v45 = vpop.permute.xlu0 %5707  ;;  %v11726_v32 = vmul.f32 0.0033557047, %v11640_v20  ;;  %v13232_v41 = vld [vmem:[#allocation39_spill] sm:$0xff]  ;;  %v5303_v20 = vmul.f32 0.0033557047, %v11642_v46 }
 0x96d   : > { %v5737_v13 = vsel %vm4249_vm3, %v5706_v3, %v5708_v45  ;;  %v5738_v52 = vsel %vm4249_vm3, %v5708_v45, %v5710_v21  ;;  %v6174_v3 = vsub.f32 %v6158_v30, %v6166_v50 }
 0x96e   : > { %v6906_v56 = vadd.f32 %v11706_v58, %v11703_v55  ;;  %v5781_v0 = vadd.f32 %v5737_v13, %v5589_v22  ;;  %v5782_v12 = vadd.f32 %v5738_v52, %v5590_v27  ;;  %v5904_v51 = vpop.permute.xlu1 %5903  ;;  %v5311_v50 = vmul.f32 %v11726_v32, %v11726_v32 }
 0x96f   : > { %v6182_v24 = vmax.f32 %v6174_v3, 0.0  ;;  %v5594_v22 = vmul.f32 %v13233_v1, %v11616_v28 }
 0x970   : > { %v5898_v62 = vpop.permute.xlu0 %5897  ;;  %v6908_v4 = vadd.f32 %v6907_v9, %v6906_v56  ;;  %v6954_v56 = vmul.f32 %v11706_v58, %v11706_v58  ;;  %v5319_v3 = vsub.f32 %v5303_v20, %v5311_v50 }
 0x971   : > { %v5929_v8 = vsel %vm4649_vm8, %v5898_v62, %v5900_v37  ;;  %v6214_v13 = vadd.f32 1e-05, %v6182_v24 }
 0x972   : > { %6909 = vadd.xlane.f32.xlu0 %v6908_v4  ;;  %v5973_v5 = vadd.f32 %v5929_v8, %v5781_v0  ;;  %v6955_v4 = vmul.f32 %v11697_v54, %v11697_v54  ;;  %v5908_v28 = vpop.permute.xlu1 %5907 }
 0x973   : > { %9133 = vrsqrt.f32 %v6214_v13 }
 0x974   : > { %v5902_v2 = vpop.permute.xlu0 %5901  ;;  %v11732_v17 = vadd.f32 %v13232_v41, %v5973_v5  ;;  %v5593_v5 = vmul.f32 %v13233_v1, %v11599_v10  ;;  %v5327_v10 = vmax.f32 %v5319_v3, 0.0  ;;  %v5304_v3 = vmul.f32 0.0033557047, %v11650_v49 }
 0x975   : > { %v5930_v40 = vsel %vm4649_vm8, %v5900_v37, %v5902_v2  ;;  %v5975_v36 = vadd.f32 %v5902_v2, %v5783_v48  ;;  %v6953_v37 = vmul.f32 %v11703_v55, %v11703_v55 }
 0x976   : > { %v5974_v25 = vadd.f32 %v5930_v40, %v5782_v12  ;;  %v5592_v12 = vmul.f32 %v13233_v1, %v11608_v59  ;;  %v6103_v2 = vmul.f32 %v11732_v17, %v11732_v17  ;;  %v6195_v1 = vsub.f32 %v11378_v19, %v11662_v47 }
 0x977   : > { %v11729_v45 = vadd.f32 %v13232_v41, %v5975_v36  ;;  %v6979_v8 = vadd.f32 %v6954_v56, %v6953_v37  ;;  %v6193_v36 = vsub.f32 %v11372_v53, %v11662_v47 }
 0x978   : > { %v11735_v21 = vadd.f32 %v13232_v41, %v5974_v25  ;;  %v5712_v30 = vpop.permute.xlu0 %5711  ;;  %v9132_v40 = vpop.eup %9131 }
 0x979   : > { %v6063_v62 = vsel %vm6042_vm14, %v11729_v45, 0.0  ;;  %v5739_v27 = vsel %vm4249_vm3, %v5712_v30, %v5714_v15  ;;  %v6105_v25 = vmul.f32 %v11729_v45, %v11729_v45  ;;  %v6233_v53 = vmul.f32 %v9132_v40, %v6193_v36 }
 0x97a   : > { %v6062_v9 = vadd.f32 %v11735_v21, %v11732_v17  ;;  %v6104_v46 = vmul.f32 %v11735_v21, %v11735_v21  ;;  %v5784_v41 = vadd.f32 %v5739_v27, %v5592_v12  ;;  %v6235_v27 = vmul.f32 %v9132_v40, %v6195_v1 }
 0x97c   : > { %v5716_v44 = vpop.permute.xlu0 %5715  ;;  %v6064_v52 = vadd.f32 %v6063_v62, %v6062_v9  ;;  %v6135_v56 = vadd.f32 %v6104_v46, %v6103_v2  ;;  %v13234_v62 = vld [vmem:[#allocation36_spill] sm:$0xff]  ;;  %v5359_v46 = vadd.f32 1e-05, %v5327_v10 }
 0x97d   : > { %v5740_v0 = vsel %vm4249_vm3, %v5714_v15, %v5716_v44  ;;  %v5786_v48 = vadd.f32 %v5716_v44, %v5594_v22  ;;  %v6980_v15 = vsel %vm6901_vm15, %v6955_v4, 0.0  ;;  %v11772_v22 = vmul.f32 0.0033557047, %v11648_v18 }
 0x97e   : > { %6065 = vadd.xlane.f32.xlu1 %v6064_v52  ;;  %v5785_v30 = vadd.f32 %v5740_v0, %v5593_v5  ;;  %v6981_v37 = vadd.f32 %v6980_v15, %v6979_v8  ;;  %v6136_v44 = vsel %vm6042_vm14, %v6105_v25, 0.0  ;;  %9135 = vrsqrt.f32 %v5359_v46 }
 0x97f   : > { %v5978_v24 = vadd.f32 %v5908_v28, %v5786_v48  ;;  %v6137_v8 = vadd.f32 %v6136_v44, %v6135_v56  ;;  %v6273_v48 = vmul.f32 %v11433_v38, %v6233_v53  ;;  %v5312_v12 = vmul.f32 %v11772_v22, %v11772_v22 }
 0x980   : > { %v5906_v59 = vpop.permute.xlu0 %5905  ;;  %v6198_v44 = vsub.f32 %v11436_v60, %v11700_v57 }
 0x981   : > { %v5931_v20 = vsel %vm4649_vm8, %v5904_v51, %v5906_v59  ;;  %v5932_v13 = vsel %vm4649_vm8, %v5906_v59, %v5908_v28  ;;  %v11775_v4 = vadd.f32 %v13234_v62, %v5978_v24  ;;  %v6194_v28 = vsub.f32 %v11381_v43, %v11662_v47  ;;  %v9134_v43 = vpop.eup %9133 }
 0x982   : > { %v5976_v9 = vadd.f32 %v5931_v20, %v5784_v41  ;;  %v5977_v50 = vadd.f32 %v5932_v13, %v5785_v30  ;;  %6982 = vadd.xlane.f32.xlu1 %v6981_v37  ;;  %v5320_v24 = vsub.f32 %v5304_v3, %v5312_v12  ;;  %v6313_v25 = vadd.f32 %v11439_v63, %v6273_v48 }
 0x983   : > { %v6068_v49 = vsel %vm6042_vm14, %v11775_v4, 0.0  ;;  %v6108_v5 = vmul.f32 %v11775_v4, %v11775_v4  ;;  %v6234_v15 = vmul.f32 %v9132_v40, %v6194_v28  ;;  %v6275_v41 = vmul.f32 %v11442_v31, %v6235_v27 }
 0x984   : > { %v11779_v52 = vadd.f32 %v13234_v62, %v5976_v9  ;;  %v11782_v51 = vadd.f32 %v13234_v62, %v5977_v50  ;;  %v6197_v30 = vsub.f32 %v11448_v29, %v11700_v57  ;;  %v5328_v37 = vmax.f32 %v5320_v24, 0.0 }
 0x985   : > { %v6141_v47 = vsel %vm6042_vm14, %v6108_v5, 0.0  ;;  %v6274_v56 = vmul.f32 %v11477_v61, %v6234_v15  ;;  %v6361_v10 = vmul.f32 0.2, %v6313_v25  ;;  %v6315_v20 = vadd.f32 %v11488_v35, %v6275_v41 }
 0x986   : > { %6138 = vadd.xlane.f32.xlu1 %v6137_v8  ;;  %v6067_v19 = vadd.f32 %v11782_v51, %v11779_v52  ;;  %v6106_v18 = vmul.f32 %v11779_v52, %v11779_v52  ;;  %v6107_v0 = vmul.f32 %v11782_v51, %v11782_v51  ;;  %v6237_v40 = vmul.f32 %v9134_v43, %v6197_v30  ;;  %v13235_v8 = vld [vmem:[#allocation42_spill] sm:$0xff] }
 0x987   : > { %vm6337_vm5 = vcmp.ge.f32.partialorder %v6313_v25, 0.0  ;;  %v6196_v13 = vsub.f32 %v11445_v34, %v11700_v57  ;;  %v5360_v9 = vadd.f32 1e-05, %v5328_v37  ;;  %v6314_v50 = vadd.f32 %v11502_v26, %v6274_v56 }
 0x988   : > { %v6069_v2 = vadd.f32 %v6068_v49, %v6067_v19  ;;  %v6140_v36 = vadd.f32 %v6107_v0, %v6106_v18  ;;  %v11810_v53 = vsel %vm6337_vm5, %v6313_v25, %v6361_v10  ;;  %v6363_v1 = vmul.f32 0.2, %v6315_v20 }
 0x989   : > { %v6277_v29 = vmul.f32 %v11477_v61, %v6237_v40  ;;  %v6236_v62 = vmul.f32 %v9134_v43, %v6196_v13  ;;  %vm6339_vm0 = vcmp.ge.f32.partialorder %v6315_v20, 0.0  ;;  %9137 = vrsqrt.f32 %v5360_v9 }
 0x98a   : > { %6070 = vadd.xlane.f32.xlu0 %v6069_v2  ;;  %v6142_v59 = vadd.f32 %v6141_v47, %v6140_v36  ;;  %v6497_v46 = vmul.f32 %v13235_v8, %v11810_v53  ;;  %v6362_v3 = vmul.f32 0.2, %v6314_v50  ;;  %v11817_v34 = vsel %vm6339_vm0, %v6315_v20, %v6363_v1  ;;  %v13236_v2 = vld [vmem:[#allocation59_spill] sm:$0xff] }
 0x98b   : > { %v9136_v27 = vpop.eup %9135  ;;  %v6317_v19 = vadd.f32 %v11502_v26, %v6277_v29  ;;  %v6276_v18 = vmul.f32 %v11433_v38, %v6236_v62  ;;  %v6238_v0 = vmul.f32 %v9134_v43, %v6198_v44  ;;  %v5347_v48 = vsub.f32 %v11401_v14, %v11726_v32  ;;  %v13237_v47 = vld [vmem:[#allocation15_spill] sm:$0xff] }
 0x98c   : > { %vm6338_vm2 = vcmp.ge.f32.partialorder %v6314_v50, 0.0  ;;  %v6499_v60 = vmul.f32 %v13235_v8, %v11817_v34  ;;  %v5349_v14 = vsub.f32 %v11398_v16, %v11726_v32  ;;  %v5348_v30 = vsub.f32 %v13237_v47, %v11726_v32 }
 0x98d   : > { %v5387_v57 = vmul.f32 %v9136_v27, %v5347_v48  ;;  %v11826_v28 = vsel %vm6338_vm2, %v6314_v50, %v6362_v3  ;;  %v6365_v12 = vmul.f32 0.2, %v6317_v19  ;;  %v6316_v49 = vadd.f32 %v11439_v63, %v6276_v18  ;;  %v13239_v50 = vld [vmem:[#allocation67_spill] sm:$0xff]  ;;  %v13240_v18 = vld [vmem:[#allocation74_spill] sm:$0xff] }
 0x98e   : > { %6143 = vadd.xlane.f32.xlu0 %v6142_v59  ;;  %v6278_v5 = vmul.f32 %v11442_v31, %v6238_v0  ;;  %vm6341_vm12 = vcmp.ge.f32.partialorder %v6317_v19, 0.0  ;;  %v6690_v36 = vmul.f32 %v13236_v2, %v11826_v28  ;;  %v5389_v43 = vmul.f32 %v9136_v27, %v5349_v14  ;;  %v13238_v59 = vld [vmem:[#allocation55_spill] sm:$0xff] }
 0x98f   : > { %v5427_v24 = vmul.f32 %v11046_v39, %v5387_v57  ;;  %v11836_v15 = vsel %vm6341_vm12, %v6317_v19, %v6365_v12  ;;  %v6364_v25 = vmul.f32 0.2, %v6316_v49  ;;  %vm6340_vm1 = vcmp.ge.f32.partialorder %v6316_v49, 0.0 }
 0x990   : > { %v6318_v41 = vadd.f32 %v11488_v35, %v6278_v5  ;;  %v6501_v16 = vmul.f32 %v13238_v59, %v11836_v15  ;;  %v6498_v37 = vmul.f32 %v13235_v8, %v11826_v28  ;;  %v5388_v56 = vmul.f32 %v9136_v27, %v5348_v30  ;;  %v13242_v5 = vld [vmem:[#allocation23_spill] sm:$0xff] }
 0x991   : > { %v11846_v20 = vsel %vm6340_vm1, %v6316_v49, %v6364_v25  ;;  %v5467_v13 = vadd.f32 %v11057_v7, %v5427_v24  ;;  %v5429_v9 = vmul.f32 %v11054_v42, %v5389_v43  ;;  %v5351_v32 = vsub.f32 %v11455_v23, %v11772_v22 }
 0x992   : > { %v6366_v40 = vmul.f32 0.2, %v6318_v41  ;;  %vm6342_vm4 = vcmp.ge.f32.partialorder %v6318_v41, 0.0  ;;  %v6692_v1 = vmul.f32 %v13239_v50, %v11846_v20  ;;  %v6689_v29 = vmul.f32 %v13236_v2, %v11810_v53 }
 0x993   : > { %v5428_v62 = vmul.f32 %v11049_v33, %v5388_v56  ;;  %v5515_v8 = vmul.f32 0.2, %v5467_v13  ;;  %vm5491_vm6 = vcmp.ge.f32.partialorder %v5467_v13, 0.0  ;;  %v5350_v23 = vsub.f32 %v11452_v6, %v11772_v22  ;;  %v13241_v6 = vld [vmem:[#allocation25_spill] sm:$0xff] }
 0x994   : > { %v11859_v44 = vsel %vm6342_vm4, %v6318_v41, %v6366_v40  ;;  %v6691_v19 = vmul.f32 %v13236_v2, %v11817_v34  ;;  %v5352_v49 = vsub.f32 %v13241_v6, %v11772_v22  ;;  %v6500_v2 = vmul.f32 %v13238_v59, %v11846_v20 }
 0x995   : > { %v6694_v27 = vmul.f32 %v13239_v50, %v11859_v44  ;;  %v5468_v0 = vadd.f32 %v13240_v18, %v5428_v62  ;;  %v11871_v48 = vsel %vm5491_vm6, %v5467_v13, %v5515_v8  ;;  %v6502_v43 = vmul.f32 %v13238_v59, %v11859_v44 }
 0x996   : > { %v9138_v10 = vpop.eup %9137  ;;  %v5651_v14 = vmul.f32 %v13242_v5, %v11871_v48 }
 0x997   : > { %6551 = vrot.lane.b32.xlu1 %v6497_v46, %s9271_s26  ;;  %v5469_v46 = vadd.f32 %v11069_v11, %v5429_v9  ;;  %v5391_v3 = vmul.f32 %v9138_v10, %v5351_v32  ;;  %v5390_v12 = vmul.f32 %v9138_v10, %v5350_v23  ;;  %v5392_v41 = vmul.f32 %v9138_v10, %v5352_v49 }
 0x998   : > { %vm5492_vm9 = vcmp.ge.f32.partialorder %v5468_v0, 0.0  ;;  %v6693_v10 = vmul.f32 %v13239_v50, %v11836_v15 }
 0x999   : > { %v5431_v57 = vmul.f32 %v11049_v33, %v5391_v3  ;;  %vm5493_vm7 = vcmp.ge.f32.partialorder %v5469_v46, 0.0  ;;  %v5430_v25 = vmul.f32 %v11046_v39, %v5390_v12  ;;  %v13243_v39 = vld [vmem:[#allocation30_spill] sm:$0xff] }
 0x99b   : > { %6555 = vrot.lane.b32.xlu1 %v6499_v60, %s9271_s26  ;;  %v5517_v60 = vmul.f32 0.2, %v5469_v46  ;;  %v5471_v33 = vadd.f32 %v13240_v18, %v5431_v57 }
 0x99d   : > { %v11882_v24 = vsel %vm5493_vm7, %v5469_v46, %v5517_v60  ;;  %v5519_v30 = vmul.f32 0.2, %v5471_v33  ;;  %vm5495_vm10 = vcmp.ge.f32.partialorder %v5471_v33, 0.0 }
 0x99e   : > { %v5653_v22 = vmul.f32 %v13242_v5, %v11882_v24  ;;  %v5845_v46 = vmul.f32 %v13243_v39, %v11882_v24 }
 0x99f   : > { %6745 = vrot.lane.b32.xlu1 %v6690_v36, %s9276_s14  ;;  %v5516_v36 = vmul.f32 0.2, %v5468_v0  ;;  %v11902_v40 = vsel %vm5495_vm10, %v5471_v33, %v5519_v30 }
 0x9a1   : > { %v11892_v47 = vsel %vm5492_vm9, %v5468_v0, %v5516_v36 }
 0x9a2   : > { %v5844_v56 = vmul.f32 %v13243_v39, %v11892_v47  ;;  %v5652_v9 = vmul.f32 %v13242_v5, %v11892_v47 }
 0x9a3   : > { %6559 = vrot.lane.b32.xlu1 %v6501_v16, %s9271_s26  ;;  %v5470_v16 = vadd.f32 %v11057_v7, %v5430_v25  ;;  %v13246_v25 = vld [vmem:[#allocation45_spill] sm:$0xff] }
 0x9a4   : > { %6553 = vrot.lane.b32.xlu0 %v6498_v37, %s9271_s26  ;;  %v5432_v37 = vmul.f32 %v11054_v42, %v5392_v41  ;;  %v13244_v42 = vld [vmem:[#allocation24_spill] sm:$0xff]  ;;  %v6441_v41 = vmul.f32 %v13246_v25, %v11810_v53 }
 0x9a5   : > { %v5518_v59 = vmul.f32 0.2, %v5470_v16  ;;  %vm5494_vm5 = vcmp.ge.f32.partialorder %v5470_v16, 0.0  ;;  %v5655_v7 = vmul.f32 %v13244_v42, %v11902_v40 }
 0x9a6   : > { %v5472_v13 = vadd.f32 %v11069_v11, %v5432_v37  ;;  %v13245_v11 = vld [vmem:[#allocation33_spill] sm:$0xff] }
 0x9a7   : > { %6749 = vrot.lane.b32.xlu1 %v6692_v1, %s9276_s14  ;;  %v11911_v32 = vsel %vm5494_vm5, %v5470_v16, %v5518_v59  ;;  %v6443_v16 = vmul.f32 %v13246_v25, %v11817_v34 }
 0x9a8   : > { %6743 = vrot.lane.b32.xlu0 %v6689_v29, %s9276_s14  ;;  %v5520_v1 = vmul.f32 0.2, %v5472_v13  ;;  %vm5496_vm0 = vcmp.ge.f32.partialorder %v5472_v13, 0.0  ;;  %v5846_v50 = vmul.f32 %v13245_v11, %v11911_v32  ;;  %v5843_v29 = vmul.f32 %v13243_v39, %v11871_v48 }
 0x9a9   : > { %v5654_v3 = vmul.f32 %v13244_v42, %v11911_v32 }
 0x9aa   : > { %v11919_v62 = vsel %vm5496_vm0, %v5472_v13, %v5520_v1  ;;  %v13247_v1 = vld [vmem:[#allocation70_spill] sm:$0xff] }
 0x9ab   : > { %6753 = vrot.lane.b32.xlu1 %v6694_v27, %s9276_s14  ;;  %v5848_v8 = vmul.f32 %v13245_v11, %v11919_v62  ;;  %v5656_v23 = vmul.f32 %v13244_v42, %v11919_v62  ;;  %v5847_v27 = vmul.f32 %v13245_v11, %v11902_v40 }
 0x9ac   : > { %6747 = vrot.lane.b32.xlu0 %v6691_v19, %s9276_s14 }
 0x9af   : > { %5717 = vrot.lane.b32.xlu1 %v5651_v14, %s9270_s16 }
 0x9b0   : > { %6557 = vrot.lane.b32.xlu0 %v6500_v2, %s9271_s26 }
 0x9b3   : > { %5721 = vrot.lane.b32.xlu1 %v5653_v22, %s9270_s16 }
 0x9b4   : > { %6561 = vrot.lane.b32.xlu0 %v6502_v43, %s9271_s26 }
 0x9b7   : > { %5911 = vrot.lane.b32.xlu1 %v5844_v56, %s9272_s6  ;;  %v6442_v56 = vmul.f32 %v13246_v25, %v11826_v28 }
 0x9b8   : > { %6751 = vrot.lane.b32.xlu0 %v6693_v10, %s9276_s14 }
 0x9bb   : > { %5725 = vrot.lane.b32.xlu1 %v5655_v7, %s9270_s16 }
 0x9bc   : > { %5719 = vrot.lane.b32.xlu0 %v5652_v9, %s9270_s16 }
 0x9bf   : > { %5915 = vrot.lane.b32.xlu1 %v5846_v50, %s9272_s6 }
 0x9c0   : > { %5909 = vrot.lane.b32.xlu0 %v5843_v29, %s9272_s6 }
 0x9c3   : > { %5919 = vrot.lane.b32.xlu1 %v5848_v8, %s9272_s6 }
 0x9c4   : > { %5913 = vrot.lane.b32.xlu0 %v5845_v46, %s9272_s6 }
 0x9c8   : > { %5723 = vrot.lane.b32.xlu0 %v5654_v3, %s9270_s16 }
 0x9cc   : > { %5727 = vrot.lane.b32.xlu0 %v5656_v23, %s9270_s16  ;;  %s9199_s16 = scalar_lea.vmem %s12976_s11, 3072 }
 0x9cd   : > { %p9200_p11 = scmp.ne.s32.totalorder %s12976_s11, %s9199_s16 }
 0x9cf   : > { %p9201_p12 = pnand %p9200_p11, %p9352_p5 }
 0x9d0   : > { %5917 = vrot.lane.b32.xlu0 %v5847_v27, %s9272_s6 }
 0x9d1   : > { %p9202_p13 = pneg %p9201_p12 }
 0x9ef   : > { %v11938_v19 = vpop.xlane.xlu1 %6904 }
 0x9f1   : > { %v11940_v0 = vpop.xlane.xlu0 %6977 }
 0x9fb   : > { %v11944_v57 = vpop.xlane.xlu0 %6909 }
 0xa07   : > { %v6066_v18 = vpop.xlane.xlu1 %6065 }
 0xa08   : > { %v11964_v29 = vmul.f32 0.0034013605, %v6066_v18 }
 0xa0b   : > { %v11942_v60 = vpop.xlane.xlu1 %6982 }
 0xa0f   : > { %v6139_v12 = vpop.xlane.xlu1 %6138 }
 0xa10   : > { %v6159_v3 = vmul.f32 0.0034013605, %v6139_v12  ;;  %v6167_v12 = vmul.f32 %v11964_v29, %v11964_v29 }
 0xa13   : > { %v6552_v6 = vpop.permute.xlu1 %6551  ;;  %v6071_v49 = vpop.xlane.xlu0 %6070 }
 0xa17   : > { %v6556_v5 = vpop.permute.xlu1 %6555  ;;  %v11946_v14 = vpop.xlane.xlu0 %6143 }
 0xa18   : > { %v6635_v59 = vadd.f32 %v6556_v5, %v6443_v16 }
 0xa1b   : > { %v6746_v2 = vpop.permute.xlu1 %6745  ;;  %v6554_v36 = vpop.permute.xlu0 %6553 }
 0xa1c   : > { %v6591_v33 = vsel %vm4604_vm13, %v6552_v6, %v6554_v36  ;;  %v6592_v37 = vsel %vm4604_vm13, %v6554_v36, %v6556_v5  ;;  %v13248_v5 = vld [vmem:[#allocation48_spill] sm:$0xff] }
 0xa1d   : > { %v6633_v22 = vadd.f32 %v6591_v33, %v6441_v41  ;;  %v6634_v13 = vadd.f32 %v6592_v37, %v6442_v56  ;;  %v6445_v56 = vmul.f32 %v13248_v5, %v11836_v15  ;;  %v11995_v15 = vmul.f32 0.0034013605, %v6071_v49 }
 0xa1f   : > { %v6560_v43 = vpop.permute.xlu1 %6559  ;;  %v6744_v30 = vpop.permute.xlu0 %6743 }
 0xa20   : > { %v6784_v39 = vsel %vm6779_vm11, %v6744_v30, %v6746_v2 }
 0xa21   : > { %v6826_v10 = vadd.f32 %v6784_v39, %v6633_v22  ;;  %v6175_v39 = vsub.f32 %v6159_v3, %v6167_v12 }
 0xa23   : > { %v6750_v42 = vpop.permute.xlu1 %6749  ;;  %v6748_v7 = vpop.permute.xlu0 %6747  ;;  %v11959_v11 = vadd.f32 %v13247_v1, %v6826_v10 }
 0xa24   : > { %v6785_v53 = vsel %vm6779_vm11, %v6746_v2, %v6748_v7  ;;  %v6828_v9 = vadd.f32 %v6748_v7, %v6635_v59  ;;  %v6446_v2 = vmul.f32 %v13248_v5, %v11859_v44  ;;  %v6444_v44 = vmul.f32 %v13248_v5, %v11846_v20  ;;  %v13249_v20 = vld [vmem:[#allocation65_spill] sm:$0xff] }
 0xa25   : > { %v6827_v50 = vadd.f32 %v6785_v53, %v6634_v13  ;;  %v6956_v27 = vmul.f32 %v11959_v11, %v11959_v11 }
 0xa26   : > { %v11962_v34 = vadd.f32 %v13247_v1, %v6828_v9 }
 0xa27   : > { %v11967_v8 = vadd.f32 %v13247_v1, %v6827_v50  ;;  %v6754_v28 = vpop.permute.xlu1 %6753  ;;  %v6558_v46 = vpop.permute.xlu0 %6557 }
 0xa28   : > { %v6912_v18 = vsel %vm6901_vm15, %v11962_v34, 0.0  ;;  %v6958_v36 = vmul.f32 %v11962_v34, %v11962_v34  ;;  %v6593_v30 = vsel %vm4604_vm13, %v6558_v46, %v6560_v43  ;;  %v6183_v46 = vmax.f32 %v6175_v39, 0.0 }
 0xa29   : > { %v6911_v23 = vadd.f32 %v11967_v8, %v11959_v11  ;;  %v6957_v6 = vmul.f32 %v11967_v8, %v11967_v8  ;;  %v6636_v13 = vadd.f32 %v6593_v30, %v6444_v44 }
 0xa2a   : > { %v6985_v59 = vsel %vm6901_vm15, %v6958_v36, 0.0 }
 0xa2b   : > { %v5718_v33 = vpop.permute.xlu1 %5717  ;;  %v6562_v25 = vpop.permute.xlu0 %6561  ;;  %v6913_v41 = vadd.f32 %v6912_v18, %v6911_v23  ;;  %v6984_v22 = vadd.f32 %v6957_v6, %v6956_v27 }
 0xa2c   : > { %v6594_v16 = vsel %vm4604_vm13, %v6560_v43, %v6562_v25  ;;  %v6638_v37 = vadd.f32 %v6562_v25, %v6446_v2  ;;  %v6168_v25 = vmul.f32 %v11995_v15, %v11995_v15 }
 0xa2d   : > { %6914 = vadd.xlane.f32.xlu0 %v6913_v41  ;;  %v6637_v7 = vadd.f32 %v6594_v16, %v6445_v56  ;;  %v6986_v1 = vadd.f32 %v6985_v59, %v6984_v22  ;;  %v13250_v41 = vld [vmem:[#allocation12_spill] sm:$0xff] }
 0xa2e   : > { %v6831_v10 = vadd.f32 %v6754_v28, %v6638_v37  ;;  %v5595_v22 = vmul.f32 %v13250_v41, %v11871_v48  ;;  %v5597_v37 = vmul.f32 %v13250_v41, %v11882_v24  ;;  %v5596_v44 = vmul.f32 %v13250_v41, %v11892_v47 }
 0xa2f   : > { %v5722_v53 = vpop.permute.xlu1 %5721  ;;  %v6752_v9 = vpop.permute.xlu0 %6751 }
 0xa30   : > { %v6786_v50 = vsel %vm6779_vm11, %v6750_v42, %v6752_v9  ;;  %v6787_v43 = vsel %vm6779_vm11, %v6752_v9, %v6754_v28  ;;  %v11993_v27 = vadd.f32 %v13249_v20, %v6831_v10  ;;  %v6215_v42 = vadd.f32 1e-05, %v6183_v46 }
 0xa31   : > { %v6829_v3 = vadd.f32 %v6786_v50, %v6636_v13  ;;  %v6830_v23 = vadd.f32 %v6787_v43, %v6637_v7  ;;  %6987 = vadd.xlane.f32.xlu0 %v6986_v1  ;;  %v6160_v28 = vmul.f32 0.0034013605, %v11946_v14  ;;  %v5789_v59 = vadd.f32 %v5722_v53, %v5597_v37  ;;  %v13251_v43 = vld [vmem:[#allocation41_spill] sm:$0xff] }
 0xa32   : > { %v6917_v49 = vsel %vm6901_vm15, %v11993_v27, 0.0  ;;  %9139 = vrsqrt.f32 %v6215_v42 }
 0xa33   : > { %v11998_v6 = vadd.f32 %v13249_v20, %v6829_v3  ;;  %v12001_v5 = vadd.f32 %v13249_v20, %v6830_v23  ;;  %v5912_v2 = vpop.permute.xlu1 %5911  ;;  %v5720_v18 = vpop.permute.xlu0 %5719 }
 0xa34   : > { %v5741_v12 = vsel %vm4249_vm3, %v5718_v33, %v5720_v18  ;;  %v5742_v14 = vsel %vm4249_vm3, %v5720_v18, %v5722_v53  ;;  %v6176_v33 = vsub.f32 %v6160_v28, %v6168_v25  ;;  %v13252_v28 = vld [vmem:[#allocation13_spill] sm:$0xff] }
 0xa35   : > { %v6916_v36 = vadd.f32 %v12001_v5, %v11998_v6  ;;  %v5787_v56 = vadd.f32 %v5741_v12, %v5595_v22  ;;  %v5788_v13 = vadd.f32 %v5742_v14, %v5596_v44  ;;  %v6959_v53 = vmul.f32 %v11998_v6, %v11998_v6 }
 0xa36   : > { %v6184_v24 = vmax.f32 %v6176_v33, 0.0  ;;  %v5599_v33 = vmul.f32 %v13252_v28, %v11902_v40 }
 0xa37   : > { %v5910_v30 = vpop.permute.xlu0 %5909  ;;  %v6918_v16 = vadd.f32 %v6917_v49, %v6916_v36  ;;  %v5726_v10 = vpop.permute.xlu1 %5725  ;;  %v5600_v36 = vmul.f32 %v13252_v28, %v11919_v62  ;;  %v6961_v49 = vmul.f32 %v11993_v27, %v11993_v27  ;;  %v5598_v62 = vmul.f32 %v13252_v28, %v11911_v32 }
 0xa38   : > { %v5933_v39 = vsel %vm4649_vm8, %v5910_v30, %v5912_v2  ;;  %v6216_v18 = vadd.f32 1e-05, %v6184_v24 }
 0xa39   : > { %6919 = vadd.xlane.f32.xlu1 %v6918_v16  ;;  %v5979_v48 = vadd.f32 %v5933_v39, %v5787_v56 }
 0xa3a   : > { %9141 = vrsqrt.f32 %v6216_v18 }
 0xa3b   : > { %v5914_v7 = vpop.permute.xlu0 %5913  ;;  %v12024_v3 = vadd.f32 %v13251_v43, %v5979_v48  ;;  %v5916_v23 = vpop.permute.xlu1 %5915 }
 0xa3c   : > { %v5934_v9 = vsel %vm4649_vm8, %v5912_v2, %v5914_v7  ;;  %v5981_v1 = vadd.f32 %v5914_v7, %v5789_v59  ;;  %v6960_v2 = vmul.f32 %v12001_v5, %v12001_v5  ;;  %v6199_v59 = vsub.f32 %v11732_v17, %v11964_v29 }
 0xa3d   : > { %v5980_v50 = vadd.f32 %v5934_v9, %v5788_v13  ;;  %v6109_v44 = vmul.f32 %v12024_v3, %v12024_v3  ;;  %v6201_v17 = vsub.f32 %v11729_v45, %v11964_v29 }
 0xa3e   : > { %v12021_v46 = vadd.f32 %v13251_v43, %v5981_v1  ;;  %v6989_v22 = vadd.f32 %v6960_v2, %v6959_v53  ;;  %v13253_v2 = vld [vmem:[#allocation38_spill] sm:$0xff] }
 0xa3f   : > { %v12027_v47 = vadd.f32 %v13251_v43, %v5980_v50  ;;  %v5724_v20 = vpop.permute.xlu0 %5723  ;;  %v5920_v39 = vpop.permute.xlu1 %5919 }
 0xa40   : > { %v6073_v12 = vsel %vm6042_vm14, %v12021_v46, 0.0  ;;  %v5743_v16 = vsel %vm4249_vm3, %v5724_v20, %v5726_v10  ;;  %v9140_v56 = vpop.eup %9139  ;;  %v6111_v48 = vmul.f32 %v12021_v46, %v12021_v46 }
 0xa41   : > { %v6072_v42 = vadd.f32 %v12027_v47, %v12024_v3  ;;  %v6110_v30 = vmul.f32 %v12027_v47, %v12027_v47  ;;  %v5790_v7 = vadd.f32 %v5743_v16, %v5598_v62  ;;  %v6239_v53 = vmul.f32 %v9140_v56, %v6199_v59 }
 0xa42   : > { %v6200_v16 = vsub.f32 %v11735_v21, %v11964_v29 }
 0xa43   : > { %v5728_v25 = vpop.permute.xlu0 %5727  ;;  %v6074_v41 = vadd.f32 %v6073_v12, %v6072_v42  ;;  %v6145_v24 = vadd.f32 %v6110_v30, %v6109_v44  ;;  %v6146_v42 = vsel %vm6042_vm14, %v6111_v48, 0.0  ;;  %v6241_v12 = vmul.f32 %v9140_v56, %v6201_v17 }
 0xa44   : > { %v5744_v37 = vsel %vm4249_vm3, %v5726_v10, %v5728_v25  ;;  %v5792_v14 = vadd.f32 %v5728_v25, %v5600_v36  ;;  %v6990_v10 = vsel %vm6901_vm15, %v6961_v49, 0.0 }
 0xa45   : > { %6075 = vadd.xlane.f32.xlu1 %v6074_v41  ;;  %v5791_v9 = vadd.f32 %v5744_v37, %v5599_v33  ;;  %v6991_v1 = vadd.f32 %v6990_v10, %v6989_v22  ;;  %v6279_v41 = vmul.f32 %v11433_v38, %v6239_v53  ;;  %v6240_v33 = vmul.f32 %v9140_v56, %v6200_v16 }
 0xa46   : > { %v5984_v13 = vadd.f32 %v5920_v39, %v5792_v14 }
 0xa47   : > { %v5918_v32 = vpop.permute.xlu0 %5917  ;;  %v6319_v62 = vadd.f32 %v11439_v63, %v6279_v41  ;;  %v9142_v44 = vpop.eup %9141  ;;  %v6280_v21 = vmul.f32 %v11477_v61, %v6240_v33 }
 0xa48   : > { %v5935_v40 = vsel %vm4649_vm8, %v5916_v23, %v5918_v32  ;;  %v5936_v50 = vsel %vm4649_vm8, %v5918_v32, %v5920_v39  ;;  %v12061_v18 = vadd.f32 %v13253_v2, %v5984_v13  ;;  %v6147_v23 = vadd.f32 %v6146_v42, %v6145_v24 }
 0xa49   : > { %v5982_v43 = vadd.f32 %v5935_v40, %v5790_v7  ;;  %v5983_v20 = vadd.f32 %v5936_v50, %v5791_v9  ;;  %6992 = vadd.xlane.f32.xlu1 %v6991_v1  ;;  %v6281_v39 = vmul.f32 %v11442_v31, %v6241_v12  ;;  %v6203_v13 = vsub.f32 %v11782_v51, %v11995_v15  ;;  %v13254_v50 = vld [vmem:[#allocation56_spill] sm:$0xff] }
 0xa4a   : > { %v6078_v22 = vsel %vm6042_vm14, %v12061_v18, 0.0  ;;  %v6114_v30 = vmul.f32 %v12061_v18, %v12061_v18  ;;  %v6367_v7 = vmul.f32 0.2, %v6319_v62  ;;  %vm6343_vm3 = vcmp.ge.f32.partialorder %v6319_v62, 0.0 }
 0xa4b   : > { %v12065_v28 = vadd.f32 %v13253_v2, %v5982_v43  ;;  %v12068_v36 = vadd.f32 %v13253_v2, %v5983_v20  ;;  %v6321_v48 = vadd.f32 %v11488_v35, %v6281_v39  ;;  %v6243_v29 = vmul.f32 %v9142_v44, %v6203_v13 }
 0xa4c   : > { %v6151_v59 = vsel %vm6042_vm14, %v6114_v30, 0.0  ;;  %v6202_v9 = vsub.f32 %v11779_v52, %v11995_v15  ;;  %v12092_v32 = vsel %vm6343_vm3, %v6319_v62, %v6367_v7  ;;  %v6320_v1 = vadd.f32 %v11502_v26, %v6280_v21  ;;  %v13256_v30 = vld [vmem:[#allocation44_spill] sm:$0xff] }
 0xa4d   : > { %6148 = vadd.xlane.f32.xlu1 %v6147_v23  ;;  %v6077_v49 = vadd.f32 %v12068_v36, %v12065_v28  ;;  %v6112_v45 = vmul.f32 %v12065_v28, %v12065_v28  ;;  %v6113_v25 = vmul.f32 %v12068_v36, %v12068_v36  ;;  %vm6345_vm8 = vcmp.ge.f32.partialorder %v6321_v48, 0.0  ;;  %v13257_v62 = vld [vmem:[#allocation68_spill] sm:$0xff] }
 0xa4e   : > { %v6369_v56 = vmul.f32 0.2, %v6321_v48  ;;  %v6283_v51 = vmul.f32 %v11477_v61, %v6243_v29  ;;  %v6242_v24 = vmul.f32 %v9142_v44, %v6202_v9  ;;  %v6204_v40 = vsub.f32 %v11775_v4, %v11995_v15 }
 0xa4f   : > { %v6079_v37 = vadd.f32 %v6078_v22, %v6077_v49  ;;  %v6150_v14 = vadd.f32 %v6113_v25, %v6112_v45  ;;  %v6503_v43 = vmul.f32 %v13254_v50, %v12092_v32  ;;  %v6368_v53 = vmul.f32 0.2, %v6320_v1  ;;  %v13255_v49 = vld [vmem:[#allocation63_spill] sm:$0xff] }
 0xa50   : > { %v12100_v20 = vsel %vm6345_vm8, %v6321_v48, %v6369_v56  ;;  %v6323_v52 = vadd.f32 %v11502_v26, %v6283_v51  ;;  %v6282_v17 = vmul.f32 %v11433_v38, %v6242_v24  ;;  %v6244_v2 = vmul.f32 %v9142_v44, %v6204_v40 }
 0xa51   : > { %6080 = vadd.xlane.f32.xlu0 %v6079_v37  ;;  %v6152_v10 = vadd.f32 %v6151_v59, %v6150_v14  ;;  %vm6344_vm14 = vcmp.ge.f32.partialorder %v6320_v1, 0.0  ;;  %v6505_v42 = vmul.f32 %v13254_v50, %v12100_v20  ;;  %v6695_v44 = vmul.f32 %v13255_v49, %v12092_v32 }
 0xa52   : > { %v12107_v23 = vsel %vm6344_vm14, %v6320_v1, %v6368_v53  ;;  %v6371_v4 = vmul.f32 0.2, %v6323_v52  ;;  %v6322_v15 = vadd.f32 %v11439_v63, %v6282_v17  ;;  %v6284_v12 = vmul.f32 %v11442_v31, %v6244_v2 }
 0xa53   : > { %vm6347_vm2 = vcmp.ge.f32.partialorder %v6323_v52, 0.0  ;;  %v6696_v45 = vmul.f32 %v13255_v49, %v12107_v23  ;;  %v6504_v37 = vmul.f32 %v13254_v50, %v12107_v23 }
 0xa54   : > { %v12114_v25 = vsel %vm6347_vm2, %v6323_v52, %v6371_v4  ;;  %v6370_v41 = vmul.f32 0.2, %v6322_v15  ;;  %v6324_v22 = vadd.f32 %v11488_v35, %v6284_v12  ;;  %vm6346_vm12 = vcmp.ge.f32.partialorder %v6322_v15, 0.0 }
 0xa55   : > { %6153 = vadd.xlane.f32.xlu0 %v6152_v10  ;;  %v6507_v16 = vmul.f32 %v13256_v30, %v12114_v25  ;;  %v6697_v10 = vmul.f32 %v13255_v49, %v12100_v20  ;;  %v6699_v21 = vmul.f32 %v13257_v62, %v12114_v25 }
 0xa56   : > { %v12122_v14 = vsel %vm6346_vm12, %v6322_v15, %v6370_v41  ;;  %v6372_v39 = vmul.f32 0.2, %v6324_v22  ;;  %vm6348_vm1 = vcmp.ge.f32.partialorder %v6324_v22, 0.0 }
 0xa57   : > { %v6698_v33 = vmul.f32 %v13257_v62, %v12122_v14  ;;  %v6506_v48 = vmul.f32 %v13256_v30, %v12122_v14 }
 0xa58   : > { %v12130_v59 = vsel %vm6348_vm1, %v6324_v22, %v6372_v39 }
 0xa59   : > { %v6700_v13 = vmul.f32 %v13257_v62, %v12130_v59  ;;  %v6508_v7 = vmul.f32 %v13256_v30, %v12130_v59 }
 0xa5e   : > { %6563 = vrot.lane.b32.xlu1 %v6503_v43, %s9271_s26  ;;  %v9277_v43 = vmov 9  }
 0xa5f   : > { %8608 = vset.pattern.permute.xlu0 %v9277_v43  ;;  %8609 = vset.pattern.permute.xlu1 %v9277_v43 }
 0xa62   : > { %6567 = vrot.lane.b32.xlu1 %v6505_v42, %s9271_s26 }
 0xa66   : > { %6757 = vrot.lane.b32.xlu1 %v6696_v45, %s9276_s14 }
 0xa6a   : > { %6571 = vrot.lane.b32.xlu1 %v6507_v16, %s9271_s26 }
 0xa6b   : > { %6565 = vrot.lane.b32.xlu0 %v6504_v37, %s9271_s26 }
 0xa6e   : > { %6761 = vrot.lane.b32.xlu1 %v6698_v33, %s9276_s14 }
 0xa6f   : > { %6755 = vrot.lane.b32.xlu0 %v6695_v44, %s9276_s14 }
 0xa72   : > { %6765 = vrot.lane.b32.xlu1 %v6700_v13, %s9276_s14 }
 0xa73   : > { %6759 = vrot.lane.b32.xlu0 %v6697_v10, %s9276_s14 }
 0xa77   : > { %6569 = vrot.lane.b32.xlu0 %v6506_v48, %s9271_s26 }
 0xa7b   : > { %6573 = vrot.lane.b32.xlu0 %v6508_v7, %s9271_s26 }
 0xa7f   : > { %6763 = vrot.lane.b32.xlu0 %v6699_v21, %s9276_s14 }
 0xab6   : > { %v6915_v29 = vpop.xlane.xlu0 %6914 }
 0xab7   : > { %v6944_v9 = vmul.f32 0.0034722222, %v6915_v29 }
 0xab9   : > { %v7024_v1 = vmul.f32 %v6944_v9, %v6944_v9  ;;  %v7052_v2 = vsub.f32 %v11959_v11, %v6944_v9  ;;  %v7053_v42 = vsub.f32 %v11967_v8, %v6944_v9  ;;  %v7054_v4 = vsub.f32 %v11962_v34, %v6944_v9  ;;  %v13258_v9 = vld [vmem:[#allocation49_spill] sm:$0xff] }
 0xaba   : > { %v6988_v56 = vpop.xlane.xlu0 %6987 }
 0xabb   : > { %v7016_v51 = vmul.f32 0.0034722222, %v6988_v56  ;;  %v6447_v56 = vmul.f32 %v13258_v9, %v12092_v32 }
 0xabd   : > { %v7032_v24 = vsub.f32 %v7016_v51, %v7024_v1  ;;  %v6449_v51 = vmul.f32 %v13258_v9, %v12100_v20  ;;  %v13259_v20 = vld [vmem:[#allocation71_spill] sm:$0xff] }
 0xabf   : > { %v7040_v40 = vmax.f32 %v7032_v24, 0.0 }
 0xac1   : > { %v7072_v50 = vadd.f32 1e-05, %v7040_v40 }
 0xac2   : > { %v12149_v53 = vpop.xlane.xlu1 %6919 }
 0xac3   : > { %9143 = vrsqrt.f32 %v7072_v50  ;;  %v6448_v50 = vmul.f32 %v13258_v9, %v12107_v23 }
 0xace   : > { %v6076_v52 = vpop.xlane.xlu1 %6075 }
 0xacf   : > { %v12162_v41 = vmul.f32 0.0034013605, %v6076_v52 }
 0xad0   : > { %v9144_v17 = vpop.eup %9143 }
 0xad1   : > { %v12156_v12 = vmul.f32 %v9144_v17, %v7052_v2  ;;  %v12158_v49 = vmul.f32 %v9144_v17, %v7053_v42  ;;  %v12160_v45 = vmul.f32 %v9144_v17, %v7054_v4  ;;  %v6169_v30 = vmul.f32 %v12162_v41, %v12162_v41 }
 0xad2   : > { %v12154_v15 = vpop.xlane.xlu1 %6992 }
 0xad6   : > { %v6149_v22 = vpop.xlane.xlu1 %6148 }
 0xad7   : > { %v6161_v16 = vmul.f32 0.0034013605, %v6149_v22 }
 0xad9   : > { %v6177_v11 = vsub.f32 %v6161_v16, %v6169_v30 }
 0xada   : > { %v6564_v37 = vpop.permute.xlu1 %6563  ;;  %v6081_v8 = vpop.xlane.xlu0 %6080 }
 0xadb   : > { %v6185_v39 = vmax.f32 %v6177_v11, 0.0  ;;  %v12166_v33 = vmul.f32 0.0034013605, %v6081_v8 }
 0xadd   : > { %v6217_v44 = vadd.f32 1e-05, %v6185_v39  ;;  %v6170_v7 = vmul.f32 %v12166_v33, %v12166_v33 }
 0xade   : > { %v6568_v34 = vpop.permute.xlu1 %6567  ;;  %v6154_v62 = vpop.xlane.xlu0 %6153 }
 0xadf   : > { %v6162_v13 = vmul.f32 0.0034013605, %v6154_v62  ;;  %9145 = vrsqrt.f32 %v6217_v44  ;;  %v6641_v17 = vadd.f32 %v6568_v34, %v6449_v51  ;;  %v13260_v44 = vld [vmem:[#allocation50_spill] sm:$0xff] }
 0xae1   : > { %v6178_v21 = vsub.f32 %v6162_v13, %v6170_v7  ;;  %v6452_v13 = vmul.f32 %v13260_v44, %v12130_v59  ;;  %v6451_v59 = vmul.f32 %v13260_v44, %v12114_v25 }
 0xae2   : > { %v6758_v10 = vpop.permute.xlu1 %6757  ;;  %v6566_v48 = vpop.permute.xlu0 %6565 }
 0xae3   : > { %v6595_v29 = vsel %vm4604_vm13, %v6564_v37, %v6566_v48  ;;  %v6596_v24 = vsel %vm4604_vm13, %v6566_v48, %v6568_v34  ;;  %v6186_v2 = vmax.f32 %v6178_v21, 0.0 }
 0xae4   : > { %v6639_v43 = vadd.f32 %v6595_v29, %v6447_v56  ;;  %v6640_v42 = vadd.f32 %v6596_v24, %v6448_v50  ;;  %v6206_v29 = vsub.f32 %v12027_v47, %v12162_v41  ;;  %v6450_v24 = vmul.f32 %v13260_v44, %v12122_v14 }
 0xae5   : > { %v6218_v11 = vadd.f32 1e-05, %v6186_v2  ;;  %v6205_v47 = vsub.f32 %v12024_v3, %v12162_v41 }
 0xae6   : > { %v6756_v1 = vpop.permute.xlu0 %6755  ;;  %v6572_v52 = vpop.permute.xlu1 %6571 }
 0xae7   : > { %v6788_v40 = vsel %vm6779_vm11, %v6756_v1, %v6758_v10  ;;  %9147 = vrsqrt.f32 %v6218_v11 }
 0xae8   : > { %v6832_v4 = vadd.f32 %v6788_v40, %v6639_v43 }
 0xaea   : > { %v6760_v22 = vpop.permute.xlu0 %6759  ;;  %v12184_v8 = vadd.f32 %v13259_v20, %v6832_v4  ;;  %v6762_v39 = vpop.permute.xlu1 %6761 }
 0xaeb   : > { %v6789_v32 = vsel %vm6779_vm11, %v6758_v10, %v6760_v22  ;;  %v6834_v30 = vadd.f32 %v6760_v22, %v6641_v17 }
 0xaec   : > { %v6833_v16 = vadd.f32 %v6789_v32, %v6640_v42  ;;  %v9146_v48 = vpop.eup %9145  ;;  %v13261_v32 = vld [vmem:[#allocation66_spill] sm:$0xff] }
 0xaed   : > { %v12181_v37 = vadd.f32 %v13259_v20, %v6834_v30  ;;  %v6246_v50 = vmul.f32 %v9146_v48, %v6206_v29  ;;  %v6245_v30 = vmul.f32 %v9146_v48, %v6205_v47 }
 0xaee   : > { %v12187_v23 = vadd.f32 %v13259_v20, %v6833_v16  ;;  %v6570_v34 = vpop.permute.xlu0 %6569  ;;  %v6766_v51 = vpop.permute.xlu1 %6765  ;;  %v6207_v16 = vsub.f32 %v12021_v46, %v12162_v41  ;;  %v6208_v46 = vsub.f32 %v12065_v28, %v12166_v33  ;;  %v6209_v28 = vsub.f32 %v12068_v36, %v12166_v33 }
 0xaef   : > { %v6922_v10 = vsel %vm6901_vm15, %v12181_v37, 0.0  ;;  %v6597_v9 = vsel %vm4604_vm13, %v6570_v34, %v6572_v52  ;;  %v6286_v25 = vmul.f32 %v11477_v61, %v6246_v50  ;;  %v6285_v44 = vmul.f32 %v11433_v38, %v6245_v30 }
 0xaf0   : > { %v6921_v62 = vadd.f32 %v12187_v23, %v12184_v8  ;;  %v6642_v43 = vadd.f32 %v6597_v9, %v6450_v24 }
 0xaf2   : > { %v6574_v7 = vpop.permute.xlu0 %6573  ;;  %v6923_v21 = vadd.f32 %v6922_v10, %v6921_v62  ;;  %v6326_v62 = vadd.f32 %v11502_v26, %v6286_v25 }
 0xaf3   : > { %v6598_v56 = vsel %vm4604_vm13, %v6572_v52, %v6574_v7  ;;  %v6644_v1 = vadd.f32 %v6574_v7, %v6452_v13 }
 0xaf4   : > { %6924 = vadd.xlane.f32.xlu0 %v6923_v21  ;;  %v6643_v17 = vadd.f32 %v6598_v56, %v6451_v59  ;;  %v9148_v13 = vpop.eup %9147  ;;  %v6374_v7 = vmul.f32 0.2, %v6326_v62  ;;  %v6325_v21 = vadd.f32 %v11439_v63, %v6285_v44  ;;  %vm6350_vm4 = vcmp.ge.f32.partialorder %v6326_v62, 0.0  ;;  %v13262_v59 = vld [vmem:[#allocation57_spill] sm:$0xff] }
 0xaf5   : > { %v6837_v40 = vadd.f32 %v6766_v51, %v6644_v1  ;;  %v6248_v29 = vmul.f32 %v9148_v13, %v6208_v46  ;;  %v6249_v50 = vmul.f32 %v9148_v13, %v6209_v28  ;;  %v6962_v46 = vmul.f32 %v12184_v8, %v12184_v8 }
 0xaf6   : > { %v6764_v2 = vpop.permute.xlu0 %6763  ;;  %v12232_v56 = vsel %vm6350_vm4, %v6326_v62, %v6374_v7  ;;  %v6373_v1 = vmul.f32 0.2, %v6325_v21  ;;  %vm6349_vm6 = vcmp.ge.f32.partialorder %v6325_v21, 0.0  ;;  %v13265_v62 = vld [vmem:[#allocation69_spill] sm:$0xff] }
 0xaf7   : > { %v6790_v42 = vsel %vm6779_vm11, %v6762_v39, %v6764_v2  ;;  %v6791_v52 = vsel %vm6779_vm11, %v6764_v2, %v6766_v51  ;;  %v12208_v14 = vadd.f32 %v13261_v32, %v6837_v40  ;;  %v6247_v39 = vmul.f32 %v9146_v48, %v6207_v16 }
 0xaf8   : > { %v6835_v4 = vadd.f32 %v6790_v42, %v6642_v43  ;;  %v6836_v22 = vadd.f32 %v6791_v52, %v6643_v17  ;;  %v6210_v48 = vsub.f32 %v12061_v18, %v12166_v33  ;;  %v6288_v51 = vmul.f32 %v11433_v38, %v6248_v29  ;;  %v13263_v38 = vld [vmem:[#allocation64_spill] sm:$0xff] }
 0xaf9   : > { %v6927_v34 = vsel %vm6901_vm15, %v12208_v14, 0.0  ;;  %v6287_v41 = vmul.f32 %v11442_v31, %v6247_v39  ;;  %v6510_v40 = vmul.f32 %v13262_v59, %v12232_v56  ;;  %v12239_v43 = vsel %vm6349_vm6, %v6325_v21, %v6373_v1 }
 0xafa   : > { %v12214_v11 = vadd.f32 %v13261_v32, %v6835_v4  ;;  %v12217_v3 = vadd.f32 %v13261_v32, %v6836_v22  ;;  %v6250_v24 = vmul.f32 %v9148_v13, %v6210_v48  ;;  %v6328_v18 = vadd.f32 %v11439_v63, %v6288_v51  ;;  %v13264_v32 = vld [vmem:[#allocation46_spill] sm:$0xff] }
 0xafb   : > { %v6327_v9 = vadd.f32 %v11488_v35, %v6287_v41  ;;  %v6701_v47 = vmul.f32 %v13263_v38, %v12239_v43  ;;  %v6289_v36 = vmul.f32 %v11477_v61, %v6249_v50  ;;  %v6509_v63 = vmul.f32 %v13262_v59, %v12239_v43 }
 0xafc   : > { %v6926_v20 = vadd.f32 %v12217_v3, %v12214_v11  ;;  %v6290_v2 = vmul.f32 %v11442_v31, %v6250_v24  ;;  %v6376_v42 = vmul.f32 0.2, %v6328_v18  ;;  %vm6352_vm9 = vcmp.ge.f32.partialorder %v6328_v18, 0.0 }
 0xafd   : > { %v6375_v17 = vmul.f32 0.2, %v6327_v9  ;;  %vm6351_vm7 = vcmp.ge.f32.partialorder %v6327_v9, 0.0  ;;  %v6329_v4 = vadd.f32 %v11502_v26, %v6289_v36  ;;  %v6702_v26 = vmul.f32 %v13263_v38, %v12232_v56  ;;  %v12343_v36 = vld [vmem:[%s13033_s4 + $0x30] sm:$0xff] }
 0xafe   : > { %v6928_v10 = vadd.f32 %v6927_v34, %v6926_v20  ;;  %v6330_v52 = vadd.f32 %v11488_v35, %v6290_v2  ;;  %v12257_v22 = vsel %vm6352_vm9, %v6328_v18, %v6376_v42  ;;  %v6964_v41 = vmul.f32 %v12181_v37, %v12181_v37  ;;  %v12318_v18 = vld [vmem:[%s13033_s4 + $0x20] sm:$0xff]  ;;  %v12324_v2 = vld [vmem:[%s13033_s4 + $0x10] sm:$0xff]  ;;  %v12349_v42 = vld [vmem:[%s13033_s4 + $0x38] sm:$0xff] }
 0xaff   : > { %v12247_v33 = vsel %vm6351_vm7, %v6327_v9, %v6375_v17  ;;  %v6512_v25 = vmul.f32 %v13264_v32, %v12257_v22  ;;  %v6377_v30 = vmul.f32 0.2, %v6329_v4  ;;  %vm6353_vm5 = vcmp.ge.f32.partialorder %v6329_v4, 0.0  ;;  %v12311_v17 = vld [vmem:[%s13033_s4 + $0x8] sm:$0xff] }
 0xb00   : > { %6929 = vadd.xlane.f32.xlu1 %v6928_v10  ;;  %v6703_v31 = vmul.f32 %v13263_v38, %v12247_v33  ;;  %v6378_v61 = vmul.f32 0.2, %v6330_v52  ;;  %vm6354_vm10 = vcmp.ge.f32.partialorder %v6330_v52, 0.0  ;;  %v6511_v35 = vmul.f32 %v13262_v59, %v12247_v33  ;;  %v12302_v59 = vld [vmem:[%s13033_s4] sm:$0xff]  ;;  %v12330_v38 = vld [vmem:[%s13033_s4 + $0x18] sm:$0xff] }
 0xb01   : > { %v12272_v39 = vsel %vm6353_vm5, %v6329_v4, %v6377_v30  ;;  %v6704_v13 = vmul.f32 %v13265_v62, %v12257_v22  ;;  %v6963_v10 = vmul.f32 %v12187_v23, %v12187_v23  ;;  %v6995_v21 = vsel %vm6901_vm15, %v6964_v41, 0.0 }
 0xb02   : > { %v12265_v16 = vsel %vm6354_vm10, %v6330_v52, %v6378_v61  ;;  %v6513_v34 = vmul.f32 %v13264_v32, %v12272_v39  ;;  %v6705_v44 = vmul.f32 %v13265_v62, %v12272_v39  ;;  %v6965_v48 = vmul.f32 %v12214_v11, %v12214_v11 }
 0xb03   : > { %v6514_v20 = vmul.f32 %v13264_v32, %v12265_v16  ;;  %v6994_v7 = vadd.f32 %v6963_v10, %v6962_v46  ;;  %v6966_v9 = vmul.f32 %v12217_v3, %v12217_v3  ;;  %v6967_v1 = vmul.f32 %v12208_v14, %v12208_v14 }
 0xb04   : > { %v9278_v50 = vmov 10  }
 0xb05   : > { %v6996_v29 = vadd.f32 %v6995_v21, %v6994_v7  ;;  %v6999_v51 = vadd.f32 %v6966_v9, %v6965_v48  ;;  %v7000_v24 = vsel %vm6901_vm15, %v6967_v1, 0.0  ;;  %v13267_v9 = vld [vmem:[#allocation73_spill] sm:$0xff] }
 0xb07   : > { %v7001_v28 = vadd.f32 %v7000_v24, %v6999_v51 }
 0xb0a   : > { %6577 = vrot.lane.b32.xlu0 %v6510_v40, %s9271_s26  ;;  %v6706_v40 = vmul.f32 %v13265_v62, %v12265_v16 }
 0xb0e   : > { %6767 = vrot.lane.b32.xlu0 %v6701_v47, %s9276_s14  ;;  %v12337_v47 = vld [vmem:[%s13033_s4 + $0x28] sm:$0xff] }
 0xb11   : > { %6575 = vrot.lane.b32.xlu1 %v6509_v63, %s9271_s26 }
 0xb12   : > { %6771 = vrot.lane.b32.xlu0 %v6703_v31, %s9276_s14 }
 0xb15   : > { %6579 = vrot.lane.b32.xlu1 %v6511_v35, %s9271_s26  ;;  %v13266_v35 = vld [vmem:[#allocation51_spill] sm:$0xff] }
 0xb16   : > { %6581 = vrot.lane.b32.xlu0 %v6512_v25, %s9271_s26  ;;  %v6455_v32 = vmul.f32 %v13266_v35, %v12247_v33 }
 0xb19   : > { %6769 = vrot.lane.b32.xlu1 %v6702_v26, %s9276_s14 }
 0xb1a   : > { %6585 = vrot.lane.b32.xlu0 %v6514_v20, %s9271_s26 }
 0xb1d   : > { %6583 = vrot.lane.b32.xlu1 %v6513_v34, %s9271_s26  ;;  %v9279_v34 = vmov 11   ;;  %s9281_s26 = smov [#allocation2]  }
 0xb1e   : > { %6775 = vrot.lane.b32.xlu0 %v6705_v44, %s9276_s14  ;;  %v6453_v44 = vmul.f32 %v13266_v35, %v12239_v43  ;;  %s9203_s6 = sshll.u32 %s9281_s26, 4  ;;  %s9204_s6 = int_to_ptr.vmem [resolvable:$false] %s9203_s6 }
 0xb1f   : > { %s9205_s15 = scalar_lea.vmem %s9204_s6, 6144  ;;  %p9206_p0 = scmp.lt.s32.totalorder %s12976_s11, %s9204_s6 }
 0xb20   : > { %p9207_p1 = scmp.lt.s32.totalorder %s9205_s15, %s9199_s16 }
 0xb21   : > { %6773 = vrot.lane.b32.xlu1 %v6704_v13, %s9276_s14  ;;  %v6454_v13 = vmul.f32 %v13266_v35, %v12232_v56 }
 0xb22   : > { %p9208_p2 = por %p9207_p1, %p9206_p0 }
 0xb24   : > { %p9209_p3 = pnand %p9208_p2, %p9202_p13 }
 0xb3d   : > { %6997 = vadd.xlane.f32.xlu0 %v6996_v29 }
 0xb45   : > { %7002 = vadd.xlane.f32.xlu1 %v7001_v28 }
 0xb53   : > { %7263 = vperm.xlu0 %8608, %v12302_v59  }
 0xb56   : > { %6777 = vrot.lane.b32.xlu1 %v6706_v40, %s9276_s14  ;;  %s12989_s14 = scalar_lea.sflag [#allocation3], %s218_s7 }
 0xb57   : > { %8611 = vset.pattern.permute.xlu0 %v9278_v50 }
 0xb58   : > { %7323 = vperm.xlu0 %8611, %v12311_v17  }
 0xb5a   : > { %7267 = vperm.xlu1 %8609, %v12311_v17  }
 0xb5c   : > { %7335 = vperm.xlu0 %8611, %v12318_v18  }
 0xb5e   : > { %7271 = vperm.xlu1 %8609, %v12324_v2  }
 0xb62   : > { %7275 = vperm.xlu1 %8609, %v12330_v38  }
 0xb66   : > { %7279 = vperm.xlu1 %8609, %v12318_v18  }
 0xb6a   : > { %7283 = vperm.xlu1 %8609, %v12337_v47  }
 0xb6e   : > { %7287 = vperm.xlu1 %8609, %v12343_v36  }
 0xb72   : > { %7291 = vperm.xlu1 %8609, %v12349_v42  }
 0xb76   : > { %8610 = vset.pattern.permute.xlu1 %v9278_v50 }
 0xb77   : > { %7319 = vperm.xlu1 %8610, %v12302_v59  }
 0xb7b   : > { %7327 = vperm.xlu1 %8610, %v12324_v2  }
 0xb7d   : > { %v12355_v52 = vpop.xlane.xlu0 %6924 }
 0xb7f   : > { %7331 = vperm.xlu1 %8610, %v12330_v38  }
 0xb81   : > { %v6578_v63 = vpop.permute.xlu0 %6577 }
 0xb83   : > { %7339 = vperm.xlu1 %8610, %v12337_v47  }
 0xb85   : > { %v6768_v4 = vpop.permute.xlu0 %6767 }
 0xb87   : > { %7347 = vperm.xlu1 %8610, %v12349_v42  }
 0xb89   : > { %v12359_v31 = vpop.xlane.xlu1 %6929  ;;  %v6772_v62 = vpop.permute.xlu0 %6771 }
 0xb8b   : > { %8613 = vset.pattern.permute.xlu1 %v9279_v34 }
 0xb8d   : > { %v6576_v61 = vpop.permute.xlu1 %6575 }
 0xb8e   : > { %v6599_v30 = vsel %vm4604_vm13, %v6576_v61, %v6578_v63 }
 0xb8f   : > { %v6645_v46 = vadd.f32 %v6599_v30, %v6453_v44  ;;  %v7014_v44 = vmul.f32 0.0034722222, %v11940_v0 }
 0xb91   : > { %v6580_v25 = vpop.permute.xlu1 %6579 }
 0xb92   : > { %v6600_v26 = vsel %vm4604_vm13, %v6578_v63, %v6580_v25  ;;  %v6647_v20 = vadd.f32 %v6580_v25, %v6455_v32  ;;  %v6943_v32 = vmul.f32 0.0034722222, %v11944_v57  ;;  %v7015_v25 = vmul.f32 0.0034722222, %v11942_v60 }
 0xb93   : > { %v6646_v41 = vadd.f32 %v6600_v26, %v6454_v13  ;;  %v12394_v26 = vmul.f32 0.0034722222, %v11938_v19  ;;  %v12401_v60 = vmul.f32 0.0034722222, %v12149_v53 }
 0xb94   : > { %v6840_v10 = vadd.f32 %v6772_v62, %v6647_v20  ;;  %v7023_v30 = vmul.f32 %v6943_v32, %v6943_v32  ;;  %v7926_v53 = vld [vmem:[%s13032_s3 + $0x6] ss:$8 sm:$0x7] }
 0xb95   : > { %v6770_v7 = vpop.permute.xlu1 %6769  ;;  %v7025_v0 = vmul.f32 %v12401_v60, %v12401_v60 }
 0xb96   : > { %v6792_v33 = vsel %vm6779_vm11, %v6768_v4, %v6770_v7  ;;  %v6793_v21 = vsel %vm6779_vm11, %v6770_v7, %v6772_v62  ;;  %v12372_v1 = vadd.f32 %v13267_v9, %v6840_v10  ;;  %v7031_v20 = vsub.f32 %v7015_v25, %v7023_v30  ;;  %v6582_v7 = vpop.permute.xlu0 %6581 }
 0xb97   : > { %v6838_v29 = vadd.f32 %v6792_v33, %v6645_v46  ;;  %v6839_v48 = vadd.f32 %v6793_v21, %v6646_v41  ;;  %v7022_v62 = vmul.f32 %v12394_v26, %v12394_v26  ;;  %v7017_v33 = vmul.f32 0.0034722222, %v12154_v15 }
 0xb98   : > { %v6932_v28 = vsel %vm6901_vm15, %v12372_v1, 0.0  ;;  %v6970_v50 = vmul.f32 %v12372_v1, %v12372_v1  ;;  %v7039_v13 = vmax.f32 %v7031_v20, 0.0  ;;  %v7051_v15 = vsub.f32 %v11697_v54, %v6943_v32 }
 0xb99   : > { %v12375_v51 = vadd.f32 %v13267_v9, %v6838_v29  ;;  %v12378_v43 = vadd.f32 %v13267_v9, %v6839_v48  ;;  %v7030_v10 = vsub.f32 %v7014_v44, %v7022_v62  ;;  %v7033_v21 = vsub.f32 %v7017_v33, %v7025_v0 }
 0xb9a   : > { %v7005_v61 = vsel %vm6901_vm15, %v6970_v50, 0.0  ;;  %v7071_v46 = vadd.f32 1e-05, %v7039_v13  ;;  %v6586_v19 = vpop.permute.xlu0 %6585  ;;  %v7049_v9 = vsub.f32 %v11703_v55, %v6943_v32  ;;  %v7927_v55 = vld [vmem:[%s13032_s3 + $0x7] ss:$8 sm:$0x7] }
 0xb9b   : > { %v6931_v56 = vadd.f32 %v12378_v43, %v12375_v51  ;;  %v6968_v24 = vmul.f32 %v12375_v51, %v12375_v51  ;;  %v6969_v40 = vmul.f32 %v12378_v43, %v12378_v43  ;;  %v7038_v41 = vmax.f32 %v7030_v10, 0.0 }
 0xb9c   : > { %9149 = vrsqrt.f32 %v7071_v46 }
 0xb9d   : > { %v6933_v63 = vadd.f32 %v6932_v28, %v6931_v56  ;;  %v7004_v4 = vadd.f32 %v6969_v40, %v6968_v24  ;;  %v7070_v57 = vadd.f32 1e-05, %v7038_v41  ;;  %v7050_v56 = vsub.f32 %v11706_v58, %v6943_v32  ;;  %v13268_v58 = vld [vmem:[#allocation60_spill] sm:$0xff]  ;;  %v13270_v32 = vld [vmem:[#allocation62_spill] sm:$0xff] }
 0xb9e   : > { %v12406_v48 = vpop.permute.xlu0 %6775  ;;  %v12411_v24 = vmul.f32 0.0034722222, %v12355_v52  ;;  %v7041_v28 = vmax.f32 %v7033_v21, 0.0  ;;  %v13269_v52 = vld [vmem:[#allocation61_spill] sm:$0xff]  ;;  %v12429_v30 = vrot.slane %v7926_v53, %v13270_v32  ;;  %v12434_v46 = vrot.slane %v7927_v55, %v13268_v58 }
 0xb9f   : > { %6934 = vadd.xlane.f32.xlu0 %v6933_v63  ;;  %v7006_v35 = vadd.f32 %v7005_v61, %v7004_v4  ;;  %9151 = vrsqrt.f32 %v7070_v57  ;;  %v12421_v61 = vrot.slane %v7926_v53, %v13268_v58  ;;  %v12437_v41 = vrot.slane %v7927_v55, %v13269_v52  ;;  %v13271_v57 = vld [vmem:[#allocation17_spill] sm:$0xff] }
 0xba0   : > { %v7026_v25 = vmul.f32 %v12411_v24, %v12411_v24  ;;  %v7073_v62 = vadd.f32 1e-05, %v7041_v28  ;;  %v7046_v33 = vsub.f32 %v13271_v57, %v12394_v26  ;;  %v13273_v28 = vld [vmem:[#allocation26_spill] sm:$0xff] }
 0xba2   : > { %9153 = vrsqrt.f32 %v7073_v62 }
 0xba3   : > { %7007 = vadd.xlane.f32.xlu0 %v7006_v35  ;;  %v12424_v35 = vrot.slane %v7926_v53, %v13269_v52  ;;  %v12448_v53 = vmul.f32 0.0034722222, %v12359_v31 }
 0xba5   : > { %v7027_v62 = vmul.f32 %v12448_v53, %v12448_v53 }
 0xba9   : > { %v9150_v29 = vpop.eup %9149 }
 0xbaa   : > { %v7089_v40 = vmul.f32 %v9150_v29, %v7049_v9  ;;  %v7090_v50 = vmul.f32 %v9150_v29, %v7050_v56  ;;  %v7091_v4 = vmul.f32 %v9150_v29, %v7051_v15  ;;  %v12443_v29 = vrot.slane %v7927_v55, %v13270_v32  ;;  %v13272_v9 = vld [vmem:[#allocation7_spill] sm:$0xff] }
 0xbab   : > { %v7047_v56 = vsub.f32 %v13272_v9, %v12394_v26 }
 0xbac   : > { %v9152_v20 = vpop.eup %9151  ;;  %v7129_v13 = vmul.f32 %v12421_v61, %v7089_v40  ;;  %v7130_v10 = vmul.f32 %v12424_v35, %v7090_v50  ;;  %v7131_v21 = vmul.f32 %v12429_v30, %v7091_v4  ;;  %v7048_v40 = vsub.f32 %v13273_v28, %v12394_v26  ;;  %v13274_v50 = vld [vmem:[#allocation52_spill] sm:$0xff] }
 0xbad   : > { %v7086_v52 = vmul.f32 %v9152_v20, %v7046_v33  ;;  %v7087_v32 = vmul.f32 %v9152_v20, %v7047_v56  ;;  %v6458_v26 = vmul.f32 %v13274_v50, %v12265_v16 }
 0xbae   : > { %v7169_v55 = vadd.f32 %v12434_v46, %v7129_v13  ;;  %v7171_v57 = vadd.f32 %v12443_v29, %v7131_v21  ;;  %v6457_v13 = vmul.f32 %v13274_v50, %v12272_v39 }
 0xbaf   : > { %v6650_v9 = vadd.f32 %v6586_v19, %v6458_v26 }
 0xbb0   : > { %vm7193_vm0 = vcmp.ge.f32.partialorder %v7169_v55, 0.0  ;;  %v7217_v16 = vmul.f32 0.2, %v7169_v55 }
 0xbb9   : > { %7343 = vperm.xlu0 %8611, %v12343_v36  }
 0xbbd   : > { %8612 = vset.pattern.permute.xlu0 %v9279_v34  ;;  %v6584_v34 = vpop.permute.xlu1 %6583 }
 0xbbe   : > { %v6601_v15 = vsel %vm4604_vm13, %v6582_v7, %v6584_v34  ;;  %v7088_v7 = vmul.f32 %v9152_v20, %v7048_v40 }
 0xbc1   : > { %v6774_v0 = vpop.permute.xlu1 %6773 }
 0xbc2   : > { %v6794_v4 = vsel %vm6779_vm11, %v6774_v0, %v12406_v48  ;;  %v7126_v0 = vmul.f32 %v12421_v61, %v7086_v52 }
 0xbc6   : > { %v6998_v63 = vpop.xlane.xlu0 %6997 }
 0xbc7   : > { %v7018_v54 = vmul.f32 0.0034722222, %v6998_v63  ;;  %v6456_v63 = vmul.f32 %v13274_v50, %v12257_v22  ;;  %v6602_v22 = vsel %vm4604_vm13, %v6584_v34, %v6586_v19  ;;  %v7219_v34 = vmul.f32 0.2, %v7171_v57  ;;  %v13275_v50 = vld [vmem:[#allocation72_spill] sm:$0xff] }
 0xbc8   : > { %v6649_v21 = vadd.f32 %v6602_v22, %v6457_v13  ;;  %vm7195_vm13 = vcmp.ge.f32.partialorder %v7171_v57, 0.0  ;;  %v7166_v13 = vadd.f32 %v12434_v46, %v7126_v0  ;;  %v9154_v0 = vpop.eup %9153 }
 0xbc9   : > { %v7034_v44 = vsub.f32 %v7018_v54, %v7026_v25  ;;  %v7170_v25 = vadd.f32 %v12437_v41, %v7130_v10  ;;  %v6648_v31 = vadd.f32 %v6601_v15, %v6456_v63 }
 0xbcb   : > { %v7042_v58 = vmax.f32 %v7034_v44, 0.0  ;;  %v6841_v33 = vadd.f32 %v6794_v4, %v6648_v31  ;;  %vm7194_vm3 = vcmp.ge.f32.partialorder %v7170_v25, 0.0  ;;  %v7218_v15 = vmul.f32 0.2, %v7170_v25 }
 0xbcc   : > { %v7127_v4 = vmul.f32 %v12424_v35, %v7087_v32  ;;  %v7128_v31 = vmul.f32 %v12429_v30, %v7088_v7 }
 0xbcd   : > { %v7074_v10 = vadd.f32 1e-05, %v7042_v58  ;;  %v12473_v58 = vadd.f32 %v13275_v50, %v6841_v33  ;;  %v7242_v22 = vsel %vm7194_vm3, %v7170_v25, %v7218_v15 }
 0xbce   : > { %v7003_v54 = vpop.xlane.xlu1 %7002  ;;  %v12468_v40 = vpop.permute.xlu0 %7263 }
 0xbcf   : > { %v7019_v44 = vmul.f32 0.0034722222, %v7003_v54  ;;  %9155 = vrsqrt.f32 %v7074_v10 }
 0xbd1   : > { %v7035_v20 = vsub.f32 %v7019_v44, %v7027_v62  ;;  %v7243_v62 = vsel %vm7195_vm13, %v7171_v57, %v7219_v34 }
 0xbd2   : > { %v6778_v56 = vpop.permute.xlu1 %6777 }
 0xbd3   : > { %v7043_v28 = vmax.f32 %v7035_v20, 0.0  ;;  %v6795_v63 = vsel %vm6779_vm11, %v12406_v48, %v6778_v56  ;;  %v6843_v39 = vadd.f32 %v6778_v56, %v6650_v9  ;;  %v7241_v48 = vsel %vm7193_vm0, %v7169_v55, %v7217_v16  ;;  %v7324_v32 = vpop.permute.xlu0 %7323 }
 0xbd4   : > { %v6842_v19 = vadd.f32 %v6795_v63, %v6649_v21  ;;  %v6971_v20 = vmul.f32 %v12473_v58, %v12473_v58  ;;  %v7167_v63 = vadd.f32 %v12437_v41, %v7127_v4  ;;  %vm7190_vm11 = vcmp.ge.f32.partialorder %v7166_v13, 0.0 }
 0xbd5   : > { %v7075_v52 = vadd.f32 1e-05, %v7043_v28  ;;  %v12478_v54 = vadd.f32 %v13275_v50, %v6843_v39  ;;  %v7055_v28 = vsub.f32 %v11998_v6, %v12401_v60 }
 0xbd6   : > { %v12481_v26 = vadd.f32 %v13275_v50, %v6842_v19  ;;  %v7268_v44 = vpop.permute.xlu1 %7267  ;;  %v7056_v50 = vsub.f32 %v12001_v5, %v12401_v60  ;;  %v7168_v19 = vadd.f32 %v12443_v29, %v7128_v31  ;;  %vm7191_vm8 = vcmp.ge.f32.partialorder %v7167_v63, 0.0 }
 0xbd7   : > { %v7297_v33 = vmul.f32 %v7268_v44, %v7241_v48  ;;  %v7298_v10 = vmul.f32 %v7268_v44, %v7242_v22  ;;  %v7299_v9 = vmul.f32 %v7268_v44, %v7243_v62  ;;  %9157 = vrsqrt.f32 %v7075_v52 }
 0xbd8   : > { %v6936_v7 = vadd.f32 %v12481_v26, %v12473_v58  ;;  %v6972_v55 = vmul.f32 %v12481_v26, %v12481_v26  ;;  %v6937_v25 = vsel %vm6901_vm15, %v12478_v54, 0.0  ;;  %v6973_v57 = vmul.f32 %v12478_v54, %v12478_v54 }
 0xbd9   : > { %v12496_v21 = vadd.f32 %v7324_v32, %v7297_v33  ;;  %v12498_v56 = vadd.f32 %v7324_v32, %v7298_v10  ;;  %v12505_v39 = vadd.f32 %v7324_v32, %v7299_v9  ;;  %v7214_v52 = vmul.f32 0.2, %v7166_v13 }
 0xbda   : > { %v12500_v16 = vpop.permute.xlu1 %7271  ;;  %v6938_v15 = vadd.f32 %v6937_v25, %v6936_v7  ;;  %v7009_v34 = vadd.f32 %v6972_v55, %v6971_v20  ;;  %v7057_v48 = vsub.f32 %v11993_v27, %v12401_v60  ;;  %v7132_v22 = vmul.f32 %v12421_v61, %v12156_v12 }
 0xbdb   : > { %v7095_v62 = vmul.f32 %v9154_v0, %v7055_v28  ;;  %v7010_v6 = vsel %vm6901_vm15, %v6973_v57, 0.0  ;;  %v7379_v5 = vadd.f32 %v12498_v56, %v12496_v21  ;;  %v7425_v31 = vmul.f32 %v12496_v21, %v12496_v21 }
 0xbdc   : > { %6939 = vadd.xlane.f32.xlu1 %v6938_v15  ;;  %v7011_v44 = vadd.f32 %v7010_v6, %v7009_v34  ;;  %v7426_v33 = vmul.f32 %v12498_v56, %v12498_v56  ;;  %v7096_v10 = vmul.f32 %v9154_v0, %v7056_v50  ;;  %v7097_v27 = vmul.f32 %v9154_v0, %v7057_v48  ;;  %v9156_v32 = vpop.eup %9155 }
 0xbdd   : > { %v7380_v12 = vsel %vm6901_vm15, %v12505_v39, 0.0  ;;  %v7427_v60 = vmul.f32 %v12505_v39, %v12505_v39  ;;  %vm7192_vm14 = vcmp.ge.f32.partialorder %v7168_v19, 0.0  ;;  %v7133_v9 = vmul.f32 %v12424_v35, %v12158_v49 }
 0xbde   : > { %v12515_v4 = vpop.permute.xlu1 %7275  ;;  %v7215_v7 = vmul.f32 0.2, %v7167_v63  ;;  %v7216_v20 = vmul.f32 0.2, %v7168_v19  ;;  %v7134_v55 = vmul.f32 %v12429_v30, %v12160_v45  ;;  %v7135_v25 = vmul.f32 %v12421_v61, %v7095_v62 }
 0xbdf   : > { %v7058_v57 = vsub.f32 %v12184_v8, %v12411_v24  ;;  %v7238_v0 = vsel %vm7190_vm11, %v7166_v13, %v7214_v52  ;;  %v7381_v34 = vadd.f32 %v7380_v12, %v7379_v5  ;;  %v7451_v28 = vadd.f32 %v7426_v33, %v7425_v31 }
 0xbe0   : > { %7012 = vadd.xlane.f32.xlu1 %v7011_v44  ;;  %v7172_v49 = vadd.f32 %v12434_v46, %v7132_v22  ;;  %v7136_v50 = vmul.f32 %v12424_v35, %v7096_v10  ;;  %v7137_v48 = vmul.f32 %v12429_v30, %v7097_v27  ;;  %v7452_v6 = vsel %vm6901_vm15, %v7427_v60, 0.0 }
 0xbe1   : > { %v7059_v45 = vsub.f32 %v12187_v23, %v12411_v24  ;;  %v7060_v8 = vsub.f32 %v12181_v37, %v12411_v24  ;;  %v7173_v13 = vadd.f32 %v12437_v41, %v7133_v9  ;;  %v7098_v52 = vmul.f32 %v9156_v32, %v7058_v57 }
 0xbe2   : > { %v12535_v15 = vpop.permute.xlu1 %7279  ;;  %v7239_v44 = vsel %vm7191_vm8, %v7167_v63, %v7215_v7  ;;  %v7240_v22 = vsel %vm7192_vm14, %v7168_v19, %v7216_v20  ;;  %v7174_v5 = vadd.f32 %v12443_v29, %v7134_v55  ;;  %v7175_v31 = vadd.f32 %v12434_v46, %v7135_v25 }
 0xbe3   : > { %v7061_v33 = vsub.f32 %v12214_v11, %v12448_v53  ;;  %v7099_v23 = vmul.f32 %v9156_v32, %v7059_v45  ;;  %v7100_v10 = vmul.f32 %v9156_v32, %v7060_v8  ;;  %v7453_v37 = vadd.f32 %v7452_v6, %v7451_v28 }
 0xbe4   : > { %7382 = vadd.xlane.f32.xlu1 %v7381_v34  ;;  %v9158_v62 = vpop.eup %9157  ;;  %v7062_v24 = vsub.f32 %v12217_v3, %v12448_v53  ;;  %v7063_v63 = vsub.f32 %v12208_v14, %v12448_v53  ;;  %v7176_v19 = vadd.f32 %v12437_v41, %v7136_v50  ;;  %v7177_v12 = vadd.f32 %v12443_v29, %v7137_v48 }
 0xbe5   : > { %vm7196_vm2 = vcmp.ge.f32.partialorder %v7172_v49, 0.0  ;;  %vm7197_vm12 = vcmp.ge.f32.partialorder %v7173_v13, 0.0  ;;  %v7138_v60 = vmul.f32 %v12421_v61, %v7098_v52  ;;  %v7101_v11 = vmul.f32 %v9158_v62, %v7061_v33 }
 0xbe6   : > { %v12552_v27 = vpop.permute.xlu1 %7283  ;;  %v7220_v9 = vmul.f32 0.2, %v7172_v49  ;;  %v7221_v32 = vmul.f32 0.2, %v7173_v13  ;;  %v7102_v7 = vmul.f32 %v9158_v62, %v7062_v24  ;;  %v7103_v20 = vmul.f32 %v9158_v62, %v7063_v63 }
 0xbe7   : > { %v7222_v55 = vmul.f32 0.2, %v7174_v5  ;;  %v7223_v25 = vmul.f32 0.2, %v7175_v31  ;;  %v7139_v3 = vmul.f32 %v12424_v35, %v7099_v23  ;;  %v7140_v14 = vmul.f32 %v12429_v30, %v7100_v10 }
 0xbe8   : > { %7454 = vadd.xlane.f32.xlu1 %v7453_v37  ;;  %vm7198_vm1 = vcmp.ge.f32.partialorder %v7174_v5, 0.0  ;;  %vm7199_vm4 = vcmp.ge.f32.partialorder %v7175_v31, 0.0  ;;  %v7224_v57 = vmul.f32 0.2, %v7176_v19  ;;  %v7225_v34 = vmul.f32 0.2, %v7177_v12 }
 0xbe9   : > { %vm7200_vm6 = vcmp.ge.f32.partialorder %v7176_v19, 0.0  ;;  %vm7201_vm7 = vcmp.ge.f32.partialorder %v7177_v12, 0.0  ;;  %v7178_v28 = vadd.f32 %v12434_v46, %v7138_v60  ;;  %v7141_v50 = vmul.f32 %v12421_v61, %v7101_v11 }
 0xbea   : > { %v12563_v53 = vpop.permute.xlu1 %7287  ;;  %v7244_v48 = vsel %vm7196_vm2, %v7172_v49, %v7220_v9  ;;  %v7245_v6 = vsel %vm7197_vm12, %v7173_v13, %v7221_v32  ;;  %v7142_v45 = vmul.f32 %v12424_v35, %v7102_v7  ;;  %v7143_v8 = vmul.f32 %v12429_v30, %v7103_v20 }
 0xbeb   : > { %v7246_v52 = vsel %vm7198_vm1, %v7174_v5, %v7222_v55  ;;  %v7247_v62 = vsel %vm7199_vm4, %v7175_v31, %v7223_v25  ;;  %v7179_v33 = vadd.f32 %v12437_v41, %v7139_v3  ;;  %v7180_v23 = vadd.f32 %v12443_v29, %v7140_v14 }
 0xbec   : > { %v7294_v37 = vmul.f32 %v12468_v40, %v7238_v0  ;;  %v7295_v24 = vmul.f32 %v12468_v40, %v7239_v44  ;;  %v7248_v63 = vsel %vm7200_vm6, %v7176_v19, %v7224_v57  ;;  %v7249_v49 = vsel %vm7201_vm7, %v7177_v12, %v7225_v34 }
 0xbed   : > { %v7296_v13 = vmul.f32 %v12468_v40, %v7240_v22  ;;  %v7300_v60 = vmul.f32 %v12500_v16, %v7244_v48  ;;  %v7226_v11 = vmul.f32 0.2, %v7178_v28  ;;  %v7181_v5 = vadd.f32 %v12434_v46, %v7141_v50 }
 0xbee   : > { %v12573_v10 = vpop.permute.xlu1 %7291  ;;  %v7301_v31 = vmul.f32 %v12500_v16, %v7245_v6  ;;  %vm7202_vm9 = vcmp.ge.f32.partialorder %v7178_v28, 0.0  ;;  %v7182_v9 = vadd.f32 %v12437_v41, %v7142_v45  ;;  %v7183_v32 = vadd.f32 %v12443_v29, %v7143_v8 }
 0xbef   : > { %v7302_v0 = vmul.f32 %v12500_v16, %v7246_v52  ;;  %vm7203_vm10 = vcmp.ge.f32.partialorder %v7179_v33, 0.0  ;;  %v7227_v44 = vmul.f32 0.2, %v7179_v33  ;;  %v7228_v19 = vmul.f32 0.2, %v7180_v23 }
 0xbf0   : > { %vm7204_vm5 = vcmp.ge.f32.partialorder %v7180_v23, 0.0  ;;  %v7303_v20 = vmul.f32 %v12515_v4, %v7247_v62  ;;  %v7250_v55 = vsel %vm7202_vm9, %v7178_v28, %v7226_v11  ;;  %vm7205_vm0 = vcmp.ge.f32.partialorder %v7181_v5, 0.0 }
 0xbf1   : > { %v7229_v25 = vmul.f32 0.2, %v7181_v5  ;;  %v7230_v3 = vmul.f32 0.2, %v7182_v9  ;;  %v7231_v14 = vmul.f32 0.2, %v7183_v32  ;;  %v7251_v34 = vsel %vm7203_vm10, %v7179_v33, %v7227_v44 }
 0xbf2   : > { %v7320_v12 = vpop.permute.xlu1 %7319  ;;  %v7252_v50 = vsel %vm7204_vm5, %v7180_v23, %v7228_v19  ;;  %vm7206_vm3 = vcmp.ge.f32.partialorder %v7182_v9, 0.0  ;;  %vm7207_vm13 = vcmp.ge.f32.partialorder %v7183_v32, 0.0  ;;  %v7304_v52 = vmul.f32 %v12515_v4, %v7248_v63 }
 0xbf3   : > { %v12584_v40 = vadd.f32 %v7320_v12, %v7294_v37  ;;  %v12586_v22 = vadd.f32 %v7320_v12, %v7295_v24  ;;  %v12588_v7 = vadd.f32 %v7320_v12, %v7296_v13  ;;  %v7305_v62 = vmul.f32 %v12515_v4, %v7249_v49 }
 0xbf4   : > { %v7306_v37 = vmul.f32 %v12535_v15, %v7250_v55  ;;  %v7253_v24 = vsel %vm7205_vm0, %v7181_v5, %v7229_v25  ;;  %v7254_v33 = vsel %vm7206_vm3, %v7182_v9, %v7230_v3  ;;  %v7255_v23 = vsel %vm7207_vm13, %v7183_v32, %v7231_v14  ;;  %v7336_v14 = vpop.permute.xlu0 %7335 }
 0xbf5   : > { %v7374_v16 = vadd.f32 %v12586_v22, %v12584_v40  ;;  %v7375_v57 = vsel %vm6901_vm15, %v12588_v7, 0.0  ;;  %v7307_v11 = vmul.f32 %v12535_v15, %v7251_v34  ;;  %v7422_v4 = vmul.f32 %v12584_v40, %v12584_v40 }
 0xbf6   : > { %v7328_v48 = vpop.permute.xlu1 %7327  ;;  %v7423_v49 = vmul.f32 %v12586_v22, %v12586_v22  ;;  %v7309_v44 = vmul.f32 %v12552_v27, %v7253_v24  ;;  %v7310_v19 = vmul.f32 %v12552_v27, %v7254_v33  ;;  %v7424_v12 = vmul.f32 %v12588_v7, %v12588_v7 }
 0xbf7   : > { %v12596_v6 = vadd.f32 %v7328_v48, %v7300_v60  ;;  %v12598_v45 = vadd.f32 %v7328_v48, %v7301_v31  ;;  %v12600_v28 = vadd.f32 %v7328_v48, %v7302_v0  ;;  %v7376_v8 = vadd.f32 %v7375_v57, %v7374_v16 }
 0xbf8   : > { %v7308_v31 = vmul.f32 %v12535_v15, %v7252_v50  ;;  %v7311_v15 = vmul.f32 %v12552_v27, %v7255_v23  ;;  %v7446_v57 = vadd.f32 %v7423_v49, %v7422_v4  ;;  %v7447_v23 = vsel %vm6901_vm15, %v7424_v12, 0.0 }
 0xbf9   : > { %7377 = vadd.xlane.f32.xlu0 %v7376_v8  ;;  %v7384_v13 = vadd.f32 %v12598_v45, %v12596_v6  ;;  %v7385_v60 = vsel %vm6901_vm15, %v12600_v28, 0.0  ;;  %v7428_v34 = vmul.f32 %v12596_v6, %v12596_v6  ;;  %v7429_v50 = vmul.f32 %v12598_v45, %v12598_v45 }
 0xbfa   : > { %v7332_v63 = vpop.permute.xlu1 %7331 }
 0xbfb   : > { %v12616_v5 = vadd.f32 %v7332_v63, %v7303_v20  ;;  %v12618_v9 = vadd.f32 %v7332_v63, %v7304_v52  ;;  %v12620_v32 = vadd.f32 %v7332_v63, %v7305_v62  ;;  %v7386_v0 = vadd.f32 %v7385_v60, %v7384_v13 }
 0xbfc   : > { %v7430_v13 = vmul.f32 %v12600_v28, %v12600_v28  ;;  %v12651_v60 = vadd.f32 %v7336_v14, %v7306_v37  ;;  %v12653_v63 = vadd.f32 %v7336_v14, %v7307_v11  ;;  %v7456_v12 = vadd.f32 %v7429_v50, %v7428_v34 }
 0xbfd   : > { %7387 = vadd.xlane.f32.xlu0 %v7386_v0  ;;  %v7389_v55 = vadd.f32 %v12618_v9, %v12616_v5  ;;  %v7390_v20 = vsel %vm6901_vm15, %v12620_v32, 0.0  ;;  %v7431_v25 = vmul.f32 %v12616_v5, %v12616_v5  ;;  %v7432_v3 = vmul.f32 %v12618_v9, %v12618_v9 }
 0xbfe   : > { %v7340_v16 = vpop.permute.xlu1 %7339  ;;  %v7433_v27 = vmul.f32 %v12620_v32, %v12620_v32  ;;  %v12665_v11 = vadd.f32 %v7336_v14, %v7308_v31  ;;  %v7435_v34 = vmul.f32 %v12653_v63, %v12653_v63 }
 0xbff   : > { %v12641_v48 = vadd.f32 %v7340_v16, %v7309_v44  ;;  %v12643_v8 = vadd.f32 %v7340_v16, %v7310_v19  ;;  %v12645_v52 = vadd.f32 %v7340_v16, %v7311_v15  ;;  %v7391_v62 = vadd.f32 %v7390_v20, %v7389_v55 }
 0xc00   : > { %v7461_v24 = vadd.f32 %v7432_v3, %v7431_v25  ;;  %v7462_v33 = vsel %vm6901_vm15, %v7433_v27, 0.0  ;;  %v7448_v19 = vadd.f32 %v7447_v23, %v7446_v57  ;;  %v7457_v55 = vsel %vm6901_vm15, %v7430_v13, 0.0 }
 0xc01   : > { %7392 = vadd.xlane.f32.xlu0 %v7391_v62  ;;  %v7399_v49 = vadd.f32 %v12643_v8, %v12641_v48  ;;  %v7437_v0 = vmul.f32 %v12641_v48, %v12641_v48  ;;  %v7438_v44 = vmul.f32 %v12643_v8, %v12643_v8  ;;  %v7400_v15 = vsel %vm6901_vm15, %v12645_v52, 0.0 }
 0xc02   : > { %v7463_v4 = vadd.f32 %v7462_v33, %v7461_v24  ;;  %v7439_v37 = vmul.f32 %v12645_v52, %v12645_v52  ;;  %v7434_v3 = vmul.f32 %v12651_v60, %v12651_v60  ;;  %v7458_v16 = vadd.f32 %v7457_v55, %v7456_v12 }
 0xc03   : > { %v7401_v20 = vadd.f32 %v7400_v15, %v7399_v49  ;;  %v7471_v25 = vadd.f32 %v7438_v44, %v7437_v0  ;;  %v7394_v57 = vadd.f32 %v12653_v63, %v12651_v60  ;;  %v7395_v31 = vsel %vm6901_vm15, %v12665_v11, 0.0 }
 0xc04   : > { %7464 = vadd.xlane.f32.xlu1 %v7463_v4  ;;  %v7472_v27 = vsel %vm6901_vm15, %v7439_v37, 0.0  ;;  %v7436_v14 = vmul.f32 %v12665_v11, %v12665_v11  ;;  %v7466_v24 = vadd.f32 %v7435_v34, %v7434_v3  ;;  %v9280_v37 = vmov 12  }
 0xc05   : > { %7449 = vadd.xlane.f32.xlu0 %v7448_v19  ;;  %v7473_v50 = vadd.f32 %v7472_v27, %v7471_v25  ;;  %v7396_v62 = vadd.f32 %v7395_v31, %v7394_v57 }
 0xc06   : > { %v7467_v33 = vsel %vm6901_vm15, %v7436_v14, 0.0 }
 0xc07   : > { %v7468_v23 = vadd.f32 %v7467_v33, %v7466_v24 }
 0xc08   : > { %7402 = vadd.xlane.f32.xlu1 %v7401_v20 }
 0xc09   : > { %7459 = vadd.xlane.f32.xlu0 %v7458_v16 }
 0xc0c   : > { %7474 = vadd.xlane.f32.xlu1 %v7473_v50 }
 0xc0d   : > { %7397 = vadd.xlane.f32.xlu0 %v7396_v62 }
 0xc11   : > { %7469 = vadd.xlane.f32.xlu0 %v7468_v23 }
 0xc1d   : > { %7707 = vperm.xlu1 %8613, %v12311_v17  }
 0xc21   : > { %7711 = vperm.xlu1 %8613, %v12324_v2  }
 0xc25   : > { %7715 = vperm.xlu1 %8613, %v12330_v38  }
 0xc28   : > { %v6935_v13 = vpop.xlane.xlu0 %6934 }
 0xc29   : > { %7719 = vperm.xlu1 %8613, %v12318_v18   ;;  %v6948_v4 = vmul.f32 0.0034722222, %v6935_v13 }
 0xc2b   : > { %v7028_v0 = vmul.f32 %v6948_v4, %v6948_v4  ;;  %v7064_v55 = vsub.f32 %v12375_v51, %v6948_v4  ;;  %v7066_v20 = vsub.f32 %v12372_v1, %v6948_v4 }
 0xc2c   : > { %v7008_v49 = vpop.xlane.xlu0 %7007 }
 0xc2d   : > { %7723 = vperm.xlu1 %8613, %v12337_v47   ;;  %v7020_v44 = vmul.f32 0.0034722222, %v7008_v49  ;;  %v7065_v47 = vsub.f32 %v12378_v43, %v6948_v4 }
 0xc2f   : > { %v7036_v19 = vsub.f32 %v7020_v44, %v7028_v0 }
 0xc31   : > { %v7044_v15 = vmax.f32 %v7036_v19, 0.0  ;;  %7727 = vperm.xlu1 %8613, %v12343_v36  }
 0xc33   : > { %v7076_v12 = vadd.f32 1e-05, %v7044_v15 }
 0xc34   : > { %v7344_v13 = vpop.permute.xlu0 %7343 }
 0xc35   : > { %9159 = vrsqrt.f32 %v7076_v12  ;;  %7731 = vperm.xlu1 %8613, %v12349_v42  }
 0xc39   : > { %8614 = vset.pattern.permute.xlu1 %v9280_v37 }
 0xc3a   : > { %7759 = vperm.xlu1 %8614, %v12302_v59  }
 0xc3e   : > { %7767 = vperm.xlu1 %8614, %v12324_v2  }
 0xc42   : > { %v9160_v25 = vpop.eup %9159  ;;  %7771 = vperm.xlu1 %8614, %v12330_v38  }
 0xc43   : > { %v7104_v3 = vmul.f32 %v9160_v25, %v7064_v55  ;;  %v7105_v16 = vmul.f32 %v9160_v25, %v7065_v47  ;;  %v7106_v27 = vmul.f32 %v9160_v25, %v7066_v20 }
 0xc45   : > { %v7144_v42 = vmul.f32 %v12421_v61, %v7104_v3  ;;  %v7145_v57 = vmul.f32 %v12424_v35, %v7105_v16  ;;  %v7146_v34 = vmul.f32 %v12429_v30, %v7106_v27  ;;  %v12719_v3 = vpop.permute.xlu1 %7347 }
 0xc47   : > { %v7184_v2 = vadd.f32 %v12434_v46, %v7144_v42  ;;  %v7185_v51 = vadd.f32 %v12437_v41, %v7145_v57  ;;  %v7186_v43 = vadd.f32 %v12443_v29, %v7146_v34 }
 0xc49   : > { %vm7208_vm11 = vcmp.ge.f32.partialorder %v7184_v2, 0.0  ;;  %vm7209_vm8 = vcmp.ge.f32.partialorder %v7185_v51, 0.0  ;;  %vm7210_vm14 = vcmp.ge.f32.partialorder %v7186_v43, 0.0  ;;  %v7232_v1 = vmul.f32 0.2, %v7184_v2 }
 0xc4a   : > { %v7233_v38 = vmul.f32 0.2, %v7185_v51  ;;  %v7234_v31 = vmul.f32 0.2, %v7186_v43 }
 0xc4b   : > { %v7256_v14 = vsel %vm7208_vm11, %v7184_v2, %v7232_v1 }
 0xc4c   : > { %v7257_v50 = vsel %vm7209_vm8, %v7185_v51, %v7233_v38  ;;  %v7258_v62 = vsel %vm7210_vm14, %v7186_v43, %v7234_v31  ;;  %v7312_v24 = vmul.f32 %v12563_v53, %v7256_v14 }
 0xc4d   : > { %v7313_v33 = vmul.f32 %v12563_v53, %v7257_v50  ;;  %v7314_v23 = vmul.f32 %v12563_v53, %v7258_v62 }
 0xc4e   : > { %v12702_v4 = vadd.f32 %v7344_v13, %v7312_v24 }
 0xc4f   : > { %v12704_v49 = vadd.f32 %v7344_v13, %v7313_v33  ;;  %v12706_v0 = vadd.f32 %v7344_v13, %v7314_v23 }
 0xc50   : > { %v7440_v44 = vmul.f32 %v12702_v4, %v12702_v4 }
 0xc51   : > { %v7404_v19 = vadd.f32 %v12704_v49, %v12702_v4  ;;  %v7405_v15 = vsel %vm6901_vm15, %v12706_v0, 0.0  ;;  %v7441_v12 = vmul.f32 %v12704_v49, %v12704_v49  ;;  %v7442_v53 = vmul.f32 %v12706_v0, %v12706_v0 }
 0xc53   : > { %v7406_v55 = vadd.f32 %v7405_v15, %v7404_v19  ;;  %v7476_v47 = vadd.f32 %v7441_v12, %v7440_v44  ;;  %v7477_v20 = vsel %vm6901_vm15, %v7442_v53, 0.0 }
 0xc55   : > { %7407 = vadd.xlane.f32.xlu0 %v7406_v55  ;;  %v7478_v25 = vadd.f32 %v7477_v20, %v7476_v47 }
 0xc59   : > { %7479 = vadd.xlane.f32.xlu0 %v7478_v25 }
 0xc65   : > { %v6940_v16 = vpop.xlane.xlu1 %6939 }
 0xc66   : > { %v6949_v27 = vmul.f32 0.0034722222, %v6940_v16 }
 0xc68   : > { %v7029_v57 = vmul.f32 %v6949_v27, %v6949_v27  ;;  %v7067_v23 = vsub.f32 %v12473_v58, %v6949_v27  ;;  %v7069_v13 = vsub.f32 %v12478_v54, %v6949_v27 }
 0xc69   : > { %v7013_v42 = vpop.xlane.xlu1 %7012 }
 0xc6a   : > { %v7021_v34 = vmul.f32 0.0034722222, %v7013_v42 }
 0xc6c   : > { %v7037_v2 = vsub.f32 %v7021_v34, %v7029_v57 }
 0xc6d   : > { %v7383_v51 = vpop.xlane.xlu1 %7382 }
 0xc6e   : > { %v7045_v43 = vmax.f32 %v7037_v2, 0.0  ;;  %v7415_v1 = vmul.f32 0.0034722222, %v7383_v51 }
 0xc6f   : > { %7703 = vperm.xlu0 %8612, %v12302_v59   ;;  %v7068_v59 = vsub.f32 %v12481_v26, %v6949_v27 }
 0xc70   : > { %v7077_v38 = vadd.f32 1e-05, %v7045_v43  ;;  %v7495_v14 = vmul.f32 %v7415_v1, %v7415_v1  ;;  %v7521_v54 = vsub.f32 %v12496_v21, %v7415_v1  ;;  %v7522_v55 = vsub.f32 %v12498_v56, %v7415_v1 }
 0xc71   : > { %v7455_v31 = vpop.xlane.xlu1 %7454  ;;  %v7523_v47 = vsub.f32 %v12505_v39, %v7415_v1 }
 0xc72   : > { %9161 = vrsqrt.f32 %v7077_v38  ;;  %v7487_v50 = vmul.f32 0.0034722222, %v7455_v31 }
 0xc73   : > { %8615 = vset.pattern.permute.xlu0 %v9280_v37 }
 0xc74   : > { %v7503_v62 = vsub.f32 %v7487_v50, %v7495_v14  ;;  %7763 = vperm.xlu0 %8615, %v12311_v17  }
 0xc76   : > { %v7511_v24 = vmax.f32 %v7503_v62, 0.0 }
 0xc78   : > { %v7543_v33 = vadd.f32 1e-05, %v7511_v24  ;;  %7775 = vperm.xlu0 %8615, %v12318_v18  }
 0xc7a   : > { %9163 = vrsqrt.f32 %v7543_v33 }
 0xc7c   : > { %7783 = vperm.xlu0 %8615, %v12343_v36  }
 0xc7f   : > { %v9162_v44 = vpop.eup %9161 }
 0xc80   : > { %v7107_v19 = vmul.f32 %v9162_v44, %v7067_v23  ;;  %v7108_v15 = vmul.f32 %v9162_v44, %v7068_v59  ;;  %v7109_v37 = vmul.f32 %v9162_v44, %v7069_v13 }
 0xc82   : > { %v12728_v12 = vpop.xlane.xlu0 %7377  ;;  %v7147_v17 = vmul.f32 %v12421_v61, %v7107_v19  ;;  %v7148_v53 = vmul.f32 %v12424_v35, %v7108_v15  ;;  %v7149_v18 = vmul.f32 %v12429_v30, %v7109_v37 }
 0xc84   : > { %v7187_v36 = vadd.f32 %v12434_v46, %v7147_v17  ;;  %v7188_v58 = vadd.f32 %v12437_v41, %v7148_v53  ;;  %v7189_v26 = vadd.f32 %v12443_v29, %v7149_v18 }
 0xc86   : > { %v7388_v20 = vpop.xlane.xlu0 %7387  ;;  %vm7211_vm2 = vcmp.ge.f32.partialorder %v7187_v36, 0.0  ;;  %vm7212_vm12 = vcmp.ge.f32.partialorder %v7188_v58, 0.0  ;;  %v7235_v25 = vmul.f32 0.2, %v7187_v36  ;;  %vm7213_vm1 = vcmp.ge.f32.partialorder %v7189_v26, 0.0 }
 0xc87   : > { %v9164_v16 = vpop.eup %9163  ;;  %v7236_v27 = vmul.f32 0.2, %v7188_v58  ;;  %v7237_v42 = vmul.f32 0.2, %v7189_v26  ;;  %v12764_v37 = vmul.f32 0.0034722222, %v7388_v20 }
 0xc88   : > { %v7259_v57 = vsel %vm7211_vm2, %v7187_v36, %v7235_v25  ;;  %v7561_v34 = vmul.f32 %v9164_v16, %v7521_v54  ;;  %v7562_v2 = vmul.f32 %v9164_v16, %v7522_v55  ;;  %v7563_v51 = vmul.f32 %v9164_v16, %v7523_v47 }
 0xc89   : > { %v7260_v43 = vsel %vm7212_vm12, %v7188_v58, %v7236_v27  ;;  %v7261_v31 = vsel %vm7213_vm1, %v7189_v26, %v7237_v42  ;;  %v7315_v21 = vmul.f32 %v12573_v10, %v7259_v57  ;;  %v7496_v42 = vmul.f32 %v12764_v37, %v12764_v37 }
 0xc8a   : > { %v7393_v38 = vpop.xlane.xlu0 %7392  ;;  %v7316_v56 = vmul.f32 %v12573_v10, %v7260_v43  ;;  %v7317_v1 = vmul.f32 %v12573_v10, %v7261_v31  ;;  %v7585_v14 = vmul.f32 %v7561_v34, %v12421_v61  ;;  %v7586_v24 = vmul.f32 %v7562_v2, %v12424_v35 }
 0xc8b   : > { %v12741_v39 = vmul.f32 0.0034722222, %v7393_v38  ;;  %v12746_v50 = vadd.f32 %v12719_v3, %v7315_v21  ;;  %v7587_v59 = vmul.f32 %v7563_v51, %v12429_v30 }
 0xc8c   : > { %v12749_v62 = vadd.f32 %v12719_v3, %v7316_v56  ;;  %v12758_v10 = vadd.f32 %v12719_v3, %v7317_v1  ;;  %v7609_v53 = vadd.f32 %v7585_v14, %v12434_v46  ;;  %v7610_v58 = vadd.f32 %v7586_v24, %v12437_v41 }
 0xc8d   : > { %v7465_v33 = vpop.xlane.xlu1 %7464  ;;  %v7497_v23 = vmul.f32 %v12741_v39, %v12741_v39  ;;  %v7443_v15 = vmul.f32 %v12746_v50, %v12746_v50  ;;  %v7611_v47 = vadd.f32 %v7587_v59, %v12443_v29 }
 0xc8e   : > { %v7489_v13 = vmul.f32 0.0034722222, %v7465_v33  ;;  %v12755_v44 = vpop.xlane.xlu0 %7449  ;;  %v7409_v19 = vadd.f32 %v12749_v62, %v12746_v50  ;;  %v7444_v17 = vmul.f32 %v12749_v62, %v12749_v62  ;;  %v7410_v36 = vsel %vm6901_vm15, %v12758_v10, 0.0 }
 0xc8f   : > { %v7445_v3 = vmul.f32 %v12758_v10, %v12758_v10  ;;  %vm7633_vm4 = vcmp.ge.f32.partialorder %v7609_v53, 0.0  ;;  %vm7634_vm6 = vcmp.ge.f32.partialorder %v7610_v58, 0.0  ;;  %vm7635_vm7 = vcmp.ge.f32.partialorder %v7611_v47, 0.0 }
 0xc90   : > { %v7505_v18 = vsub.f32 %v7489_v13, %v7497_v23  ;;  %v7411_v54 = vadd.f32 %v7410_v36, %v7409_v19  ;;  %v7481_v55 = vadd.f32 %v7444_v17, %v7443_v15  ;;  %v7657_v31 = vmul.f32 0.2, %v7609_v53 }
 0xc91   : > { %v7403_v26 = vpop.xlane.xlu1 %7402  ;;  %v7482_v27 = vsel %vm6901_vm15, %v7445_v3, 0.0  ;;  %v7658_v56 = vmul.f32 0.2, %v7610_v58  ;;  %v7659_v1 = vmul.f32 0.2, %v7611_v47 }
 0xc92   : > { %v7513_v20 = vmax.f32 %v7505_v18, 0.0  ;;  %v12775_v25 = vmul.f32 0.0034722222, %v7403_v26  ;;  %v7460_v16 = vpop.xlane.xlu0 %7459  ;;  %7412 = vadd.xlane.f32.xlu1 %v7411_v54  ;;  %v7483_v2 = vadd.f32 %v7482_v27, %v7481_v55  ;;  %v7681_v23 = vsel %vm7633_vm4, %v7609_v53, %v7657_v31 }
 0xc93   : > { %v7488_v57 = vmul.f32 0.0034722222, %v7460_v16  ;;  %v7682_v59 = vsel %vm7634_vm6, %v7610_v58, %v7658_v56  ;;  %v7683_v13 = vsel %vm7635_vm7, %v7611_v47, %v7659_v1  ;;  %v7527_v53 = vsub.f32 %v12616_v5, %v12741_v39 }
 0xc94   : > { %v7545_v34 = vadd.f32 1e-05, %v7513_v20  ;;  %v7499_v43 = vmul.f32 %v12775_v25, %v12775_v25  ;;  %v7528_v58 = vsub.f32 %v12618_v9, %v12741_v39  ;;  %v7529_v47 = vsub.f32 %v12620_v32, %v12741_v39  ;;  %v9197_v32 = vld [vmem:[%s13033_s4 + $0x28] sm:$0xff] }
 0xc95   : > { %v7504_v51 = vsub.f32 %v7488_v57, %v7496_v42  ;;  %v7475_v38 = vpop.xlane.xlu1 %7474  ;;  %v7524_v57 = vsub.f32 %v12596_v6, %v12764_v37  ;;  %v7526_v5 = vsub.f32 %v12600_v28, %v12764_v37  ;;  %v7534_v28 = vsub.f32 %v12643_v8, %v12775_v25 }
 0xc96   : > { %9165 = vrsqrt.f32 %v7545_v34  ;;  %v7491_v21 = vmul.f32 0.0034722222, %v7475_v38  ;;  %7484 = vadd.xlane.f32.xlu1 %v7483_v2  ;;  %v7525_v34 = vsub.f32 %v12598_v45, %v12764_v37  ;;  %v7533_v45 = vsub.f32 %v12641_v48, %v12775_v25 }
 0xc97   : > { %v7512_v14 = vmax.f32 %v7504_v51, 0.0  ;;  %v7535_v1 = vsub.f32 %v12645_v52, %v12775_v25 }
 0xc98   : > { %v7507_v24 = vsub.f32 %v7491_v21, %v7499_v43 }
 0xc99   : > { %v7544_v33 = vadd.f32 1e-05, %v7512_v14  ;;  %v7708_v19 = vpop.permute.xlu1 %7707 }
 0xc9a   : > { %v7515_v15 = vmax.f32 %v7507_v24, 0.0  ;;  %v12782_v17 = vmul.f32 %v7708_v19, %v7681_v23  ;;  %v12784_v18 = vmul.f32 %v7708_v19, %v7682_v59  ;;  %v12786_v36 = vmul.f32 %v7708_v19, %v7683_v13  ;;  %v9198_v23 = vld [vmem:[%s13033_s4 + $0x38] sm:$0xff] }
 0xc9b   : > { %9167 = vrsqrt.f32 %v7544_v33 }
 0xc9c   : > { %v7547_v3 = vadd.f32 1e-05, %v7515_v15 }
 0xc9d   : > { %v12788_v26 = vpop.permute.xlu1 %7711 }
 0xc9e   : > { %9169 = vrsqrt.f32 %v7547_v3 }
 0xca1   : > { %v12790_v54 = vpop.permute.xlu1 %7715 }
 0xca3   : > { %v9166_v55 = vpop.eup %9165 }
 0xca4   : > { %v7567_v20 = vmul.f32 %v9166_v55, %v7527_v53  ;;  %v7568_v16 = vmul.f32 %v9166_v55, %v7528_v58  ;;  %v7569_v27 = vmul.f32 %v9166_v55, %v7529_v47  ;;  %v12836_v53 = vmul.f32 0.0034722222, %v12728_v12 }
 0xca5   : > { %v12798_v42 = vpop.permute.xlu1 %7719 }
 0xca6   : > { %v7591_v9 = vmul.f32 %v7567_v20, %v12421_v61  ;;  %v7592_v51 = vmul.f32 %v7568_v16, %v12424_v35  ;;  %v7593_v6 = vmul.f32 %v7569_v27, %v12429_v30  ;;  %v7398_v27 = vpop.xlane.xlu0 %7397 }
 0xca7   : > { %7779 = vperm.xlu1 %8614, %v9197_v32   ;;  %v7486_v32 = vmul.f32 0.0034722222, %v12755_v44 }
 0xca8   : > { %v9168_v2 = vpop.eup %9167  ;;  %v7615_v48 = vadd.f32 %v7591_v9, %v12434_v46  ;;  %v7616_v8 = vadd.f32 %v7592_v51, %v12437_v41  ;;  %v7617_v59 = vadd.f32 %v7593_v6, %v12443_v29  ;;  %v7494_v51 = vmul.f32 %v12836_v53, %v12836_v53 }
 0xca9   : > { %v7564_v39 = vmul.f32 %v9168_v2, %v7524_v57  ;;  %v7565_v43 = vmul.f32 %v9168_v2, %v7525_v34  ;;  %v7566_v38 = vmul.f32 %v9168_v2, %v7526_v5  ;;  %v12812_v31 = vpop.permute.xlu1 %7723 }
 0xcaa   : > { %vm7639_vm9 = vcmp.ge.f32.partialorder %v7615_v48, 0.0  ;;  %vm7640_vm10 = vcmp.ge.f32.partialorder %v7616_v8, 0.0  ;;  %vm7641_vm5 = vcmp.ge.f32.partialorder %v7617_v59, 0.0  ;;  %v7663_v55 = vmul.f32 0.2, %v7615_v48 }
 0xcab   : > { %v9170_v37 = vpop.eup %9169  ;;  %v7588_v21 = vmul.f32 %v7564_v39, %v12421_v61  ;;  %v7589_v56 = vmul.f32 %v7565_v43, %v12424_v35  ;;  %v7590_v14 = vmul.f32 %v7566_v38, %v12429_v30  ;;  %7787 = vperm.xlu1 %8614, %v9198_v23   ;;  %v7664_v47 = vmul.f32 0.2, %v7616_v8 }
 0xcac   : > { %v7573_v24 = vmul.f32 %v9170_v37, %v7533_v45  ;;  %v7574_v33 = vmul.f32 %v9170_v37, %v7534_v28  ;;  %v7575_v19 = vmul.f32 %v9170_v37, %v7535_v1  ;;  %v7665_v20 = vmul.f32 0.2, %v7617_v59 }
 0xcad   : > { %v12829_v13 = vpop.permute.xlu1 %7727  ;;  %v7612_v52 = vadd.f32 %v7588_v21, %v12434_v46  ;;  %v7613_v25 = vadd.f32 %v7589_v56, %v12437_v41  ;;  %v7614_v15 = vadd.f32 %v7590_v14, %v12443_v29  ;;  %v12850_v43 = vmul.f32 0.0034722222, %v7398_v27 }
 0xcae   : > { %v7597_v3 = vmul.f32 %v7573_v24, %v12421_v61  ;;  %v7598_v16 = vmul.f32 %v7574_v33, %v12424_v35  ;;  %v7599_v12 = vmul.f32 %v7575_v19, %v12429_v30  ;;  %v7687_v38 = vsel %vm7639_vm9, %v7615_v48, %v7663_v55  ;;  %v7470_v48 = vpop.xlane.xlu0 %7469 }
 0xcaf   : > { %vm7636_vm0 = vcmp.ge.f32.partialorder %v7612_v52, 0.0  ;;  %vm7637_vm3 = vcmp.ge.f32.partialorder %v7613_v25, 0.0  ;;  %v7660_v57 = vmul.f32 0.2, %v7612_v52  ;;  %v7661_v34 = vmul.f32 0.2, %v7613_v25 }
 0xcb0   : > { %v7662_v5 = vmul.f32 0.2, %v7614_v15  ;;  %v7621_v2 = vadd.f32 %v7597_v3, %v12434_v46  ;;  %v7622_v9 = vadd.f32 %v7598_v16, %v12437_v41  ;;  %vm7638_vm13 = vcmp.ge.f32.partialorder %v7614_v15, 0.0 }
 0xcb1   : > { %v12838_v58 = vpop.permute.xlu1 %7731  ;;  %v7688_v6 = vsel %vm7640_vm10, %v7616_v8, %v7664_v47  ;;  %v7623_v45 = vadd.f32 %v7599_v12, %v12443_v29  ;;  %v7684_v28 = vsel %vm7636_vm0, %v7612_v52, %v7660_v57  ;;  %v7685_v37 = vsel %vm7637_vm3, %v7613_v25, %v7661_v34 }
 0xcb2   : > { %v7689_v21 = vsel %vm7641_vm5, %v7617_v59, %v7665_v20  ;;  %vm7645_vm11 = vcmp.ge.f32.partialorder %v7621_v2, 0.0  ;;  %v7686_v44 = vsel %vm7638_vm13, %v7614_v15, %v7662_v5  ;;  %vm7646_vm8 = vcmp.ge.f32.partialorder %v7622_v9, 0.0 }
 0xcb3   : > { %vm7647_vm14 = vcmp.ge.f32.partialorder %v7623_v45, 0.0  ;;  %v7669_v56 = vmul.f32 0.2, %v7621_v2  ;;  %v7743_v1 = vmul.f32 %v12790_v54, %v7687_v38  ;;  %v7744_v14 = vmul.f32 %v12790_v54, %v7688_v6 }
 0xcb4   : > { %v7670_v24 = vmul.f32 0.2, %v7622_v9  ;;  %v7671_v33 = vmul.f32 0.2, %v7623_v45  ;;  %v7740_v8 = vmul.f32 %v12788_v26, %v7684_v28  ;;  %v7741_v19 = vmul.f32 %v12788_v26, %v7685_v37 }
 0xcb5   : > { %v12848_v39 = vpop.permute.xlu1 %7759  ;;  %v7745_v59 = vmul.f32 %v12790_v54, %v7689_v21  ;;  %v7693_v52 = vsel %vm7645_vm11, %v7621_v2, %v7669_v56  ;;  %v7742_v25 = vmul.f32 %v12788_v26, %v7686_v44  ;;  %v7490_v57 = vmul.f32 0.0034722222, %v7470_v48 }
 0xcb6   : > { %v7694_v15 = vsel %vm7646_vm8, %v7622_v9, %v7670_v24  ;;  %v7695_v3 = vsel %vm7647_vm14, %v7623_v45, %v7671_v33  ;;  %v12867_v55 = vmul.f32 %v12812_v31, %v7693_v52  ;;  %v7502_v54 = vsub.f32 %v7486_v32, %v7494_v51 }
 0xcb7   : > { %v12870_v47 = vmul.f32 %v12812_v31, %v7694_v15  ;;  %v12873_v20 = vmul.f32 %v12812_v31, %v7695_v3  ;;  %v7498_v2 = vmul.f32 %v12850_v43, %v12850_v43  ;;  %v7518_v28 = vsub.f32 %v12584_v40, %v12836_v53 }
 0xcb8   : > { %v7510_v51 = vmax.f32 %v7502_v54, 0.0  ;;  %v7519_v37 = vsub.f32 %v12586_v22, %v12836_v53  ;;  %v7520_v21 = vsub.f32 %v12588_v7, %v12836_v53  ;;  %v7530_v24 = vsub.f32 %v12651_v60, %v12850_v43 }
 0xcb9   : > { %v7768_v23 = vpop.permute.xlu1 %7767  ;;  %v7506_v9 = vsub.f32 %v7490_v57, %v7498_v2  ;;  %v7531_v33 = vsub.f32 %v12653_v63, %v12850_v43 }
 0xcba   : > { %v7796_v16 = vadd.f32 %v7768_v23, %v7740_v8  ;;  %v7797_v27 = vadd.f32 %v7768_v23, %v7741_v19  ;;  %v7798_v34 = vadd.f32 %v7768_v23, %v7742_v25  ;;  %v7542_v38 = vadd.f32 1e-05, %v7510_v51 }
 0xcbb   : > { %v7514_v32 = vmax.f32 %v7506_v9, 0.0  ;;  %v7532_v23 = vsub.f32 %v12665_v11, %v12850_v43 }
 0xcbc   : > { %7820 = vst [vmem:[%s12875_s9 + $0x30] sm:$0xff] %v7796_v16  ;;  %7821 = vst [vmem:[%s12875_s9 + $0x38] sm:$0xff] %v7797_v27  ;;  %9171 = vrsqrt.f32 %v7542_v38 }
 0xcbd   : > { %v7772_v5 = vpop.permute.xlu1 %7771  ;;  %7822 = vst.msk [vmem:[%s12875_s9 + $0x40] sm:$0xff] %vm6901_vm15, %v7798_v34  ;;  %v7546_v6 = vadd.f32 1e-05, %v7514_v32 }
 0xcbe   : > { %v7799_v26 = vadd.f32 %v7772_v5, %v7743_v1  ;;  %v7800_v12 = vadd.f32 %v7772_v5, %v7744_v14  ;;  %v7801_v31 = vadd.f32 %v7772_v5, %v7745_v59 }
 0xcbf   : > { %9173 = vrsqrt.f32 %v7546_v6 }
 0xcc0   : > { %7823 = vst [vmem:[%s12875_s9 + $0x48] sm:$0xff] %v7799_v26  ;;  %7824 = vst [vmem:[%s12875_s9 + $0x50] sm:$0xff] %v7800_v12 }
 0xcc1   : > { %7825 = vst.msk [vmem:[%s12875_s9 + $0x58] sm:$0xff] %vm6901_vm15, %v7801_v31 }
 0xcc9   : > { %v9172_v45 = vpop.eup %9171 }
 0xcca   : > { %v7558_v56 = vmul.f32 %v9172_v45, %v7518_v28  ;;  %v7559_v1 = vmul.f32 %v9172_v45, %v7519_v37  ;;  %v7560_v14 = vmul.f32 %v9172_v45, %v7520_v21 }
 0xccc   : > { %v9174_v44 = vpop.eup %9173  ;;  %v7582_v19 = vmul.f32 %v7558_v56, %v12421_v61  ;;  %v7583_v7 = vmul.f32 %v7559_v1, %v12424_v35  ;;  %v7584_v53 = vmul.f32 %v7560_v14, %v12429_v30 }
 0xccd   : > { %v7570_v40 = vmul.f32 %v9174_v44, %v7530_v24  ;;  %v7571_v48 = vmul.f32 %v9174_v44, %v7531_v33  ;;  %v7572_v8 = vmul.f32 %v9174_v44, %v7532_v23 }
 0xcce   : > { %v7606_v11 = vadd.f32 %v7582_v19, %v12434_v46  ;;  %v7607_v43 = vadd.f32 %v7583_v7, %v12437_v41  ;;  %v7608_v15 = vadd.f32 %v7584_v53, %v12443_v29 }
 0xccf   : > { %v7594_v60 = vmul.f32 %v7570_v40, %v12421_v61  ;;  %v7595_v52 = vmul.f32 %v7571_v48, %v12424_v35  ;;  %v7596_v63 = vmul.f32 %v7572_v8, %v12429_v30 }
 0xcd0   : > { %v7654_v54 = vmul.f32 0.2, %v7606_v11  ;;  %v7655_v26 = vmul.f32 0.2, %v7607_v43  ;;  %v7656_v12 = vmul.f32 0.2, %v7608_v15 }
 0xcd1   : > { %v7618_v27 = vadd.f32 %v7594_v60, %v12434_v46  ;;  %v7619_v57 = vadd.f32 %v7595_v52, %v12437_v41  ;;  %v7620_v5 = vadd.f32 %v7596_v63, %v12443_v29  ;;  %vm7630_vm2 = vcmp.ge.f32.partialorder %v7606_v11, 0.0 }
 0xcd2   : > { %vm7631_vm12 = vcmp.ge.f32.partialorder %v7607_v43, 0.0  ;;  %vm7632_vm1 = vcmp.ge.f32.partialorder %v7608_v15, 0.0  ;;  %v7678_v38 = vsel %vm7630_vm2, %v7606_v11, %v7654_v54 }
 0xcd3   : > { %v7666_v2 = vmul.f32 0.2, %v7618_v27  ;;  %v7667_v9 = vmul.f32 0.2, %v7619_v57  ;;  %v7668_v32 = vmul.f32 0.2, %v7620_v5  ;;  %v7679_v6 = vsel %vm7631_vm12, %v7607_v43, %v7655_v26 }
 0xcd4   : > { %v7680_v45 = vsel %vm7632_vm1, %v7608_v15, %v7656_v12  ;;  %vm7642_vm4 = vcmp.ge.f32.partialorder %v7618_v27, 0.0  ;;  %vm7643_vm6 = vcmp.ge.f32.partialorder %v7619_v57, 0.0  ;;  %vm7644_vm7 = vcmp.ge.f32.partialorder %v7620_v5, 0.0 }
 0xcd5   : > { %v7690_v24 = vsel %vm7642_vm4, %v7618_v27, %v7666_v2  ;;  %v7691_v33 = vsel %vm7643_vm6, %v7619_v57, %v7667_v9  ;;  %v7692_v23 = vsel %vm7644_vm7, %v7620_v5, %v7668_v32 }
 0xcd6   : > { %v7747_v19 = vmul.f32 %v12798_v42, %v7691_v33  ;;  %v7748_v7 = vmul.f32 %v12798_v42, %v7692_v23 }
 0xcde   : > { %v7408_v22 = vpop.xlane.xlu0 %7407 }
 0xcdf   : > { %v12902_v59 = vmul.f32 0.0034722222, %v7408_v22 }
 0xce1   : > { %v7500_v3 = vmul.f32 %v12902_v59, %v12902_v59 }
 0xce2   : > { %v7480_v25 = vpop.xlane.xlu0 %7479 }
 0xce3   : > { %v7492_v16 = vmul.f32 0.0034722222, %v7480_v25 }
 0xce5   : > { %v7508_v34 = vsub.f32 %v7492_v16, %v7500_v3 }
 0xce7   : > { %v7516_v31 = vmax.f32 %v7508_v34, 0.0 }
 0xce9   : > { %v7548_v51 = vadd.f32 1e-05, %v7516_v31 }
 0xcea   : > { %v7704_v28 = vpop.permute.xlu0 %7703 }
 0xceb   : > { %9175 = vrsqrt.f32 %v7548_v51  ;;  %v7734_v37 = vmul.f32 %v7704_v28, %v7678_v38  ;;  %v7735_v21 = vmul.f32 %v7704_v28, %v7679_v6  ;;  %v7736_v44 = vmul.f32 %v7704_v28, %v7680_v45 }
 0xced   : > { %v7790_v56 = vadd.f32 %v12848_v39, %v7734_v37  ;;  %v7791_v1 = vadd.f32 %v12848_v39, %v7735_v21  ;;  %v7792_v14 = vadd.f32 %v12848_v39, %v7736_v44  ;;  %v7746_v39 = vmul.f32 %v12798_v42, %v7690_v24 }
 0xcef   : > { %7814 = vst [vmem:[%s12875_s9] sm:$0xff] %v7790_v56  ;;  %7815 = vst [vmem:[%s12875_s9 + $0x8] sm:$0xff] %v7791_v1  ;;  %v7764_v40 = vpop.permute.xlu0 %7763 }
 0xcf0   : > { %7816 = vst.msk [vmem:[%s12875_s9 + $0x10] sm:$0xff] %vm6901_vm15, %v7792_v14  ;;  %v7793_v48 = vadd.f32 %v7764_v40, %v12782_v17  ;;  %v7794_v8 = vadd.f32 %v7764_v40, %v12784_v18  ;;  %v7795_v22 = vadd.f32 %v7764_v40, %v12786_v36  ;;  %v7536_v17 = vsub.f32 %v12702_v4, %v12902_v59 }
 0xcf1   : > { %v7537_v18 = vsub.f32 %v12704_v49, %v12902_v59  ;;  %v7538_v36 = vsub.f32 %v12706_v0, %v12902_v59 }
 0xcf2   : > { %7817 = vst [vmem:[%s12875_s9 + $0x18] sm:$0xff] %v7793_v48  ;;  %7818 = vst [vmem:[%s12875_s9 + $0x20] sm:$0xff] %v7794_v8 }
 0xcf3   : > { %7819 = vst.msk [vmem:[%s12875_s9 + $0x28] sm:$0xff] %vm6901_vm15, %v7795_v22  ;;  %v7776_v53 = vpop.permute.xlu0 %7775 }
 0xcf4   : > { %v7802_v60 = vadd.f32 %v7776_v53, %v7746_v39  ;;  %v7803_v52 = vadd.f32 %v7776_v53, %v7747_v19  ;;  %v7804_v63 = vadd.f32 %v7776_v53, %v7748_v7 }
 0xcf6   : > { %7826 = vst [vmem:[%s12875_s9 + $0x60] sm:$0xff] %v7802_v60  ;;  %7827 = vst [vmem:[%s12875_s9 + $0x68] sm:$0xff] %v7803_v52 }
 0xcf7   : > { %7828 = vst.msk [vmem:[%s12875_s9 + $0x70] sm:$0xff] %vm6901_vm15, %v7804_v63  ;;  %v7784_v5 = vpop.permute.xlu0 %7783 }
 0xcf8   : > { %v9176_v42 = vpop.eup %9175 }
 0xcf9   : > { %v7576_v25 = vmul.f32 %v9176_v42, %v7536_v17  ;;  %v7577_v11 = vmul.f32 %v9176_v42, %v7537_v18  ;;  %v7578_v43 = vmul.f32 %v9176_v42, %v7538_v36 }
 0xcfb   : > { %v7600_v15 = vmul.f32 %v7576_v25, %v12421_v61  ;;  %v7601_v3 = vmul.f32 %v7577_v11, %v12424_v35  ;;  %v7602_v16 = vmul.f32 %v7578_v43, %v12429_v30 }
 0xcfd   : > { %v7624_v27 = vadd.f32 %v7600_v15, %v12434_v46  ;;  %v7625_v4 = vadd.f32 %v7601_v3, %v12437_v41  ;;  %v7626_v57 = vadd.f32 %v7602_v16, %v12443_v29 }
 0xcff   : > { %vm7648_vm9 = vcmp.ge.f32.partialorder %v7624_v27, 0.0  ;;  %vm7649_vm10 = vcmp.ge.f32.partialorder %v7625_v4, 0.0  ;;  %vm7650_vm5 = vcmp.ge.f32.partialorder %v7626_v57, 0.0  ;;  %v7672_v49 = vmul.f32 0.2, %v7624_v27 }
 0xd00   : > { %v7673_v0 = vmul.f32 0.2, %v7625_v4  ;;  %v7674_v59 = vmul.f32 0.2, %v7626_v57 }
 0xd01   : > { %v7696_v34 = vsel %vm7648_vm9, %v7624_v27, %v7672_v49 }
 0xd02   : > { %v7697_v54 = vsel %vm7649_vm10, %v7625_v4, %v7673_v0  ;;  %v7698_v26 = vsel %vm7650_vm5, %v7626_v57, %v7674_v59  ;;  %v7752_v12 = vmul.f32 %v12829_v13, %v7696_v34 }
 0xd03   : > { %v7753_v31 = vmul.f32 %v12829_v13, %v7697_v54  ;;  %v7754_v2 = vmul.f32 %v12829_v13, %v7698_v26 }
 0xd04   : > { %v7808_v9 = vadd.f32 %v7784_v5, %v7752_v12 }
 0xd05   : > { %v7809_v51 = vadd.f32 %v7784_v5, %v7753_v31  ;;  %v7810_v32 = vadd.f32 %v7784_v5, %v7754_v2 }
 0xd06   : > { %7832 = vst [vmem:[%s12875_s9 + $0x90] sm:$0xff] %v7808_v9 }
 0xd07   : > { %7833 = vst [vmem:[%s12875_s9 + $0x98] sm:$0xff] %v7809_v51  ;;  %7834 = vst.msk [vmem:[%s12875_s9 + $0xa0] sm:$0xff] %vm6901_vm15, %v7810_v32 }
 0xd1b   : > { %v7413_v38 = vpop.xlane.xlu1 %7412 }
 0xd1c   : > { %v7421_v6 = vmul.f32 0.0034722222, %v7413_v38 }
 0xd1e   : > { %v7501_v28 = vmul.f32 %v7421_v6, %v7421_v6  ;;  %v7539_v33 = vsub.f32 %v12746_v50, %v7421_v6  ;;  %v7540_v23 = vsub.f32 %v12749_v62, %v7421_v6  ;;  %v7541_v40 = vsub.f32 %v12758_v10, %v7421_v6 }
 0xd1f   : > { %v7485_v45 = vpop.xlane.xlu1 %7484 }
 0xd20   : > { %v7493_v37 = vmul.f32 0.0034722222, %v7485_v45 }
 0xd22   : > { %v7509_v21 = vsub.f32 %v7493_v37, %v7501_v28 }
 0xd23   : > { %v7780_v44 = vpop.permute.xlu1 %7779 }
 0xd24   : > { %v7517_v56 = vmax.f32 %v7509_v21, 0.0  ;;  %v7805_v13 = vadd.f32 %v7780_v44, %v12867_v55  ;;  %v7806_v1 = vadd.f32 %v7780_v44, %v12870_v47  ;;  %v7807_v14 = vadd.f32 %v7780_v44, %v12873_v20 }
 0xd26   : > { %v7549_v24 = vadd.f32 1e-05, %v7517_v56  ;;  %7829 = vst [vmem:[%s12875_s9 + $0x78] sm:$0xff] %v7805_v13  ;;  %7830 = vst [vmem:[%s12875_s9 + $0x80] sm:$0xff] %v7806_v1 }
 0xd27   : > { %7831 = vst.msk [vmem:[%s12875_s9 + $0x88] sm:$0xff] %vm6901_vm15, %v7807_v14 }
 0xd28   : > { %9177 = vrsqrt.f32 %v7549_v24 }
 0xd35   : > { %v9178_v48 = vpop.eup %9177 }
 0xd36   : > { %v7579_v8 = vmul.f32 %v9178_v48, %v7539_v33  ;;  %v7580_v55 = vmul.f32 %v9178_v48, %v7540_v23  ;;  %v7581_v47 = vmul.f32 %v9178_v48, %v7541_v40 }
 0xd38   : > { %v7603_v20 = vmul.f32 %v7579_v8, %v12421_v61  ;;  %v7604_v22 = vmul.f32 %v7580_v55, %v12424_v35  ;;  %v7605_v39 = vmul.f32 %v7581_v47, %v12429_v30 }
 0xd3a   : > { %v7627_v19 = vadd.f32 %v7603_v20, %v12434_v46  ;;  %v7628_v50 = vadd.f32 %v7604_v22, %v12437_v41  ;;  %v7629_v62 = vadd.f32 %v7605_v39, %v12443_v29  ;;  %v7788_v29 = vpop.permute.xlu1 %7787 }
 0xd3c   : > { %vm7651_vm0 = vcmp.ge.f32.partialorder %v7627_v19, 0.0  ;;  %vm7652_vm3 = vcmp.ge.f32.partialorder %v7628_v50, 0.0  ;;  %vm7653_vm13 = vcmp.ge.f32.partialorder %v7629_v62, 0.0  ;;  %v7675_v10 = vmul.f32 0.2, %v7627_v19 }
 0xd3d   : > { %v7676_v7 = vmul.f32 0.2, %v7628_v50  ;;  %v7677_v53 = vmul.f32 0.2, %v7629_v62 }
 0xd3e   : > { %v7699_v60 = vsel %vm7651_vm0, %v7627_v19, %v7675_v10 }
 0xd3f   : > { %v7700_v61 = vsel %vm7652_vm3, %v7628_v50, %v7676_v7  ;;  %v7701_v35 = vsel %vm7653_vm13, %v7629_v62, %v7677_v53  ;;  %v7755_v30 = vmul.f32 %v12838_v58, %v7699_v60 }
 0xd40   : > { %v7756_v46 = vmul.f32 %v12838_v58, %v7700_v61  ;;  %v7757_v41 = vmul.f32 %v12838_v58, %v7701_v35 }
 0xd41   : > { %v7811_v52 = vadd.f32 %v7788_v29, %v7755_v30 }
 0xd42   : > { %v7812_v63 = vadd.f32 %v7788_v29, %v7756_v46  ;;  %v7813_v17 = vadd.f32 %v7788_v29, %v7757_v41 }
 0xd43   : > { %7835 = vst [vmem:[%s12875_s9 + $0xa8] sm:$0xff] %v7811_v52 }
 0xd44   : > { %7836 = vst [vmem:[%s12875_s9 + $0xb0] sm:$0xff] %v7812_v63  ;;  %7837 = vst.msk [vmem:[%s12875_s9 + $0xb8] sm:$0xff] %vm6901_vm15, %v7813_v17 }
 0xd45   : > { %9212 = shalt.err (!%p9209_p3)
}
 0xd46   : > { %s9213_s10 = scalar_lea.hbm %s12981_s13, 3072  ;;  %s9217_s25 = scalar_lea.hbm %s13034_s5, 12288 }
 0xd47   : > { %p9214_p4 = scmp.ne.s32.totalorder %s12981_s13, %s9213_s10  ;;  %p9218_p9 = scmp.lt.s32.totalorder %s12981_s13, %s13034_s5 }
 0xd48   : > { %p9219_p10 = scmp.lt.s32.totalorder %s9217_s25, %s9213_s10 }
 0xd49   : > { %p9215_p7 = pnand %p9214_p4, %p9352_p5 }
 0xd4a   : > { %p9220_p11 = por %p9219_p10, %p9218_p9 }
 0xd4b   : > { %p9216_p8 = pneg %p9215_p7 }
 0xd4d   : > { %p9221_p12 = pnand %p9220_p11, %p9216_p8 }
 0xd4f   : > { %9224 = shalt.err (!%p9221_p12)
}
 0xd50   : > { %s9282_s9 = smov 384   ;;  %s9283_s30 = smov 24  }
 0xd51   : > { %8419 = dma.vmem_to_hbm [thread:$0]  (%p9352_p5), %s12976_s11, 3072, %s12981_s13, %s12989_s14, %s9282_s9, %s9282_s9, %s9283_s30  }
 0xd52 PF: > { %p8425_p13 = scmp.ge.s32.totalorder %s9259_s21, 2  ;;  %s7868_s22 = sand.u32 1, %s9247_s18  }
 0xd53   : > { %s7869_s12 = scalar_lea.sflag [#allocation3], %s7868_s22 }
 0xd54   : > { %p8422_p0 = pnand %p8425_p13, %p9356_p6 }
 0xd56   : > { %p8423_p1 = pneg %p8422_p0 }
 0xd58   : > { %9242 = dma.done.wait (%p8423_p1), %s7869_s12, 3072  }
 0xd59   : > { %9244 = vsyncadd (%p8423_p1), %s7869_s12, 4294964224  ;;  %p15_p2 = scmp.ge.s32.totalorder %s9339_s24, 6   ;;  %s13276_s18 = smov %s9251_s19 }
 0xd5a   : > { %s13277_s19 = smov %s9255_s20  ;;  %s13278_s20 = smov %s9350_s27 }
 0xd5b   : > { %s13279_s21 = smov %s9339_s24  ;;  %17 = sbr.rel (!%p15_p2) target bundleno = 3 (0x3), region = 82 }
 0xd60   :  { %7874 = vsyncpa [#allocation3], 1 }
 0xd61   :  { %7876 = vsyncpa [#allocation3 + $0x1], 1 }

</bundles_post_ra>
